<compile_context>
chip_gen: v6e
topology: v6e:2x2x1
jax: 0.10.0
libtpu: 0.0.40
codegen_flags: <defaults>
</compile_context>

<pallas_src>
import jax
import jax.numpy as jnp
from jax.experimental import pallas as pl
from jax.experimental.pallas import tpu as pltpu

# ---------------- synthetic configuration ----------------
CIN = 3                 # input image channels
CFEAT = 8               # encoder.out_dim
C9 = CFEAT * 9          # channels after feat_unfold (72)
CPAD = 128              # C9 zero-padded to one full lane group
IMNET_HIDDEN = 64       # imnet hidden width (imnet_spec is free in the module)
SW_HIDDEN = 256         # Score / Weight hidden width (hard-coded in the module)

TN_DEFAULT = 128        # query tile; sweep 128..1024 per generation
                        # (v7x: re-check against its 64 MiB VMEM before growing)
TM_CONV = 512           # encoder pixel tile


def _round_up(x, m):
    return -(-x // m) * m


def _gelu(x):
    # TODO(synk): torch.nn.GELU defaults to exact erf; the tanh approximation is
    # used to guarantee Mosaic lowering (~1e-3 max abs diff).
    c = 0.7978845608028654  # sqrt(2/pi)
    return 0.5 * x * (1.0 + jnp.tanh(c * (x + 0.044715 * x * x * x)))


def _resident(shape):
    # Weight / bias blocks: same block index every grid step -> fetched once,
    # stays resident in VMEM for the whole kernel.
    nd = len(shape)
    return pl.BlockSpec(shape, lambda i: (0,) * nd)


# ---------------- Pallas kernel: encoder 3x3 conv as im2col matmul ----------------
def _conv_mm_kernel(w_ref, x_ref, b_ref, o_ref):
    # (CFEAT, 27) @ (27, TM) + (CFEAT, 1)  ->  lane-dense (CFEAT, TM) output
    o_ref[...] = (
        jnp.dot(w_ref[...], x_ref[...], preferred_element_type=jnp.float32)
        + b_ref[...]
    )


def conv3x3_encoder(x_nhwc, w_t, b_col, *, tm=TM_CONV):
    B, H, W, cin = x_nhwc.shape
    K = 9 * cin
    M = B * H * W
    xp = jnp.pad(x_nhwc, ((0, 0), (1, 1), (1, 1), (0, 0)))
    # patch feature order: (cin, dy, dx); pixels end up on the lane axis.
    cols = [xp[:, dy:dy + H, dx:dx + W, c]
            for c in range(cin) for dy in range(3) for dx in range(3)]
    patches_t = jnp.stack(cols, axis=0).reshape(K, M)                 # (27, M)

    m_pad = _round_up(M, tm)
    if m_pad != M:
        patches_t = jnp.pad(patches_t, ((0, 0), (0, m_pad - M)))

    out_t = pl.pallas_call(
        _conv_mm_kernel,
        out_shape=jax.ShapeDtypeStruct((CFEAT, m_pad), jnp.float32),
        grid=(m_pad // tm,),
        in_specs=[
            _resident((CFEAT, K)),
            pl.BlockSpec((K, tm), lambda i: (0, i)),
            _resident((CFEAT, 1)),
        ],
        out_specs=pl.BlockSpec((CFEAT, tm), lambda i: (0, i)),
        compiler_params=pltpu.CompilerParams(
            dimension_semantics=("parallel",)),
    )(w_t, patches_t, b_col)
    return jnp.transpose(out_t[:, :M]).reshape(B, H, W, CFEAT)


# ---------------- Pallas kernel: query_rgb hot path ----------------
# Per grid step (one tile of TN queries):
#   value_ref : (4, TN, CPAD)   nearest-gathered unfolded features, 1 per corner
#   inp_ref   : (4, TN, 4)      [rel*(H,W), scale*(H,W)]  (rel = first 2 cols)
#   + 12 resident weight/bias refs
#   out_ref   : (TN, 3)
def _itnsr_query_kernel(value_ref, inp_ref,
                        w_im1_ref, b_im1_ref, w_imf_ref, b_imf_ref,
                        w_s1_ref, b_s1_ref, w_s2_ref, b_s2_ref,
                        w_w1_ref, b_w1_ref, w_w2_ref, b_w2_ref,
                        out_ref):
    tn = out_ref.shape[0]
    cpad = value_ref.shape[2]

    # Batch the 4 local-ensemble corners into the matmul M dimension.
    inp = jnp.concatenate(
        [inp_ref[0], inp_ref[1], inp_ref[2], inp_ref[3]], axis=0)     # (4*TN, 4)
    rel = inp[:, :2]                                                   # (4*TN, 2)

    # imnet MLP: 4 -> hidden (relu) -> 3*CPAD, one matmul pair for all corners.
    h = jnp.dot(inp, w_im1_ref[...], preferred_element_type=jnp.float32) + b_im1_ref[...]
    h = jnp.maximum(h, 0.0)
    wa = jnp.dot(h, w_imf_ref[...], preferred_element_type=jnp.float32) + b_imf_ref[...]
    # wa columns: head-major layout k*CPAD + c (column-permuted, zero-padded
    # equivalent of the PyTorch (hidden, C9*3) final layer).

    # Score MLP: 2 -> 256 (gelu) -> 1, one matmul for all corners; the 256->1
    # head is a VPU multiply + lane reduce (no 1-wide MXU output).
    hs = _gelu(jnp.dot(rel, w_s1_ref[...], preferred_element_type=jnp.float32)
               + b_s1_ref[...])                                        # (4*TN, 256)
    sc = jnp.sum(hs * w_s2_ref[...], axis=-1, keepdims=True) + b_s2_ref[...]  # (4*TN, 1)

    # Per-corner, per-channel bmm(value(1,C), weight(C,1)) + score.
    chans = [[], [], []]                       # chans[k][v] : (TN, 1)
    for v in range(4):                         # 4 static ensemble corners
        val_v = value_ref[v]                   # (TN, CPAD)
        wa_v = wa[v * tn:(v + 1) * tn, :]      # (TN, 3*CPAD)   (vreg-aligned slice)
        sc_v = sc[v * tn:(v + 1) * tn, :]      # (TN, 1)
        for k in range(3):                     # 3 static RGB heads
            wk = wa_v[:, k * cpad:(k + 1) * cpad]                      # (TN, CPAD)
            chans[k].append(jnp.sum(val_v * wk, axis=-1, keepdims=True) + sc_v)

    # Weight MLP: 4 corner preds -> 256 (gelu) -> 1, all 3 channels batched
    # into one matmul (rows are channel-major: k*TN + n).
    p_in = jnp.concatenate(
        [jnp.concatenate(chans[k], axis=-1) for k in range(3)], axis=0)  # (3*TN, 4)
    hk = _gelu(jnp.dot(p_in, w_w1_ref[...], preferred_element_type=jnp.float32)
               + b_w1_ref[...])                                        # (3*TN, 256)
    ok = jnp.sum(hk * w_w2_ref[...], axis=-1, keepdims=True) + b_w2_ref[...]  # (3*TN, 1)

    # Final (TN, 3) tile: TN/8 masked stores, negligible vs. the matmuls above.
    out_ref[...] = jnp.concatenate(
        [ok[k * tn:(k + 1) * tn, :] for k in range(3)], axis=-1)       # (TN, 3)


def _query_rgb_pallas(value4, inp4, params, tn):
    n_pad = value4.shape[1]
    return pl.pallas_call(
        _itnsr_query_kernel,
        out_shape=jax.ShapeDtypeStruct((n_pad, 3), jnp.float32),
        grid=(n_pad // tn,),
        in_specs=[
            pl.BlockSpec((4, tn, CPAD), lambda i: (0, i, 0)),
            pl.BlockSpec((4, tn, 4), lambda i: (0, i, 0)),
            _resident((4, IMNET_HIDDEN)), _resident((1, IMNET_HIDDEN)),
            _resident((IMNET_HIDDEN, 3 * CPAD)), _resident((1, 3 * CPAD)),
            _resident((2, SW_HIDDEN)), _resident((1, SW_HIDDEN)),
            _resident((1, SW_HIDDEN)), _resident((1, 1)),
            _resident((4, SW_HIDDEN)), _resident((1, SW_HIDDEN)),
            _resident((1, SW_HIDDEN)), _resident((1, 1)),
        ],
        out_specs=pl.BlockSpec((tn, 3), lambda i: (i, 0)),
        compiler_params=pltpu.CompilerParams(
            # N axis is embarrassingly parallel: 2-TC split on v7x, no-op elsewhere.
            dimension_semantics=("parallel",),
            # ~3 MiB working set per step at TN=128; explicit cap with ample
            # headroom (safe on v7x's 64 MiB physical VMEM as well).
            vmem_limit_bytes=32 * 1024 * 1024,
        ),
    )(value4, inp4,
      params["w_im1"], params["b_im1"], params["w_imf"], params["b_imf"],
      params["w_s1"], params["b_s1"], params["w_s2"], params["b_s2"],
      params["w_w1"], params["b_w1"], params["w_w2"], params["b_w2"])


# ---------------- JAX glue (gather / unfold / coord math) ----------------
def _nearest_idx(c, n):
    # F.grid_sample(mode='nearest', align_corners=False) index rule.
    return jnp.clip(jnp.round(((c + 1.0) * n - 1.0) * 0.5).astype(jnp.int32), 0, n - 1)


def itnsr_forward(params, inp_nchw, coord, scale, *, tn=TN_DEFAULT):
    B, _, H, W = inp_nchw.shape
    Q = coord.shape[1]
    N = B * Q

    x = jnp.transpose(inp_nchw, (0, 2, 3, 1)).astype(jnp.float32)      # NCHW -> NHWC
    feat = conv3x3_encoder(x, params["w_conv_t"], params["b_conv"])    # (B,H,W,CFEAT)

    # feat_unfold: F.unfold(feat, 3, padding=1); channel order c*9 + dy*3 + dx.
    # TODO(synk): fold this unfold + the nearest gather below into the query
    # kernel via scalar-prefetched indices for production query counts.
    fp = jnp.pad(feat, ((0, 0), (1, 1), (1, 1), (0, 0)))
    chans = [fp[:, dy:dy + H, dx:dx + W, c]
             for c in range(CFEAT) for dy in range(3) for dx in range(3)]
    feat_unf = jnp.stack(chans, axis=-1)                               # (B,H,W,C9)

    # make_coord((H,W)): pixel-center coords in [-1,1]; channel 0 <-> H, 1 <-> W
    # (matches coord.flip(-1) + grid_sample's (x, y) convention in the reference).
    cy = -1.0 + (2.0 * jnp.arange(H, dtype=jnp.float32) + 1.0) / H
    cx = -1.0 + (2.0 * jnp.arange(W, dtype=jnp.float32) + 1.0) / W
    feat_coord = jnp.stack(jnp.meshgrid(cy, cx, indexing="ij"), axis=-1)  # (H,W,2)

    eps = 1e-6
    coord = coord.astype(jnp.float32)
    scale = scale.astype(jnp.float32)
    rx = ((1.0 - scale[:, 0, 0]) / (H - 1))[:, None]                   # (B,1) = 1/tx
    ry = ((1.0 - scale[:, 0, 1]) / (W - 1))[:, None]                   # (B,1) = 1/ty

    hw_vec = jnp.array([H, W], jnp.float32)
    scale_tok = scale * hw_vec                                         # (B,Q,2)

    value_list, inp_list = [], []
    bidx = jnp.arange(B)[:, None]
    for vx in (-1, 1):                         # same corner order as PyTorch v_lst
        for vy in (-1, 1):
            c0 = jnp.clip(coord[:, :, 0] + vx * rx + eps, -1 + 1e-6, 1 - 1e-6)
            c1 = jnp.clip(coord[:, :, 1] + vy * ry + eps, -1 + 1e-6, 1 - 1e-6)
            iy = _nearest_idx(c0, H)
            ix = _nearest_idx(c1, W)
            value = feat_unf[bidx, iy, ix]                             # (B,Q,C9)
            coord_k = feat_coord[iy, ix]                               # (B,Q,2)
            rel = (coord - coord_k) * hw_vec                           # (B,Q,2)
            inp_q = jnp.concatenate([rel, scale_tok], axis=-1)         # (B,Q,4)
            value_list.append(value.reshape(N, C9))
            inp_list.append(inp_q.reshape(N, 4))

    value4 = jnp.stack(value_list, 0)                                  # (4,N,C9)
    inp4 = jnp.stack(inp_list, 0)                                      # (4,N,4)

    # Zero-pad channels to a full lane group (exact: imnet cols past C9 are
    # zero) and pad the query dim to a multiple of the tile.
    value4 = jnp.pad(value4, ((0, 0), (0, 0), (0, CPAD - C9)))
    n_pad = _round_up(N, tn)
    if n_pad != N:
        value4 = jnp.pad(value4, ((0, 0), (0, n_pad - N), (0, 0)))
        inp4 = jnp.pad(inp4, ((0, 0), (0, n_pad - N), (0, 0)))

    out = _query_rgb_pallas(value4, inp4, params, tn)                  # (n_pad, 3)
    return out[:N].reshape(B, Q, 3)


# ---------------- deterministic synthetic parameters ----------------
def init_params(key):
    ks = jax.random.split(key, 12)
    s = 0.1
    p = {}
    p["w_conv_t"] = s * jax.random.normal(ks[0], (CFEAT, 9 * CIN), jnp.float32)
    p["b_conv"] = s * jax.random.normal(ks[1], (CFEAT, 1), jnp.float32)
    p["w_im1"] = s * jax.random.normal(ks[2], (4, IMNET_HIDDEN), jnp.float32)
    p["b_im1"] = s * jax.random.normal(ks[3], (1, IMNET_HIDDEN), jnp.float32)
    # imnet final layer: per-RGB-head (column-permuted) parameterization of the
    # (hidden, C9*3) PyTorch matrix, zero-padded from C9=72 to CPAD=128 lanes.
    w_imf = s * jax.random.normal(ks[4], (IMNET_HIDDEN, 3, C9), jnp.float32)
    b_imf = s * jax.random.normal(ks[5], (1, 3, C9), jnp.float32)
    p["w_imf"] = jnp.pad(w_imf, ((0, 0), (0, 0), (0, CPAD - C9))).reshape(
        IMNET_HIDDEN, 3 * CPAD)
    p["b_imf"] = jnp.pad(b_imf, ((0, 0), (0, 0), (0, CPAD - C9))).reshape(1, 3 * CPAD)
    p["w_s1"] = s * jax.random.normal(ks[6], (2, SW_HIDDEN), jnp.float32)
    p["b_s1"] = s * jax.random.normal(ks[7], (1, SW_HIDDEN), jnp.float32)
    p["w_s2"] = s * jax.random.normal(ks[8], (1, SW_HIDDEN), jnp.float32)   # row form
    p["b_s2"] = jnp.zeros((1, 1), jnp.float32)
    p["w_w1"] = s * jax.random.normal(ks[9], (4, SW_HIDDEN), jnp.float32)
    p["b_w1"] = s * jax.random.normal(ks[10], (1, SW_HIDDEN), jnp.float32)
    p["w_w2"] = s * jax.random.normal(ks[11], (1, SW_HIDDEN), jnp.float32)  # row form
    p["b_w2"] = jnp.zeros((1, 1), jnp.float32)
    return p


if __name__ == "__main__":
    key = jax.random.PRNGKey(0)
    kp, kx, kc, ksc = jax.random.split(key, 4)
    params = init_params(kp)

    B, H, W, Q = 2, 16, 16, 256
    inp = jax.random.normal(kx, (B, CIN, H, W), jnp.float32)           # NCHW like PyTorch
    coord = jax.random.uniform(kc, (B, Q, 2), jnp.float32, -1.0, 1.0)
    scale = jax.random.uniform(ksc, (B, Q, 2), jnp.float32, 0.1, 0.5)

    fwd = jax.jit(itnsr_forward)
    out = fwd(params, inp, coord, scale)
    jax.block_until_ready(out)
    assert out.shape == (B, Q, 3) and out.dtype == jnp.float32
    assert bool(jnp.all(jnp.isfinite(out)))
    print("KERNEL_OK")
</pallas_src>

<mosaic_0001>
module attributes {stable_mosaic.version = 11 : i64} {
  func.func @_conv_mm_kernel(%arg0: i32, %arg1: memref<8x27xf32, #tpu.memory_space<vmem>>, %arg2: memref<27x512xf32, #tpu.memory_space<vmem>>, %arg3: memref<8x1xf32, #tpu.memory_space<vmem>>, %arg4: memref<8x512xf32, #tpu.memory_space<vmem>>) attributes {dimension_semantics = [#tpu.dimension_semantics<parallel>], iteration_bounds = array<i64: 1>, scalar_prefetch = 0 : i64, scratch_operands = 0 : i64, tpu.core_type = #tpu.core_type<tc>, window_params = [{pipeline_mode = #tpu.pipeline_mode<synchronous>, transform_indices = @transform_0, window_bounds = array<i64: 8, 27>}, {transform_indices = @transform_1, window_bounds = array<i64: 27, 512>}, {pipeline_mode = #tpu.pipeline_mode<synchronous>, transform_indices = @transform_2, window_bounds = array<i64: 8, 1>}, {transform_indices = @transform_3, window_bounds = array<i64: 8, 512>}]} {
    %c0 = arith.constant 0 : index
    %c0_0 = arith.constant 0 : index
    %0 = vector.load %arg1[%c0, %c0_0] : memref<8x27xf32, #tpu.memory_space<vmem>>, vector<8x27xf32>
    %c0_1 = arith.constant 0 : index
    %c0_2 = arith.constant 0 : index
    %1 = vector.load %arg2[%c0_1, %c0_2] : memref<27x512xf32, #tpu.memory_space<vmem>>, vector<27x512xf32>
    %cst = arith.constant dense<0.000000e+00> : vector<8x512xf32>
    %2 = tpu.matmul %0, %1, %cst {dimension_numbers = #tpu.dot_dimension_numbers<[1], [0], [0], [1], [0, 0, 1, 1], [], []>} : vector<8x27xf32>, vector<27x512xf32>, vector<8x512xf32> -> vector<8x512xf32>
    %c0_3 = arith.constant 0 : index
    %c0_4 = arith.constant 0 : index
    %3 = vector.load %arg3[%c0_3, %c0_4] : memref<8x1xf32, #tpu.memory_space<vmem>>, vector<8x1xf32>
    %4 = vector.broadcast %3 : vector<8x1xf32> to vector<8x512xf32>
    %5 = arith.addf %2, %4 : vector<8x512xf32>
    %c0_5 = arith.constant 0 : index
    %c0_6 = arith.constant 0 : index
    %6 = vector.load %arg4[%c0_5, %c0_6] : memref<8x512xf32, #tpu.memory_space<vmem>>, vector<8x512xf32>
    tpu.vector_store %arg4[%c0_5, %c0_6], %5 {strides = array<i32>} : memref<8x512xf32, #tpu.memory_space<vmem>>, vector<8x512xf32>,
    return
  }
  func.func @transform_0(%arg0: i32) -> (i32, i32) {
    %c0_i32 = arith.constant 0 : i32
    %c0_i32_0 = arith.constant 0 : i32
    %c0_i32_1 = arith.constant 0 : i32
    return %c0_i32, %c0_i32_0 : i32, i32
  }
  func.func @transform_1(%arg0: i32) -> (i32, i32) {
    %c0_i32 = arith.constant 0 : i32
    %c0_i32_0 = arith.constant 0 : i32
    return %c0_i32, %arg0 : i32, i32
  }
  func.func @transform_2(%arg0: i32) -> (i32, i32) {
    %c0_i32 = arith.constant 0 : i32
    %c0_i32_0 = arith.constant 0 : i32
    %c0_i32_1 = arith.constant 0 : i32
    return %c0_i32, %c0_i32_0 : i32, i32
  }
  func.func @transform_3(%arg0: i32) -> (i32, i32) {
    %c0_i32 = arith.constant 0 : i32
    %c0_i32_0 = arith.constant 0 : i32
    return %c0_i32, %arg0 : i32, i32
  }
}

module attributes {stable_mosaic.version = 11 : i64} {
  func.func @_itnsr_query_kernel(%arg0: i32, %arg1: memref<4x128x128xf32, #tpu.memory_space<vmem>>, %arg2: memref<4x128x4xf32, #tpu.memory_space<vmem>>, %arg3: memref<4x64xf32, #tpu.memory_space<vmem>>, %arg4: memref<1x64xf32, #tpu.memory_space<vmem>>, %arg5: memref<64x384xf32, #tpu.memory_space<vmem>>, %arg6: memref<1x384xf32, #tpu.memory_space<vmem>>, %arg7: memref<2x256xf32, #tpu.memory_space<vmem>>, %arg8: memref<1x256xf32, #tpu.memory_space<vmem>>, %arg9: memref<1x256xf32, #tpu.memory_space<vmem>>, %arg10: memref<1x1xf32, #tpu.memory_space<vmem>>, %arg11: memref<4x256xf32, #tpu.memory_space<vmem>>, %arg12: memref<1x256xf32, #tpu.memory_space<vmem>>, %arg13: memref<1x256xf32, #tpu.memory_space<vmem>>, %arg14: memref<1x1xf32, #tpu.memory_space<vmem>>, %arg15: memref<128x3xf32, #tpu.memory_space<vmem>>) attributes {dimension_semantics = [#tpu.dimension_semantics<parallel>], iteration_bounds = array<i64: 4>, scalar_prefetch = 0 : i64, scratch_operands = 0 : i64, tpu.core_type = #tpu.core_type<tc>, window_params = [{transform_indices = @transform_0, window_bounds = array<i64: 4, 128, 128>}, {transform_indices = @transform_1, window_bounds = array<i64: 4, 128, 4>}, {pipeline_mode = #tpu.pipeline_mode<synchronous>, transform_indices = @transform_2, window_bounds = array<i64: 4, 64>}, {pipeline_mode = #tpu.pipeline_mode<synchronous>, transform_indices = @transform_3, window_bounds = array<i64: 1, 64>}, {pipeline_mode = #tpu.pipeline_mode<synchronous>, transform_indices = @transform_4, window_bounds = array<i64: 64, 384>}, {pipeline_mode = #tpu.pipeline_mode<synchronous>, transform_indices = @transform_5, window_bounds = array<i64: 1, 384>}, {pipeline_mode = #tpu.pipeline_mode<synchronous>, transform_indices = @transform_6, window_bounds = array<i64: 2, 256>}, {pipeline_mode = #tpu.pipeline_mode<synchronous>, transform_indices = @transform_7, window_bounds = array<i64: 1, 256>}, {pipeline_mode = #tpu.pipeline_mode<synchronous>, transform_indices = @transform_8, window_bounds = array<i64: 1, 256>}, {pipeline_mode = #tpu.pipeline_mode<synchronous>, transform_indices = @transform_9, window_bounds = array<i64: 1, 1>}, {pipeline_mode = #tpu.pipeline_mode<synchronous>, transform_indices = @transform_10, window_bounds = array<i64: 4, 256>}, {pipeline_mode = #tpu.pipeline_mode<synchronous>, transform_indices = @transform_11, window_bounds = array<i64: 1, 256>}, {pipeline_mode = #tpu.pipeline_mode<synchronous>, transform_indices = @transform_12, window_bounds = array<i64: 1, 256>}, {pipeline_mode = #tpu.pipeline_mode<synchronous>, transform_indices = @transform_13, window_bounds = array<i64: 1, 1>}, {transform_indices = @transform_14, window_bounds = array<i64: 128, 3>}]} {
    %c0 = arith.constant 0 : index
    %c0_0 = arith.constant 0 : index
    %c0_1 = arith.constant 0 : index
    %0 = vector.load %arg2[%c0, %c0_0, %c0_1] : memref<4x128x4xf32, #tpu.memory_space<vmem>>, vector<1x128x4xf32>
    %1 = vector.shape_cast %0 : vector<1x128x4xf32> to vector<128x4xf32>
    %c1 = arith.constant 1 : index
    %c0_2 = arith.constant 0 : index
    %c0_3 = arith.constant 0 : index
    %2 = vector.load %arg2[%c1, %c0_2, %c0_3] : memref<4x128x4xf32, #tpu.memory_space<vmem>>, vector<1x128x4xf32>
    %3 = vector.shape_cast %2 : vector<1x128x4xf32> to vector<128x4xf32>
    %c2 = arith.constant 2 : index
    %c0_4 = arith.constant 0 : index
    %c0_5 = arith.constant 0 : index
    %4 = vector.load %arg2[%c2, %c0_4, %c0_5] : memref<4x128x4xf32, #tpu.memory_space<vmem>>, vector<1x128x4xf32>
    %5 = vector.shape_cast %4 : vector<1x128x4xf32> to vector<128x4xf32>
    %c3 = arith.constant 3 : index
    %c0_6 = arith.constant 0 : index
    %c0_7 = arith.constant 0 : index
    %6 = vector.load %arg2[%c3, %c0_6, %c0_7] : memref<4x128x4xf32, #tpu.memory_space<vmem>>, vector<1x128x4xf32>
    %7 = vector.shape_cast %6 : vector<1x128x4xf32> to vector<128x4xf32>
    %8 = tpu.concatenate %1, %3, %5, %7 in 0 : vector<128x4xf32>, vector<128x4xf32>, vector<128x4xf32>, vector<128x4xf32> -> vector<512x4xf32>
    %9 = vector.extract_strided_slice %8 {offsets = [0, 0], sizes = [512, 2], strides = [1, 1]} : vector<512x4xf32> to vector<512x2xf32>
    %c0_8 = arith.constant 0 : index
    %c0_9 = arith.constant 0 : index
    %10 = vector.load %arg3[%c0_8, %c0_9] : memref<4x64xf32, #tpu.memory_space<vmem>>, vector<4x64xf32>
    %cst = arith.constant dense<0.000000e+00> : vector<512x64xf32>
    %11 = tpu.matmul %8, %10, %cst {dimension_numbers = #tpu.dot_dimension_numbers<[1], [0], [0], [1], [0, 0, 1, 1], [], []>} : vector<512x4xf32>, vector<4x64xf32>, vector<512x64xf32> -> vector<512x64xf32>
    %c0_10 = arith.constant 0 : index
    %c0_11 = arith.constant 0 : index
    %12 = vector.load %arg4[%c0_10, %c0_11] : memref<1x64xf32, #tpu.memory_space<vmem>>, vector<1x64xf32>
    %13 = vector.broadcast %12 : vector<1x64xf32> to vector<512x64xf32>
    %14 = arith.addf %11, %13 : vector<512x64xf32>
    %cst_12 = arith.constant 0.000000e+00 : f32
    %15 = vector.broadcast %cst_12 : f32 to vector<512x64xf32>
    %16 = arith.maximumf %14, %15 : vector<512x64xf32>
    %c0_13 = arith.constant 0 : index
    %c0_14 = arith.constant 0 : index
    %17 = vector.load %arg5[%c0_13, %c0_14] : memref<64x384xf32, #tpu.memory_space<vmem>>, vector<64x384xf32>
    %cst_15 = arith.constant dense<0.000000e+00> : vector<512x384xf32>
    %18 = tpu.matmul %16, %17, %cst_15 {dimension_numbers = #tpu.dot_dimension_numbers<[1], [0], [0], [1], [0, 0, 1, 1], [], []>} : vector<512x64xf32>, vector<64x384xf32>, vector<512x384xf32> -> vector<512x384xf32>
    %c0_16 = arith.constant 0 : index
    %c0_17 = arith.constant 0 : index
    %19 = vector.load %arg6[%c0_16, %c0_17] : memref<1x384xf32, #tpu.memory_space<vmem>>, vector<1x384xf32>
    %20 = vector.broadcast %19 : vector<1x384xf32> to vector<512x384xf32>
    %21 = arith.addf %18, %20 : vector<512x384xf32>
    %c0_18 = arith.constant 0 : index
    %c0_19 = arith.constant 0 : index
    %22 = vector.load %arg7[%c0_18, %c0_19] : memref<2x256xf32, #tpu.memory_space<vmem>>, vector<2x256xf32>
    %cst_20 = arith.constant dense<0.000000e+00> : vector<512x256xf32>
    %23 = tpu.matmul %9, %22, %cst_20 {dimension_numbers = #tpu.dot_dimension_numbers<[1], [0], [0], [1], [0, 0, 1, 1], [], []>} : vector<512x2xf32>, vector<2x256xf32>, vector<512x256xf32> -> vector<512x256xf32>
    %c0_21 = arith.constant 0 : index
    %c0_22 = arith.constant 0 : index
    %24 = vector.load %arg8[%c0_21, %c0_22] : memref<1x256xf32, #tpu.memory_space<vmem>>, vector<1x256xf32>
    %25 = vector.broadcast %24 : vector<1x256xf32> to vector<512x256xf32>
    %26 = arith.addf %23, %25 : vector<512x256xf32>
    %cst_23 = arith.constant 5.000000e-01 : f32
    %27 = vector.broadcast %cst_23 : f32 to vector<512x256xf32>
    %28 = arith.mulf %27, %26 : vector<512x256xf32>
    %cst_24 = arith.constant 4.471500e-02 : f32
    %29 = vector.broadcast %cst_24 : f32 to vector<512x256xf32>
    %30 = arith.mulf %29, %26 : vector<512x256xf32>
    %31 = arith.mulf %30, %26 : vector<512x256xf32>
    %32 = arith.mulf %31, %26 : vector<512x256xf32>
    %33 = arith.addf %26, %32 : vector<512x256xf32>
    %cst_25 = arith.constant 0.797884583 : f32
    %34 = vector.broadcast %cst_25 : f32 to vector<512x256xf32>
    %35 = arith.mulf %34, %33 : vector<512x256xf32>
    %36 = math.tanh %35 : vector<512x256xf32>
    %cst_26 = arith.constant 1.000000e+00 : f32
    %37 = vector.broadcast %cst_26 : f32 to vector<512x256xf32>
    %38 = arith.addf %37, %36 : vector<512x256xf32>
    %39 = arith.mulf %28, %38 : vector<512x256xf32>
    %c0_27 = arith.constant 0 : index
    %c0_28 = arith.constant 0 : index
    %40 = vector.load %arg9[%c0_27, %c0_28] : memref<1x256xf32, #tpu.memory_space<vmem>>, vector<1x256xf32>
    %41 = vector.broadcast %40 : vector<1x256xf32> to vector<512x256xf32>
    %42 = arith.mulf %39, %41 : vector<512x256xf32>
    %cst_29 = arith.constant dense<0.000000e+00> : vector<512xf32>
    %43 = vector.multi_reduction <add>, %42, %cst_29 [1] : vector<512x256xf32> to vector<512xf32>
    %44 = vector.shape_cast %43 : vector<512xf32> to vector<512x1xf32>
    %c0_30 = arith.constant 0 : index
    %c0_31 = arith.constant 0 : index
    %45 = vector.load %arg10[%c0_30, %c0_31] : memref<1x1xf32, #tpu.memory_space<vmem>>, vector<1x1xf32>
    %46 = vector.broadcast %45 : vector<1x1xf32> to vector<512x1xf32>
    %47 = arith.addf %44, %46 : vector<512x1xf32>
    %c0_32 = arith.constant 0 : index
    %c0_33 = arith.constant 0 : index
    %c0_34 = arith.constant 0 : index
    %48 = vector.load %arg1[%c0_32, %c0_33, %c0_34] : memref<4x128x128xf32, #tpu.memory_space<vmem>>, vector<1x128x128xf32>
    %49 = vector.shape_cast %48 : vector<1x128x128xf32> to vector<128x128xf32>
    %50 = vector.extract_strided_slice %21 {offsets = [0, 0], sizes = [128, 384], strides = [1, 1]} : vector<512x384xf32> to vector<128x384xf32>
    %51 = vector.extract_strided_slice %47 {offsets = [0, 0], sizes = [128, 1], strides = [1, 1]} : vector<512x1xf32> to vector<128x1xf32>
    %52 = vector.extract_strided_slice %50 {offsets = [0, 0], sizes = [128, 128], strides = [1, 1]} : vector<128x384xf32> to vector<128x128xf32>
    %53 = arith.mulf %49, %52 : vector<128x128xf32>
    %cst_35 = arith.constant dense<0.000000e+00> : vector<128xf32>
    %54 = vector.multi_reduction <add>, %53, %cst_35 [1] : vector<128x128xf32> to vector<128xf32>
    %55 = vector.shape_cast %54 : vector<128xf32> to vector<128x1xf32>
    %56 = arith.addf %55, %51 : vector<128x1xf32>
    %57 = vector.extract_strided_slice %50 {offsets = [0, 128], sizes = [128, 128], strides = [1, 1]} : vector<128x384xf32> to vector<128x128xf32>
    %58 = arith.mulf %49, %57 : vector<128x128xf32>
    %cst_36 = arith.constant dense<0.000000e+00> : vector<128xf32>
    %59 = vector.multi_reduction <add>, %58, %cst_36 [1] : vector<128x128xf32> to vector<128xf32>
    %60 = vector.shape_cast %59 : vector<128xf32> to vector<128x1xf32>
    %61 = arith.addf %60, %51 : vector<128x1xf32>
    %62 = vector.extract_strided_slice %50 {offsets = [0, 256], sizes = [128, 128], strides = [1, 1]} : vector<128x384xf32> to vector<128x128xf32>
    %63 = arith.mulf %49, %62 : vector<128x128xf32>
    %cst_37 = arith.constant dense<0.000000e+00> : vector<128xf32>
    %64 = vector.multi_reduction <add>, %63, %cst_37 [1] : vector<128x128xf32> to vector<128xf32>
    %65 = vector.shape_cast %64 : vector<128xf32> to vector<128x1xf32>
    %66 = arith.addf %65, %51 : vector<128x1xf32>
    %c1_38 = arith.constant 1 : index
    %c0_39 = arith.constant 0 : index
    %c0_40 = arith.constant 0 : index
    %67 = vector.load %arg1[%c1_38, %c0_39, %c0_40] : memref<4x128x128xf32, #tpu.memory_space<vmem>>, vector<1x128x128xf32>
    %68 = vector.shape_cast %67 : vector<1x128x128xf32> to vector<128x128xf32>
    %69 = vector.extract_strided_slice %21 {offsets = [128, 0], sizes = [128, 384], strides = [1, 1]} : vector<512x384xf32> to vector<128x384xf32>
    %70 = vector.extract_strided_slice %47 {offsets = [128, 0], sizes = [128, 1], strides = [1, 1]} : vector<512x1xf32> to vector<128x1xf32>
    %71 = vector.extract_strided_slice %69 {offsets = [0, 0], sizes = [128, 128], strides = [1, 1]} : vector<128x384xf32> to vector<128x128xf32>
    %72 = arith.mulf %68, %71 : vector<128x128xf32>
    %cst_41 = arith.constant dense<0.000000e+00> : vector<128xf32>
    %73 = vector.multi_reduction <add>, %72, %cst_41 [1] : vector<128x128xf32> to vector<128xf32>
    %74 = vector.shape_cast %73 : vector<128xf32> to vector<128x1xf32>
    %75 = arith.addf %74, %70 : vector<128x1xf32>
    %76 = vector.extract_strided_slice %69 {offsets = [0, 128], sizes = [128, 128], strides = [1, 1]} : vector<128x384xf32> to vector<128x128xf32>
    %77 = arith.mulf %68, %76 : vector<128x128xf32>
    %cst_42 = arith.constant dense<0.000000e+00> : vector<128xf32>
    %78 = vector.multi_reduction <add>, %77, %cst_42 [1] : vector<128x128xf32> to vector<128xf32>
    %79 = vector.shape_cast %78 : vector<128xf32> to vector<128x1xf32>
    %80 = arith.addf %79, %70 : vector<128x1xf32>
    %81 = vector.extract_strided_slice %69 {offsets = [0, 256], sizes = [128, 128], strides = [1, 1]} : vector<128x384xf32> to vector<128x128xf32>
    %82 = arith.mulf %68, %81 : vector<128x128xf32>
    %cst_43 = arith.constant dense<0.000000e+00> : vector<128xf32>
    %83 = vector.multi_reduction <add>, %82, %cst_43 [1] : vector<128x128xf32> to vector<128xf32>
    %84 = vector.shape_cast %83 : vector<128xf32> to vector<128x1xf32>
    %85 = arith.addf %84, %70 : vector<128x1xf32>
    %c2_44 = arith.constant 2 : index
    %c0_45 = arith.constant 0 : index
    %c0_46 = arith.constant 0 : index
    %86 = vector.load %arg1[%c2_44, %c0_45, %c0_46] : memref<4x128x128xf32, #tpu.memory_space<vmem>>, vector<1x128x128xf32>
    %87 = vector.shape_cast %86 : vector<1x128x128xf32> to vector<128x128xf32>
    %88 = vector.extract_strided_slice %21 {offsets = [256, 0], sizes = [128, 384], strides = [1, 1]} : vector<512x384xf32> to vector<128x384xf32>
    %89 = vector.extract_strided_slice %47 {offsets = [256, 0], sizes = [128, 1], strides = [1, 1]} : vector<512x1xf32> to vector<128x1xf32>
    %90 = vector.extract_strided_slice %88 {offsets = [0, 0], sizes = [128, 128], strides = [1, 1]} : vector<128x384xf32> to vector<128x128xf32>
    %91 = arith.mulf %87, %90 : vector<128x128xf32>
    %cst_47 = arith.constant dense<0.000000e+00> : vector<128xf32>
    %92 = vector.multi_reduction <add>, %91, %cst_47 [1] : vector<128x128xf32> to vector<128xf32>
    %93 = vector.shape_cast %92 : vector<128xf32> to vector<128x1xf32>
    %94 = arith.addf %93, %89 : vector<128x1xf32>
    %95 = vector.extract_strided_slice %88 {offsets = [0, 128], sizes = [128, 128], strides = [1, 1]} : vector<128x384xf32> to vector<128x128xf32>
    %96 = arith.mulf %87, %95 : vector<128x128xf32>
    %cst_48 = arith.constant dense<0.000000e+00> : vector<128xf32>
    %97 = vector.multi_reduction <add>, %96, %cst_48 [1] : vector<128x128xf32> to vector<128xf32>
    %98 = vector.shape_cast %97 : vector<128xf32> to vector<128x1xf32>
    %99 = arith.addf %98, %89 : vector<128x1xf32>
    %100 = vector.extract_strided_slice %88 {offsets = [0, 256], sizes = [128, 128], strides = [1, 1]} : vector<128x384xf32> to vector<128x128xf32>
    %101 = arith.mulf %87, %100 : vector<128x128xf32>
    %cst_49 = arith.constant dense<0.000000e+00> : vector<128xf32>
    %102 = vector.multi_reduction <add>, %101, %cst_49 [1] : vector<128x128xf32> to vector<128xf32>
    %103 = vector.shape_cast %102 : vector<128xf32> to vector<128x1xf32>
    %104 = arith.addf %103, %89 : vector<128x1xf32>
    %c3_50 = arith.constant 3 : index
    %c0_51 = arith.constant 0 : index
    %c0_52 = arith.constant 0 : index
    %105 = vector.load %arg1[%c3_50, %c0_51, %c0_52] : memref<4x128x128xf32, #tpu.memory_space<vmem>>, vector<1x128x128xf32>
    %106 = vector.shape_cast %105 : vector<1x128x128xf32> to vector<128x128xf32>
    %107 = vector.extract_strided_slice %21 {offsets = [384, 0], sizes = [128, 384], strides = [1, 1]} : vector<512x384xf32> to vector<128x384xf32>
    %108 = vector.extract_strided_slice %47 {offsets = [384, 0], sizes = [128, 1], strides = [1, 1]} : vector<512x1xf32> to vector<128x1xf32>
    %109 = vector.extract_strided_slice %107 {offsets = [0, 0], sizes = [128, 128], strides = [1, 1]} : vector<128x384xf32> to vector<128x128xf32>
    %110 = arith.mulf %106, %109 : vector<128x128xf32>
    %cst_53 = arith.constant dense<0.000000e+00> : vector<128xf32>
    %111 = vector.multi_reduction <add>, %110, %cst_53 [1] : vector<128x128xf32> to vector<128xf32>
    %112 = vector.shape_cast %111 : vector<128xf32> to vector<128x1xf32>
    %113 = arith.addf %112, %108 : vector<128x1xf32>
    %114 = vector.extract_strided_slice %107 {offsets = [0, 128], sizes = [128, 128], strides = [1, 1]} : vector<128x384xf32> to vector<128x128xf32>
    %115 = arith.mulf %106, %114 : vector<128x128xf32>
    %cst_54 = arith.constant dense<0.000000e+00> : vector<128xf32>
    %116 = vector.multi_reduction <add>, %115, %cst_54 [1] : vector<128x128xf32> to vector<128xf32>
    %117 = vector.shape_cast %116 : vector<128xf32> to vector<128x1xf32>
    %118 = arith.addf %117, %108 : vector<128x1xf32>
    %119 = vector.extract_strided_slice %107 {offsets = [0, 256], sizes = [128, 128], strides = [1, 1]} : vector<128x384xf32> to vector<128x128xf32>
    %120 = arith.mulf %106, %119 : vector<128x128xf32>
    %cst_55 = arith.constant dense<0.000000e+00> : vector<128xf32>
    %121 = vector.multi_reduction <add>, %120, %cst_55 [1] : vector<128x128xf32> to vector<128xf32>
    %122 = vector.shape_cast %121 : vector<128xf32> to vector<128x1xf32>
    %123 = arith.addf %122, %108 : vector<128x1xf32>
    %124 = tpu.concatenate %56, %75, %94, %113 in 1 : vector<128x1xf32>, vector<128x1xf32>, vector<128x1xf32>, vector<128x1xf32> -> vector<128x4xf32>
    %125 = tpu.concatenate %61, %80, %99, %118 in 1 : vector<128x1xf32>, vector<128x1xf32>, vector<128x1xf32>, vector<128x1xf32> -> vector<128x4xf32>
    %126 = tpu.concatenate %66, %85, %104, %123 in 1 : vector<128x1xf32>, vector<128x1xf32>, vector<128x1xf32>, vector<128x1xf32> -> vector<128x4xf32>
    %127 = tpu.concatenate %124, %125, %126 in 0 : vector<128x4xf32>, vector<128x4xf32>, vector<128x4xf32> -> vector<384x4xf32>
    %c0_56 = arith.constant 0 : index
    %c0_57 = arith.constant 0 : index
    %128 = vector.load %arg11[%c0_56, %c0_57] : memref<4x256xf32, #tpu.memory_space<vmem>>, vector<4x256xf32>
    %cst_58 = arith.constant dense<0.000000e+00> : vector<384x256xf32>
    %129 = tpu.matmul %127, %128, %cst_58 {dimension_numbers = #tpu.dot_dimension_numbers<[1], [0], [0], [1], [0, 0, 1, 1], [], []>} : vector<384x4xf32>, vector<4x256xf32>, vector<384x256xf32> -> vector<384x256xf32>
    %c0_59 = arith.constant 0 : index
    %c0_60 = arith.constant 0 : index
    %130 = vector.load %arg12[%c0_59, %c0_60] : memref<1x256xf32, #tpu.memory_space<vmem>>, vector<1x256xf32>
    %131 = vector.broadcast %130 : vector<1x256xf32> to vector<384x256xf32>
    %132 = arith.addf %129, %131 : vector<384x256xf32>
    %cst_61 = arith.constant 5.000000e-01 : f32
    %133 = vector.broadcast %cst_61 : f32 to vector<384x256xf32>
    %134 = arith.mulf %133, %132 : vector<384x256xf32>
    %cst_62 = arith.constant 4.471500e-02 : f32
    %135 = vector.broadcast %cst_62 : f32 to vector<384x256xf32>
    %136 = arith.mulf %135, %132 : vector<384x256xf32>
    %137 = arith.mulf %136, %132 : vector<384x256xf32>
    %138 = arith.mulf %137, %132 : vector<384x256xf32>
    %139 = arith.addf %132, %138 : vector<384x256xf32>
    %cst_63 = arith.constant 0.797884583 : f32
    %140 = vector.broadcast %cst_63 : f32 to vector<384x256xf32>
    %141 = arith.mulf %140, %139 : vector<384x256xf32>
    %142 = math.tanh %141 : vector<384x256xf32>
    %cst_64 = arith.constant 1.000000e+00 : f32
    %143 = vector.broadcast %cst_64 : f32 to vector<384x256xf32>
    %144 = arith.addf %143, %142 : vector<384x256xf32>
    %145 = arith.mulf %134, %144 : vector<384x256xf32>
    %c0_65 = arith.constant 0 : index
    %c0_66 = arith.constant 0 : index
    %146 = vector.load %arg13[%c0_65, %c0_66] : memref<1x256xf32, #tpu.memory_space<vmem>>, vector<1x256xf32>
    %147 = vector.broadcast %146 : vector<1x256xf32> to vector<384x256xf32>
    %148 = arith.mulf %145, %147 : vector<384x256xf32>
    %cst_67 = arith.constant dense<0.000000e+00> : vector<384xf32>
    %149 = vector.multi_reduction <add>, %148, %cst_67 [1] : vector<384x256xf32> to vector<384xf32>
    %150 = vector.shape_cast %149 : vector<384xf32> to vector<384x1xf32>
    %c0_68 = arith.constant 0 : index
    %c0_69 = arith.constant 0 : index
    %151 = vector.load %arg14[%c0_68, %c0_69] : memref<1x1xf32, #tpu.memory_space<vmem>>, vector<1x1xf32>
    %152 = vector.broadcast %151 : vector<1x1xf32> to vector<384x1xf32>
    %153 = arith.addf %150, %152 : vector<384x1xf32>
    %154 = vector.extract_strided_slice %153 {offsets = [0, 0], sizes = [128, 1], strides = [1, 1]} : vector<384x1xf32> to vector<128x1xf32>
    %155 = vector.extract_strided_slice %153 {offsets = [128, 0], sizes = [128, 1], strides = [1, 1]} : vector<384x1xf32> to vector<128x1xf32>
    %156 = vector.extract_strided_slice %153 {offsets = [256, 0], sizes = [128, 1], strides = [1, 1]} : vector<384x1xf32> to vector<128x1xf32>
    %157 = tpu.concatenate %154, %155, %156 in 1 : vector<128x1xf32>, vector<128x1xf32>, vector<128x1xf32> -> vector<128x3xf32>
    %c0_70 = arith.constant 0 : index
    %c0_71 = arith.constant 0 : index
    %158 = vector.load %arg15[%c0_70, %c0_71] : memref<128x3xf32, #tpu.memory_space<vmem>>, vector<128x3xf32>
    tpu.vector_store %arg15[%c0_70, %c0_71], %157 {strides = array<i32>} : memref<128x3xf32, #tpu.memory_space<vmem>>, vector<128x3xf32>,
    return
  }
  func.func @transform_0(%arg0: i32) -> (i32, i32, i32) {
    %c0_i32 = arith.constant 0 : i32
    %c0_i32_0 = arith.constant 0 : i32
    %c0_i32_1 = arith.constant 0 : i32
    return %c0_i32, %arg0, %c0_i32_0 : i32, i32, i32
  }
  func.func @transform_1(%arg0: i32) -> (i32, i32, i32) {
    %c0_i32 = arith.constant 0 : i32
    %c0_i32_0 = arith.constant 0 : i32
    %c0_i32_1 = arith.constant 0 : i32
    return %c0_i32, %arg0, %c0_i32_0 : i32, i32, i32
  }
  func.func @transform_2(%arg0: i32) -> (i32, i32) {
    %c0_i32 = arith.constant 0 : i32
    %c0_i32_0 = arith.constant 0 : i32
    %c0_i32_1 = arith.constant 0 : i32
    return %c0_i32, %c0_i32_0 : i32, i32
  }
  func.func @transform_3(%arg0: i32) -> (i32, i32) {
    %c0_i32 = arith.constant 0 : i32
    %c0_i32_0 = arith.constant 0 : i32
    %c0_i32_1 = arith.constant 0 : i32
    return %c0_i32, %c0_i32_0 : i32, i32
  }
  func.func @transform_4(%arg0: i32) -> (i32, i32) {
    %c0_i32 = arith.constant 0 : i32
    %c0_i32_0 = arith.constant 0 : i32
    %c0_i32_1 = arith.constant 0 : i32
    return %c0_i32, %c0_i32_0 : i32, i32
  }
  func.func @transform_5(%arg0: i32) -> (i32, i32) {
    %c0_i32 = arith.constant 0 : i32
    %c0_i32_0 = arith.constant 0 : i32
    %c0_i32_1 = arith.constant 0 : i32
    return %c0_i32, %c0_i32_0 : i32, i32
  }
  func.func @transform_6(%arg0: i32) -> (i32, i32) {
    %c0_i32 = arith.constant 0 : i32
    %c0_i32_0 = arith.constant 0 : i32
    %c0_i32_1 = arith.constant 0 : i32
    return %c0_i32, %c0_i32_0 : i32, i32
  }
  func.func @transform_7(%arg0: i32) -> (i32, i32) {
    %c0_i32 = arith.constant 0 : i32
    %c0_i32_0 = arith.constant 0 : i32
    %c0_i32_1 = arith.constant 0 : i32
    return %c0_i32, %c0_i32_0 : i32, i32
  }
  func.func @transform_8(%arg0: i32) -> (i32, i32) {
    %c0_i32 = arith.constant 0 : i32
    %c0_i32_0 = arith.constant 0 : i32
    %c0_i32_1 = arith.constant 0 : i32
    return %c0_i32, %c0_i32_0 : i32, i32
  }
  func.func @transform_9(%arg0: i32) -> (i32, i32) {
    %c0_i32 = arith.constant 0 : i32
    %c0_i32_0 = arith.constant 0 : i32
    %c0_i32_1 = arith.constant 0 : i32
    return %c0_i32, %c0_i32_0 : i32, i32
  }
  func.func @transform_10(%arg0: i32) -> (i32, i32) {
    %c0_i32 = arith.constant 0 : i32
    %c0_i32_0 = arith.constant 0 : i32
    %c0_i32_1 = arith.constant 0 : i32
    return %c0_i32, %c0_i32_0 : i32, i32
  }
  func.func @transform_11(%arg0: i32) -> (i32, i32) {
    %c0_i32 = arith.constant 0 : i32
    %c0_i32_0 = arith.constant 0 : i32
    %c0_i32_1 = arith.constant 0 : i32
    return %c0_i32, %c0_i32_0 : i32, i32
  }
  func.func @transform_12(%arg0: i32) -> (i32, i32) {
    %c0_i32 = arith.constant 0 : i32
    %c0_i32_0 = arith.constant 0 : i32
    %c0_i32_1 = arith.constant 0 : i32
    return %c0_i32, %c0_i32_0 : i32, i32
  }
  func.func @transform_13(%arg0: i32) -> (i32, i32) {
    %c0_i32 = arith.constant 0 : i32
    %c0_i32_0 = arith.constant 0 : i32
    %c0_i32_1 = arith.constant 0 : i32
    return %c0_i32, %c0_i32_0 : i32, i32
  }
  func.func @transform_14(%arg0: i32) -> (i32, i32) {
    %c0_i32 = arith.constant 0 : i32
    %c0_i32_0 = arith.constant 0 : i32
    return %arg0, %c0_i32 : i32, i32
  }
}

</mosaic_0001>

<bundles_post_ra>
// kernel: itnsr_forward.2
= control target key start
LH: loop header
LB: loop body
LE: loop exit
PB: predicated region body
PF: predicated region fallthrough
CT: control target
= control target key end

     0   :  { %vm41_vm0 = vcmask 1042432   ;;  %v213_v3 = vmov 0.0   ;;  %vm37_vm1 = vcmask 220160   ;;  %v214_v19 = vmov 0   ;;  %s301_s1 = inlined_call_operand.vmem [shape: f32[27,512], index: 1, kind: input, shape index: {}]   ;;  %s302_s0 = inlined_call_operand.vmem [shape: f32[8,27], index: 0, kind: input, shape index: {}]   ;;  %s303_s2 = inlined_call_operand.vmem [shape: f32[8,1], index: 2, kind: input, shape index: {}]   ;;  %s304_s3 = inlined_call_operand.vmem [shape: f32[8,512], index: 3, kind: output, shape index: {}]  }
   0x1   :  { %v28_v0 = vld [vmem:[%s301_s1 + $0x68] sm:$0x7]  ;;  %v30_v1 = vld [vmem:[%s301_s1 + $0x78] sm:$0x7]  ;;  %v27_v2 = vld [vmem:[%s301_s1 + $0x60] sm:$0x7]  ;;  %118 = vmatprep.mubr.f32.mxu0 %v213_v3  ;;  %189 = vmatprep.mubr.f32.mxu1 %v213_v3 }
   0x2   :  { %204 = vmatprep.subr.msk.mxu0 %vm41_vm0, %v28_v0  ;;  %207 = vmatprep.subr.msk.mxu1 %vm41_vm0, %v30_v1  ;;  %v29_v4 = vld [vmem:[%s301_s1 + $0x70] sm:$0x7]  ;;  %v24_v5 = vld [vmem:[%s301_s1 + $0x48] sm:$0xff]  ;;  %v26_v6 = vld [vmem:[%s301_s1 + $0x58] sm:$0xff] }
   0x3   :  { %205 = vmatpush1.msk.msra.mxu0 %vm41_vm0, %v27_v2  ;;  %208 = vmatpush1.msk.msra.mxu1 %vm41_vm0, %v29_v4  ;;  %v23_v7 = vld [vmem:[%s301_s1 + $0x40] sm:$0xff]  ;;  %v25_v8 = vld [vmem:[%s301_s1 + $0x50] sm:$0xff]  ;;  %v20_v9 = vld [vmem:[%s301_s1 + $0x28] sm:$0xff] }
   0x4   :  { %80 = vmatprep.subr.mxu0 %v24_v5  ;;  %151 = vmatprep.subr.mxu1 %v26_v6  ;;  %v22_v10 = vld [vmem:[%s301_s1 + $0x38] sm:$0xff]  ;;  %v19_v11 = vld [vmem:[%s301_s1 + $0x20] sm:$0xff]  ;;  %v21_v12 = vld [vmem:[%s301_s1 + $0x30] sm:$0xff] }
   0x5   :  { %81 = vmatpush1.msra.mxu0 %v23_v7  ;;  %152 = vmatpush1.msra.mxu1 %v25_v8  ;;  %v16_v13 = vld [vmem:[%s301_s1 + $0x8] sm:$0xff]  ;;  %v18_v14 = vld [vmem:[%s301_s1 + $0x18] sm:$0xff]  ;;  %v15_v15 = vld [vmem:[%s301_s1] sm:$0xff] }
   0x6   :  { %82 = vmatprep.subr.mxu0 %v20_v9  ;;  %153 = vmatprep.subr.mxu1 %v22_v10  ;;  %v17_v16 = vld [vmem:[%s301_s1 + $0x10] sm:$0xff]  ;;  %v14_v17 = vld [vmem:[%s302_s0] sm:$0xff] }
   0x7   :  { %83 = vmatpush1.msra.mxu0 %v19_v11  ;;  %154 = vmatpush1.msra.mxu1 %v21_v12  ;;  %v31_v18 = vld [vmem:[%s303_s2] sm:$0xff] }
   0x8   :  { %84 = vmatprep.subr.mxu0 %v16_v13  ;;  %155 = vmatprep.subr.mxu1 %v18_v14 }
   0x9   :  { %85 = vmatpush1.msra.mxu0 %v15_v15  ;;  %156 = vmatpush1.msra.mxu1 %v17_v16 }
   0xa   :  { %206 = vmatmul.mubr.msk.f32.vlgmr.msra.gmra.mxu0 %vm37_vm1, %v14_v17  ;;  %209 = vmatmul.mubr.msk.f32.vlgmr.msra.gmra.mxu1 %vm37_vm1, %v14_v17 }
   0xb   :  { %212 = vset.pattern.permute.xlu0 %v214_v19 }
   0xc   :  { %34 = vperm.xlu0 %212, %v31_v18  }
  0x87   :  { %v35_v20 = vpop.permute.xlu0 %34 }
  0xca   :  { %v120_v21 = vpop.f32.mrf.mxu0  ;;  %v191_v22 = vpop.f32.mrf.mxu1 }
  0xcb   :  { %v121_v23 = vadd.f32 %v120_v21, %v35_v20  ;;  %v192_v24 = vadd.f32 %v191_v22, %v35_v20 }
  0xcc   :  { %v122_v25 = vpop.f32.mrf.mxu0  ;;  %v193_v26 = vpop.f32.mrf.mxu1 }
  0xcd   :  { %196 = vst [vmem:[%s304_s3] sm:$0xff] %v121_v23  ;;  %198 = vst [vmem:[%s304_s3 + $0x10] sm:$0xff] %v192_v24  ;;  %v123_v27 = vadd.f32 %v122_v25, %v35_v20  ;;  %v194_v28 = vadd.f32 %v193_v26, %v35_v20 }
  0xcf   :  { %197 = vst [vmem:[%s304_s3 + $0x8] sm:$0xff] %v123_v27  ;;  %199 = vst [vmem:[%s304_s3 + $0x18] sm:$0xff] %v194_v28 }

// kernel: itnsr_forward.3
= control target key start
LH: loop header
LB: loop body
LE: loop exit
PB: predicated region body
PF: predicated region fallthrough
CT: control target
= control target key end

     0   :  { %s17055_s0 = inlined_call_operand.vmem [shape: f32[4,512,128], index: 0, kind: input, shape index: {}]   ;;  %s17056_s1 = inlined_call_operand.vmem [shape: f32[4,512,4], index: 1, kind: input, shape index: {}]   ;;  %s17057_s2 = inlined_call_operand.vmem [shape: f32[4,64], index: 2, kind: input, shape index: {}]   ;;  %s17058_s3 = inlined_call_operand.vmem [shape: f32[1,64], index: 3, kind: input, shape index: {}]   ;;  %s17059_s4 = inlined_call_operand.vmem [shape: f32[64,384], index: 4, kind: input, shape index: {}]   ;;  %s17060_s5 = inlined_call_operand.vmem [shape: f32[1,384], index: 5, kind: input, shape index: {}]   ;;  %s17061_s6 = inlined_call_operand.vmem [shape: f32[2,256], index: 6, kind: input, shape index: {}]   ;;  %s17062_s7 = inlined_call_operand.vmem [shape: f32[1,256], index: 7, kind: input, shape index: {}]   ;;  %s17063_s8 = inlined_call_operand.vmem [shape: f32[1,256], index: 8, kind: input, shape index: {}]   ;;  %s17064_s9 = inlined_call_operand.<no memory space> [shape: f32[1,1], index: 9, kind: input, shape index: {}]   ;;  %s17065_s10 = inlined_call_operand.vmem [shape: f32[4,256], index: 10, kind: input, shape index: {}]   ;;  %s17066_s11 = inlined_call_operand.vmem [shape: f32[1,256], index: 11, kind: input, shape index: {}]   ;;  %s17067_s12 = inlined_call_operand.vmem [shape: f32[1,256], index: 12, kind: input, shape index: {}]   ;;  %s17068_s14 = inlined_call_operand.vmem [shape: f32[512,3], index: 14, kind: output, shape index: {}]   ;;  %s17069_s13 = inlined_call_operand.<no memory space> [shape: f32[1,1], index: 13, kind: input, shape index: {}]  }
   0x1   :  { %v19_v0 = vstv %s17064_s9  ;;  %v21_v1 = vstv %s17069_s13 }
   0x2   :  { %20 = vst [vmem:[#allocation2] sm:$0x1] %v19_v0  ;;  %22 = vst [vmem:[#allocation3] sm:$0x1] %v21_v1 }
   0x3   :  { %s9985_s17 = smov 0   ;;  %s9987_s18 = smov 0  }
   0x4   :  { %s9989_s19 = smov 0  }
   0x5 LB: > { %s8520_s9 = sadd.s32 4294967295, %s9898_s19   ;;  %s10002_s13 = sadd.s32 1, %s9898_s19   ;;  %s9898_s19 = sphi %s9989_s19, %s18277_s19   ;;  %s9894_s18 = sphi %s9987_s18, %s18276_s18   ;;  %s9890_s17 = sphi %s9985_s17, %s18275_s17  }
   0x6   : > { %s32_s20 = ssub.s32 %s9898_s19, %s10002_s13  ;;  %s35_s21 = sadd.s32 1, %s9894_s18 }
   0x7   : > { %p33_p0 = scmp.eq.s32.totalorder %s32_s20, 0  ;;  %p42_p1 = scmp.ne.s32.totalorder %s9894_s18, %s9890_s17 }
   0x8   : > { %p43_p2 = scmp.eq.s32.totalorder %s9898_s19, 0  ;;  %p8523_p4 = scmp.ge.s32.totalorder %s9898_s19, 4 }
   0x9   : > { %s10011_s22 = scalar_select %p33_p0, %s9894_s18, %s35_s21  }
   0xa   : > { %p10013_p3 = por %p43_p2, %p42_p1  ;;  %408 = sbr.rel (%p8523_p4) target bundleno = 87 (0x57), region = 64 }
   0xf   : > { %411 = sbr.rel (!%p10013_p3) target bundleno = 51 (0x33), region = 68  ;;  %s413_s24 = sand.u32 (%p10013_p3), 1, %s9894_s18  }
  0x10   : > { %s8946_s25 = sshll.u32 (%p10013_p3), %s9898_s19, 7  ;;  %s8524_s26 = sshll.u32 (%p10013_p3), %s413_s24, 9 }
  0x11   : > { %s10025_s29 = scalar_lea.vmem (%p10013_p3), %s17055_s0, %s8946_s25  ;;  %s10030_s30 = scalar_lea.vmem (%p10013_p3), [#allocation4], %s8524_s26 }
  0x12   : > { %v573_v2 = vld [vmem:[%s10025_s29] sm:$0xff] (%p10013_p3)  ;;  %v575_v3 = vld [vmem:[%s10025_s29 + $0x8] sm:$0xff] (%p10013_p3)  ;;  %v577_v4 = vld [vmem:[%s10025_s29 + $0x10] sm:$0xff] (%p10013_p3) }
  0x13   : > { %574 = vst [vmem:[%s10030_s30] sm:$0xff] (%p10013_p3), %v573_v2  ;;  %576 = vst [vmem:[%s10030_s30 + $0x8] sm:$0xff] (%p10013_p3), %v575_v3  ;;  %v579_v5 = vld [vmem:[%s10025_s29 + $0x18] sm:$0xff] (%p10013_p3)  ;;  %v581_v6 = vld [vmem:[%s10025_s29 + $0x20] sm:$0xff] (%p10013_p3) }
  0x14   : > { %578 = vst [vmem:[%s10030_s30 + $0x10] sm:$0xff] %v577_v4  ;;  %v583_v7 = vld [vmem:[%s10025_s29 + $0x28] sm:$0xff]  ;;  %580 = vst [vmem:[%s10030_s30 + $0x18] sm:$0xff] %v579_v5  ;;  %v585_v8 = vld [vmem:[%s10025_s29 + $0x30] sm:$0xff] }
  0x15   : > { %582 = vst [vmem:[%s10030_s30 + $0x20] sm:$0xff] %v581_v6  ;;  %584 = vst [vmem:[%s10030_s30 + $0x28] sm:$0xff] %v583_v7  ;;  %v587_v9 = vld [vmem:[%s10025_s29 + $0x38] sm:$0xff]  ;;  %v589_v10 = vld [vmem:[%s10025_s29 + $0x40] sm:$0xff] }
  0x16   : > { %586 = vst [vmem:[%s10030_s30 + $0x30] sm:$0xff] %v585_v8  ;;  %588 = vst [vmem:[%s10030_s30 + $0x38] sm:$0xff] %v587_v9  ;;  %v591_v11 = vld [vmem:[%s10025_s29 + $0x48] sm:$0xff]  ;;  %v593_v12 = vld [vmem:[%s10025_s29 + $0x50] sm:$0xff] }
  0x17   : > { %590 = vst [vmem:[%s10030_s30 + $0x40] sm:$0xff] %v589_v10  ;;  %v595_v13 = vld [vmem:[%s10025_s29 + $0x58] sm:$0xff]  ;;  %592 = vst [vmem:[%s10030_s30 + $0x48] sm:$0xff] %v591_v11  ;;  %v597_v14 = vld [vmem:[%s10025_s29 + $0x60] sm:$0xff] }
  0x18   : > { %594 = vst [vmem:[%s10030_s30 + $0x50] sm:$0xff] %v593_v12  ;;  %596 = vst [vmem:[%s10030_s30 + $0x58] sm:$0xff] %v595_v13  ;;  %v599_v15 = vld [vmem:[%s10025_s29 + $0x68] sm:$0xff]  ;;  %v601_v16 = vld [vmem:[%s10025_s29 + $0x70] sm:$0xff] }
  0x19   : > { %598 = vst [vmem:[%s10030_s30 + $0x60] sm:$0xff] %v597_v14  ;;  %600 = vst [vmem:[%s10030_s30 + $0x68] sm:$0xff] %v599_v15  ;;  %v603_v17 = vld [vmem:[%s10025_s29 + $0x78] sm:$0xff]  ;;  %v605_v18 = vld [vmem:[%s10025_s29 + $0x200] sm:$0xff] }
  0x1a   : > { %602 = vst [vmem:[%s10030_s30 + $0x70] sm:$0xff] %v601_v16  ;;  %v607_v19 = vld [vmem:[%s10025_s29 + $0x208] sm:$0xff]  ;;  %604 = vst [vmem:[%s10030_s30 + $0x78] sm:$0xff] %v603_v17  ;;  %v609_v20 = vld [vmem:[%s10025_s29 + $0x210] sm:$0xff] }
  0x1b   : > { %606 = vst [vmem:[%s10030_s30 + $0x80] sm:$0xff] %v605_v18  ;;  %608 = vst [vmem:[%s10030_s30 + $0x88] sm:$0xff] %v607_v19  ;;  %v611_v21 = vld [vmem:[%s10025_s29 + $0x218] sm:$0xff]  ;;  %v613_v22 = vld [vmem:[%s10025_s29 + $0x220] sm:$0xff] }
  0x1c   : > { %610 = vst [vmem:[%s10030_s30 + $0x90] sm:$0xff] %v609_v20  ;;  %612 = vst [vmem:[%s10030_s30 + $0x98] sm:$0xff] %v611_v21  ;;  %v615_v23 = vld [vmem:[%s10025_s29 + $0x228] sm:$0xff]  ;;  %v617_v24 = vld [vmem:[%s10025_s29 + $0x230] sm:$0xff] }
  0x1d   : > { %614 = vst [vmem:[%s10030_s30 + $0xa0] sm:$0xff] %v613_v22  ;;  %v619_v25 = vld [vmem:[%s10025_s29 + $0x238] sm:$0xff]  ;;  %616 = vst [vmem:[%s10030_s30 + $0xa8] sm:$0xff] %v615_v23  ;;  %v621_v26 = vld [vmem:[%s10025_s29 + $0x240] sm:$0xff] }
  0x1e   : > { %618 = vst [vmem:[%s10030_s30 + $0xb0] sm:$0xff] %v617_v24  ;;  %620 = vst [vmem:[%s10030_s30 + $0xb8] sm:$0xff] %v619_v25  ;;  %v623_v27 = vld [vmem:[%s10025_s29 + $0x248] sm:$0xff]  ;;  %v625_v28 = vld [vmem:[%s10025_s29 + $0x250] sm:$0xff] }
  0x1f   : > { %622 = vst [vmem:[%s10030_s30 + $0xc0] sm:$0xff] %v621_v26  ;;  %624 = vst [vmem:[%s10030_s30 + $0xc8] sm:$0xff] %v623_v27  ;;  %v627_v29 = vld [vmem:[%s10025_s29 + $0x258] sm:$0xff]  ;;  %v629_v30 = vld [vmem:[%s10025_s29 + $0x260] sm:$0xff] }
  0x20   : > { %626 = vst [vmem:[%s10030_s30 + $0xd0] sm:$0xff] %v625_v28  ;;  %v631_v31 = vld [vmem:[%s10025_s29 + $0x268] sm:$0xff]  ;;  %628 = vst [vmem:[%s10030_s30 + $0xd8] sm:$0xff] %v627_v29  ;;  %v633_v32 = vld [vmem:[%s10025_s29 + $0x270] sm:$0xff] }
  0x21   : > { %630 = vst [vmem:[%s10030_s30 + $0xe0] sm:$0xff] %v629_v30  ;;  %632 = vst [vmem:[%s10030_s30 + $0xe8] sm:$0xff] %v631_v31  ;;  %v635_v33 = vld [vmem:[%s10025_s29 + $0x278] sm:$0xff]  ;;  %v637_v34 = vld [vmem:[%s10025_s29 + $0x400] sm:$0xff] }
  0x22   : > { %634 = vst [vmem:[%s10030_s30 + $0xf0] sm:$0xff] %v633_v32  ;;  %636 = vst [vmem:[%s10030_s30 + $0xf8] sm:$0xff] %v635_v33  ;;  %v639_v35 = vld [vmem:[%s10025_s29 + $0x408] sm:$0xff]  ;;  %v641_v36 = vld [vmem:[%s10025_s29 + $0x410] sm:$0xff] }
  0x23   : > { %638 = vst [vmem:[%s10030_s30 + $0x100] sm:$0xff] %v637_v34  ;;  %v643_v37 = vld [vmem:[%s10025_s29 + $0x418] sm:$0xff]  ;;  %640 = vst [vmem:[%s10030_s30 + $0x108] sm:$0xff] %v639_v35  ;;  %v645_v38 = vld [vmem:[%s10025_s29 + $0x420] sm:$0xff] }
  0x24   : > { %642 = vst [vmem:[%s10030_s30 + $0x110] sm:$0xff] %v641_v36  ;;  %644 = vst [vmem:[%s10030_s30 + $0x118] sm:$0xff] %v643_v37  ;;  %v647_v39 = vld [vmem:[%s10025_s29 + $0x428] sm:$0xff]  ;;  %v649_v40 = vld [vmem:[%s10025_s29 + $0x430] sm:$0xff] }
  0x25   : > { %646 = vst [vmem:[%s10030_s30 + $0x120] sm:$0xff] %v645_v38  ;;  %648 = vst [vmem:[%s10030_s30 + $0x128] sm:$0xff] %v647_v39  ;;  %v651_v41 = vld [vmem:[%s10025_s29 + $0x438] sm:$0xff]  ;;  %v653_v42 = vld [vmem:[%s10025_s29 + $0x440] sm:$0xff] }
  0x26   : > { %650 = vst [vmem:[%s10030_s30 + $0x130] sm:$0xff] %v649_v40  ;;  %v655_v43 = vld [vmem:[%s10025_s29 + $0x448] sm:$0xff]  ;;  %652 = vst [vmem:[%s10030_s30 + $0x138] sm:$0xff] %v651_v41  ;;  %v657_v44 = vld [vmem:[%s10025_s29 + $0x450] sm:$0xff] }
  0x27   : > { %654 = vst [vmem:[%s10030_s30 + $0x140] sm:$0xff] %v653_v42  ;;  %656 = vst [vmem:[%s10030_s30 + $0x148] sm:$0xff] %v655_v43  ;;  %v659_v45 = vld [vmem:[%s10025_s29 + $0x458] sm:$0xff]  ;;  %v661_v46 = vld [vmem:[%s10025_s29 + $0x460] sm:$0xff] }
  0x28   : > { %658 = vst [vmem:[%s10030_s30 + $0x150] sm:$0xff] %v657_v44  ;;  %660 = vst [vmem:[%s10030_s30 + $0x158] sm:$0xff] %v659_v45  ;;  %v663_v47 = vld [vmem:[%s10025_s29 + $0x468] sm:$0xff]  ;;  %v665_v48 = vld [vmem:[%s10025_s29 + $0x470] sm:$0xff] }
  0x29   : > { %662 = vst [vmem:[%s10030_s30 + $0x160] sm:$0xff] %v661_v46  ;;  %v667_v49 = vld [vmem:[%s10025_s29 + $0x478] sm:$0xff]  ;;  %664 = vst [vmem:[%s10030_s30 + $0x168] sm:$0xff] %v663_v47  ;;  %v669_v50 = vld [vmem:[%s10025_s29 + $0x600] sm:$0xff] }
  0x2a   : > { %666 = vst [vmem:[%s10030_s30 + $0x170] sm:$0xff] %v665_v48  ;;  %668 = vst [vmem:[%s10030_s30 + $0x178] sm:$0xff] %v667_v49  ;;  %v671_v51 = vld [vmem:[%s10025_s29 + $0x608] sm:$0xff]  ;;  %v673_v52 = vld [vmem:[%s10025_s29 + $0x610] sm:$0xff] }
  0x2b   : > { %670 = vst [vmem:[%s10030_s30 + $0x180] sm:$0xff] %v669_v50  ;;  %672 = vst [vmem:[%s10030_s30 + $0x188] sm:$0xff] %v671_v51  ;;  %v675_v53 = vld [vmem:[%s10025_s29 + $0x618] sm:$0xff]  ;;  %v677_v54 = vld [vmem:[%s10025_s29 + $0x620] sm:$0xff] }
  0x2c   : > { %674 = vst [vmem:[%s10030_s30 + $0x190] sm:$0xff] %v673_v52  ;;  %v679_v55 = vld [vmem:[%s10025_s29 + $0x628] sm:$0xff]  ;;  %676 = vst [vmem:[%s10030_s30 + $0x198] sm:$0xff] %v675_v53  ;;  %v681_v56 = vld [vmem:[%s10025_s29 + $0x630] sm:$0xff] }
  0x2d   : > { %678 = vst [vmem:[%s10030_s30 + $0x1a0] sm:$0xff] %v677_v54  ;;  %680 = vst [vmem:[%s10030_s30 + $0x1a8] sm:$0xff] %v679_v55  ;;  %v683_v57 = vld [vmem:[%s10025_s29 + $0x638] sm:$0xff]  ;;  %v685_v58 = vld [vmem:[%s10025_s29 + $0x640] sm:$0xff] }
  0x2e   : > { %682 = vst [vmem:[%s10030_s30 + $0x1b0] sm:$0xff] %v681_v56  ;;  %684 = vst [vmem:[%s10030_s30 + $0x1b8] sm:$0xff] %v683_v57  ;;  %v687_v59 = vld [vmem:[%s10025_s29 + $0x648] sm:$0xff]  ;;  %v689_v60 = vld [vmem:[%s10025_s29 + $0x650] sm:$0xff] }
  0x2f   : > { %686 = vst [vmem:[%s10030_s30 + $0x1c0] sm:$0xff] %v685_v58  ;;  %v691_v61 = vld [vmem:[%s10025_s29 + $0x658] sm:$0xff]  ;;  %688 = vst [vmem:[%s10030_s30 + $0x1c8] sm:$0xff] %v687_v59  ;;  %v693_v62 = vld [vmem:[%s10025_s29 + $0x660] sm:$0xff] }
  0x30   : > { %690 = vst [vmem:[%s10030_s30 + $0x1d0] sm:$0xff] %v689_v60  ;;  %692 = vst [vmem:[%s10030_s30 + $0x1d8] sm:$0xff] %v691_v61  ;;  %v695_v63 = vld [vmem:[%s10025_s29 + $0x668] sm:$0xff]  ;;  %v697_v0 = vld [vmem:[%s10025_s29 + $0x670] sm:$0xff] }
  0x31   : > { %694 = vst [vmem:[%s10030_s30 + $0x1e0] sm:$0xff] %v693_v62  ;;  %696 = vst [vmem:[%s10030_s30 + $0x1e8] sm:$0xff] %v695_v63  ;;  %v699_v1 = vld [vmem:[%s10025_s29 + $0x678] sm:$0xff] }
  0x32   : > { %698 = vst [vmem:[%s10030_s30 + $0x1f0] sm:$0xff] %v697_v0  ;;  %700 = vst [vmem:[%s10030_s30 + $0x1f8] sm:$0xff] %v699_v1 }
  0x33 PF: > { %706 = sbr.rel (!%p10013_p3) target bundleno = 87 (0x57), region = 106  ;;  %s708_s15 = sand.u32 (%p10013_p3), 1, %s9894_s18  }
  0x34   : > { %s8947_s16 = sshll.u32 (%p10013_p3), %s9898_s19, 7  ;;  %s8527_s20 = sshll.u32 (%p10013_p3), %s708_s15, 9 }
  0x35   : > { %s10164_s25 = scalar_lea.vmem (%p10013_p3), %s17056_s1, %s8947_s16  ;;  %s10169_s23 = scalar_lea.vmem (%p10013_p3), [#allocation5], %s8527_s20 }
  0x36   : > { %v868_v2 = vld [vmem:[%s10164_s25] sm:$0xff] (%p10013_p3)  ;;  %v870_v3 = vld [vmem:[%s10164_s25 + $0x8] sm:$0xff] (%p10013_p3)  ;;  %v872_v4 = vld [vmem:[%s10164_s25 + $0x10] sm:$0xff] (%p10013_p3) }
  0x37   : > { %869 = vst [vmem:[%s10169_s23] sm:$0xff] (%p10013_p3), %v868_v2  ;;  %871 = vst [vmem:[%s10169_s23 + $0x8] sm:$0xff] (%p10013_p3), %v870_v3  ;;  %v874_v5 = vld [vmem:[%s10164_s25 + $0x18] sm:$0xff] (%p10013_p3)  ;;  %v876_v6 = vld [vmem:[%s10164_s25 + $0x20] sm:$0xff] (%p10013_p3) }
  0x38   : > { %873 = vst [vmem:[%s10169_s23 + $0x10] sm:$0xff] %v872_v4  ;;  %v878_v7 = vld [vmem:[%s10164_s25 + $0x28] sm:$0xff]  ;;  %875 = vst [vmem:[%s10169_s23 + $0x18] sm:$0xff] %v874_v5  ;;  %v880_v8 = vld [vmem:[%s10164_s25 + $0x30] sm:$0xff] }
  0x39   : > { %877 = vst [vmem:[%s10169_s23 + $0x20] sm:$0xff] %v876_v6  ;;  %879 = vst [vmem:[%s10169_s23 + $0x28] sm:$0xff] %v878_v7  ;;  %v882_v9 = vld [vmem:[%s10164_s25 + $0x38] sm:$0xff]  ;;  %v884_v10 = vld [vmem:[%s10164_s25 + $0x40] sm:$0xff] }
  0x3a   : > { %881 = vst [vmem:[%s10169_s23 + $0x30] sm:$0xff] %v880_v8  ;;  %883 = vst [vmem:[%s10169_s23 + $0x38] sm:$0xff] %v882_v9  ;;  %v886_v11 = vld [vmem:[%s10164_s25 + $0x48] sm:$0xff]  ;;  %v888_v12 = vld [vmem:[%s10164_s25 + $0x50] sm:$0xff] }
  0x3b   : > { %885 = vst [vmem:[%s10169_s23 + $0x40] sm:$0xff] %v884_v10  ;;  %v890_v13 = vld [vmem:[%s10164_s25 + $0x58] sm:$0xff]  ;;  %887 = vst [vmem:[%s10169_s23 + $0x48] sm:$0xff] %v886_v11  ;;  %v892_v14 = vld [vmem:[%s10164_s25 + $0x60] sm:$0xff] }
  0x3c   : > { %889 = vst [vmem:[%s10169_s23 + $0x50] sm:$0xff] %v888_v12  ;;  %891 = vst [vmem:[%s10169_s23 + $0x58] sm:$0xff] %v890_v13  ;;  %v894_v15 = vld [vmem:[%s10164_s25 + $0x68] sm:$0xff]  ;;  %v896_v16 = vld [vmem:[%s10164_s25 + $0x70] sm:$0xff] }
  0x3d   : > { %893 = vst [vmem:[%s10169_s23 + $0x60] sm:$0xff] %v892_v14  ;;  %895 = vst [vmem:[%s10169_s23 + $0x68] sm:$0xff] %v894_v15  ;;  %v898_v17 = vld [vmem:[%s10164_s25 + $0x78] sm:$0xff]  ;;  %v900_v18 = vld [vmem:[%s10164_s25 + $0x200] sm:$0xff] }
  0x3e   : > { %897 = vst [vmem:[%s10169_s23 + $0x70] sm:$0xff] %v896_v16  ;;  %v902_v19 = vld [vmem:[%s10164_s25 + $0x208] sm:$0xff]  ;;  %899 = vst [vmem:[%s10169_s23 + $0x78] sm:$0xff] %v898_v17  ;;  %v904_v20 = vld [vmem:[%s10164_s25 + $0x210] sm:$0xff] }
  0x3f   : > { %901 = vst [vmem:[%s10169_s23 + $0x80] sm:$0xff] %v900_v18  ;;  %903 = vst [vmem:[%s10169_s23 + $0x88] sm:$0xff] %v902_v19  ;;  %v906_v21 = vld [vmem:[%s10164_s25 + $0x218] sm:$0xff]  ;;  %v908_v22 = vld [vmem:[%s10164_s25 + $0x220] sm:$0xff] }
  0x40   : > { %905 = vst [vmem:[%s10169_s23 + $0x90] sm:$0xff] %v904_v20  ;;  %907 = vst [vmem:[%s10169_s23 + $0x98] sm:$0xff] %v906_v21  ;;  %v910_v23 = vld [vmem:[%s10164_s25 + $0x228] sm:$0xff]  ;;  %v912_v24 = vld [vmem:[%s10164_s25 + $0x230] sm:$0xff] }
  0x41   : > { %909 = vst [vmem:[%s10169_s23 + $0xa0] sm:$0xff] %v908_v22  ;;  %v914_v25 = vld [vmem:[%s10164_s25 + $0x238] sm:$0xff]  ;;  %911 = vst [vmem:[%s10169_s23 + $0xa8] sm:$0xff] %v910_v23  ;;  %v916_v26 = vld [vmem:[%s10164_s25 + $0x240] sm:$0xff] }
  0x42   : > { %913 = vst [vmem:[%s10169_s23 + $0xb0] sm:$0xff] %v912_v24  ;;  %915 = vst [vmem:[%s10169_s23 + $0xb8] sm:$0xff] %v914_v25  ;;  %v918_v27 = vld [vmem:[%s10164_s25 + $0x248] sm:$0xff]  ;;  %v920_v28 = vld [vmem:[%s10164_s25 + $0x250] sm:$0xff] }
  0x43   : > { %917 = vst [vmem:[%s10169_s23 + $0xc0] sm:$0xff] %v916_v26  ;;  %919 = vst [vmem:[%s10169_s23 + $0xc8] sm:$0xff] %v918_v27  ;;  %v922_v29 = vld [vmem:[%s10164_s25 + $0x258] sm:$0xff]  ;;  %v924_v30 = vld [vmem:[%s10164_s25 + $0x260] sm:$0xff] }
  0x44   : > { %921 = vst [vmem:[%s10169_s23 + $0xd0] sm:$0xff] %v920_v28  ;;  %v926_v31 = vld [vmem:[%s10164_s25 + $0x268] sm:$0xff]  ;;  %923 = vst [vmem:[%s10169_s23 + $0xd8] sm:$0xff] %v922_v29  ;;  %v928_v32 = vld [vmem:[%s10164_s25 + $0x270] sm:$0xff] }
  0x45   : > { %925 = vst [vmem:[%s10169_s23 + $0xe0] sm:$0xff] %v924_v30  ;;  %927 = vst [vmem:[%s10169_s23 + $0xe8] sm:$0xff] %v926_v31  ;;  %v930_v33 = vld [vmem:[%s10164_s25 + $0x278] sm:$0xff]  ;;  %v932_v34 = vld [vmem:[%s10164_s25 + $0x400] sm:$0xff] }
  0x46   : > { %929 = vst [vmem:[%s10169_s23 + $0xf0] sm:$0xff] %v928_v32  ;;  %931 = vst [vmem:[%s10169_s23 + $0xf8] sm:$0xff] %v930_v33  ;;  %v934_v35 = vld [vmem:[%s10164_s25 + $0x408] sm:$0xff]  ;;  %v936_v36 = vld [vmem:[%s10164_s25 + $0x410] sm:$0xff] }
  0x47   : > { %933 = vst [vmem:[%s10169_s23 + $0x100] sm:$0xff] %v932_v34  ;;  %v938_v37 = vld [vmem:[%s10164_s25 + $0x418] sm:$0xff]  ;;  %935 = vst [vmem:[%s10169_s23 + $0x108] sm:$0xff] %v934_v35  ;;  %v940_v38 = vld [vmem:[%s10164_s25 + $0x420] sm:$0xff] }
  0x48   : > { %937 = vst [vmem:[%s10169_s23 + $0x110] sm:$0xff] %v936_v36  ;;  %939 = vst [vmem:[%s10169_s23 + $0x118] sm:$0xff] %v938_v37  ;;  %v942_v39 = vld [vmem:[%s10164_s25 + $0x428] sm:$0xff]  ;;  %v944_v40 = vld [vmem:[%s10164_s25 + $0x430] sm:$0xff] }
  0x49   : > { %941 = vst [vmem:[%s10169_s23 + $0x120] sm:$0xff] %v940_v38  ;;  %943 = vst [vmem:[%s10169_s23 + $0x128] sm:$0xff] %v942_v39  ;;  %v946_v41 = vld [vmem:[%s10164_s25 + $0x438] sm:$0xff]  ;;  %v948_v42 = vld [vmem:[%s10164_s25 + $0x440] sm:$0xff] }
  0x4a   : > { %945 = vst [vmem:[%s10169_s23 + $0x130] sm:$0xff] %v944_v40  ;;  %v950_v43 = vld [vmem:[%s10164_s25 + $0x448] sm:$0xff]  ;;  %947 = vst [vmem:[%s10169_s23 + $0x138] sm:$0xff] %v946_v41  ;;  %v952_v44 = vld [vmem:[%s10164_s25 + $0x450] sm:$0xff] }
  0x4b   : > { %949 = vst [vmem:[%s10169_s23 + $0x140] sm:$0xff] %v948_v42  ;;  %951 = vst [vmem:[%s10169_s23 + $0x148] sm:$0xff] %v950_v43  ;;  %v954_v45 = vld [vmem:[%s10164_s25 + $0x458] sm:$0xff]  ;;  %v956_v46 = vld [vmem:[%s10164_s25 + $0x460] sm:$0xff] }
  0x4c   : > { %953 = vst [vmem:[%s10169_s23 + $0x150] sm:$0xff] %v952_v44  ;;  %955 = vst [vmem:[%s10169_s23 + $0x158] sm:$0xff] %v954_v45  ;;  %v958_v47 = vld [vmem:[%s10164_s25 + $0x468] sm:$0xff]  ;;  %v960_v48 = vld [vmem:[%s10164_s25 + $0x470] sm:$0xff] }
  0x4d   : > { %957 = vst [vmem:[%s10169_s23 + $0x160] sm:$0xff] %v956_v46  ;;  %v962_v49 = vld [vmem:[%s10164_s25 + $0x478] sm:$0xff]  ;;  %959 = vst [vmem:[%s10169_s23 + $0x168] sm:$0xff] %v958_v47  ;;  %v964_v50 = vld [vmem:[%s10164_s25 + $0x600] sm:$0xff] }
  0x4e   : > { %961 = vst [vmem:[%s10169_s23 + $0x170] sm:$0xff] %v960_v48  ;;  %963 = vst [vmem:[%s10169_s23 + $0x178] sm:$0xff] %v962_v49  ;;  %v966_v51 = vld [vmem:[%s10164_s25 + $0x608] sm:$0xff]  ;;  %v968_v52 = vld [vmem:[%s10164_s25 + $0x610] sm:$0xff] }
  0x4f   : > { %965 = vst [vmem:[%s10169_s23 + $0x180] sm:$0xff] %v964_v50  ;;  %967 = vst [vmem:[%s10169_s23 + $0x188] sm:$0xff] %v966_v51  ;;  %v970_v53 = vld [vmem:[%s10164_s25 + $0x618] sm:$0xff]  ;;  %v972_v54 = vld [vmem:[%s10164_s25 + $0x620] sm:$0xff] }
  0x50   : > { %969 = vst [vmem:[%s10169_s23 + $0x190] sm:$0xff] %v968_v52  ;;  %v974_v55 = vld [vmem:[%s10164_s25 + $0x628] sm:$0xff]  ;;  %971 = vst [vmem:[%s10169_s23 + $0x198] sm:$0xff] %v970_v53  ;;  %v976_v56 = vld [vmem:[%s10164_s25 + $0x630] sm:$0xff] }
  0x51   : > { %973 = vst [vmem:[%s10169_s23 + $0x1a0] sm:$0xff] %v972_v54  ;;  %975 = vst [vmem:[%s10169_s23 + $0x1a8] sm:$0xff] %v974_v55  ;;  %v978_v57 = vld [vmem:[%s10164_s25 + $0x638] sm:$0xff]  ;;  %v980_v58 = vld [vmem:[%s10164_s25 + $0x640] sm:$0xff] }
  0x52   : > { %977 = vst [vmem:[%s10169_s23 + $0x1b0] sm:$0xff] %v976_v56  ;;  %979 = vst [vmem:[%s10169_s23 + $0x1b8] sm:$0xff] %v978_v57  ;;  %v982_v59 = vld [vmem:[%s10164_s25 + $0x648] sm:$0xff]  ;;  %v984_v60 = vld [vmem:[%s10164_s25 + $0x650] sm:$0xff] }
  0x53   : > { %981 = vst [vmem:[%s10169_s23 + $0x1c0] sm:$0xff] %v980_v58  ;;  %v986_v61 = vld [vmem:[%s10164_s25 + $0x658] sm:$0xff]  ;;  %983 = vst [vmem:[%s10169_s23 + $0x1c8] sm:$0xff] %v982_v59  ;;  %v988_v62 = vld [vmem:[%s10164_s25 + $0x660] sm:$0xff] }
  0x54   : > { %985 = vst [vmem:[%s10169_s23 + $0x1d0] sm:$0xff] %v984_v60  ;;  %987 = vst [vmem:[%s10169_s23 + $0x1d8] sm:$0xff] %v986_v61  ;;  %v990_v63 = vld [vmem:[%s10164_s25 + $0x668] sm:$0xff]  ;;  %v992_v0 = vld [vmem:[%s10164_s25 + $0x670] sm:$0xff] }
  0x55   : > { %989 = vst [vmem:[%s10169_s23 + $0x1e0] sm:$0xff] %v988_v62  ;;  %991 = vst [vmem:[%s10169_s23 + $0x1e8] sm:$0xff] %v990_v63  ;;  %v994_v1 = vld [vmem:[%s10164_s25 + $0x678] sm:$0xff] }
  0x56   : > { %993 = vst [vmem:[%s10169_s23 + $0x1f0] sm:$0xff] %v992_v0  ;;  %995 = vst [vmem:[%s10169_s23 + $0x1f8] sm:$0xff] %v994_v1 }
  0x57 PF: > { %p8530_p5 = scmp.ge.s32.totalorder %s9898_s19, 1  ;;  %p1000_p6 = scmp.lt.s32.totalorder %s9898_s19, 5 }
  0x59   : > { %p1001_p7 = pnand %p8530_p5, %p1000_p6 }
  0x5b   : > { %1004 = sbr.rel (%p1001_p7) target bundleno = 2910 (0xb5e), region = 144 }
  0x60   : > { %v1138_v2 = vld [vmem:[%s17057_s2] sm:$0xf]  ;;  %vm1339_vm0 = vcmask 1043456   ;;  %s1007_s28 = sand.u32 1, %s9890_s17   ;;  %v1815_v3 = vld [vmem:[%s17059_s4 + $0xb8] sm:$0xff]  ;;  %vm1146_vm1 = vcmask 31744  }
  0x61   : > { %9085 = vmatprep.subr.msk.mxu0 %vm1339_vm0, %v1138_v2  ;;  %s10306_s15 = sshll.u32 %s1007_s28, 9  ;;  %9295 = vmatprep.subr.msk.mxu1 %vm1339_vm0, %v1138_v2  ;;  %v1814_v4 = vld [vmem:[%s17059_s4 + $0xb0] sm:$0xff]  ;;  %v1812_v8 = vld [vmem:[%s17059_s4 + $0xa0] sm:$0xff]  ;;  %v1809_v10 = vld [vmem:[%s17059_s4 + $0x88] sm:$0xff]  ;;  %vm3011_vm2 = vcmask 1041408   ;;  %vm1833_vm3 = vcmask 523264  }
  0x62   : > { %9086 = vmatpush3.msk.msra.mxu0 %vm1339_vm0, %v1138_v2  ;;  %9296 = vmatpush3.msk.msra.mxu1 %vm1339_vm0, %v1138_v2  ;;  %s10315_s17 = scalar_lea.vmem [#allocation5], %s10306_s15  ;;  %v1806_v12 = vld [vmem:[%s17059_s4 + $0x70] sm:$0xff]  ;;  %v1803_v14 = vld [vmem:[%s17059_s4 + $0x58] sm:$0xff]  ;;  %v1813_v23 = vld [vmem:[%s17059_s4 + $0xa8] sm:$0xff]  ;;  %vm2882_vm4 = vcmask 15360   ;;  %s11177_s28 = scalar_lea.vmem [#allocation4], %s10306_s15 }
  0x63   : > { %v1071_v5 = vld [vmem:[%s10315_s17] sm:$0xff]  ;;  %v1072_v6 = vld [vmem:[%s10315_s17 + $0x8] sm:$0xff]  ;;  %v1073_v7 = vld [vmem:[%s10315_s17 + $0x10] sm:$0xff]  ;;  %9183 = vmatprep.subr.mxu0 %v1815_v3  ;;  %2042 = vmatprep.subr.mxu1 %v1814_v4  ;;  %s9902_s20 = smov 2   ;;  %s9903_s21 = smov 3   ;;  %vm6047_vm5 = vcmask 7168  }
  0x64   : > { %9087 = vmatprep.mubr.msk.f32.mxu0 %vm1146_vm1, %v1071_v5  ;;  %v1074_v9 = vld [vmem:[%s10315_s17 + $0x18] sm:$0xff]  ;;  %v1075_v11 = vld [vmem:[%s10315_s17 + $0x20] sm:$0xff]  ;;  %v1076_v13 = vld [vmem:[%s10315_s17 + $0x28] sm:$0xff]  ;;  %vm6080_vm6 = vcmask 23552  }
  0x65   : > { %9088 = vmatmul.mubr.msk.f32.vlgmr.msra.gmra.mxu0 %vm1146_vm1, %v1072_v6  ;;  %v1077_v15 = vld [vmem:[%s10315_s17 + $0x30] sm:$0xff]  ;;  %v1078_v16 = vld [vmem:[%s10315_s17 + $0x38] sm:$0xff]  ;;  %v1079_v17 = vld [vmem:[%s10315_s17 + $0x40] sm:$0xff] }
  0x66   : > { %9090 = vmatprep.mubr.msk.f32.mxu0 %vm1146_vm1, %v1073_v7  ;;  %9184 = vmatpush3.msra.mxu0 %v1815_v3  ;;  %v1080_v18 = vld [vmem:[%s10315_s17 + $0x48] sm:$0xff]  ;;  %v1081_v19 = vld [vmem:[%s10315_s17 + $0x50] sm:$0xff]  ;;  %v8567_v20 = vld [vmem:[%s10315_s17 + $0x180] sm:$0xff] }
  0x67   : > { %9185 = vmatprep.subr.mxu0 %v1812_v8  ;;  %v8568_v21 = vld [vmem:[%s10315_s17 + $0x188] sm:$0xff]  ;;  %v8569_v22 = vld [vmem:[%s10315_s17 + $0x190] sm:$0xff]  ;;  %9159 = vmatprep.mubr.msk.f32.mxu1 %vm1146_vm1, %v8567_v20  ;;  %v1082_v24 = vld [vmem:[%s10315_s17 + $0x58] sm:$0xff] }
  0x68   : > { %9186 = vmatpush3.msra.mxu0 %v1812_v8  ;;  %9160 = vmatmul.mubr.msk.f32.vlgmr.msra.gmra.mxu1 %vm1146_vm1, %v8568_v21  ;;  %v8570_v25 = vld [vmem:[%s10315_s17 + $0x198] sm:$0xff]  ;;  %v1083_v26 = vld [vmem:[%s10315_s17 + $0x60] sm:$0xff]  ;;  %v1810_v30 = vld [vmem:[%s17059_s4 + $0x90] sm:$0xff] }
  0x69   : > { %9091 = vmatmul.mubr.msk.f32.gmra.mxu0 %vm1146_vm1, %v1074_v9  ;;  %9187 = vmatprep.subr.mxu0 %v1809_v10  ;;  %v8571_v27 = vld [vmem:[%s10315_s17 + $0x1a0] sm:$0xff]  ;;  %v1811_v29 = vld [vmem:[%s17059_s4 + $0x98] sm:$0xff]  ;;  %v1084_v31 = vld [vmem:[%s10315_s17 + $0x68] sm:$0xff] }
  0x6a   : > { %9093 = vmatprep.mubr.msk.f32.mxu0 %vm1146_vm1, %v1075_v11  ;;  %9188 = vmatpush3.msra.mxu0 %v1809_v10  ;;  %v1800_v28 = vld [vmem:[%s17059_s4 + $0x40] sm:$0xff]  ;;  %v8572_v32 = vld [vmem:[%s10315_s17 + $0x1a8] sm:$0xff]  ;;  %v1085_v33 = vld [vmem:[%s10315_s17 + $0x70] sm:$0xff] }
  0x6b   : > { %9189 = vmatprep.subr.mxu0 %v1806_v12  ;;  %9162 = vmatprep.mubr.msk.f32.mxu1 %vm1146_vm1, %v8569_v22  ;;  %v8573_v34 = vld [vmem:[%s10315_s17 + $0x1b0] sm:$0xff]  ;;  %v1808_v35 = vld [vmem:[%s17059_s4 + $0x80] sm:$0xff]  ;;  %v1797_v36 = vld [vmem:[%s17059_s4 + $0x28] sm:$0xff] }
  0x6c   : > { %9190 = vmatpush3.msra.mxu0 %v1806_v12  ;;  %2043 = vmatpush1.msra.mxu1 %v1813_v23  ;;  %v1807_v37 = vld [vmem:[%s17059_s4 + $0x78] sm:$0xff]  ;;  %v8535_v40 = vld [vmem:[%s10315_s17 + $0x80] sm:$0xff]  ;;  %v8536_v44 = vld [vmem:[%s10315_s17 + $0x88] sm:$0xff] }
  0x6d   : > { %9094 = vmatmul.mubr.msk.f32.gmra.mxu0 %vm1146_vm1, %v1076_v13  ;;  %9191 = vmatprep.subr.mxu0 %v1803_v14  ;;  %v1086_v38 = vld [vmem:[%s10315_s17 + $0x78] sm:$0xff]  ;;  %v8575_v41 = vld [vmem:[%s10315_s17 + $0x1c0] sm:$0xff]  ;;  %v8576_v45 = vld [vmem:[%s10315_s17 + $0x1c8] sm:$0xff] }
  0x6e   : > { %9096 = vmatprep.mubr.msk.f32.mxu0 %vm1146_vm1, %v1077_v15  ;;  %9192 = vmatpush3.msra.mxu0 %v1803_v14  ;;  %v8574_v39 = vld [vmem:[%s10315_s17 + $0x1b8] sm:$0xff]  ;;  %v1805_v42 = vld [vmem:[%s17059_s4 + $0x68] sm:$0xff]  ;;  %v8537_v46 = vld [vmem:[%s10315_s17 + $0x90] sm:$0xff] }
  0x6f   : > { %9163 = vmatmul.mubr.msk.f32.gmra.mxu1 %vm1146_vm1, %v8570_v25  ;;  %9193 = vmatprep.subr.mxu0 %v1800_v28  ;;  %v1804_v43 = vld [vmem:[%s17059_s4 + $0x60] sm:$0xff]  ;;  %v8577_v47 = vld [vmem:[%s10315_s17 + $0x1d0] sm:$0xff]  ;;  %v1801_v49 = vld [vmem:[%s17059_s4 + $0x48] sm:$0xff] }
  0x70   : > { %9165 = vmatprep.mubr.msk.f32.mxu1 %vm1146_vm1, %v8571_v27  ;;  %2044 = vmatprep.subr.mxu1 %v1811_v29  ;;  %v1802_v48 = vld [vmem:[%s17059_s4 + $0x50] sm:$0xff]  ;;  %v8538_v50 = vld [vmem:[%s10315_s17 + $0x98] sm:$0xff]  ;;  %v8539_v52 = vld [vmem:[%s10315_s17 + $0xa0] sm:$0xff] }
  0x71   : > { %9097 = vmatmul.mubr.msk.f32.gmra.mxu0 %vm1146_vm1, %v1078_v16  ;;  %2045 = vmatpush1.msra.mxu1 %v1810_v30  ;;  %v8578_v51 = vld [vmem:[%s10315_s17 + $0x1d8] sm:$0xff]  ;;  %v8579_v53 = vld [vmem:[%s10315_s17 + $0x1e0] sm:$0xff]  ;;  %v1798_v55 = vld [vmem:[%s17059_s4 + $0x30] sm:$0xff] }
  0x72   : > { %9099 = vmatprep.mubr.msk.f32.mxu0 %vm1146_vm1, %v1079_v17  ;;  %9194 = vmatpush3.msra.mxu0 %v1800_v28  ;;  %v1799_v54 = vld [vmem:[%s17059_s4 + $0x38] sm:$0xff]  ;;  %v8540_v56 = vld [vmem:[%s10315_s17 + $0xa8] sm:$0xff]  ;;  %v1796_v60 = vld [vmem:[%s17059_s4 + $0x20] sm:$0xff] }
  0x73   : > { %9166 = vmatmul.mubr.msk.f32.gmra.mxu1 %vm1146_vm1, %v8572_v32  ;;  %2046 = vmatprep.subr.mxu1 %v1808_v35  ;;  %v8580_v57 = vld [vmem:[%s10315_s17 + $0x1e8] sm:$0xff]  ;;  %v8541_v58 = vld [vmem:[%s10315_s17 + $0xb0] sm:$0xff]  ;;  %v8542_v62 = vld [vmem:[%s10315_s17 + $0xb8] sm:$0xff] }
  0x74   : > { %9168 = vmatprep.mubr.msk.f32.mxu1 %vm1146_vm1, %v8573_v34  ;;  %9195 = vmatprep.subr.mxu0 %v1797_v36  ;;  %v8581_v59 = vld [vmem:[%s10315_s17 + $0x1f0] sm:$0xff]  ;;  %v8582_v63 = vld [vmem:[%s10315_s17 + $0x1f8] sm:$0xff]  ;;  %v8543_v0 = vld [vmem:[%s10315_s17 + $0xc0] sm:$0xff] }
  0x75   : > { %9100 = vmatmul.mubr.msk.f32.gmra.mxu0 %vm1146_vm1, %v1080_v18  ;;  %2047 = vmatpush1.msra.mxu1 %v1807_v37  ;;  %v1795_v61 = vld [vmem:[%s17059_s4 + $0x18] sm:$0xff]  ;;  %v8544_v1 = vld [vmem:[%s10315_s17 + $0xc8] sm:$0xff]  ;;  %v8547_v4 = vld [vmem:[%s10315_s17 + $0xe0] sm:$0xff]  ;;  %v17079_v18 = vmov 0.0  }
  0x76   : > { %9102 = vmatprep.mubr.msk.f32.mxu0 %vm1146_vm1, %v1081_v19  ;;  %9196 = vmatpush3.msra.mxu0 %v1797_v36  ;;  %v8545_v2 = vld [vmem:[%s10315_s17 + $0xd0] sm:$0xff]  ;;  %v8546_v3 = vld [vmem:[%s10315_s17 + $0xd8] sm:$0xff]  ;;  %v8548_v5 = vld [vmem:[%s10315_s17 + $0xe8] sm:$0xff] }
  0x77   : > { %9169 = vmatmul.mubr.msk.f32.gmra.mxu1 %vm1146_vm1, %v8574_v39  ;;  %2048 = vmatprep.subr.mxu1 %v1805_v42  ;;  %v8549_v6 = vld [vmem:[%s10315_s17 + $0xf0] sm:$0xff]  ;;  %v8550_v7 = vld [vmem:[%s10315_s17 + $0xf8] sm:$0xff]  ;;  %v8551_v8 = vld [vmem:[%s10315_s17 + $0x100] sm:$0xff] }
  0x78   : > { %9171 = vmatprep.mubr.msk.f32.mxu1 %vm1146_vm1, %v8575_v41  ;;  %2049 = vmatpush1.msra.mxu1 %v1804_v43  ;;  %v8552_v9 = vld [vmem:[%s10315_s17 + $0x108] sm:$0xff]  ;;  %v8553_v10 = vld [vmem:[%s10315_s17 + $0x110] sm:$0xff]  ;;  %v8554_v11 = vld [vmem:[%s10315_s17 + $0x118] sm:$0xff] }
  0x79   : > { %9103 = vmatmul.mubr.msk.f32.gmra.mxu0 %vm1146_vm1, %v1082_v24  ;;  %2050 = vmatprep.subr.mxu1 %v1802_v48  ;;  %v8555_v12 = vld [vmem:[%s10315_s17 + $0x120] sm:$0xff]  ;;  %v1794_v13 = vld [vmem:[%s17059_s4 + $0x10] sm:$0xff]  ;;  %v8558_v19 = vld [vmem:[%s10315_s17 + $0x138] sm:$0xff] }
  0x7a   : > { %9105 = vmatprep.mubr.msk.f32.mxu0 %vm1146_vm1, %v1083_v26  ;;  %2051 = vmatpush1.msra.mxu1 %v1801_v49  ;;  %v1793_v14 = vld [vmem:[%s17059_s4 + $0x8] sm:$0xff]  ;;  %v1792_v16 = vld [vmem:[%s17059_s4] sm:$0xff]  ;;  %v8557_v17 = vld [vmem:[%s10315_s17 + $0x130] sm:$0xff] }
  0x7b   : > { %9172 = vmatmul.mubr.msk.f32.gmra.mxu1 %vm1146_vm1, %v8576_v45  ;;  %2052 = vmatprep.subr.mxu1 %v1799_v54  ;;  %v8556_v15 = vld [vmem:[%s10315_s17 + $0x128] sm:$0xff]  ;;  %v8559_v20 = vld [vmem:[%s10315_s17 + $0x140] sm:$0xff]  ;;  %v8561_v22 = vld [vmem:[%s10315_s17 + $0x150] sm:$0xff] }
  0x7c   : > { %9174 = vmatprep.mubr.msk.f32.mxu1 %vm1146_vm1, %v8577_v47  ;;  %2053 = vmatpush1.msra.mxu1 %v1798_v55  ;;  %v8560_v21 = vld [vmem:[%s10315_s17 + $0x148] sm:$0xff]  ;;  %v8562_v23 = vld [vmem:[%s10315_s17 + $0x158] sm:$0xff]  ;;  %v8563_v24 = vld [vmem:[%s10315_s17 + $0x160] sm:$0xff] }
  0x7d   : > { %9106 = vmatmul.mubr.msk.f32.gmra.mxu0 %vm1146_vm1, %v1084_v31  ;;  %2054 = vmatprep.subr.mxu1 %v1796_v60  ;;  %v8564_v25 = vld [vmem:[%s10315_s17 + $0x168] sm:$0xff]  ;;  %v8565_v26 = vld [vmem:[%s10315_s17 + $0x170] sm:$0xff]  ;;  %v8566_v27 = vld [vmem:[%s10315_s17 + $0x178] sm:$0xff] }
  0x7e   : > { %9108 = vmatprep.mubr.msk.f32.mxu0 %vm1146_vm1, %v1085_v33  ;;  %2055 = vmatpush1.msra.mxu1 %v1795_v61  ;;  %v8777_v28 = vld.sshfl [vmem:[%s17061_s6] sm:$0x33 pattern:$0x76325410] }
  0x7f   : > { %9175 = vmatmul.mubr.msk.f32.gmra.mxu1 %vm1146_vm1, %v8578_v51  ;;  %9197 = vmatprep.subr.mxu0 %v1794_v13  ;;  %v2881_v29 = vcombine.high %v8777_v28, %v8777_v28  ;;  %v10519_v30 = vld [vmem:[%s17058_s3] ss:$0 sm:$0xff] }
  0x80   : > { %9177 = vmatprep.mubr.msk.f32.mxu1 %vm1146_vm1, %v8579_v53  ;;  %9198 = vmatpush3.msra.mxu0 %v1794_v13 }
  0x81   : > { %9109 = vmatmul.mubr.msk.f32.gmra.mxu0 %vm1146_vm1, %v1086_v38  ;;  %2056 = vmatprep.subr.mxu1 %v1793_v14 }
  0x82   : > { %9111 = vmatprep.mubr.msk.f32.mxu0 %vm1146_vm1, %v8535_v40  ;;  %2057 = vmatpush1.msra.mxu1 %v1792_v16 }
  0x83   : > { %9178 = vmatmul.mubr.msk.f32.gmra.mxu1 %vm1146_vm1, %v8580_v57  ;;  %8778 = vmatprep.subr.msk.mxu0 %vm3011_vm2, %v2881_v29 }
  0x84   : > { %9180 = vmatprep.mubr.msk.f32.mxu1 %vm1146_vm1, %v8581_v59 }
  0x85   : > { %9112 = vmatmul.mubr.msk.f32.gmra.mxu0 %vm1146_vm1, %v8536_v44 }
  0x86   : > { %9114 = vmatprep.mubr.msk.f32.mxu0 %vm1146_vm1, %v8537_v46 }
  0x87   : > { %9181 = vmatmul.mubr.msk.f32.gmra.mxu1 %vm1146_vm1, %v8582_v63 }
  0x88   : > { %2090 = vmatprep.mubr.f32.mxu1 %v17079_v18 }
  0x89   : > { %9115 = vmatmul.mubr.msk.f32.gmra.mxu0 %vm1146_vm1, %v8538_v50 }
  0x8a   : > { %9117 = vmatprep.mubr.msk.f32.mxu0 %vm1146_vm1, %v8539_v52 }
  0x8d   : > { %9118 = vmatmul.mubr.msk.f32.gmra.mxu0 %vm1146_vm1, %v8540_v56 }
  0x8e   : > { %9120 = vmatprep.mubr.msk.f32.mxu0 %vm1146_vm1, %v8541_v58 }
  0x91   : > { %9121 = vmatmul.mubr.msk.f32.gmra.mxu0 %vm1146_vm1, %v8542_v62 }
  0x92   : > { %9123 = vmatprep.mubr.msk.f32.mxu0 %vm1146_vm1, %v8543_v0 }
  0x95   : > { %9124 = vmatmul.mubr.msk.f32.gmra.mxu0 %vm1146_vm1, %v8544_v1 }
  0x96   : > { %9126 = vmatprep.mubr.msk.f32.mxu0 %vm1146_vm1, %v8545_v2 }
  0x99   : > { %9127 = vmatmul.mubr.msk.f32.gmra.mxu0 %vm1146_vm1, %v8546_v3 }
  0x9a   : > { %9129 = vmatprep.mubr.msk.f32.mxu0 %vm1146_vm1, %v8547_v4 }
  0x9d   : > { %9130 = vmatmul.mubr.msk.f32.gmra.mxu0 %vm1146_vm1, %v8548_v5 }
  0x9e   : > { %9132 = vmatprep.mubr.msk.f32.mxu0 %vm1146_vm1, %v8549_v6 }
  0xa1   : > { %9133 = vmatmul.mubr.msk.f32.gmra.mxu0 %vm1146_vm1, %v8550_v7 }
  0xa2   : > { %9135 = vmatprep.mubr.msk.f32.mxu0 %vm1146_vm1, %v8551_v8 }
  0xa5   : > { %9136 = vmatmul.mubr.msk.f32.gmra.mxu0 %vm1146_vm1, %v8552_v9 }
  0xa6   : > { %9138 = vmatprep.mubr.msk.f32.mxu0 %vm1146_vm1, %v8553_v10 }
  0xa9   : > { %9139 = vmatmul.mubr.msk.f32.gmra.mxu0 %vm1146_vm1, %v8554_v11 }
  0xaa   : > { %9141 = vmatprep.mubr.msk.f32.mxu0 %vm1146_vm1, %v8555_v12 }
  0xad   : > { %9142 = vmatmul.mubr.msk.f32.gmra.mxu0 %vm1146_vm1, %v8556_v15 }
  0xae   : > { %9144 = vmatprep.mubr.msk.f32.mxu0 %vm1146_vm1, %v8557_v17 }
  0xb1   : > { %9145 = vmatmul.mubr.msk.f32.gmra.mxu0 %vm1146_vm1, %v8558_v19 }
  0xb2   : > { %9147 = vmatprep.mubr.msk.f32.mxu0 %vm1146_vm1, %v8559_v20 }
  0xb5   : > { %9148 = vmatmul.mubr.msk.f32.gmra.mxu0 %vm1146_vm1, %v8560_v21 }
  0xb6   : > { %9150 = vmatprep.mubr.msk.f32.mxu0 %vm1146_vm1, %v8561_v22 }
  0xb9   : > { %9151 = vmatmul.mubr.msk.f32.gmra.mxu0 %vm1146_vm1, %v8562_v23 }
  0xba   : > { %9153 = vmatprep.mubr.msk.f32.mxu0 %vm1146_vm1, %v8563_v24 }
  0xbd   : > { %9154 = vmatmul.mubr.msk.f32.gmra.mxu0 %vm1146_vm1, %v8564_v25 }
  0xbe   : > { %9156 = vmatprep.mubr.msk.f32.mxu0 %vm1146_vm1, %v8565_v26 }
  0xc1   : > { %9157 = vmatmul.mubr.msk.f32.gmra.mxu0 %vm1146_vm1, %v8566_v27 }
 0x125   : > { %v9089_v31 = vpop.f32.mrf.mxu0 }
 0x126   : > { %v1415_v32 = vadd.f32 %v9089_v31, %v10519_v30 }
 0x127   : > { %v1409_v33 = vpop.f32.mrf.mxu0 }
 0x128   : > { %v1410_v34 = vadd.f32 %v10519_v30, %v1409_v33  ;;  %v1729_v38 = vmax.f32 %v1415_v32, 0.0 }
 0x129   : > { %v9092_v35 = vpop.f32.mrf.mxu0 }
 0x12a   : > { %v1728_v36 = vmax.f32 %v1410_v34, 0.0  ;;  %v1425_v37 = vadd.f32 %v9092_v35, %v10519_v30 }
 0x12b   : > { %v1419_v39 = vpop.f32.mrf.mxu0 }
 0x12c   : > { %v1420_v40 = vadd.f32 %v10519_v30, %v1419_v39  ;;  %8649 = vmatmul.mubr.msk.f32.vlgmr.msra.gmra.mxu1 %vm1833_vm3, %v1728_v36  ;;  %9199 = vmatprep.mubr.msk.f32.mxu0 %vm1833_vm3, %v1728_v36  ;;  %v1731_v41 = vmax.f32 %v1425_v37, 0.0 }
 0x12d   : > { %9200 = vmatmul.mubr.msk.f32.vlgmr.msra.gmra.mxu0 %vm1833_vm3, %v1729_v38  ;;  %2096 = vmatprep.mubr.f32.mxu1 %v17079_v18  ;;  %v9095_v42 = vpop.f32.mrf.mxu0 }
 0x12e   : > { %v1730_v43 = vmax.f32 %v1420_v40, 0.0  ;;  %v1435_v44 = vadd.f32 %v9095_v42, %v10519_v30  ;;  %8779 = vmatpush1.msk.msra.mxu0 %vm3011_vm2, %v8777_v28 }
 0x12f   : > { %v1429_v45 = vpop.f32.mrf.mxu0 }
 0x130   : > { %8650 = vmatmul.mubr.msk.f32.gmra.mxu1 %vm1833_vm3, %v1729_v38  ;;  %9202 = vmatprep.mubr.msk.f32.mxu0 %vm1833_vm3, %v1730_v43  ;;  %v1430_v46 = vadd.f32 %v10519_v30, %v1429_v45  ;;  %v1733_v47 = vmax.f32 %v1435_v44, 0.0 }
 0x131   : > { %9203 = vmatmul.mubr.msk.f32.gmra.mxu0 %vm1833_vm3, %v1731_v41  ;;  %2102 = vmatprep.mubr.f32.mxu1 %v17079_v18  ;;  %v9098_v48 = vpop.f32.mrf.mxu0 }
 0x132   : > { %v1732_v49 = vmax.f32 %v1430_v46, 0.0  ;;  %v1445_v50 = vadd.f32 %v9098_v48, %v10519_v30 }
 0x133   : > { %v1439_v51 = vpop.f32.mrf.mxu0 }
 0x134   : > { %8651 = vmatmul.mubr.msk.f32.gmra.mxu1 %vm1833_vm3, %v1730_v43  ;;  %v1440_v52 = vadd.f32 %v10519_v30, %v1439_v51  ;;  %9205 = vmatprep.mubr.msk.f32.mxu0 %vm1833_vm3, %v1732_v49  ;;  %v1735_v53 = vmax.f32 %v1445_v50, 0.0 }
 0x135   : > { %2108 = vmatprep.mubr.f32.mxu1 %v17079_v18  ;;  %9206 = vmatmul.mubr.msk.f32.gmra.mxu0 %vm1833_vm3, %v1733_v47  ;;  %v9101_v54 = vpop.f32.mrf.mxu0 }
 0x136   : > { %v1734_v55 = vmax.f32 %v1440_v52, 0.0  ;;  %v10543_v56 = vadd.f32 %v9101_v54, %v10519_v30 }
 0x137   : > { %v1449_v57 = vpop.f32.mrf.mxu0 }
 0x138   : > { %8652 = vmatmul.mubr.msk.f32.gmra.mxu1 %vm1833_vm3, %v1731_v41  ;;  %9208 = vmatprep.mubr.msk.f32.mxu0 %vm1833_vm3, %v1734_v55  ;;  %v1450_v58 = vadd.f32 %v10519_v30, %v1449_v57  ;;  %v1737_v59 = vmax.f32 %v10543_v56, 0.0  ;;  %v10693_v56 = vpop.f32.mrf.mxu1 }
 0x139   : > { %2114 = vmatprep.mubr.f32.mxu1 %v17079_v18  ;;  %9209 = vmatmul.mubr.msk.f32.gmra.mxu0 %vm1833_vm3, %v1735_v53  ;;  %v9104_v60 = vpop.f32.mrf.mxu0 }
 0x13a   : > { %v1736_v61 = vmax.f32 %v1450_v58, 0.0  ;;  %v10552_v62 = vadd.f32 %v9104_v60, %v10519_v30 }
 0x13b   : > { %v1459_v63 = vpop.f32.mrf.mxu0 }
 0x13c   : > { %8653 = vmatmul.mubr.msk.f32.gmra.mxu1 %vm1833_vm3, %v1732_v49  ;;  %v1460_v0 = vadd.f32 %v10519_v30, %v1459_v63  ;;  %9211 = vmatprep.mubr.msk.f32.mxu0 %vm1833_vm3, %v1736_v61  ;;  %v1739_v1 = vmax.f32 %v10552_v62, 0.0  ;;  %v10713_v63 = vpop.f32.mrf.mxu1 }
 0x13d   : > { %2120 = vmatprep.mubr.f32.mxu1 %v17079_v18  ;;  %9212 = vmatmul.mubr.msk.f32.gmra.mxu0 %vm1833_vm3, %v1737_v59  ;;  %v9107_v2 = vpop.f32.mrf.mxu0 }
 0x13e   : > { %v1738_v3 = vmax.f32 %v1460_v0, 0.0  ;;  %v10561_v4 = vadd.f32 %v9107_v2, %v10519_v30 }
 0x13f   : > { %v1469_v5 = vpop.f32.mrf.mxu0 }
 0x140   : > { %8654 = vmatmul.mubr.msk.f32.gmra.mxu1 %vm1833_vm3, %v1733_v47  ;;  %9214 = vmatprep.mubr.msk.f32.mxu0 %vm1833_vm3, %v1738_v3  ;;  %v10566_v6 = vadd.f32 %v10519_v30, %v1469_v5  ;;  %v1741_v7 = vmax.f32 %v10561_v4, 0.0 }
 0x141   : > { %2126 = vmatprep.mubr.f32.mxu1 %v17079_v18  ;;  %9215 = vmatmul.mubr.msk.f32.gmra.mxu0 %vm1833_vm3, %v1739_v1  ;;  %v9110_v8 = vpop.f32.mrf.mxu0 }
 0x142   : > { %v1740_v9 = vmax.f32 %v10566_v6, 0.0  ;;  %v10575_v10 = vadd.f32 %v9110_v8, %v10519_v30  ;;  %v10733_v6 = vpop.f32.mrf.mxu1 }
 0x143   : > { %v1479_v11 = vpop.f32.mrf.mxu0 }
 0x144   : > { %8655 = vmatmul.mubr.msk.f32.gmra.mxu1 %vm1833_vm3, %v1734_v55  ;;  %v10579_v12 = vadd.f32 %v10519_v30, %v1479_v11  ;;  %9217 = vmatprep.mubr.msk.f32.mxu0 %vm1833_vm3, %v1740_v9  ;;  %v1743_v13 = vmax.f32 %v10575_v10, 0.0 }
 0x145   : > { %2132 = vmatprep.mubr.f32.mxu1 %v17079_v18  ;;  %v9113_v14 = vpop.f32.mrf.mxu0  ;;  %9218 = vmatmul.mubr.msk.f32.gmra.mxu0 %vm1833_vm3, %v1741_v7 }
 0x146   : > { %v1742_v15 = vmax.f32 %v10579_v12, 0.0  ;;  %v10591_v16 = vadd.f32 %v9113_v14, %v10519_v30 }
 0x147   : > { %v1489_v17 = vpop.f32.mrf.mxu0 }
 0x148   : > { %8656 = vmatmul.mubr.msk.f32.gmra.mxu1 %vm1833_vm3, %v1735_v53  ;;  %v10595_v19 = vadd.f32 %v10519_v30, %v1489_v17  ;;  %9220 = vmatprep.mubr.msk.f32.mxu0 %vm1833_vm3, %v1742_v15  ;;  %v1745_v20 = vmax.f32 %v10591_v16, 0.0 }
 0x149   : > { %2138 = vmatprep.mubr.f32.mxu1 %v17079_v18  ;;  %v9116_v21 = vpop.f32.mrf.mxu0  ;;  %9221 = vmatmul.mubr.msk.f32.gmra.mxu0 %vm1833_vm3, %v1743_v13 }
 0x14a   : > { %v1744_v22 = vmax.f32 %v10595_v19, 0.0  ;;  %v10607_v23 = vadd.f32 %v9116_v21, %v10519_v30 }
 0x14b   : > { %v1499_v24 = vpop.f32.mrf.mxu0 }
 0x14c   : > { %8657 = vmatmul.mubr.msk.f32.gmra.mxu1 %vm1833_vm3, %v1736_v61  ;;  %v10611_v25 = vadd.f32 %v10519_v30, %v1499_v24  ;;  %9223 = vmatprep.mubr.msk.f32.mxu0 %vm1833_vm3, %v1744_v22  ;;  %v1747_v26 = vmax.f32 %v10607_v23, 0.0 }
 0x14d   : > { %2144 = vmatprep.mubr.f32.mxu1 %v17079_v18  ;;  %v9119_v27 = vpop.f32.mrf.mxu0  ;;  %9224 = vmatmul.mubr.msk.f32.gmra.mxu0 %vm1833_vm3, %v1745_v20 }
 0x14e   : > { %v1746_v28 = vmax.f32 %v10611_v25, 0.0  ;;  %v10623_v29 = vadd.f32 %v9119_v27, %v10519_v30 }
 0x14f   : > { %v1509_v31 = vpop.f32.mrf.mxu0 }
 0x150   : > { %8658 = vmatmul.mubr.msk.f32.gmra.mxu1 %vm1833_vm3, %v1737_v59  ;;  %v10627_v32 = vadd.f32 %v10519_v30, %v1509_v31  ;;  %9226 = vmatprep.mubr.msk.f32.mxu0 %vm1833_vm3, %v1746_v28  ;;  %v1749_v33 = vmax.f32 %v10623_v29, 0.0 }
 0x151   : > { %2150 = vmatprep.mubr.f32.mxu1 %v17079_v18  ;;  %v9122_v34 = vpop.f32.mrf.mxu0  ;;  %9227 = vmatmul.mubr.msk.f32.gmra.mxu0 %vm1833_vm3, %v1747_v26 }
 0x152   : > { %v1748_v35 = vmax.f32 %v10627_v32, 0.0  ;;  %v10639_v36 = vadd.f32 %v9122_v34, %v10519_v30 }
 0x153   : > { %v1519_v37 = vpop.f32.mrf.mxu0 }
 0x154   : > { %8659 = vmatmul.mubr.msk.f32.gmra.mxu1 %vm1833_vm3, %v1738_v3  ;;  %v10643_v38 = vadd.f32 %v10519_v30, %v1519_v37  ;;  %9229 = vmatprep.mubr.msk.f32.mxu0 %vm1833_vm3, %v1748_v35  ;;  %v1751_v39 = vmax.f32 %v10639_v36, 0.0 }
 0x155   : > { %2156 = vmatprep.mubr.f32.mxu1 %v17079_v18  ;;  %v9125_v40 = vpop.f32.mrf.mxu0  ;;  %9230 = vmatmul.mubr.msk.f32.gmra.mxu0 %vm1833_vm3, %v1749_v33 }
 0x156   : > { %v1750_v41 = vmax.f32 %v10643_v38, 0.0  ;;  %v10655_v42 = vadd.f32 %v9125_v40, %v10519_v30 }
 0x157   : > { %v1529_v43 = vpop.f32.mrf.mxu0 }
 0x158   : > { %8660 = vmatmul.mubr.msk.f32.gmra.mxu1 %vm1833_vm3, %v1739_v1  ;;  %v10661_v44 = vadd.f32 %v10519_v30, %v1529_v43  ;;  %9232 = vmatprep.mubr.msk.f32.mxu0 %vm1833_vm3, %v1750_v41  ;;  %v1753_v45 = vmax.f32 %v10655_v42, 0.0 }
 0x159   : > { %2162 = vmatprep.mubr.f32.mxu1 %v17079_v18  ;;  %v9128_v46 = vpop.f32.mrf.mxu0  ;;  %9233 = vmatmul.mubr.msk.f32.gmra.mxu0 %vm1833_vm3, %v1751_v39 }
 0x15a   : > { %v1752_v47 = vmax.f32 %v10661_v44, 0.0  ;;  %v10673_v48 = vadd.f32 %v9128_v46, %v10519_v30 }
 0x15b   : > { %v1539_v49 = vpop.f32.mrf.mxu0 }
 0x15c   : > { %8661 = vmatmul.mubr.msk.f32.gmra.mxu1 %vm1833_vm3, %v1740_v9  ;;  %v10679_v50 = vadd.f32 %v10519_v30, %v1539_v49  ;;  %9235 = vmatprep.mubr.msk.f32.mxu0 %vm1833_vm3, %v1752_v47  ;;  %v1755_v51 = vmax.f32 %v10673_v48, 0.0 }
 0x15d   : > { %2168 = vmatprep.mubr.f32.mxu1 %v17079_v18  ;;  %v9131_v52 = vpop.f32.mrf.mxu0  ;;  %9236 = vmatmul.mubr.msk.f32.gmra.mxu0 %vm1833_vm3, %v1753_v45 }
 0x15e   : > { %v1754_v53 = vmax.f32 %v10679_v50, 0.0  ;;  %v10691_v54 = vadd.f32 %v9131_v52, %v10519_v30 }
 0x15f   : > { %v1549_v55 = vpop.f32.mrf.mxu0 }
 0x160   : > { %8662 = vmatmul.mubr.msk.f32.gmra.mxu1 %vm1833_vm3, %v1741_v7  ;;  %v10699_v57 = vadd.f32 %v10519_v30, %v1549_v55  ;;  %9238 = vmatprep.mubr.msk.f32.mxu0 %vm1833_vm3, %v1754_v53  ;;  %v1757_v58 = vmax.f32 %v10691_v54, 0.0  ;;  %v9774_v54 = vld [vmem:[%s10315_s17] sm:$0xff] }
 0x161   : > { %2174 = vmatprep.mubr.f32.mxu1 %v17079_v18  ;;  %v9134_v59 = vpop.f32.mrf.mxu0  ;;  %9239 = vmatmul.mubr.msk.f32.gmra.mxu0 %vm1833_vm3, %v1755_v51 }
 0x162   : > { %v1756_v60 = vmax.f32 %v10699_v57, 0.0  ;;  %v10711_v61 = vadd.f32 %v9134_v59, %v10519_v30 }
 0x163   : > { %v1559_v62 = vpop.f32.mrf.mxu0 }
 0x164   : > { %8663 = vmatmul.mubr.msk.f32.gmra.mxu1 %vm1833_vm3, %v1742_v15  ;;  %v10719_v0 = vadd.f32 %v10519_v30, %v1559_v62  ;;  %9241 = vmatprep.mubr.msk.f32.mxu0 %vm1833_vm3, %v1756_v60  ;;  %v1759_v1 = vmax.f32 %v10711_v61, 0.0  ;;  %v9776_v61 = vld [vmem:[%s10315_s17 + $0x10] sm:$0xff] }
 0x165   : > { %2180 = vmatprep.mubr.f32.mxu1 %v17079_v18  ;;  %v9137_v2 = vpop.f32.mrf.mxu0  ;;  %9242 = vmatmul.mubr.msk.f32.gmra.mxu0 %vm1833_vm3, %v1757_v58 }
 0x166   : > { %v1758_v3 = vmax.f32 %v10719_v0, 0.0  ;;  %v10731_v4 = vadd.f32 %v9137_v2, %v10519_v30  ;;  %v9777_v0 = vld [vmem:[%s10315_s17 + $0x18] sm:$0xff] }
 0x167   : > { %v1569_v5 = vpop.f32.mrf.mxu0 }
 0x168   : > { %8664 = vmatmul.mubr.msk.f32.gmra.mxu1 %vm1833_vm3, %v1743_v13  ;;  %v10739_v7 = vadd.f32 %v10519_v30, %v1569_v5  ;;  %9244 = vmatprep.mubr.msk.f32.mxu0 %vm1833_vm3, %v1758_v3  ;;  %v1761_v8 = vmax.f32 %v10731_v4, 0.0  ;;  %v10753_v13 = vpop.f32.mrf.mxu1  ;;  %v9780_v4 = vld [vmem:[%s10315_s17 + $0x30] sm:$0xff] }
 0x169   : > { %2186 = vmatprep.mubr.f32.mxu1 %v17079_v18  ;;  %v9140_v9 = vpop.f32.mrf.mxu0  ;;  %9245 = vmatmul.mubr.msk.f32.gmra.mxu0 %vm1833_vm3, %v1759_v1 }
 0x16a   : > { %v1760_v10 = vmax.f32 %v10739_v7, 0.0  ;;  %v10751_v11 = vadd.f32 %v9140_v9, %v10519_v30  ;;  %v10773_v24 = vpop.f32.mrf.mxu1  ;;  %v9781_v7 = vld [vmem:[%s10315_s17 + $0x38] sm:$0xff] }
 0x16b   : > { %v1579_v12 = vpop.f32.mrf.mxu0 }
 0x16c   : > { %8665 = vmatmul.mubr.msk.f32.gmra.mxu1 %vm1833_vm3, %v1744_v22  ;;  %v10759_v14 = vadd.f32 %v10519_v30, %v1579_v12  ;;  %9247 = vmatprep.mubr.msk.f32.mxu0 %vm1833_vm3, %v1760_v10  ;;  %v1763_v15 = vmax.f32 %v10751_v11, 0.0  ;;  %v10793_v40 = vpop.f32.mrf.mxu1 }
 0x16d   : > { %2192 = vmatprep.mubr.f32.mxu1 %v17079_v18  ;;  %v9143_v17 = vpop.f32.mrf.mxu0  ;;  %9248 = vmatmul.mubr.msk.f32.gmra.mxu0 %vm1833_vm3, %v1761_v8 }
 0x16e   : > { %v1762_v19 = vmax.f32 %v10759_v14, 0.0  ;;  %v10771_v21 = vadd.f32 %v9143_v17, %v10519_v30  ;;  %v10813_v55 = vpop.f32.mrf.mxu1  ;;  %v9784_v14 = vld [vmem:[%s10315_s17 + $0x50] sm:$0xff] }
 0x16f   : > { %v1589_v22 = vpop.f32.mrf.mxu0 }
 0x170   : > { %8666 = vmatmul.mubr.msk.f32.gmra.mxu1 %vm1833_vm3, %v1745_v20  ;;  %v10779_v27 = vadd.f32 %v10519_v30, %v1589_v22  ;;  %9250 = vmatprep.mubr.msk.f32.mxu0 %vm1833_vm3, %v1762_v19  ;;  %v1765_v31 = vmax.f32 %v10771_v21, 0.0  ;;  %v1679_v9 = vpop.f32.mrf.mxu1  ;;  %v1818_v21 = vlaneseq }
 0x171   : > { %2198 = vmatprep.mubr.f32.mxu1 %v17079_v18  ;;  %v9146_v34 = vpop.f32.mrf.mxu0  ;;  %9251 = vmatmul.mubr.msk.f32.gmra.mxu0 %vm1833_vm3, %v1763_v15  ;;  %v10937_v44 = vadd.f32 %v10519_v30, %v1679_v9 }
 0x172   : > { %v1764_v16 = vmax.f32 %v10779_v27, 0.0  ;;  %v10791_v20 = vadd.f32 %v9146_v34, %v10519_v30  ;;  %v9786_v27 = vld [vmem:[%s10315_s17 + $0x60] sm:$0xff] }
 0x173   : > { %v1599_v37 = vpop.f32.mrf.mxu0  ;;  %v17077_v9 = vmax.f32 %v10937_v44, 0.0 }
 0x174   : > { %8667 = vmatmul.mubr.msk.f32.gmra.mxu1 %vm1833_vm3, %v1746_v28  ;;  %v10799_v43 = vadd.f32 %v10519_v30, %v1599_v37  ;;  %9253 = vmatprep.mubr.msk.f32.mxu0 %vm1833_vm3, %v1764_v16  ;;  %v1767_v46 = vmax.f32 %v10791_v20, 0.0  ;;  %v9173_v37 = vpop.f32.mrf.mxu1  ;;  %v9787_v20 = vld [vmem:[%s10315_s17 + $0x68] sm:$0xff] }
 0x175   : > { %2204 = vmatprep.mubr.f32.mxu1 %v17079_v18  ;;  %v9149_v49 = vpop.f32.mrf.mxu0  ;;  %9254 = vmatmul.mubr.msk.f32.gmra.mxu0 %vm1833_vm3, %v1765_v31 }
 0x176   : > { %v1766_v25 = vmax.f32 %v10799_v43, 0.0  ;;  %v10811_v28 = vadd.f32 %v9149_v49, %v10519_v30 }
 0x177   : > { %v1609_v52 = vpop.f32.mrf.mxu0 }
 0x178   : > { %8668 = vmatmul.mubr.msk.f32.gmra.mxu1 %vm1833_vm3, %v1747_v26  ;;  %v10819_v59 = vadd.f32 %v10519_v30, %v1609_v52  ;;  %9256 = vmatprep.mubr.msk.f32.mxu0 %vm1833_vm3, %v1766_v25  ;;  %v1769_v62 = vmax.f32 %v10811_v28, 0.0 }
 0x179   : > { %2210 = vmatprep.mubr.f32.mxu1 %v17079_v18  ;;  %v9152_v2 = vpop.f32.mrf.mxu0  ;;  %9257 = vmatmul.mubr.msk.f32.gmra.mxu0 %vm1833_vm3, %v1767_v46 }
 0x17a   : > { %v1768_v23 = vmax.f32 %v10819_v59, 0.0  ;;  %v10831_v26 = vadd.f32 %v9152_v2, %v10519_v30 }
 0x17b   : > { %v1619_v5 = vpop.f32.mrf.mxu0 }
 0x17c   : > { %8669 = vmatmul.mubr.msk.f32.gmra.mxu1 %vm1833_vm3, %v1748_v35  ;;  %v10837_v12 = vadd.f32 %v10519_v30, %v1619_v5  ;;  %9259 = vmatprep.mubr.msk.f32.mxu0 %vm1833_vm3, %v1768_v23  ;;  %v1771_v17 = vmax.f32 %v10831_v26, 0.0  ;;  %v10871_v5 = vadd.f32 %v10519_v30, %v10713_v63  ;;  %v10886_v63 = vadd.f32 %v10693_v56, %v10519_v30  ;;  %v9789_v26 = vld [vmem:[%s10315_s17 + $0x78] sm:$0xff] }
 0x17d   : > { %2216 = vmatprep.mubr.f32.mxu1 %v17079_v18  ;;  %v9155_v22 = vpop.f32.mrf.mxu0  ;;  %9260 = vmatmul.mubr.msk.f32.gmra.mxu0 %vm1833_vm3, %v1769_v62 }
 0x17e   : > { %v17070_v32 = vmax.f32 %v10837_v12, 0.0  ;;  %v10849_v35 = vadd.f32 %v9155_v22, %v10519_v30  ;;  %v17074_v56 = vmax.f32 %v10886_v63, 0.0  ;;  %v17293_v11 = vmax.f32 %v10837_v12, 0.0 }
 0x17f   : > { %v1629_v34 = vpop.f32.mrf.mxu0 }
 0x180   : > { %8670 = vmatmul.mubr.msk.f32.gmra.mxu1 %vm1833_vm3, %v1749_v33  ;;  %v10855_v49 = vadd.f32 %v10519_v30, %v1629_v34  ;;  %9262 = vmatprep.mubr.msk.f32.mxu0 %vm1833_vm3, %v17070_v32  ;;  %v17072_v52 = vmax.f32 %v10849_v35, 0.0  ;;  %v1689_v34 = vpop.f32.mrf.mxu1 }
 0x181   : > { %2222 = vmatprep.mubr.f32.mxu1 %v17079_v18  ;;  %v9158_v2 = vpop.f32.mrf.mxu0  ;;  %9263 = vmatmul.mubr.msk.f32.gmra.mxu0 %vm1833_vm3, %v1771_v17  ;;  %v10956_v42 = vadd.f32 %v10519_v30, %v1689_v34 }
 0x182   : > { %v17071_v29 = vmax.f32 %v10855_v49, 0.0  ;;  %v10867_v33 = vadd.f32 %v9158_v2, %v10519_v30 }
 0x183   : > { %v1639_v22 = vpop.f32.mrf.mxu0 }
 0x184   : > { %8671 = vmatmul.mubr.msk.f32.gmra.mxu1 %vm1833_vm3, %v1750_v41  ;;  %v10877_v32 = vadd.f32 %v10519_v30, %v1639_v22  ;;  %9265 = vmatprep.mubr.msk.f32.mxu0 %vm1833_vm3, %v17071_v29  ;;  %v17073_v2 = vmax.f32 %v10867_v33, 0.0  ;;  %v1776_v41 = vmax.f32 %v10871_v5, 0.0  ;;  %v10895_v22 = vadd.f32 %v10519_v30, %v10753_v13  ;;  %v9176_v29 = vpop.f32.mrf.mxu1 }
 0x185   : > { %2228 = vmatprep.mubr.f32.mxu1 %v17079_v18  ;;  %9266 = vmatmul.mubr.msk.f32.gmra.mxu0 %vm1833_vm3, %v17072_v52  ;;  %v10907_v52 = vadd.f32 %v10733_v6, %v10519_v30  ;;  %v10982_v34 = vadd.f32 %v9176_v29, %v10519_v30 }
 0x186   : > { %v1774_v38 = vmax.f32 %v10877_v32, 0.0  ;;  %v1778_v36 = vmax.f32 %v10895_v22, 0.0  ;;  %v1699_v13 = vpop.f32.mrf.mxu1 }
 0x187   : > { %v17075_v6 = vmax.f32 %v10907_v52, 0.0  ;;  %v10974_v50 = vadd.f32 %v10519_v30, %v1699_v13  ;;  %v1787_v29 = vmax.f32 %v10982_v34, 0.0 }
 0x188   : > { %8672 = vmatmul.mubr.msk.f32.gmra.mxu1 %vm1833_vm3, %v1751_v39  ;;  %9268 = vmatprep.mubr.msk.f32.mxu0 %vm1833_vm3, %v1774_v38  ;;  %v10918_v39 = vadd.f32 %v10519_v30, %v10793_v40 }
 0x189   : > { %2234 = vmatprep.mubr.f32.mxu1 %v17079_v18  ;;  %9269 = vmatmul.mubr.msk.f32.gmra.mxu0 %vm1833_vm3, %v17073_v2  ;;  %v10927_v2 = vadd.f32 %v10773_v24, %v10519_v30 }
 0x18a   : > { %9271 = vmatprep.mubr.msk.f32.mxu0 %vm1833_vm3, %v1776_v41  ;;  %v17076_v40 = vmax.f32 %v10918_v39, 0.0 }
 0x18b   : > { %v1781_v24 = vmax.f32 %v10927_v2, 0.0 }
 0x18c   : > { %8673 = vmatmul.mubr.msk.f32.gmra.mxu1 %vm1833_vm3, %v1752_v47  ;;  %v9179_v47 = vpop.f32.mrf.mxu1 }
 0x18d   : > { %2240 = vmatprep.mubr.f32.mxu1 %v17079_v18  ;;  %9272 = vmatmul.mubr.msk.f32.gmra.mxu0 %vm1833_vm3, %v17074_v56  ;;  %v10946_v56 = vadd.f32 %v10813_v55, %v10519_v30  ;;  %v11000_v13 = vadd.f32 %v9179_v47, %v10519_v30 }
 0x18e   : > { %9274 = vmatprep.mubr.msk.f32.mxu0 %vm1833_vm3, %v1778_v36 }
 0x18f   : > { %v1783_v55 = vmax.f32 %v10946_v56, 0.0 }
 0x190   : > { %8674 = vmatmul.mubr.msk.f32.gmra.mxu1 %vm1833_vm3, %v1753_v45  ;;  %v1709_v45 = vpop.f32.mrf.mxu1 }
 0x191   : > { %2246 = vmatprep.mubr.f32.mxu1 %v17079_v18  ;;  %9275 = vmatmul.mubr.msk.f32.gmra.mxu0 %vm1833_vm3, %v17075_v6  ;;  %v10964_v6 = vadd.f32 %v9173_v37, %v10519_v30  ;;  %v10992_v48 = vadd.f32 %v10519_v30, %v1709_v45 }
 0x192   : > { %9277 = vmatprep.mubr.msk.f32.mxu0 %vm1833_vm3, %v17076_v40  ;;  %v17078_v40 = vmax.f32 %v10956_v42, 0.0 }
 0x193   : > { %v1785_v37 = vmax.f32 %v10964_v6, 0.0 }
 0x194   : > { %8675 = vmatmul.mubr.msk.f32.gmra.mxu1 %vm1833_vm3, %v1754_v53  ;;  %v9182_v53 = vpop.f32.mrf.mxu1 }
 0x195   : > { %2252 = vmatprep.mubr.f32.mxu1 %v17079_v18  ;;  %9278 = vmatmul.mubr.msk.f32.gmra.mxu0 %vm1833_vm3, %v1781_v24  ;;  %v11018_v47 = vadd.f32 %v9182_v53, %v10519_v30  ;;  %v9790_v53 = vld [vmem:[%s10315_s17 + $0x80] sm:$0xff] }
 0x196   : > { %9280 = vmatprep.mubr.msk.f32.mxu0 %vm1833_vm3, %v17077_v9  ;;  %v1786_v9 = vmax.f32 %v10974_v50, 0.0 }
 0x198   : > { %8676 = vmatmul.mubr.msk.f32.gmra.mxu1 %vm1833_vm3, %v1755_v51  ;;  %v1719_v51 = vpop.f32.mrf.mxu1 }
 0x199   : > { %2258 = vmatprep.mubr.f32.mxu1 %v17079_v18  ;;  %9281 = vmatmul.mubr.msk.f32.gmra.mxu0 %vm1833_vm3, %v1783_v55  ;;  %v11010_v57 = vadd.f32 %v10519_v30, %v1719_v51  ;;  %v1791_v30 = vmax.f32 %v11018_v47, 0.0 }
 0x19a   : > { %9283 = vmatprep.mubr.msk.f32.mxu0 %vm1833_vm3, %v17078_v40  ;;  %v1788_v40 = vmax.f32 %v10992_v48, 0.0 }
 0x19b   : > { %v1790_v45 = vmax.f32 %v11010_v57, 0.0 }
 0x19c   : > { %8677 = vmatmul.mubr.msk.f32.gmra.mxu1 %vm1833_vm3, %v1756_v60  ;;  %v1789_v60 = vmax.f32 %v11000_v13, 0.0 }
 0x19d   : > { %2264 = vmatprep.mubr.f32.mxu1 %v17079_v18  ;;  %9284 = vmatmul.mubr.msk.f32.gmra.mxu0 %vm1833_vm3, %v1785_v37 }
 0x19e   : > { %9286 = vmatprep.mubr.msk.f32.mxu0 %vm1833_vm3, %v1786_v9 }
 0x1a0   : > { %8678 = vmatmul.mubr.msk.f32.gmra.mxu1 %vm1833_vm3, %v1757_v58  ;;  %v9775_v58 = vld [vmem:[%s10315_s17 + $0x8] sm:$0xff] }
 0x1a1   : > { %2270 = vmatprep.mubr.f32.mxu1 %v17079_v18  ;;  %9287 = vmatmul.mubr.msk.f32.gmra.mxu0 %vm1833_vm3, %v1787_v29 }
 0x1a2   : > { %9289 = vmatprep.mubr.msk.f32.mxu0 %vm1833_vm3, %v1788_v40 }
 0x1a4   : > { %8679 = vmatmul.mubr.msk.f32.gmra.mxu1 %vm1833_vm3, %v1758_v3  ;;  %v9779_v3 = vld [vmem:[%s10315_s17 + $0x28] sm:$0xff] }
 0x1a5   : > { %2276 = vmatprep.mubr.f32.mxu1 %v17079_v18  ;;  %9290 = vmatmul.mubr.msk.f32.gmra.mxu0 %vm1833_vm3, %v1789_v60 }
 0x1a6   : > { %9292 = vmatprep.mubr.msk.f32.mxu0 %vm1833_vm3, %v1790_v45 }
 0x1a8   : > { %8680 = vmatmul.mubr.msk.f32.gmra.mxu1 %vm1833_vm3, %v1759_v1  ;;  %v9778_v1 = vld [vmem:[%s10315_s17 + $0x20] sm:$0xff] }
 0x1a9   : > { %2282 = vmatprep.mubr.f32.mxu1 %v17079_v18  ;;  %9293 = vmatmul.mubr.msk.f32.gmra.mxu0 %vm1833_vm3, %v1791_v30 }
 0x1aa   : > { %3080 = vmatprep.mubr.f32.mxu0 %v17079_v18 }
 0x1ac   : > { %8681 = vmatmul.mubr.msk.f32.gmra.mxu1 %vm1833_vm3, %v1760_v10  ;;  %v9783_v10 = vld [vmem:[%s10315_s17 + $0x48] sm:$0xff] }
 0x1ad   : > { %2288 = vmatprep.mubr.f32.mxu1 %v17079_v18  ;;  %8780 = vmatmul.mubr.msk.f32.vlgmr.msra.gmra.mxu0 %vm2882_vm4, %v9774_v54 }
 0x1ae   : > { %3086 = vmatprep.mubr.f32.mxu0 %v17079_v18 }
 0x1b0   : > { %8682 = vmatmul.mubr.msk.f32.gmra.mxu1 %vm1833_vm3, %v1761_v8  ;;  %v9782_v8 = vld [vmem:[%s10315_s17 + $0x40] sm:$0xff] }
 0x1b1   : > { %2294 = vmatprep.mubr.f32.mxu1 %v17079_v18  ;;  %8781 = vmatmul.mubr.msk.f32.gmra.mxu0 %vm2882_vm4, %v9775_v58 }
 0x1b2   : > { %3092 = vmatprep.mubr.f32.mxu0 %v17079_v18 }
 0x1b4   : > { %8683 = vmatmul.mubr.msk.f32.gmra.mxu1 %vm1833_vm3, %v1762_v19  ;;  %v17294_v19 = vmax.f32 %v10855_v49, 0.0 }
 0x1b5   : > { %2300 = vmatprep.mubr.f32.mxu1 %v17079_v18  ;;  %8782 = vmatmul.mubr.msk.f32.gmra.mxu0 %vm2882_vm4, %v9776_v61 }
 0x1b6   : > { %3098 = vmatprep.mubr.f32.mxu0 %v17079_v18 }
 0x1b8   : > { %8684 = vmatmul.mubr.msk.f32.gmra.mxu1 %vm1833_vm3, %v1763_v15  ;;  %v9785_v15 = vld [vmem:[%s10315_s17 + $0x58] sm:$0xff] }
 0x1b9   : > { %2306 = vmatprep.mubr.f32.mxu1 %v17079_v18  ;;  %8783 = vmatmul.mubr.msk.f32.gmra.mxu0 %vm2882_vm4, %v9777_v0  ;;  %v17301_v0 = vmax.f32 %v10886_v63, 0.0 }
 0x1ba   : > { %3104 = vmatprep.mubr.f32.mxu0 %v17079_v18 }
 0x1bc   : > { %8685 = vmatmul.mubr.msk.f32.gmra.mxu1 %vm1833_vm3, %v1764_v16  ;;  %v1819_v16 = vshrl.u32 %v1818_v21, 7  ;;  %v11203_v21 = vld [vmem:[%s11177_s28 + $0x18] sm:$0xff] }
 0x1bd   : > { %2312 = vmatprep.mubr.f32.mxu1 %v17079_v18  ;;  %8784 = vmatmul.mubr.msk.f32.gmra.mxu0 %vm2882_vm4, %v9778_v1 }
 0x1be   : > { %3110 = vmatprep.mubr.f32.mxu0 %v17079_v18  ;;  %v11148_v43 = vsub.s32 0, %v1819_v16  ;;  %v1828_v28 = vsub.s32 2, %v1819_v16  ;;  %v11156_v59 = vsub.s32 1, %v1819_v16  ;;  %v9792_v16 = vld [vmem:[%s10315_s17 + $0x90] sm:$0xff] }
 0x1c0   : > { %8686 = vmatmul.mubr.msk.f32.gmra.mxu1 %vm1833_vm3, %v1765_v31  ;;  %v17295_v31 = vmax.f32 %v10849_v35, 0.0  ;;  %17296 = vst [vmem:[#allocation6_spill] sm:$0xff] %v11148_v43  ;;  %17297 = vst [vmem:[#allocation7_spill] sm:$0xff] %v11156_v59  ;;  %v5020_v35 = vld [vmem:[%s11177_s28] sm:$0xff] }
 0x1c1   : > { %2318 = vmatprep.mubr.f32.mxu1 %v17079_v18  ;;  %8785 = vmatmul.mubr.msk.f32.gmra.mxu0 %vm2882_vm4, %v9779_v3 }
 0x1c2   : > { %3116 = vmatprep.mubr.f32.mxu0 %v17079_v18 }
 0x1c4   : > { %8687 = vmatmul.mubr.msk.f32.gmra.mxu1 %vm1833_vm3, %v1766_v25  ;;  %v1816_v25 = vld [vmem:[%s17060_s5] sm:$0x7] }
 0x1c5   : > { %2324 = vmatprep.mubr.f32.mxu1 %v17079_v18  ;;  %8786 = vmatmul.mubr.msk.f32.gmra.mxu0 %vm2882_vm4, %v9780_v4  ;;  %v11167_v12 = vrot.slane %v1816_v25, %v1828_v28  ;;  %v17302_v28 = vmax.f32 %v10907_v52, 0.0 }
 0x1c6   : > { %3122 = vmatprep.mubr.f32.mxu0 %v17079_v18 }
 0x1c7   : > { %17299 = vst [vmem:[#allocation8_spill] sm:$0xff] %v11167_v12 }
 0x1c8   : > { %8688 = vmatmul.mubr.msk.f32.gmra.mxu1 %vm1833_vm3, %v1767_v46  ;;  %v9788_v46 = vld [vmem:[%s10315_s17 + $0x70] sm:$0xff] }
 0x1c9   : > { %2330 = vmatprep.mubr.f32.mxu1 %v17079_v18  ;;  %8787 = vmatmul.mubr.msk.f32.gmra.mxu0 %vm2882_vm4, %v9781_v7 }
 0x1ca   : > { %3128 = vmatprep.mubr.f32.mxu0 %v17079_v18 }
 0x1cc   : > { %8689 = vmatmul.mubr.msk.f32.gmra.mxu1 %vm1833_vm3, %v1768_v23  ;;  %v11163_v23 = vrot.slane %v1816_v25, %v11148_v43 }
 0x1cd   : > { %2336 = vmatprep.mubr.f32.mxu1 %v17079_v18  ;;  %8788 = vmatmul.mubr.msk.f32.gmra.mxu0 %vm2882_vm4, %v9782_v8  ;;  %v9791_v8 = vld [vmem:[%s10315_s17 + $0x88] sm:$0xff] }
 0x1ce   : > { %3134 = vmatprep.mubr.f32.mxu0 %v17079_v18 }
 0x1d0   : > { %8690 = vmatmul.mubr.msk.f32.gmra.mxu1 %vm1833_vm3, %v1769_v62  ;;  %v17298_v62 = vmax.f32 %v10867_v33, 0.0 }
 0x1d1   : > { %2342 = vmatprep.mubr.f32.mxu1 %v17079_v18  ;;  %8789 = vmatmul.mubr.msk.f32.gmra.mxu0 %vm2882_vm4, %v9783_v10 }
 0x1d2   : > { %3140 = vmatprep.mubr.f32.mxu0 %v17079_v18 }
 0x1d4   : > { %8691 = vmatmul.mubr.msk.f32.gmra.mxu1 %vm1833_vm3, %v17293_v11 }
 0x1d5   : > { %2348 = vmatprep.mubr.f32.mxu1 %v17079_v18  ;;  %8790 = vmatmul.mubr.msk.f32.gmra.mxu0 %vm2882_vm4, %v9784_v14 }
 0x1d6   : > { %3146 = vmatprep.mubr.f32.mxu0 %v17079_v18 }
 0x1d8   : > { %8692 = vmatmul.mubr.msk.f32.gmra.mxu1 %vm1833_vm3, %v1771_v17  ;;  %v11171_v17 = vrot.slane %v1816_v25, %v11156_v59 }
 0x1d9   : > { %2354 = vmatprep.mubr.f32.mxu1 %v17079_v18  ;;  %8791 = vmatmul.mubr.msk.f32.gmra.mxu0 %vm2882_vm4, %v9785_v15 }
 0x1da   : > { %3152 = vmatprep.mubr.f32.mxu0 %v17079_v18  ;;  %17300 = vst [vmem:[#allocation9_spill] sm:$0xff] %v11171_v17 }
 0x1dc   : > { %8693 = vmatmul.mubr.msk.f32.gmra.mxu1 %vm1833_vm3, %v17294_v19 }
 0x1dd   : > { %2360 = vmatprep.mubr.f32.mxu1 %v17079_v18  ;;  %8792 = vmatmul.mubr.msk.f32.gmra.mxu0 %vm2882_vm4, %v9786_v27 }
 0x1de   : > { %3158 = vmatprep.mubr.f32.mxu0 %v17079_v18 }
 0x1e0   : > { %8694 = vmatmul.mubr.msk.f32.gmra.mxu1 %vm1833_vm3, %v17295_v31 }
 0x1e1   : > { %2366 = vmatprep.mubr.f32.mxu1 %v17079_v18  ;;  %8793 = vmatmul.mubr.msk.f32.gmra.mxu0 %vm2882_vm4, %v9787_v20 }
 0x1e2   : > { %3164 = vmatprep.mubr.f32.mxu0 %v17079_v18 }
 0x1e4   : > { %8695 = vmatmul.mubr.msk.f32.gmra.mxu1 %vm1833_vm3, %v1774_v38  ;;  %v5021_v38 = vld [vmem:[%s11177_s28 + $0x8] sm:$0xff] }
 0x1e5   : > { %2372 = vmatprep.mubr.f32.mxu1 %v17079_v18  ;;  %8794 = vmatmul.mubr.msk.f32.gmra.mxu0 %vm2882_vm4, %v9788_v46 }
 0x1e6   : > { %3170 = vmatprep.mubr.f32.mxu0 %v17079_v18 }
 0x1e8   : > { %8696 = vmatmul.mubr.msk.f32.gmra.mxu1 %vm1833_vm3, %v17298_v62 }
 0x1e9   : > { %2378 = vmatprep.mubr.f32.mxu1 %v17079_v18  ;;  %8795 = vmatmul.mubr.msk.f32.gmra.mxu0 %vm2882_vm4, %v9789_v26  ;;  %v5022_v26 = vld [vmem:[%s11177_s28 + $0x10] sm:$0xff] }
 0x1ea   : > { %3176 = vmatprep.mubr.f32.mxu0 %v17079_v18 }
 0x1ec   : > { %v2092_v32 = vpop.f32.mrf.mxu1  ;;  %8697 = vmatmul.mubr.msk.f32.gmra.mxu1 %vm1833_vm3, %v1776_v41 }
 0x1ed   : > { %v2093_v49 = vadd.f32 %v2092_v32, %v11163_v23  ;;  %v9201_v33 = vpop.f32.mrf.mxu0  ;;  %2384 = vmatprep.mubr.f32.mxu1 %v17079_v18  ;;  %8796 = vmatmul.mubr.msk.f32.gmra.mxu0 %vm2882_vm4, %v9790_v53 }
 0x1ee   : > { %v2547_v51 = vadd.f32 %v9201_v33, %v11167_v12  ;;  %v2094_v5 = vpop.f32.mrf.mxu1  ;;  %3182 = vmatprep.mubr.f32.mxu0 %v17079_v18  ;;  %v9793_v33 = vld [vmem:[%s10315_s17 + $0x98] sm:$0xff] }
 0x1ef   : > { %v2095_v41 = vadd.f32 %v2094_v5, %v11171_v17  ;;  %v2541_v54 = vpop.f32.mrf.mxu0  ;;  %v5036_v58 = vmul.f32 %v5020_v35, %v2093_v49 }
 0x1f0   : > { %v2098_v61 = vpop.f32.mrf.mxu1  ;;  %8698 = vmatmul.mubr.msk.f32.gmra.mxu1 %vm1833_vm3, %v17301_v0  ;;  %v5165_v1 = vmul.f32 %v5021_v38, %v2547_v51  ;;  %v2542_v10 = vadd.f32 %v2541_v54, %v11167_v12  ;;  %v11221_v51 = vld [vmem:[%s11177_s28 + $0x28] sm:$0xff]  ;;  %v17303_v54 = vmax.f32 %v10918_v39, 0.0 }
 0x1f1   : > { %v2099_v3 = vadd.f32 %v2098_v61, %v11163_v23  ;;  %v9204_v4 = vpop.f32.mrf.mxu0  ;;  %5052 = vadd.xlane.f32.xlu0 %v5036_v58  ;;  %2390 = vmatprep.mubr.f32.mxu1 %v17079_v18  ;;  %v5100_v63 = vmul.f32 %v5020_v35, %v2095_v41 }
 0x1f2   : > { %v2100_v7 = vpop.f32.mrf.mxu1  ;;  %5182 = vadd.xlane.f32.xlu1 %v5165_v1  ;;  %8797 = vmatmul.mubr.msk.f32.gmra.mxu0 %vm2882_vm4, %v9791_v8  ;;  %v2557_v15 = vadd.f32 %v9204_v4, %v11167_v12  ;;  %v5164_v46 = vmul.f32 %v5020_v35, %v2542_v10 }
 0x1f3   : > { %v2551_v11 = vpop.f32.mrf.mxu0  ;;  %v5037_v14 = vmul.f32 %v5021_v38, %v2099_v3  ;;  %3188 = vmatprep.mubr.f32.mxu0 %v17079_v18  ;;  %v2101_v22 = vadd.f32 %v2100_v7, %v11171_v17  ;;  %v9794_v3 = vld [vmem:[%s10315_s17 + $0xa0] sm:$0xff] }
 0x1f4   : > { %v2104_v19 = vpop.f32.mrf.mxu1  ;;  %8699 = vmatmul.mubr.msk.f32.gmra.mxu1 %vm1833_vm3, %v1778_v36  ;;  %v2552_v20 = vadd.f32 %v2551_v11, %v11167_v12  ;;  %v5167_v62 = vmul.f32 %v11203_v21, %v2557_v15 }
 0x1f5   : > { %5116 = vadd.xlane.f32.xlu0 %v5100_v63  ;;  %2396 = vmatprep.mubr.f32.mxu1 %v17079_v18  ;;  %v9207_v27 = vpop.f32.mrf.mxu0  ;;  %v2105_v53 = vadd.f32 %v2104_v19, %v11163_v23  ;;  %v5101_v58 = vmul.f32 %v5021_v38, %v2101_v22  ;;  %v9795_v63 = vld [vmem:[%s10315_s17 + $0xa8] sm:$0xff]  ;;  %v9796_v22 = vld [vmem:[%s10315_s17 + $0xb0] sm:$0xff] }
 0x1f6   : > { %v2106_v31 = vpop.f32.mrf.mxu1  ;;  %5054 = vadd.xlane.f32.xlu1 %v5037_v14  ;;  %8798 = vmatmul.mubr.msk.f32.gmra.mxu0 %vm2882_vm4, %v9792_v16  ;;  %v2567_v35 = vadd.f32 %v9207_v27, %v11167_v12  ;;  %v5166_v52 = vmul.f32 %v5022_v26, %v2552_v20  ;;  %v17304_v27 = vmax.f32 %v10937_v44, 0.0  ;;  %v5024_v16 = vld [vmem:[%s11177_s28 + $0x20] sm:$0xff]  ;;  %v11264_v20 = vld [vmem:[%s11177_s28 + $0x38] sm:$0xff] }
 0x1f7   : > { %v2561_v25 = vpop.f32.mrf.mxu0  ;;  %3194 = vmatprep.mubr.f32.mxu0 %v17079_v18  ;;  %v2107_v4 = vadd.f32 %v2106_v31, %v11171_v17  ;;  %v5038_v7 = vmul.f32 %v5022_v26, %v2105_v53 }
 0x1f8   : > { %v2110_v36 = vpop.f32.mrf.mxu1  ;;  %8700 = vmatmul.mubr.msk.f32.gmra.mxu1 %vm1833_vm3, %v17302_v28  ;;  %v5169_v1 = vmul.f32 %v11221_v51, %v2567_v35  ;;  %v2562_v14 = vadd.f32 %v2561_v25, %v11167_v12  ;;  %v11284_v35 = vld [vmem:[%s11177_s28 + $0x30] sm:$0xff] }
 0x1f9   : > { %5180 = vadd.xlane.f32.xlu0 %v5164_v46  ;;  %2402 = vmatprep.mubr.f32.mxu1 %v17079_v18  ;;  %v9210_v32 = vpop.f32.mrf.mxu0  ;;  %v2111_v38 = vadd.f32 %v2110_v36, %v11163_v23  ;;  %v5102_v15 = vmul.f32 %v5022_v26, %v2107_v4 }
 0x1fa   : > { %v2112_v49 = vpop.f32.mrf.mxu1  ;;  %5186 = vadd.xlane.f32.xlu1 %v5167_v62  ;;  %8799 = vmatmul.mubr.msk.f32.gmra.mxu0 %vm2882_vm4, %v9793_v33  ;;  %v5168_v36 = vmul.f32 %v5024_v16, %v2562_v14 }
 0x1fb   : > { %v2571_v5 = vpop.f32.mrf.mxu0  ;;  %3200 = vmatprep.mubr.f32.mxu0 %v17079_v18  ;;  %v5039_v31 = vmul.f32 %v11203_v21, %v2111_v38  ;;  %v2113_v62 = vadd.f32 %v2112_v49, %v11171_v17 }
 0x1fc   : > { %v2116_v41 = vpop.f32.mrf.mxu1  ;;  %8701 = vmatmul.mubr.msk.f32.gmra.mxu1 %vm1833_vm3, %v17303_v54  ;;  %v2572_v44 = vadd.f32 %v2571_v5, %v11167_v12  ;;  %v11297_v5 = vld [vmem:[%s11177_s28 + $0x48] sm:$0xff] }
 0x1fd   : > { %5184 = vadd.xlane.f32.xlu0 %v5166_v52  ;;  %2408 = vmatprep.mubr.f32.mxu1 %v17079_v18  ;;  %v9213_v61 = vpop.f32.mrf.mxu0  ;;  %v9797_v52 = vld [vmem:[%s10315_s17 + $0xb8] sm:$0xff]  ;;  %v2117_v56 = vadd.f32 %v2116_v41, %v11163_v23 }
 0x1fe   : > { %v11228_v0 = vpop.f32.mrf.mxu1  ;;  %5118 = vadd.xlane.f32.xlu1 %v5101_v58  ;;  %8800 = vmatmul.mubr.msk.f32.gmra.mxu0 %vm2882_vm4, %v9794_v3  ;;  %v2587_v49 = vadd.f32 %v9213_v61, %v11167_v12  ;;  %v5103_v61 = vmul.f32 %v11203_v21, %v2113_v62 }
 0x1ff   : > { %v11234_v39 = vpop.f32.mrf.mxu0  ;;  %3206 = vmatprep.mubr.f32.mxu0 %v17079_v18  ;;  %v5040_v38 = vmul.f32 %v5024_v16, %v2117_v56  ;;  %v11376_v56 = vld [vmem:[%s11177_s28 + $0x50] sm:$0xff] }
 0x200   : > { %v11238_v8 = vpop.f32.mrf.mxu1  ;;  %8702 = vmatmul.mubr.msk.f32.gmra.mxu1 %vm1833_vm3, %v1781_v24  ;;  %v2577_v24 = vadd.f32 %v9210_v32, %v11167_v12  ;;  %v5173_v4 = vmul.f32 %v11297_v5, %v2587_v49 }
 0x201   : > { %5056 = vadd.xlane.f32.xlu0 %v5038_v7  ;;  %2414 = vmatprep.mubr.f32.mxu1 %v17079_v18  ;;  %v11244_v10 = vpop.f32.mrf.mxu0  ;;  %v9798_v7 = vld [vmem:[%s10315_s17 + $0xc0] sm:$0xff]  ;;  %v2123_v21 = vadd.f32 %v11238_v8, %v11163_v23  ;;  %v2582_v8 = vadd.f32 %v11234_v39, %v11167_v12  ;;  %v11353_v39 = vld [vmem:[%s11177_s28 + $0x58] sm:$0xff] }
 0x202   : > { %v11246_v11 = vpop.f32.mrf.mxu1  ;;  %5190 = vadd.xlane.f32.xlu1 %v5169_v1  ;;  %8801 = vmatmul.mubr.msk.f32.gmra.mxu0 %vm2882_vm4, %v9795_v63  ;;  %v5171_v32 = vmul.f32 %v11264_v20, %v2577_v24  ;;  %v17305_v1 = vmax.f32 %v10956_v42, 0.0  ;;  %v2119_v42 = vadd.f32 %v11228_v0, %v11171_v17  ;;  %v9799_v24 = vld [vmem:[%s10315_s17 + $0xc8] sm:$0xff] }
 0x203   : > { %v11251_v2 = vpop.f32.mrf.mxu0  ;;  %3212 = vmatprep.mubr.f32.mxu0 %v17079_v18 }
 0x204   : > { %v11255_v19 = vpop.f32.mrf.mxu1  ;;  %8703 = vmatmul.mubr.msk.f32.gmra.mxu1 %vm1833_vm3, %v17304_v27  ;;  %v5104_v6 = vmul.f32 %v5024_v16, %v2119_v42 }
 0x205   : > { %5120 = vadd.xlane.f32.xlu0 %v5102_v15  ;;  %2420 = vmatprep.mubr.f32.mxu1 %v17079_v18  ;;  %v11266_v46 = vpop.f32.mrf.mxu0  ;;  %v2129_v34 = vadd.f32 %v11255_v19, %v11163_v23 }
 0x206   : > { %v11268_v25 = vpop.f32.mrf.mxu1  ;;  %5058 = vadd.xlane.f32.xlu1 %v5039_v31  ;;  %8802 = vmatmul.mubr.msk.f32.gmra.mxu0 %vm2882_vm4, %v9796_v22  ;;  %v5041_v22 = vmul.f32 %v11221_v51, %v2123_v21  ;;  %v9802_v21 = vld [vmem:[%s10315_s17 + $0xe0] sm:$0xff] }
 0x207   : > { %v11273_v28 = vpop.f32.mrf.mxu0  ;;  %3218 = vmatprep.mubr.f32.mxu0 %v17079_v18  ;;  %v2131_v48 = vadd.f32 %v11268_v25, %v11171_v17 }
 0x208   : > { %v11277_v26 = vpop.f32.mrf.mxu1  ;;  %8704 = vmatmul.mubr.msk.f32.gmra.mxu1 %vm1833_vm3, %v1783_v55  ;;  %v5170_v55 = vmul.f32 %v11284_v35, %v2572_v44  ;;  %v11349_v44 = vld [vmem:[%s11177_s28 + $0x40] sm:$0xff] }
 0x209   : > { %5188 = vadd.xlane.f32.xlu0 %v5168_v36  ;;  %2426 = vmatprep.mubr.f32.mxu1 %v17079_v18  ;;  %v11287_v33 = vpop.f32.mrf.mxu0  ;;  %v5172_v50 = vmul.f32 %v11349_v44, %v2582_v8  ;;  %v5106_v13 = vmul.f32 %v11284_v35, %v2131_v48 }
 0x20a   : > { %v11289_v53 = vpop.f32.mrf.mxu1  ;;  %5194 = vadd.xlane.f32.xlu1 %v5171_v32  ;;  %8803 = vmatmul.mubr.msk.f32.gmra.mxu0 %vm2882_vm4, %v9797_v52  ;;  %v2125_v32 = vadd.f32 %v11246_v11, %v11171_v17  ;;  %v2607_v11 = vadd.f32 %v11266_v46, %v11167_v12 }
 0x20b   : > { %v11299_v54 = vpop.f32.mrf.mxu0  ;;  %3224 = vmatprep.mubr.f32.mxu0 %v17079_v18 }
 0x20c   : > { %v11302_v58 = vpop.f32.mrf.mxu1  ;;  %8705 = vmatmul.mubr.msk.f32.gmra.mxu1 %vm1833_vm3, %v17305_v1  ;;  %v9801_v1 = vld [vmem:[%s10315_s17 + $0xd8] sm:$0xff]  ;;  %v5105_v46 = vmul.f32 %v11221_v51, %v2125_v32  ;;  %v11452_v32 = vld [vmem:[%s11177_s28 + $0xe8] sm:$0xff] }
 0x20d   : > { %5192 = vadd.xlane.f32.xlu0 %v5170_v55  ;;  %2432 = vmatprep.mubr.f32.mxu1 %v17079_v18  ;;  %v11309_v41 = vpop.f32.mrf.mxu0 }
 0x20e   : > { %v11311_v3 = vpop.f32.mrf.mxu1  ;;  %5122 = vadd.xlane.f32.xlu1 %v5103_v61  ;;  %8804 = vmatmul.mubr.msk.f32.gmra.mxu0 %vm2882_vm4, %v9798_v7  ;;  %v11391_v61 = vld [vmem:[%s11177_s28 + $0x68] sm:$0xff]  ;;  %v2627_v47 = vadd.f32 %v11309_v41, %v11167_v12 }
 0x20f   : > { %v11318_v63 = vpop.f32.mrf.mxu0  ;;  %3230 = vmatprep.mubr.f32.mxu0 %v17079_v18 }
 0x210   : > { %v11323_v14 = vpop.f32.mrf.mxu1  ;;  %8706 = vmatmul.mubr.msk.f32.gmra.mxu1 %vm1833_vm3, %v1785_v37  ;;  %v2597_v37 = vadd.f32 %v11244_v10, %v11167_v12  ;;  %v9800_v10 = vld [vmem:[%s10315_s17 + $0xd0] sm:$0xff] }
 0x211   : > { %5060 = vadd.xlane.f32.xlu0 %v5040_v38  ;;  %2438 = vmatprep.mubr.f32.mxu1 %v17079_v18  ;;  %v11329_v15 = vpop.f32.mrf.mxu0  ;;  %v5177_v38 = vmul.f32 %v11391_v61, %v2607_v11 }
 0x212   : > { %v11331_v0 = vpop.f32.mrf.mxu1  ;;  %5198 = vadd.xlane.f32.xlu1 %v5173_v4  ;;  %8805 = vmatmul.mubr.msk.f32.gmra.mxu0 %vm2882_vm4, %v9799_v24  ;;  %v5175_v52 = vmul.f32 %v11353_v39, %v2597_v37  ;;  %v2135_v24 = vadd.f32 %v11277_v26, %v11163_v23  ;;  %v9803_v37 = vld [vmem:[%s10315_s17 + $0xe8] sm:$0xff]  ;;  %v2602_v26 = vadd.f32 %v11273_v28, %v11167_v12  ;;  %v11445_v28 = vld [vmem:[%s11177_s28 + $0x60] sm:$0xff] }
 0x213   : > { %v11337_v27 = vpop.f32.mrf.mxu0  ;;  %3236 = vmatprep.mubr.f32.mxu0 %v17079_v18 }
 0x214   : > { %v11342_v31 = vpop.f32.mrf.mxu1  ;;  %8707 = vmatmul.mubr.msk.f32.gmra.mxu1 %vm1833_vm3, %v1786_v9  ;;  %v2592_v9 = vadd.f32 %v11251_v2, %v11167_v12  ;;  %v5176_v11 = vmul.f32 %v11445_v28, %v2602_v26 }
 0x215   : > { %5124 = vadd.xlane.f32.xlu0 %v5104_v6  ;;  %2444 = vmatprep.mubr.f32.mxu1 %v17079_v18  ;;  %v11355_v16 = vpop.f32.mrf.mxu0 }
 0x216   : > { %v11357_v36 = vpop.f32.mrf.mxu1  ;;  %5062 = vadd.xlane.f32.xlu1 %v5041_v22  ;;  %8806 = vmatmul.mubr.msk.f32.gmra.mxu0 %vm2882_vm4, %v9800_v10  ;;  %v2617_v22 = vadd.f32 %v11287_v33, %v11167_v12 }
 0x217   : > { %v11364_v62 = vpop.f32.mrf.mxu0  ;;  %3242 = vmatprep.mubr.f32.mxu0 %v17079_v18 }
 0x218   : > { %v11369_v49 = vpop.f32.mrf.mxu1  ;;  %8708 = vmatmul.mubr.msk.f32.gmra.mxu1 %vm1833_vm3, %v1787_v29  ;;  %v5174_v29 = vmul.f32 %v11376_v56, %v2592_v9  ;;  %v5043_v9 = vmul.f32 %v11264_v20, %v2135_v24  ;;  %v9805_v24 = vld [vmem:[%s10315_s17 + $0xf8] sm:$0xff] }
 0x219   : > { %5196 = vadd.xlane.f32.xlu0 %v5172_v50  ;;  %2450 = vmatprep.mubr.f32.mxu1 %v17079_v18  ;;  %v11379_v2 = vpop.f32.mrf.mxu0 }
 0x21a   : > { %v11381_v55 = vpop.f32.mrf.mxu1  ;;  %5202 = vadd.xlane.f32.xlu1 %v5175_v52  ;;  %8807 = vmatmul.mubr.msk.f32.gmra.mxu0 %vm2882_vm4, %v9801_v1  ;;  %v2612_v52 = vadd.f32 %v11299_v54, %v11167_v12 }
 0x21b   : > { %v11393_v4 = vpop.f32.mrf.mxu0  ;;  %3248 = vmatprep.mubr.f32.mxu0 %v17079_v18 }
 0x21c   : > { %v11396_v7 = vpop.f32.mrf.mxu1  ;;  %8709 = vmatmul.mubr.msk.f32.gmra.mxu1 %vm1833_vm3, %v1788_v40  ;;  %v5042_v40 = vmul.f32 %v11284_v35, %v2129_v34  ;;  %v11449_v35 = vld [vmem:[%s11177_s28 + $0x78] sm:$0xff]  ;;  %v11463_v34 = vld [vmem:[%s11177_s28 + $0xe0] sm:$0xff] }
 0x21d   : > { %5200 = vadd.xlane.f32.xlu0 %v5174_v29  ;;  %2456 = vmatprep.mubr.f32.mxu1 %v17079_v18  ;;  %v11403_v19 = vpop.f32.mrf.mxu0  ;;  %v2137_v29 = vadd.f32 %v11289_v53, %v11171_v17  ;;  %v5179_v54 = vmul.f32 %v11449_v35, %v2617_v22 }
 0x21e   : > { %v11405_v42 = vpop.f32.mrf.mxu1  ;;  %5126 = vadd.xlane.f32.xlu1 %v5105_v46  ;;  %8808 = vmatmul.mubr.msk.f32.gmra.mxu0 %vm2882_vm4, %v9802_v21 }
 0x21f   : > { %v11413_v51 = vpop.f32.mrf.mxu0  ;;  %3254 = vmatprep.mubr.f32.mxu0 %v17079_v18 }
 0x220   : > { %v11418_v8 = vpop.f32.mrf.mxu1  ;;  %8710 = vmatmul.mubr.msk.f32.gmra.mxu1 %vm1833_vm3, %v1789_v60 }
 0x221   : > { %5064 = vadd.xlane.f32.xlu0 %v5042_v40  ;;  %2462 = vmatprep.mubr.f32.mxu1 %v17079_v18  ;;  %v11424_v25 = vpop.f32.mrf.mxu0 }
 0x222   : > { %v11426_v6 = vpop.f32.mrf.mxu1  ;;  %5206 = vadd.xlane.f32.xlu1 %v5177_v38  ;;  %8809 = vmatmul.mubr.msk.f32.gmra.mxu0 %vm2882_vm4, %v9803_v37  ;;  %v11475_v38 = vld [vmem:[%s11177_s28 + $0x70] sm:$0xff]  ;;  %v2141_v37 = vadd.f32 %v11302_v58, %v11163_v23 }
 0x223   : > { %v11433_v60 = vpop.f32.mrf.mxu0  ;;  %3260 = vmatprep.mubr.f32.mxu0 %v17079_v18  ;;  %v5178_v26 = vmul.f32 %v11475_v38, %v2612_v52 }
 0x224   : > { %v11438_v10 = vpop.f32.mrf.mxu1  ;;  %8711 = vmatmul.mubr.msk.f32.gmra.mxu1 %vm1833_vm3, %v1790_v45  ;;  %v9804_v45 = vld [vmem:[%s10315_s17 + $0xf0] sm:$0xff] }
 0x225   : > { %5128 = vadd.xlane.f32.xlu0 %v5106_v13  ;;  %2468 = vmatprep.mubr.f32.mxu1 %v17079_v18  ;;  %v9243_v50 = vpop.f32.mrf.mxu0  ;;  %v11497_v13 = vld [vmem:[%s11177_s28 + $0x88] sm:$0xff] }
 0x226   : > { %v11454_v33 = vpop.f32.mrf.mxu1  ;;  %5066 = vadd.xlane.f32.xlu1 %v5043_v9  ;;  %v2687_v57 = vadd.f32 %v9243_v50, %v11167_v12  ;;  %8810 = vmatmul.mubr.msk.f32.gmra.mxu0 %vm2882_vm4, %v9804_v45  ;;  %v11500_v9 = vld [vmem:[%s11177_s28 + $0xf0] sm:$0xff]  ;;  %v5107_v50 = vmul.f32 %v11264_v20, %v2137_v29  ;;  %v5374_v52 = vmul.f32 %v11497_v13, %v2627_v47 }
 0x227   : > { %v2681_v1 = vpop.f32.mrf.mxu0  ;;  %3266 = vmatprep.mubr.f32.mxu0 %v17079_v18  ;;  %v2143_v20 = vadd.f32 %v11311_v3, %v11171_v17  ;;  %v5044_v29 = vmul.f32 %v11349_v44, %v2141_v37  ;;  %v2147_v47 = vadd.f32 %v11323_v14, %v11163_v23  ;;  %v2622_v14 = vadd.f32 %v11318_v63, %v11167_v12 }
 0x228   : > { %v11468_v46 = vpop.f32.mrf.mxu1  ;;  %8712 = vmatmul.mubr.msk.f32.gmra.mxu1 %vm1833_vm3, %v1791_v30  ;;  %v11478_v21 = vmul.f32 %v11452_v32, %v2687_v57  ;;  %v2682_v48 = vadd.f32 %v2681_v1, %v11167_v12  ;;  %v9806_v1 = vld [vmem:[%s10315_s17 + $0x100] sm:$0xff] }
 0x229   : > { %5204 = vadd.xlane.f32.xlu0 %v5176_v11  ;;  %v11481_v40 = vpop.f32.mrf.mxu0  ;;  %6804 = vmatprep.mubr.f32.mxu1 %v17079_v18 }
 0x22a   : > { %17306 = vst [vmem:[#allocation10_spill] sm:$0xff] %v11478_v21  ;;  %17307 = vst [vmem:[#allocation11_spill] sm:$0xff] %v11481_v40  ;;  %v11486_v30 = vpop.f32.mrf.mxu1  ;;  %5210 = vadd.xlane.f32.xlu1 %v5179_v54  ;;  %v11489_v53 = vmul.f32 %v11463_v34, %v2682_v48  ;;  %8811 = vmatmul.mubr.msk.f32.gmra.mxu0 %vm2882_vm4, %v9805_v24  ;;  %v11521_v48 = vld [vmem:[%s11177_s28 + $0x100] sm:$0xff]  ;;  %v2149_v40 = vadd.f32 %v11331_v0, %v11171_v17  ;;  %v11573_v21 = vld [vmem:[%s11177_s28 + $0x90] sm:$0xff] }
 0x22b   : > { %v2691_v22 = vpop.f32.mrf.mxu0  ;;  %3272 = vmatprep.mubr.f32.mxu0 %v17079_v18  ;;  %v2153_v0 = vadd.f32 %v11342_v31, %v11163_v23 }
 0x22c   : > { %17308 = vst [vmem:[#allocation12_spill] sm:$0xff] %v11489_v53  ;;  %v11503_v41 = vpop.f32.mrf.mxu1  ;;  %v2692_v57 = vadd.f32 %v2691_v22, %v11167_v12  ;;  %v9809_v53 = vld [vmem:[%s10315_s17 + $0x118] sm:$0xff] }
 0x22d   : > { %5208 = vadd.xlane.f32.xlu0 %v5178_v26  ;;  %v11507_v45 = vpop.f32.mrf.mxu0 }
 0x22e   : > { %17309 = vst [vmem:[#allocation13_spill] sm:$0xff] %v11507_v45  ;;  %v11509_v58 = vpop.f32.mrf.mxu1  ;;  %5130 = vadd.xlane.f32.xlu1 %v5107_v50  ;;  %v11513_v11 = vmul.f32 %v11500_v9, %v2692_v57  ;;  %8812 = vmatmul.mubr.msk.f32.gmra.mxu0 %vm2882_vm4, %v9806_v1  ;;  %v9807_v50 = vld [vmem:[%s10315_s17 + $0x108] sm:$0xff]  ;;  %v5108_v57 = vmul.f32 %v11349_v44, %v2143_v20  ;;  %v9808_v20 = vld [vmem:[%s10315_s17 + $0x110] sm:$0xff] }
 0x22f   : > { %v2701_v54 = vpop.f32.mrf.mxu0  ;;  %3278 = vmatprep.mubr.f32.mxu0 %v17079_v18 }
 0x230   : > { %17310 = vst [vmem:[#allocation14_spill] sm:$0xff] %v11513_v11  ;;  %v11526_v24 = vpop.f32.mrf.mxu1  ;;  %v2702_v26 = vadd.f32 %v2701_v54, %v11167_v12  ;;  %v5045_v54 = vmul.f32 %v11297_v5, %v2147_v47 }
 0x231   : > { %5068 = vadd.xlane.f32.xlu0 %v5044_v29  ;;  %v11529_v22 = vpop.f32.mrf.mxu0  ;;  %v2637_v29 = vadd.f32 %v11329_v15, %v11167_v12  ;;  %v2632_v15 = vadd.f32 %v11337_v27, %v11167_v12  ;;  %v2647_v27 = vadd.f32 %v11355_v16, %v11167_v12  ;;  %v5109_v16 = vmul.f32 %v11297_v5, %v2149_v40 }
 0x232   : > { %17311 = vst [vmem:[#allocation15_spill] sm:$0xff] %v11529_v22  ;;  %v11531_v3 = vpop.f32.mrf.mxu1  ;;  %5391 = vadd.xlane.f32.xlu1 %v5374_v52  ;;  %v11534_v37 = vmul.f32 %v11521_v48, %v2702_v26  ;;  %8813 = vmatmul.mubr.msk.f32.gmra.mxu0 %vm2882_vm4, %v9807_v50  ;;  %v11550_v26 = vld [vmem:[%s11177_s28 + $0x80] sm:$0xff]  ;;  %v11553_v50 = vld [vmem:[%s11177_s28 + $0x98] sm:$0xff]  ;;  %v2159_v5 = vadd.f32 %v11369_v49, %v11163_v23 }
 0x233   : > { %v11541_v1 = vpop.f32.mrf.mxu0  ;;  %3284 = vmatprep.mubr.f32.mxu0 %v17079_v18  ;;  %v5373_v47 = vmul.f32 %v11550_v26, %v2622_v14 }
 0x234   : > { %17312 = vst [vmem:[#allocation16_spill] sm:$0xff] %v11534_v37  ;;  %17313 = vst [vmem:[#allocation17_spill] sm:$0xff] %v11541_v1  ;;  %v11546_v52 = vpop.f32.mrf.mxu1 }
 0x235   : > { %5132 = vadd.xlane.f32.xlu0 %v5108_v57  ;;  %v11555_v63 = vpop.f32.mrf.mxu0  ;;  %v17316_v57 = vmov 0.0  }
 0x236   : > { %17314 = vst [vmem:[#allocation18_spill] sm:$0xff] %v11555_v63  ;;  %v11557_v44 = vpop.f32.mrf.mxu1  ;;  %5070 = vadd.xlane.f32.xlu1 %v5045_v54  ;;  %8814 = vmatmul.mubr.msk.f32.gmra.mxu0 %vm2882_vm4, %v9808_v20  ;;  %v5376_v54 = vmul.f32 %v11553_v50, %v2637_v29  ;;  %v5375_v29 = vmul.f32 %v11573_v21, %v2632_v15  ;;  %v11587_v63 = vld [vmem:[%s11177_s28 + $0xa8] sm:$0xff]  ;;  %v9810_v15 = vld [vmem:[%s10315_s17 + $0x120] sm:$0xff] }
 0x237   : > { %v11564_v18 = vpop.f32.mrf.mxu0  ;;  %3290 = vmatprep.mubr.f32.mxu0 %v17316_v57  ;;  %v5378_v31 = vmul.f32 %v11587_v63, %v2647_v27 }
 0x238   : > { %17315 = vst [vmem:[#allocation19_spill] sm:$0xff] %v11564_v18  ;;  %v11569_v11 = vpop.f32.mrf.mxu1  ;;  %v5046_v18 = vmul.f32 %v11376_v56, %v2153_v0  ;;  %v2642_v0 = vadd.f32 %v11364_v62, %v11167_v12 }
 0x239   : > { %5389 = vadd.xlane.f32.xlu0 %v5373_v47  ;;  %v11575_v20 = vpop.f32.mrf.mxu0 }
 0x23a   : > { %17317 = vst [vmem:[#allocation20_spill] sm:$0xff] %v11575_v20  ;;  %v11579_v14 = vpop.f32.mrf.mxu1  ;;  %5395 = vadd.xlane.f32.xlu1 %v5376_v54  ;;  %8815 = vmatmul.mubr.msk.f32.gmra.mxu0 %vm2882_vm4, %v9809_v53 }
 0x23b   : > { %v11589_v47 = vpop.f32.mrf.mxu0  ;;  %3296 = vmatprep.mubr.f32.mxu0 %v17316_v57 }
 0x23c   : > { %17318 = vst [vmem:[#allocation21_spill] sm:$0xff] %v11589_v47  ;;  %v11592_v20 = vpop.f32.mrf.mxu1  ;;  %v2155_v47 = vadd.f32 %v11357_v36, %v11171_v17  ;;  %v9811_v36 = vld [vmem:[%s10315_s17 + $0x128] sm:$0xff] }
 0x23d   : > { %5393 = vadd.xlane.f32.xlu0 %v5375_v29  ;;  %v11595_v54 = vpop.f32.mrf.mxu0 }
 0x23e   : > { %17319 = vst [vmem:[#allocation22_spill] sm:$0xff] %v11595_v54  ;;  %v11597_v53 = vpop.f32.mrf.mxu1  ;;  %5134 = vadd.xlane.f32.xlu1 %v5109_v16  ;;  %8816 = vmatmul.mubr.msk.f32.gmra.mxu0 %vm2882_vm4, %v9810_v15  ;;  %v5110_v16 = vmul.f32 %v11376_v56, %v2155_v47  ;;  %v9812_v47 = vld [vmem:[%s10315_s17 + $0x130] sm:$0xff] }
 0x23f   : > { %v11605_v22 = vpop.f32.mrf.mxu0  ;;  %3302 = vmatprep.mubr.f32.mxu0 %v17316_v57  ;;  %v11653_v54 = vld [vmem:[%s11177_s28 + $0xb0] sm:$0xff] }
 0x240   : > { %17320 = vst [vmem:[#allocation23_spill] sm:$0xff] %v11605_v22  ;;  %v11610_v40 = vpop.f32.mrf.mxu1  ;;  %v11667_v22 = vld [vmem:[%s11177_s28 + $0xc8] sm:$0xff] }
 0x241   : > { %5072 = vadd.xlane.f32.xlu0 %v5046_v18  ;;  %v11612_v27 = vpop.f32.mrf.mxu0  ;;  %v2657_v18 = vadd.f32 %v11379_v2, %v11167_v12  ;;  %v2652_v2 = vadd.f32 %v11393_v4, %v11167_v12  ;;  %v2667_v4 = vadd.f32 %v11403_v19, %v11167_v12 }
 0x242   : > { %17321 = vst [vmem:[#allocation24_spill] sm:$0xff] %v11612_v27  ;;  %v11614_v29 = vpop.f32.mrf.mxu1  ;;  %5399 = vadd.xlane.f32.xlu1 %v5378_v31  ;;  %8817 = vmatmul.mubr.msk.f32.gmra.mxu0 %vm2882_vm4, %v9811_v36  ;;  %v5047_v31 = vmul.f32 %v11353_v39, %v2159_v5  ;;  %v11630_v27 = vld [vmem:[%s11177_s28 + $0xa0] sm:$0xff]  ;;  %v11633_v36 = vld [vmem:[%s11177_s28 + $0xb8] sm:$0xff] }
 0x243   : > { %v11621_v15 = vpop.f32.mrf.mxu0  ;;  %3308 = vmatprep.mubr.f32.mxu0 %v17316_v57  ;;  %v5377_v5 = vmul.f32 %v11630_v27, %v2642_v0 }
 0x244   : > { %17322 = vst [vmem:[#allocation25_spill] sm:$0xff] %v11621_v15  ;;  %v11626_v49 = vpop.f32.mrf.mxu1 }
 0x245   : > { %5136 = vadd.xlane.f32.xlu0 %v5110_v16  ;;  %v11635_v62 = vpop.f32.mrf.mxu0  ;;  %v2161_v16 = vadd.f32 %v11381_v55, %v11171_v17  ;;  %v2165_v55 = vadd.f32 %v11396_v7, %v11163_v23  ;;  %v5382_v7 = vmul.f32 %v11667_v22, %v2667_v4 }
 0x246   : > { %17323 = vst [vmem:[#allocation26_spill] sm:$0xff] %v11635_v62  ;;  %v11637_v56 = vpop.f32.mrf.mxu1  ;;  %5074 = vadd.xlane.f32.xlu1 %v5047_v31  ;;  %8818 = vmatmul.mubr.msk.f32.gmra.mxu0 %vm2882_vm4, %v9812_v47  ;;  %v5380_v31 = vmul.f32 %v11633_v36, %v2657_v18  ;;  %v5379_v18 = vmul.f32 %v11653_v54, %v2652_v2  ;;  %v9814_v2 = vld [vmem:[%s10315_s17 + $0x140] sm:$0xff] }
 0x247   : > { %v11644_v15 = vpop.f32.mrf.mxu0  ;;  %3314 = vmatprep.mubr.f32.mxu0 %v17316_v57  ;;  %v5111_v19 = vmul.f32 %v11353_v39, %v2161_v16  ;;  %v5048_v1 = vmul.f32 %v11445_v28, %v2165_v55  ;;  %v2171_v39 = vadd.f32 %v11418_v8, %v11163_v23  ;;  %v2662_v55 = vadd.f32 %v11413_v51, %v11167_v12 }
 0x248   : > { %17324 = vst [vmem:[#allocation27_spill] sm:$0xff] %v11644_v15  ;;  %v11649_v62 = vpop.f32.mrf.mxu1  ;;  %v9813_v15 = vld [vmem:[%s10315_s17 + $0x138] sm:$0xff]  ;;  %v2677_v8 = vadd.f32 %v11424_v25, %v11167_v12  ;;  %v2672_v25 = vadd.f32 %v11433_v60, %v11167_v12 }
 0x249   : > { %5397 = vadd.xlane.f32.xlu0 %v5377_v5  ;;  %v11655_v47 = vpop.f32.mrf.mxu0 }
 0x24a   : > { %17325 = vst [vmem:[#allocation28_spill] sm:$0xff] %v11655_v47  ;;  %v11659_v0 = vpop.f32.mrf.mxu1  ;;  %5403 = vadd.xlane.f32.xlu1 %v5380_v31  ;;  %8819 = vmatmul.mubr.msk.f32.gmra.mxu0 %vm2882_vm4, %v9813_v15 }
 0x24b   : > { %v11669_v5 = vpop.f32.mrf.mxu0  ;;  %3320 = vmatprep.mubr.f32.mxu0 %v17316_v57 }
 0x24c   : > { %17326 = vst [vmem:[#allocation29_spill] sm:$0xff] %v11669_v5  ;;  %v11672_v47 = vpop.f32.mrf.mxu1  ;;  %v2167_v5 = vadd.f32 %v11405_v42, %v11171_v17  ;;  %v9815_v42 = vld [vmem:[%s10315_s17 + $0x148] sm:$0xff] }
 0x24d   : > { %5401 = vadd.xlane.f32.xlu0 %v5379_v18  ;;  %v11675_v31 = vpop.f32.mrf.mxu0 }
 0x24e   : > { %17327 = vst [vmem:[#allocation30_spill] sm:$0xff] %v11675_v31  ;;  %v11677_v15 = vpop.f32.mrf.mxu1  ;;  %5138 = vadd.xlane.f32.xlu1 %v5111_v19  ;;  %8820 = vmatmul.mubr.msk.f32.gmra.mxu0 %vm2882_vm4, %v9814_v2  ;;  %v5112_v19 = vmul.f32 %v11445_v28, %v2167_v5  ;;  %v9816_v5 = vld [vmem:[%s10315_s17 + $0x150] sm:$0xff] }
 0x24f   : > { %v11685_v45 = vpop.f32.mrf.mxu0  ;;  %3326 = vmatprep.mubr.f32.mxu0 %v17316_v57 }
 0x250   : > { %17328 = vst [vmem:[#allocation31_spill] sm:$0xff] %v11685_v45  ;;  %v11690_v16 = vpop.f32.mrf.mxu1 }
 0x251   : > { %5076 = vadd.xlane.f32.xlu0 %v5048_v1  ;;  %v11692_v4 = vpop.f32.mrf.mxu0 }
 0x252   : > { %17329 = vst [vmem:[#allocation32_spill] sm:$0xff] %v11692_v4  ;;  %v11694_v18 = vpop.f32.mrf.mxu1  ;;  %5407 = vadd.xlane.f32.xlu1 %v5382_v7  ;;  %8821 = vmatmul.mubr.msk.f32.gmra.mxu0 %vm2882_vm4, %v9815_v42  ;;  %v5049_v7 = vmul.f32 %v11391_v61, %v2171_v39  ;;  %v11710_v4 = vld [vmem:[%s11177_s28 + $0xc0] sm:$0xff]  ;;  %v11713_v42 = vld [vmem:[%s11177_s28 + $0xd8] sm:$0xff] }
 0x253   : > { %v11701_v2 = vpop.f32.mrf.mxu0  ;;  %3332 = vmatprep.mubr.f32.mxu0 %v17316_v57  ;;  %v5381_v39 = vmul.f32 %v11710_v4, %v2662_v55  ;;  %v5384_v31 = vmul.f32 %v11713_v42, %v2677_v8  ;;  %v9817_v55 = vld [vmem:[%s10315_s17 + $0x158] sm:$0xff]  ;;  %v2183_v8 = vadd.f32 %v11468_v46, %v11163_v23 }
 0x254   : > { %17330 = vst [vmem:[#allocation33_spill] sm:$0xff] %v11701_v2  ;;  %v11706_v1 = vpop.f32.mrf.mxu1 }
 0x255   : > { %5140 = vadd.xlane.f32.xlu0 %v5112_v19  ;;  %v11715_v51 = vpop.f32.mrf.mxu0  ;;  %v2173_v19 = vadd.f32 %v11426_v6, %v11171_v17 }
 0x256   : > { %17331 = vst [vmem:[#allocation34_spill] sm:$0xff] %v11715_v51  ;;  %v11717_v28 = vpop.f32.mrf.mxu1  ;;  %5078 = vadd.xlane.f32.xlu1 %v5049_v7  ;;  %8822 = vmatmul.mubr.msk.f32.gmra.mxu0 %vm2882_vm4, %v9816_v5  ;;  %v11733_v7 = vld [vmem:[%s11177_s28 + $0xd0] sm:$0xff] }
 0x257   : > { %v11724_v2 = vpop.f32.mrf.mxu0  ;;  %3338 = vmatprep.mubr.f32.mxu0 %v17316_v57  ;;  %v5383_v6 = vmul.f32 %v11733_v7, %v2672_v25  ;;  %v2179_v25 = vadd.f32 %v11454_v33, %v11171_v17  ;;  %v9819_v33 = vld [vmem:[%s10315_s17 + $0x168] sm:$0xff] }
 0x258   : > { %17332 = vst [vmem:[#allocation35_spill] sm:$0xff] %v11724_v2  ;;  %v11729_v51 = vpop.f32.mrf.mxu1  ;;  %v2177_v2 = vadd.f32 %v11438_v10, %v11163_v23  ;;  %v9818_v10 = vld [vmem:[%s10315_s17 + $0x160] sm:$0xff] }
 0x259   : > { %5405 = vadd.xlane.f32.xlu0 %v5381_v39  ;;  %v11735_v5 = vpop.f32.mrf.mxu0 }
 0x25a   : > { %17333 = vst [vmem:[#allocation36_spill] sm:$0xff] %v11735_v5  ;;  %v11737_v60 = vpop.f32.mrf.mxu1  ;;  %5411 = vadd.xlane.f32.xlu1 %v5384_v31  ;;  %8823 = vmatmul.mubr.msk.f32.gmra.mxu0 %vm2882_vm4, %v9817_v55  ;;  %v5113_v5 = vmul.f32 %v11391_v61, %v2173_v19  ;;  %v2185_v61 = vadd.f32 %v11486_v30, %v11171_v17 }
 0x25b   : > { %v11744_v37 = vpop.f32.mrf.mxu0  ;;  %3344 = vmatprep.mubr.f32.mxu0 %v17316_v57 }
 0x25c   : > { %17334 = vst [vmem:[#allocation37_spill] sm:$0xff] %v11744_v37  ;;  %v11749_v39 = vpop.f32.mrf.mxu1  ;;  %v5050_v37 = vmul.f32 %v11475_v38, %v2177_v2  ;;  %v2189_v2 = vadd.f32 %v11503_v41, %v11163_v23  ;;  %v9820_v41 = vld [vmem:[%s10315_s17 + $0x170] sm:$0xff] }
 0x25d   : > { %5409 = vadd.xlane.f32.xlu0 %v5383_v6  ;;  %v11752_v31 = vpop.f32.mrf.mxu0  ;;  %v5051_v6 = vmul.f32 %v11449_v35, %v2183_v8 }
 0x25e   : > { %17335 = vst [vmem:[#allocation38_spill] sm:$0xff] %v11752_v31  ;;  %v11754_v55 = vpop.f32.mrf.mxu1  ;;  %5142 = vadd.xlane.f32.xlu1 %v5113_v5  ;;  %8824 = vmatmul.mubr.msk.f32.gmra.mxu0 %vm2882_vm4, %v9818_v10  ;;  %v5114_v31 = vmul.f32 %v11475_v38, %v2179_v25  ;;  %v2191_v38 = vadd.f32 %v11509_v58, %v11171_v17 }
 0x25f   : > { %v11761_v46 = vpop.f32.mrf.mxu0  ;;  %3350 = vmatprep.mubr.f32.mxu0 %v17316_v57  ;;  %v5245_v25 = vmul.f32 %v11550_v26, %v2189_v2  ;;  %v2201_v58 = vadd.f32 %v11546_v52, %v11163_v23  ;;  %v2203_v2 = vadd.f32 %v11557_v44, %v11171_v17  ;;  %v4617_v44 = vld [vmem:[%s17063_s8] sm:$0x3] }
 0x260   : > { %17336 = vst [vmem:[#allocation39_spill] sm:$0xff] %v11761_v46  ;;  %v11766_v19 = vpop.f32.mrf.mxu1 }
 0x261   : > { %5080 = vadd.xlane.f32.xlu0 %v5050_v37  ;;  %v11769_v5 = vpop.f32.mrf.mxu0  ;;  %v2195_v37 = vadd.f32 %v11526_v24, %v11163_v23 }
 0x262   : > { %17337 = vst [vmem:[#allocation40_spill] sm:$0xff] %v11769_v5  ;;  %v11771_v10 = vpop.f32.mrf.mxu1  ;;  %5082 = vadd.xlane.f32.xlu1 %v5051_v6  ;;  %8825 = vmatmul.mubr.msk.f32.gmra.mxu0 %vm2882_vm4, %v9819_v33  ;;  %v5115_v5 = vmul.f32 %v11449_v35, %v2185_v61  ;;  %v2861_v35 = vld [vmem:[%s17062_s7] sm:$0x3] }
 0x263   : > { %v11778_v30 = vpop.f32.mrf.mxu0  ;;  %3356 = vmatprep.mubr.f32.mxu0 %v17316_v57  ;;  %v11821_v52 = vrot.slane %v2861_v35, %v11148_v43 }
 0x264   : > { %17338 = vst [vmem:[#allocation41_spill] sm:$0xff] %v11778_v30  ;;  %v11783_v8 = vpop.f32.mrf.mxu1  ;;  %v9821_v30 = vld [vmem:[%s10315_s17 + $0x178] sm:$0xff] }
 0x265   : > { %5144 = vadd.xlane.f32.xlu0 %v5114_v31  ;;  %v11786_v6 = vpop.f32.mrf.mxu0  ;;  %v2197_v31 = vadd.f32 %v11531_v3, %v11171_v17  ;;  %17342 = vst [vmem:[#allocation45_spill] sm:$0xff] %v11821_v52 }
 0x266   : > { %17339 = vst [vmem:[#allocation42_spill] sm:$0xff] %v11786_v6  ;;  %v11788_v33 = vpop.f32.mrf.mxu1  ;;  %5146 = vadd.xlane.f32.xlu1 %v5115_v5  ;;  %8826 = vmatmul.mubr.msk.f32.gmra.mxu0 %vm2882_vm4, %v9820_v41  ;;  %v5246_v5 = vmul.f32 %v11497_v13, %v2195_v37  ;;  %v2207_v6 = vadd.f32 %v11569_v11, %v11163_v23 }
 0x267   : > { %v11795_v24 = vpop.f32.mrf.mxu0  ;;  %3362 = vmatprep.mubr.f32.mxu0 %v17316_v57  ;;  %v2213_v37 = vadd.f32 %v11592_v20, %v11163_v23  ;;  %v2215_v11 = vadd.f32 %v11597_v53, %v11171_v17  ;;  %v2225_v20 = vadd.f32 %v11626_v49, %v11163_v23 }
 0x268   : > { %17340 = vst [vmem:[#allocation43_spill] sm:$0xff] %v11795_v24  ;;  %v11803_v61 = vpop.f32.mrf.mxu1  ;;  %v2209_v24 = vadd.f32 %v11579_v14, %v11171_v17  ;;  %v5309_v14 = vmul.f32 %v11550_v26, %v2191_v38  ;;  %v5310_v26 = vmul.f32 %v11497_v13, %v2197_v31  ;;  %v2227_v38 = vadd.f32 %v11637_v56, %v11171_v17  ;;  %v9822_v13 = vld [vmem:[%s10315_s17 + $0x180] sm:$0xff] }
 0x269   : > { %5261 = vadd.xlane.f32.xlu0 %v5245_v25  ;;  %v11810_v41 = vpop.f32.mrf.mxu0  ;;  %v5248_v49 = vmul.f32 %v11553_v50, %v2207_v6  ;;  %v11860_v56 = vrot.slane %v4617_v44, %v11156_v59  ;;  %v2233_v31 = vadd.f32 %v11659_v0, %v11171_v17  ;;  %v11880_v0 = vmul.f32 %v11653_v54, %v2225_v20 }
 0x26a   : > { %17341 = vst [vmem:[#allocation44_spill] sm:$0xff] %v11810_v41  ;;  %v11816_v3 = vpop.f32.mrf.mxu1  ;;  %5263 = vadd.xlane.f32.xlu1 %v5246_v5  ;;  %8827 = vmatmul.mubr.msk.f32.gmra.mxu0 %vm2882_vm4, %v9821_v30  ;;  %v11835_v30 = vrot.slane %v2861_v35, %v11156_v59  ;;  %v2219_v5 = vadd.f32 %v11610_v40, %v11163_v23 }
 0x26b   : > { %v11831_v25 = vpop.f32.mrf.mxu0  ;;  %3368 = vmatprep.mubr.f32.mxu0 %v17316_v57  ;;  %v2221_v41 = vadd.f32 %v11614_v29, %v11171_v17  ;;  %v5247_v35 = vmul.f32 %v11573_v21, %v2201_v58  ;;  %v11851_v40 = vrot.slane %v4617_v44, %v11148_v43  ;;  %v5312_v45 = vmul.f32 %v11553_v50, %v2209_v24 }
 0x26c   : > { %17343 = vst [vmem:[#allocation46_spill] sm:$0xff] %v11831_v25  ;;  %17344 = vst [vmem:[#allocation47_spill] sm:$0xff] %v11835_v30  ;;  %v11843_v53 = vpop.f32.mrf.mxu1  ;;  %v5311_v25 = vmul.f32 %v11573_v21, %v2203_v2  ;;  %v2231_v21 = vadd.f32 %v11649_v62, %v11163_v23  ;;  %v5249_v58 = vmul.f32 %v11630_v27, %v2213_v37 }
 0x26d   : > { %5325 = vadd.xlane.f32.xlu0 %v5309_v14  ;;  %v3082_v46 = vpop.f32.mrf.mxu0  ;;  %17345 = vst [vmem:[#allocation48_spill] sm:$0xff] %v11851_v40  ;;  %17346 = vst [vmem:[#allocation49_spill] sm:$0xff] %v11860_v56  ;;  %v11868_v2 = vmul.f32 %v11630_v27, %v2215_v11  ;;  %v2237_v50 = vadd.f32 %v11672_v47, %v11163_v23  ;;  %v5250_v44 = vmul.f32 %v11587_v63, %v2219_v5  ;;  %v9827_v40 = vld [vmem:[%s10315_s17 + $0x1a8] sm:$0xff] }
 0x26e   : > { %v11853_v29 = vpop.f32.mrf.mxu1  ;;  %5327 = vadd.xlane.f32.xlu1 %v5310_v26  ;;  %8828 = vmatmul.mubr.msk.f32.gmra.mxu0 %vm2882_vm4, %v9822_v13  ;;  %v11877_v62 = vmul.f32 %v11587_v63, %v2221_v41  ;;  %v2239_v27 = vadd.f32 %v11677_v15, %v11171_v17  ;;  %v2243_v37 = vadd.f32 %v11690_v16, %v11163_v23  ;;  %v9823_v16 = vld [vmem:[%s10315_s17 + $0x188] sm:$0xff] }
 0x26f   : > { %v3084_v6 = vpop.f32.mrf.mxu0  ;;  %3374 = vmatprep.mubr.f32.mxu0 %v17316_v57  ;;  %v2245_v47 = vadd.f32 %v11694_v18, %v11171_v17  ;;  %v11889_v11 = vmul.f32 %v11653_v54, %v2227_v38  ;;  %v2249_v63 = vadd.f32 %v11706_v1, %v11163_v23  ;;  %v2251_v41 = vadd.f32 %v11717_v28, %v11171_v17 }
 0x270   : > { %v11873_v24 = vpop.f32.mrf.mxu1  ;;  %v11898_v15 = vadd.f32 %v3082_v46, %v11821_v52  ;;  %v2255_v54 = vadd.f32 %v11729_v51, %v11163_v23  ;;  %v2257_v18 = vadd.f32 %v11737_v60, %v11171_v17  ;;  %v11907_v1 = vmul.f32 %v11633_v36, %v2231_v21 }
 0x271   : > { %5265 = vadd.xlane.f32.xlu0 %v5247_v35  ;;  %v3088_v14 = vpop.f32.mrf.mxu0  ;;  %v11910_v28 = vmul.f32 %v11633_v36, %v2233_v31  ;;  %v2261_v46 = vadd.f32 %v11749_v39, %v11163_v23  ;;  %v2263_v26 = vadd.f32 %v11754_v55, %v11171_v17  ;;  %v11923_v38 = vmul.f32 %v11710_v4, %v2237_v50  ;;  %v9824_v31 = vld [vmem:[%s10315_s17 + $0x190] sm:$0xff] }
 0x272   : > { %v11895_v5 = vpop.f32.mrf.mxu1  ;;  %5267 = vadd.xlane.f32.xlu1 %v5248_v49  ;;  %8829 = vmatmul.mubr.msk.f32.gmra.mxu0 %vm2882_vm4, %v9823_v16  ;;  %v11920_v60 = vadd.f32 %v3088_v14, %v11821_v52  ;;  %v2267_v36 = vadd.f32 %v11766_v19, %v11163_v23  ;;  %v11928_v35 = vadd.f32 %v3084_v6, %v11835_v30  ;;  %v3593_v21 = vmul.f32 0.044715, %v11898_v15  ;;  %v8860_v16 = vld [vmem:[%s11177_s28 + $0xf8] sm:$0xff] }
 0x273   : > { %v3090_v20 = vpop.f32.mrf.mxu0  ;;  %3380 = vmatprep.mubr.f32.mxu0 %v17316_v57  ;;  %v11931_v39 = vmul.f32 %v11667_v22, %v2243_v37  ;;  %v11934_v55 = vmul.f32 %v11710_v4, %v2239_v27  ;;  %v11942_v19 = vmul.f32 %v11667_v22, %v2245_v47  ;;  %v11948_v6 = vmul.f32 %v11733_v7, %v2251_v41 }
 0x274   : > { %v11917_v51 = vpop.f32.mrf.mxu1  ;;  %v2269_v4 = vadd.f32 %v11771_v10, %v11171_v17  ;;  %v11956_v27 = vmul.f32 %v11713_v42, %v2255_v54  ;;  %v11959_v22 = vmul.f32 %v11713_v42, %v2257_v18  ;;  %v3595_v10 = vmul.f32 0.044715, %v11920_v60 }
 0x275   : > { %5329 = vadd.xlane.f32.xlu0 %v5311_v25  ;;  %v3094_v49 = vpop.f32.mrf.mxu0  ;;  %v11945_v25 = vmul.f32 %v11733_v7, %v2249_v63  ;;  %v2275_v7 = vadd.f32 %v11788_v33, %v11171_v17  ;;  %v11970_v47 = vmul.f32 %v11463_v34, %v2263_v26  ;;  %v2279_v14 = vadd.f32 %v11803_v61, %v11163_v23 }
 0x276   : > { %v11936_v13 = vpop.f32.mrf.mxu1  ;;  %5331 = vadd.xlane.f32.xlu1 %v5312_v45  ;;  %8830 = vmatmul.mubr.msk.f32.gmra.mxu0 %vm2882_vm4, %v9824_v31  ;;  %v2273_v45 = vadd.f32 %v11783_v8, %v11163_v23  ;;  %v11967_v8 = vmul.f32 %v11463_v34, %v2261_v46  ;;  %v2281_v42 = vadd.f32 %v11816_v3, %v11171_v17  ;;  %v3594_v33 = vmul.f32 0.044715, %v11928_v35 }
 0x277   : > { %v3096_v50 = vpop.f32.mrf.mxu0  ;;  %3386 = vmatprep.mubr.f32.mxu0 %v17316_v57  ;;  %v11978_v41 = vmul.f32 %v11452_v32, %v2267_v36  ;;  %v3721_v34 = vmul.f32 %v3593_v21, %v11898_v15  ;;  %v11987_v61 = vadd.f32 %v3090_v20, %v11835_v30  ;;  %v11990_v3 = vadd.f32 %v3094_v49, %v11821_v52 }
 0x278   : > { %v11963_v37 = vpop.f32.mrf.mxu1  ;;  %v2285_v46 = vadd.f32 %v11843_v53, %v11163_v23  ;;  %v2287_v26 = vadd.f32 %v11853_v29, %v11171_v17  ;;  %v12002_v20 = vmul.f32 %v11452_v32, %v2269_v4  ;;  %v12005_v49 = vmul.f32 %v11500_v9, %v2273_v45 }
 0x279   : > { %5269 = vadd.xlane.f32.xlu0 %v5249_v58  ;;  %v3100_v63 = vpop.f32.mrf.mxu0  ;;  %v9825_v58 = vld [vmem:[%s10315_s17 + $0x198] sm:$0xff]  ;;  %v3723_v31 = vmul.f32 %v3595_v10, %v11920_v60  ;;  %v12011_v53 = vadd.f32 %v3096_v50, %v11835_v30  ;;  %v2291_v32 = vadd.f32 %v11873_v24, %v11163_v23  ;;  %v2293_v4 = vadd.f32 %v11895_v5, %v11171_v17 }
 0x27a   : > { %v11981_v54 = vpop.f32.mrf.mxu1  ;;  %5271 = vadd.xlane.f32.xlu1 %v5250_v44  ;;  %v11983_v18 = vpop.xlane.xlu0 %5052  ;;  %8831 = vmatmul.mubr.msk.f32.gmra.mxu0 %vm2882_vm4, %v9825_v58  ;;  %v12014_v29 = vadd.f32 %v3100_v63, %v11821_v52  ;;  %v12017_v58 = vmul.f32 %v11500_v9, %v2275_v7  ;;  %v3722_v45 = vmul.f32 %v3594_v33, %v11928_v35  ;;  %v3596_v7 = vmul.f32 0.044715, %v11987_v61 }
 0x27b   : > { %17347 = vst [vmem:[#allocation50_spill] sm:$0xff] %v11983_v18  ;;  %v11998_v44 = vpop.xlane.xlu1 %5182  ;;  %v3102_v36 = vpop.f32.mrf.mxu0  ;;  %3392 = vmatprep.mubr.f32.mxu0 %v17316_v57  ;;  %v12025_v50 = vmul.f32 %v8860_v16, %v2279_v14  ;;  %v3849_v24 = vmul.f32 %v3721_v34, %v11898_v15  ;;  %v3597_v5 = vmul.f32 0.044715, %v11990_v3  ;;  %v12038_v33 = vmul.f32 %v8860_v16, %v2281_v42 }
 0x27c   : > { %17348 = vst [vmem:[#allocation51_spill] sm:$0xff] %v11998_v44  ;;  %v12007_v21 = vpop.f32.mrf.mxu1  ;;  %v8862_v44 = vld [vmem:[%s11177_s28 + $0x108] sm:$0xff]  ;;  %v2297_v14 = vadd.f32 %v11917_v51, %v11163_v23  ;;  %v12049_v34 = vmul.f32 %v11521_v48, %v2287_v26  ;;  %v3851_v16 = vmul.f32 %v3723_v31, %v11920_v60  ;;  %v3598_v51 = vmul.f32 0.044715, %v12011_v53 }
 0x27d   : > { %5333 = vadd.xlane.f32.xlu0 %v11868_v2  ;;  %v3106_v10 = vpop.f32.mrf.mxu0  ;;  %v9826_v2 = vld [vmem:[%s10315_s17 + $0x1a0] sm:$0xff]  ;;  %v12061_v18 = vadd.f32 %v3102_v36, %v11835_v30  ;;  %v3977_v36 = vadd.f32 %v3849_v24, %v11898_v15  ;;  %v12094_v24 = vmul.f32 0.5, %v11920_v60 }
 0x27e   : > { %v12028_v59 = vpop.f32.mrf.mxu1  ;;  %5335 = vadd.xlane.f32.xlu1 %v11877_v62  ;;  %v12031_v9 = vpop.xlane.xlu0 %5116  ;;  %8832 = vmatmul.mubr.msk.f32.gmra.mxu0 %vm2882_vm4, %v9826_v2  ;;  %v12046_v62 = vmul.f32 %v11521_v48, %v2285_v46  ;;  %v8863_v2 = vld [vmem:[%s11177_s28 + $0x110] sm:$0xff]  ;;  %v12063_v46 = vmul.f32 %v8862_v44, %v2293_v4  ;;  %v3850_v48 = vmul.f32 %v3722_v45, %v11928_v35  ;;  %v12083_v45 = vmul.f32 0.5, %v11928_v35 }
 0x27f   : > { %17349 = vst [vmem:[#allocation52_spill] sm:$0xff] %v12031_v9  ;;  %v12042_v63 = vpop.xlane.xlu1 %5054  ;;  %v3108_v43 = vpop.f32.mrf.mxu0  ;;  %3398 = vmatprep.mubr.f32.mxu0 %v17316_v57  ;;  %v12052_v9 = vmul.f32 0.5, %v11898_v15  ;;  %v12068_v26 = vadd.f32 %v3106_v10, %v11821_v52  ;;  %v3724_v4 = vmul.f32 %v3596_v7, %v11987_v61  ;;  %17357 = vst [vmem:[#allocation60_spill] sm:$0xff] %v12094_v24 }
 0x280   : > { %17350 = vst [vmem:[#allocation53_spill] sm:$0xff] %v12042_v63  ;;  %v12055_v42 = vpop.f32.mrf.mxu1  ;;  %v3599_v63 = vmul.f32 0.044715, %v12014_v29  ;;  %17354 = vst [vmem:[#allocation57_spill] sm:$0xff] %v12083_v45  ;;  %v3979_v7 = vadd.f32 %v3851_v16, %v11920_v60  ;;  %v12112_v60 = vmul.f32 0.5, %v11987_v61  ;;  %v8864_v16 = vld [vmem:[%s11177_s28 + $0x118] sm:$0xff] }
 0x281   : > { %17351 = vst [vmem:[#allocation54_spill] sm:$0xff] %v12052_v9  ;;  %5273 = vadd.xlane.f32.xlu0 %v11880_v0  ;;  %17352 = vst [vmem:[#allocation55_spill] sm:$0xff] %v12068_v26  ;;  %v3112_v12 = vpop.f32.mrf.mxu0  ;;  %v12070_v9 = vmul.f32 %v8862_v44, %v2291_v32  ;;  %v3725_v0 = vmul.f32 %v3597_v5, %v11990_v3  ;;  %v12085_v44 = vmul.f32 %v8863_v2, %v2297_v14  ;;  %v9828_v45 = vld [vmem:[%s10315_s17 + $0x1b0] sm:$0xff] }
 0x282   : > { %v12072_v31 = vpop.f32.mrf.mxu1  ;;  %5275 = vadd.xlane.f32.xlu1 %v11907_v1  ;;  %v12075_v56 = vpop.xlane.xlu0 %5180  ;;  %8833 = vmatmul.mubr.msk.f32.gmra.mxu0 %vm2882_vm4, %v9827_v40  ;;  %v2299_v32 = vadd.f32 %v11936_v13, %v11171_v17  ;;  %v2303_v1 = vadd.f32 %v11963_v37, %v11163_v23  ;;  %v3726_v5 = vmul.f32 %v3598_v51, %v12011_v53  ;;  %v3600_v37 = vmul.f32 0.044715, %v12061_v18 }
 0x283   : > { %17353 = vst [vmem:[#allocation56_spill] sm:$0xff] %v12075_v56  ;;  %17355 = vst [vmem:[#allocation58_spill] sm:$0xff] %v12085_v44  ;;  %v12091_v15 = vpop.xlane.xlu1 %5186  ;;  %v3114_v10 = vpop.f32.mrf.mxu0  ;;  %3404 = vmatprep.mubr.f32.mxu0 %v17316_v57  ;;  %v3727_v13 = vmul.f32 %v3599_v63, %v12014_v29  ;;  %v12105_v14 = vadd.f32 %v3850_v48, %v11928_v35  ;;  %v12109_v56 = vadd.f32 %v3108_v43, %v11835_v30 }
 0x284   : > { %17356 = vst [vmem:[#allocation59_spill] sm:$0xff] %v12091_v15  ;;  %v12097_v40 = vpop.f32.mrf.mxu1  ;;  %v3601_v15 = vmul.f32 0.044715, %v12068_v26  ;;  %17360 = vst [vmem:[#allocation63_spill] sm:$0xff] %v12112_v60  ;;  %v12115_v51 = vmul.f32 0.7978846, %v3977_v36  ;;  %v3852_v35 = vmul.f32 %v3724_v4, %v11987_v61  ;;  %v3853_v48 = vmul.f32 %v3725_v0, %v11990_v3 }
 0x285   : > { %5337 = vadd.xlane.f32.xlu0 %v11889_v11  ;;  %17358 = vst [vmem:[#allocation61_spill] sm:$0xff] %v12105_v14  ;;  %17359 = vst [vmem:[#allocation62_spill] sm:$0xff] %v12109_v56  ;;  %v3118_v24 = vpop.f32.mrf.mxu0  ;;  %v12125_v43 = vadd.f32 %v3112_v12, %v11821_v52  ;;  %v12129_v60 = vmul.f32 %v8864_v16, %v2303_v1  ;;  %v2305_v36 = vadd.f32 %v11981_v54, %v11171_v17 }
 0x286   : > { %17361 = vst [vmem:[#allocation64_spill] sm:$0xff] %v12115_v51  ;;  %v12117_v63 = vpop.f32.mrf.mxu1  ;;  %5339 = vadd.xlane.f32.xlu1 %v11910_v28  ;;  %v12120_v11 = vpop.xlane.xlu0 %5184  ;;  %8834 = vmatmul.mubr.msk.f32.gmra.mxu0 %vm2882_vm4, %v9828_v45  ;;  %v12135_v14 = vmul.f32 %v8863_v2, %v2299_v32  ;;  %v12138_v4 = vmul.f32 0.5, %v11990_v3  ;;  %v12143_v0 = vmul.f32 0.7978846, %v3979_v7  ;;  %v3854_v45 = vmul.f32 %v3726_v5, %v12011_v53 }
 0x287   : > { %17362 = vst [vmem:[#allocation65_spill] sm:$0xff] %v12120_v11  ;;  %17363 = vst [vmem:[#allocation66_spill] sm:$0xff] %v12125_v43  ;;  %v12133_v51 = vpop.xlane.xlu1 %5118  ;;  %v3120_v28 = vpop.f32.mrf.mxu0  ;;  %3410 = vmatprep.mubr.f32.mxu0 %v17316_v57  ;;  %v3855_v1 = vmul.f32 %v3727_v13, %v12014_v29  ;;  %v3728_v54 = vmul.f32 %v3600_v37, %v12061_v18  ;;  %v2309_v2 = vadd.f32 %v12007_v21, %v11163_v23 }
 0x288   : > { %17364 = vst [vmem:[#allocation67_spill] sm:$0xff] %v12129_v60  ;;  %17365 = vst [vmem:[#allocation68_spill] sm:$0xff] %v12133_v51  ;;  %v12141_v12 = vpop.f32.mrf.mxu1  ;;  %v3729_v32 = vmul.f32 %v3601_v15, %v12068_v26  ;;  %v3602_v11 = vmul.f32 0.044715, %v12109_v56  ;;  %v12154_v51 = vadd.f32 %v3114_v10, %v11835_v30  ;;  %v12162_v13 = vadd.f32 %v3852_v35, %v11987_v61  ;;  %v9829_v10 = vld [vmem:[%s10315_s17 + $0x1b8] sm:$0xff] }
 0x289   : > { %17366 = vst [vmem:[#allocation69_spill] sm:$0xff] %v12143_v0  ;;  %5277 = vadd.xlane.f32.xlu0 %v11923_v38  ;;  %v3124_v7 = vpop.f32.mrf.mxu0  ;;  %v3981_v38 = vadd.f32 %v3853_v48, %v11990_v3  ;;  %v3603_v21 = vmul.f32 0.044715, %v12125_v43  ;;  %v12167_v15 = vadd.f32 %v3118_v24, %v11821_v52  ;;  %v12171_v37 = vmul.f32 %v8864_v16, %v2305_v36  ;;  %v8865_v24 = vld [vmem:[%s11177_s28 + $0x120] sm:$0xff] }
 0x28a   : > { %v12156_v0 = vpop.f32.mrf.mxu1  ;;  %5279 = vadd.xlane.f32.xlu1 %v11931_v39  ;;  %v12159_v5 = vpop.xlane.xlu0 %5056  ;;  %17368 = vst [vmem:[#allocation71_spill] sm:$0xff] %v12162_v13  ;;  %8835 = vmatmul.mubr.msk.f32.gmra.mxu0 %vm2882_vm4, %v9829_v10  ;;  %v2311_v39 = vadd.f32 %v12028_v59, %v11171_v17  ;;  %v12180_v35 = vmul.f32 0.5, %v12011_v53  ;;  %v3982_v16 = vadd.f32 %v3854_v45, %v12011_v53  ;;  %v8866_v53 = vld [vmem:[%s11177_s28 + $0x128] sm:$0xff] }
 0x28b   : > { %17367 = vst [vmem:[#allocation70_spill] sm:$0xff] %v12159_v5  ;;  %17369 = vst [vmem:[#allocation72_spill] sm:$0xff] %v12167_v15  ;;  %v2315_v5 = vadd.f32 %v12055_v42, %v11163_v23  ;;  %v12177_v61 = vpop.xlane.xlu1 %5190  ;;  %v3126_v3 = vpop.f32.mrf.mxu0  ;;  %3416 = vmatprep.mubr.f32.mxu0 %v17316_v57  ;;  %v3983_v36 = vadd.f32 %v3855_v1, %v12014_v29  ;;  %v3856_v59 = vmul.f32 %v3728_v54, %v12061_v18 }
 0x28c   : > { %17370 = vst [vmem:[#allocation73_spill] sm:$0xff] %v12171_v37  ;;  %17371 = vst [vmem:[#allocation74_spill] sm:$0xff] %v12177_v61  ;;  %v12184_v48 = vpop.f32.mrf.mxu1  ;;  %v12190_v42 = vadd.f32 %v3124_v7, %v11821_v52  ;;  %v12192_v10 = vmul.f32 %v8865_v24, %v2309_v2  ;;  %v3857_v61 = vmul.f32 %v3729_v32, %v12068_v26  ;;  %v3604_v37 = vmul.f32 0.044715, %v12154_v51  ;;  %v9830_v32 = vld [vmem:[%s10315_s17 + $0x1c0] sm:$0xff] }
 0x28d   : > { %17372 = vst [vmem:[#allocation75_spill] sm:$0xff] %v12180_v35  ;;  %5341 = vadd.xlane.f32.xlu0 %v11934_v55  ;;  %v3730_v13 = vmul.f32 %v3602_v11, %v12109_v56  ;;  %v3130_v60 = vpop.f32.mrf.mxu0  ;;  %v4109_v45 = vmul.f32 0.7978846, %v3981_v38  ;;  %v3731_v2 = vmul.f32 %v3603_v21, %v12125_v43  ;;  %v3605_v7 = vmul.f32 0.044715, %v12167_v15 }
 0x28e   : > { %17373 = vst [vmem:[#allocation76_spill] sm:$0xff] %v12190_v42  ;;  %17374 = vst [vmem:[#allocation77_spill] sm:$0xff] %v12192_v10  ;;  %v12199_v1 = vpop.f32.mrf.mxu1  ;;  %5343 = vadd.xlane.f32.xlu1 %v11942_v19  ;;  %v12202_v54 = vpop.xlane.xlu0 %5120  ;;  %v12207_v55 = vadd.f32 %v3120_v28, %v11835_v30  ;;  %8836 = vmatmul.mubr.msk.f32.gmra.mxu0 %vm2882_vm4, %v9830_v32  ;;  %v12211_v11 = vmul.f32 %v8866_v53, %v2315_v5  ;;  %v12224_v44 = vmul.f32 0.7978846, %v3983_v36 }
 0x28f   : > { %17375 = vst [vmem:[#allocation78_spill] sm:$0xff] %v12202_v54  ;;  %v2317_v38 = vadd.f32 %v12072_v31, %v11171_v17  ;;  %v2321_v19 = vadd.f32 %v12097_v40, %v11163_v23  ;;  %v12217_v54 = vpop.xlane.xlu1 %5058  ;;  %v3132_v21 = vpop.f32.mrf.mxu0  ;;  %v12219_v10 = vmul.f32 %v8865_v24, %v2311_v39  ;;  %3422 = vmatprep.mubr.f32.mxu0 %v17316_v57  ;;  %v3607_v31 = vmul.f32 0.044715, %v12190_v42 }
 0x290   : > { %17376 = vst [vmem:[#allocation79_spill] sm:$0xff] %v12207_v55  ;;  %17377 = vst [vmem:[#allocation80_spill] sm:$0xff] %v12211_v11  ;;  %v12222_v28 = vpop.f32.mrf.mxu1  ;;  %v12227_v5 = vadd.f32 %v3856_v59, %v12061_v18  ;;  %v4110_v32 = vmul.f32 0.7978846, %v3982_v16  ;;  %v3985_v40 = vadd.f32 %v3857_v61, %v12068_v26  ;;  %v3858_v39 = vmul.f32 %v3730_v13, %v12109_v56  ;;  %v8867_v11 = vld [vmem:[%s11177_s28 + $0x130] sm:$0xff]  ;;  %v9831_v13 = vld [vmem:[%s10315_s17 + $0x1c8] sm:$0xff] }
 0x291   : > { %17378 = vst [vmem:[#allocation81_spill] sm:$0xff] %v12217_v54  ;;  %5281 = vadd.xlane.f32.xlu0 %v11945_v25  ;;  %v3732_v24 = vmul.f32 %v3604_v37, %v12154_v51  ;;  %v12235_v54 = vadd.f32 %v3126_v3, %v11835_v30  ;;  %v3136_v36 = vpop.f32.mrf.mxu0  ;;  %v3859_v16 = vmul.f32 %v3731_v2, %v12125_v43  ;;  %v3606_v61 = vmul.f32 0.044715, %v12207_v55 }
 0x292   : > { %v12238_v35 = vpop.f32.mrf.mxu1  ;;  %5283 = vadd.xlane.f32.xlu1 %v11956_v27  ;;  %v12241_v59 = vpop.xlane.xlu0 %5188  ;;  %v3733_v25 = vmul.f32 %v3605_v7, %v12167_v15  ;;  %9326 = vtanh.f32 %v4109_v45  ;;  %8837 = vmatmul.mubr.msk.f32.gmra.mxu0 %vm2882_vm4, %v9831_v13  ;;  %v12248_v37 = vmul.f32 %v8867_v11, %v2321_v19  ;;  %v2323_v3 = vadd.f32 %v12117_v63, %v11171_v17 }
 0x293   : > { %17379 = vst [vmem:[#allocation82_spill] sm:$0xff] %v12235_v54  ;;  %17380 = vst [vmem:[#allocation83_spill] sm:$0xff] %v12241_v59  ;;  %v12252_v26 = vpop.xlane.xlu1 %5194  ;;  %v12255_v27 = vadd.f32 %v3130_v60, %v11821_v52  ;;  %v3138_v59 = vpop.f32.mrf.mxu0  ;;  %v12257_v2 = vmul.f32 %v8866_v53, %v2317_v38  ;;  %3428 = vmatprep.mubr.f32.mxu0 %v17316_v57  ;;  %v2327_v45 = vadd.f32 %v12141_v12, %v11163_v23 }
 0x294   : > { %17381 = vst [vmem:[#allocation84_spill] sm:$0xff] %v12248_v37  ;;  %17382 = vst [vmem:[#allocation85_spill] sm:$0xff] %v12252_v26  ;;  %v12262_v7 = vpop.f32.mrf.mxu1  ;;  %v3735_v19 = vmul.f32 %v3607_v31, %v12190_v42  ;;  %v12266_v63 = vadd.f32 %v3132_v21, %v11835_v30  ;;  %v12269_v13 = vadd.f32 %v3136_v36, %v11821_v52  ;;  %v3608_v38 = vmul.f32 0.044715, %v12235_v54 }
 0x295   : > { %17383 = vst [vmem:[#allocation86_spill] sm:$0xff] %v12255_v27  ;;  %v2329_v60 = vadd.f32 %v12156_v0, %v11171_v17  ;;  %5345 = vadd.xlane.f32.xlu0 %v11948_v6  ;;  %v12275_v53 = vadd.f32 %v3858_v39, %v12109_v56  ;;  %v3860_v12 = vmul.f32 %v3732_v24, %v12154_v51  ;;  %v3142_v31 = vpop.f32.mrf.mxu0  ;;  %v12279_v26 = vmul.f32 0.7978846, %v3985_v40  ;;  %v9832_v56 = vld [vmem:[%s10315_s17 + $0x1d0] sm:$0xff]  ;;  %v8868_v24 = vld [vmem:[%s11177_s28 + $0x138] sm:$0xff] }
 0x296   : > { %17384 = vst [vmem:[#allocation87_spill] sm:$0xff] %v12266_v63  ;;  %17385 = vst [vmem:[#allocation88_spill] sm:$0xff] %v12269_v13  ;;  %v12281_v21 = vpop.f32.mrf.mxu1  ;;  %5347 = vadd.xlane.f32.xlu1 %v11959_v22  ;;  %v12284_v36 = vpop.xlane.xlu0 %5192  ;;  %v3987_v0 = vadd.f32 %v3859_v16, %v12125_v43  ;;  %v3861_v6 = vmul.f32 %v3733_v25, %v12167_v15  ;;  %v3734_v39 = vmul.f32 %v3606_v61, %v12207_v55 }
 0x297   : > { %17386 = vst [vmem:[#allocation89_spill] sm:$0xff] %v12275_v53  ;;  %17387 = vst [vmem:[#allocation90_spill] sm:$0xff] %v12279_v26  ;;  %8838 = vmatmul.mubr.msk.f32.gmra.mxu0 %vm2882_vm4, %v9832_v56  ;;  %v12292_v53 = vmul.f32 %v8867_v11, %v2323_v3  ;;  %v2333_v40 = vadd.f32 %v12184_v48, %v11163_v23  ;;  %v12296_v26 = vpop.xlane.xlu1 %5122  ;;  %v3609_v22 = vmul.f32 0.044715, %v12255_v27  ;;  %9328 = vtanh.f32 %v4110_v32 }
 0x298   : > { %17388 = vst [vmem:[#allocation91_spill] sm:$0xff] %v12284_v36  ;;  %17389 = vst [vmem:[#allocation92_spill] sm:$0xff] %v12296_v26  ;;  %v3144_v36 = vpop.f32.mrf.mxu0  ;;  %3434 = vmatprep.mubr.f32.mxu0 %v17316_v57  ;;  %v12300_v16 = vmul.f32 %v8868_v24, %v2327_v45  ;;  %v12302_v25 = vpop.f32.mrf.mxu1  ;;  %v3863_v56 = vmul.f32 %v3735_v19, %v12190_v42  ;;  %v3610_v11 = vmul.f32 0.044715, %v12266_v63  ;;  %v3611_v48 = vmul.f32 0.044715, %v12269_v13 }
 0x299   : > { %v12307_v61 = vmul.f32 %v8868_v24, %v2329_v60  ;;  %5285 = vadd.xlane.f32.xlu0 %v11967_v8  ;;  %v12311_v3 = vadd.f32 %v3860_v12, %v12154_v51  ;;  %v3736_v32 = vmul.f32 %v3608_v38, %v12235_v54  ;;  %v12315_v45 = vadd.f32 %v3138_v59, %v11835_v30  ;;  %v9833_v38 = vld [vmem:[%s10315_s17 + $0x1d8] sm:$0xff] }
 0x29a   : > { %17390 = vst [vmem:[#allocation93_spill] sm:$0xff] %v12300_v16  ;;  %v3148_v26 = vpop.f32.mrf.mxu0  ;;  %v8869_v16 = vld [vmem:[%s11177_s28 + $0x140] sm:$0xff]  ;;  %v2335_v19 = vadd.f32 %v12199_v1, %v11171_v17  ;;  %v12320_v37 = vmul.f32 0.7978846, %v3987_v0  ;;  %v12322_v43 = vpop.f32.mrf.mxu1  ;;  %5287 = vadd.xlane.f32.xlu1 %v11978_v41  ;;  %v3989_v60 = vadd.f32 %v3861_v6, %v12167_v15  ;;  %v3862_v12 = vmul.f32 %v3734_v39, %v12207_v55 }
 0x29b   : > { %v12325_v8 = vpop.xlane.xlu0 %5060  ;;  %8839 = vmatmul.mubr.msk.f32.gmra.mxu0 %vm2882_vm4, %v9833_v38  ;;  %v12331_v59 = vmul.f32 %v8869_v16, %v2333_v40  ;;  %v2339_v1 = vadd.f32 %v12222_v28, %v11163_v23  ;;  %v12335_v0 = vpop.xlane.xlu1 %5198  ;;  %v3737_v24 = vmul.f32 %v3609_v22, %v12255_v27  ;;  %v12339_v41 = vadd.f32 %v3142_v31, %v11821_v52 }
 0x29c   : > { %17391 = vst [vmem:[#allocation94_spill] sm:$0xff] %v12325_v8  ;;  %17393 = vst [vmem:[#allocation96_spill] sm:$0xff] %v12335_v0  ;;  %v3150_v8 = vpop.f32.mrf.mxu0  ;;  %3440 = vmatprep.mubr.f32.mxu0 %v17316_v57  ;;  %v12342_v6 = vpop.f32.mrf.mxu1  ;;  %v3991_v39 = vadd.f32 %v3863_v56, %v12190_v42  ;;  %v3738_v40 = vmul.f32 %v3610_v11, %v12266_v63  ;;  %v3739_v38 = vmul.f32 %v3611_v48, %v12269_v13  ;;  %v8870_v11 = vld [vmem:[%s11177_s28 + $0x148] sm:$0xff] }
 0x29d   : > { %17392 = vst [vmem:[#allocation95_spill] sm:$0xff] %v12331_v59  ;;  %17394 = vst [vmem:[#allocation97_spill] sm:$0xff] %v12339_v41  ;;  %v12348_v28 = vadd.f32 %v3144_v36, %v11835_v30  ;;  %5349 = vadd.xlane.f32.xlu0 %v11970_v47  ;;  %v3864_v31 = vmul.f32 %v3736_v32, %v12235_v54  ;;  %v3612_v22 = vmul.f32 0.044715, %v12315_v45  ;;  %v12357_v56 = vmul.f32 0.5, %v12014_v29  ;;  %v9834_v59 = vld [vmem:[%s10315_s17 + $0x1e0] sm:$0xff] }
 0x29e   : > { %v12354_v0 = vadd.f32 %v3148_v26, %v11821_v52  ;;  %v3154_v15 = vpop.f32.mrf.mxu0  ;;  %v12360_v42 = vmul.f32 %v8869_v16, %v2335_v19  ;;  %v2341_v36 = vadd.f32 %v12238_v35, %v11171_v17  ;;  %v12364_v48 = vmul.f32 0.7978846, %v3989_v60  ;;  %v12366_v47 = vpop.f32.mrf.mxu1  ;;  %5351 = vadd.xlane.f32.xlu1 %v12002_v20 }
 0x29f   : > { %17395 = vst [vmem:[#allocation98_spill] sm:$0xff] %v12348_v28  ;;  %v12369_v32 = vpop.xlane.xlu0 %5124  ;;  %v12372_v26 = vadd.f32 %v3862_v12, %v12207_v55  ;;  %8840 = vmatmul.mubr.msk.f32.gmra.mxu0 %vm2882_vm4, %v9834_v59  ;;  %v9327_v29 = vpop.eup %9326  ;;  %v12376_v16 = vmul.f32 %v8870_v11, %v2339_v1  ;;  %v3865_v35 = vmul.f32 %v3737_v24, %v12255_v27  ;;  %v3613_v60 = vmul.f32 0.044715, %v12339_v41 }
 0x2a0   : > { %17396 = vst [vmem:[#allocation99_spill] sm:$0xff] %v12354_v0  ;;  %17397 = vst [vmem:[#allocation100_spill] sm:$0xff] %v12360_v42  ;;  %v12378_v19 = vpop.xlane.xlu1 %5062  ;;  %v12383_v20 = vmul.f32 0.5, %v12061_v18  ;;  %3446 = vmatprep.mubr.f32.mxu0 %v17316_v57  ;;  %v12386_v12 = vpop.f32.mrf.mxu1  ;;  %v3866_v59 = vmul.f32 %v3738_v40, %v12266_v63  ;;  %v3867_v1 = vmul.f32 %v3739_v38, %v12269_v13  ;;  %9330 = vtanh.f32 %v12224_v44 }
 0x2a1   : > { %17398 = vst [vmem:[#allocation101_spill] sm:$0xff] %v12364_v48  ;;  %17399 = vst [vmem:[#allocation102_spill] sm:$0xff] %v12369_v32  ;;  %v3156_v48 = vpop.f32.mrf.mxu0  ;;  %v12388_v32 = vmul.f32 0.7978846, %v3991_v39  ;;  %v2345_v24 = vadd.f32 %v12262_v7, %v11163_v23  ;;  %5289 = vadd.xlane.f32.xlu0 %v12005_v49  ;;  %v12397_v18 = vadd.f32 %v3864_v31, %v12235_v54  ;;  %v3615_v39 = vmul.f32 0.044715, %v12354_v0 }
 0x2a2   : > { %17400 = vst [vmem:[#allocation103_spill] sm:$0xff] %v12372_v26  ;;  %17401 = vst [vmem:[#allocation104_spill] sm:$0xff] %v12376_v16  ;;  %v3740_v55 = vmul.f32 %v3612_v22, %v12315_v45  ;;  %v12401_v16 = vmul.f32 %v8870_v11, %v2341_v36  ;;  %v12403_v40 = vpop.f32.mrf.mxu1  ;;  %5291 = vadd.xlane.f32.xlu1 %v12025_v50  ;;  %v12409_v7 = vadd.f32 %v3150_v8, %v11835_v30  ;;  %v9835_v22 = vld [vmem:[%s10315_s17 + $0x1e8] sm:$0xff] }
 0x2a3   : > { %17402 = vst [vmem:[#allocation105_spill] sm:$0xff] %v12378_v19  ;;  %17403 = vst [vmem:[#allocation106_spill] sm:$0xff] %v12388_v32  ;;  %v3614_v19 = vmul.f32 0.044715, %v12348_v28  ;;  %v3160_v26 = vpop.f32.mrf.mxu0  ;;  %v12406_v38 = vpop.xlane.xlu0 %5196  ;;  %v12412_v49 = vadd.f32 %v3154_v15, %v11821_v52  ;;  %v12414_v31 = vadd.f32 1.0, %v9327_v29  ;;  %8841 = vmatmul.mubr.msk.f32.gmra.mxu0 %vm2882_vm4, %v9835_v22  ;;  %v2347_v11 = vadd.f32 %v12281_v21, %v11171_v17  ;;  %v8871_v29 = vld [vmem:[%s11177_s28 + $0x150] sm:$0xff] }
 0x2a4   : > { %17404 = vst [vmem:[#allocation107_spill] sm:$0xff] %v12397_v18  ;;  %17405 = vst [vmem:[#allocation108_spill] sm:$0xff] %v12406_v38  ;;  %v12420_v36 = vpop.xlane.xlu1 %5202  ;;  %v3993_v50 = vadd.f32 %v3865_v35, %v12255_v27  ;;  %v3741_v38 = vmul.f32 %v3613_v60, %v12339_v41  ;;  %v12425_v8 = vadd.f32 %v3156_v48, %v11835_v30  ;;  %3452 = vmatprep.mubr.f32.mxu0 %v17316_v57  ;;  %v12428_v15 = vpop.eup %9328 }
 0x2a5   : > { %17406 = vst [vmem:[#allocation109_spill] sm:$0xff] %v12409_v7  ;;  %17407 = vst [vmem:[#allocation110_spill] sm:$0xff] %v12412_v49  ;;  %v3162_v42 = vpop.f32.mrf.mxu0  ;;  %v2351_v22 = vadd.f32 %v12302_v25, %v11163_v23  ;;  %v12433_v54 = vpop.f32.mrf.mxu1  ;;  %v3994_v21 = vadd.f32 %v3866_v59, %v12266_v63  ;;  %v3995_v35 = vadd.f32 %v3867_v1, %v12269_v13  ;;  %5353 = vadd.xlane.f32.xlu0 %v12017_v58 }
 0x2a6   : > { %17408 = vst [vmem:[#allocation111_spill] sm:$0xff] %v12420_v36  ;;  %17409 = vst [vmem:[#allocation112_spill] sm:$0xff] %v12425_v8  ;;  %v3742_v60 = vmul.f32 %v3614_v19, %v12348_v28  ;;  %v12438_v48 = vmul.f32 %v8871_v29, %v2345_v24  ;;  %v2353_v36 = vadd.f32 %v12322_v43, %v11171_v17  ;;  %5355 = vadd.xlane.f32.xlu1 %v12038_v33  ;;  %v9836_v43 = vld [vmem:[%s10315_s17 + $0x1f0] sm:$0xff] }
 0x2a7   : > { %v3868_v27 = vmul.f32 %v3740_v55, %v12315_v45  ;;  %v3743_v25 = vmul.f32 %v3615_v39, %v12354_v0  ;;  %v3166_v32 = vpop.f32.mrf.mxu0  ;;  %v12445_v18 = vpop.f32.mrf.mxu1  ;;  %v3616_v19 = vmul.f32 0.044715, %v12409_v7  ;;  %v3617_v1 = vmul.f32 0.044715, %v12412_v49  ;;  %8842 = vmatmul.mubr.msk.f32.gmra.mxu0 %vm2882_vm4, %v9836_v43  ;;  %v8872_v55 = vld [vmem:[%s11177_s28 + $0x158] sm:$0xff] }
 0x2a8   : > { %17410 = vst [vmem:[#allocation113_spill] sm:$0xff] %v12438_v48  ;;  %17411 = vst [vmem:[#allocation114_spill] sm:$0xff] %v12445_v18  ;;  %v12448_v59 = vpop.xlane.xlu0 %5200  ;;  %v12453_v24 = vadd.f32 %v3160_v26, %v11821_v52  ;;  %v12456_v58 = vadd.f32 %v3162_v42, %v11835_v30  ;;  %v12461_v39 = vmul.f32 %v8871_v29, %v2347_v11  ;;  %v12463_v18 = vmul.f32 0.7978846, %v3993_v50  ;;  %v12465_v33 = vpop.xlane.xlu1 %5126 }
 0x2a9   : > { %17412 = vst [vmem:[#allocation115_spill] sm:$0xff] %v12448_v59  ;;  %17416 = vst [vmem:[#allocation119_spill] sm:$0xff] %v12465_v33  ;;  %v3869_v59 = vmul.f32 %v3741_v38, %v12339_v41  ;;  %v3618_v63 = vmul.f32 0.044715, %v12425_v8  ;;  %v3168_v48 = vpop.f32.mrf.mxu0  ;;  %3458 = vmatprep.mubr.f32.mxu0 %v17316_v57  ;;  %v12470_v26 = vmul.f32 %v8872_v55, %v2351_v22  ;;  %v12472_v42 = vmul.f32 0.7978846, %v3994_v21  ;;  %v12474_v13 = vpop.f32.mrf.mxu1 }
 0x2aa   : > { %17413 = vst [vmem:[#allocation116_spill] sm:$0xff] %v12453_v24  ;;  %17414 = vst [vmem:[#allocation117_spill] sm:$0xff] %v12456_v58  ;;  %v12476_v11 = vmul.f32 0.7978846, %v3995_v35  ;;  %v3870_v50 = vmul.f32 %v3742_v60, %v12348_v28  ;;  %v12479_v29 = vmul.f32 %v8872_v55, %v2353_v36  ;;  %v2357_v38 = vadd.f32 %v12342_v6, %v11163_v23  ;;  %v9837_v55 = vld [vmem:[%s10315_s17 + $0x1f8] sm:$0xff]  ;;  %v8873_v57 = vld [vmem:[%s11177_s28 + $0x160] sm:$0xff] }
 0x2ab   : > { %17415 = vst [vmem:[#allocation118_spill] sm:$0xff] %v12463_v18  ;;  %17417 = vst [vmem:[#allocation120_spill] sm:$0xff] %v12470_v26  ;;  %5470 = vadd.xlane.f32.xlu0 %v12046_v62  ;;  %v3996_v43 = vadd.f32 %v3868_v27, %v12315_v45  ;;  %v3871_v22 = vmul.f32 %v3743_v25, %v12354_v0  ;;  %v3172_v21 = vpop.f32.mrf.mxu0  ;;  %v12486_v33 = vpop.f32.mrf.mxu1  ;;  %5538 = vadd.xlane.f32.xlu1 %v12135_v14  ;;  %v3619_v6 = vmul.f32 0.044715, %v12453_v24  ;;  %s9901_s17 = smov 1  }
 0x2ac   : > { %17418 = vst [vmem:[#allocation121_spill] sm:$0xff] %v12472_v42  ;;  %17419 = vst [vmem:[#allocation122_spill] sm:$0xff] %v12486_v33  ;;  %v12489_v35 = vpop.xlane.xlu0 %5064  ;;  %v3744_v36 = vmul.f32 %v3616_v19, %v12409_v7  ;;  %v3745_v60 = vmul.f32 %v3617_v1, %v12412_v49  ;;  %v3620_v62 = vmul.f32 0.044715, %v12456_v58  ;;  %8843 = vmatmul.mubr.msk.f32.gmra.mxu0 %vm2882_vm4, %v9837_v55  ;;  %v12499_v25 = vpop.xlane.xlu1 %5206 }
 0x2ad   : > { %17420 = vst [vmem:[#allocation123_spill] sm:$0xff] %v12489_v35  ;;  %v2359_v27 = vadd.f32 %v12366_v47, %v11171_v17  ;;  %17421 = vst [vmem:[#allocation124_spill] sm:$0xff] %v12499_v25  ;;  %v3997_v14 = vadd.f32 %v3869_v59, %v12339_v41  ;;  %v3746_v35 = vmul.f32 %v3618_v63, %v12425_v8  ;;  %v3174_v1 = vpop.f32.mrf.mxu0  ;;  %v12509_v42 = vpop.f32.mrf.mxu1  ;;  %v12522_v25 = vmul.f32 0.7978846, %v3996_v43  ;;  %v8874_v43 = vld [vmem:[%s11177_s28 + $0x168] sm:$0xff] }
 0x2ae   : > { %v12504_v19 = vadd.f32 %v3166_v32, %v11821_v52  ;;  %v2363_v33 = vadd.f32 %v12386_v12, %v11163_v23  ;;  %v3998_v55 = vadd.f32 %v3870_v50, %v12348_v28  ;;  %v12513_v47 = vadd.f32 %v3168_v48, %v11835_v30 }
 0x2af   : > { %v12516_v59 = vadd.f32 %v3172_v21, %v11821_v52  ;;  %v12518_v63 = vmul.f32 %v8873_v57, %v2357_v38  ;;  %v2365_v32 = vadd.f32 %v12403_v40, %v11171_v17  ;;  %5534 = vadd.xlane.f32.xlu0 %v12049_v34  ;;  %v3999_v12 = vadd.f32 %v3871_v22, %v12354_v0  ;;  %v3178_v41 = vpop.f32.mrf.mxu0  ;;  %v12526_v50 = vpop.f32.mrf.mxu1 }
 0x2b0   : > { %17422 = vst [vmem:[#allocation125_spill] sm:$0xff] %v12504_v19  ;;  %17423 = vst [vmem:[#allocation126_spill] sm:$0xff] %v12513_v47  ;;  %5542 = vadd.xlane.f32.xlu1 %v12219_v10  ;;  %v12529_v48 = vpop.xlane.xlu0 %5128  ;;  %v3872_v21 = vmul.f32 %v3744_v36, %v12409_v7  ;;  %v3873_v38 = vmul.f32 %v3745_v60, %v12412_v49  ;;  %v3747_v28 = vmul.f32 %v3619_v6, %v12453_v24  ;;  %v12540_v22 = vpop.xlane.xlu1 %5066 }
 0x2b1   : > { %17424 = vst [vmem:[#allocation127_spill] sm:$0xff] %v12516_v59  ;;  %17425 = vst [vmem:[#allocation128_spill] sm:$0xff] %v12518_v63  ;;  %v3748_v40 = vmul.f32 %v3620_v62, %v12456_v58  ;;  %v12536_v18 = vmul.f32 %v8873_v57, %v2359_v27  ;;  %v12538_v34 = vmul.f32 0.7978846, %v3997_v14  ;;  %v3874_v63 = vmul.f32 %v3746_v35, %v12425_v8  ;;  %v12550_v6 = vpop.f32.mrf.mxu1 }
 0x2b2   : > { %17426 = vst [vmem:[#allocation129_spill] sm:$0xff] %v12529_v48  ;;  %17429 = vst [vmem:[#allocation132_spill] sm:$0xff] %v12540_v22  ;;  %v3621_v10 = vmul.f32 0.044715, %v12504_v19  ;;  %v12544_v48 = vpop.f32.mrf.mxu0  ;;  %v12546_v36 = vmul.f32 %v8874_v43, %v2363_v33  ;;  %v12548_v60 = vmul.f32 0.7978846, %v3998_v55  ;;  %v12554_v27 = vmul.f32 %v8874_v43, %v2365_v32 }
 0x2b3   : > { %17427 = vst [vmem:[#allocation130_spill] sm:$0xff] %v12536_v18  ;;  %17428 = vst [vmem:[#allocation131_spill] sm:$0xff] %v12538_v34  ;;  %v3622_v62 = vmul.f32 0.044715, %v12513_v47  ;;  %v3623_v57 = vmul.f32 0.044715, %v12516_v59  ;;  %v2369_v14 = vadd.f32 %v12433_v54, %v11163_v23  ;;  %5472 = vadd.xlane.f32.xlu0 %v12070_v9  ;;  %v12562_v22 = vpop.f32.mrf.mxu1  ;;  %v4001_v32 = vadd.f32 %v3873_v38, %v12412_v49 }
 0x2b4   : > { %17430 = vst [vmem:[#allocation133_spill] sm:$0xff] %v12546_v36  ;;  %17431 = vst [vmem:[#allocation134_spill] sm:$0xff] %v12548_v60  ;;  %v12558_v35 = vmul.f32 0.7978846, %v3999_v12  ;;  %v4366_v33 = vadd.f32 1.0, %v12428_v15  ;;  %5544 = vadd.xlane.f32.xlu1 %v12257_v2  ;;  %v12565_v55 = vpop.xlane.xlu0 %5204  ;;  %v4000_v60 = vadd.f32 %v3872_v21, %v12409_v7  ;;  %v3875_v43 = vmul.f32 %v3747_v28, %v12453_v24  ;;  %v12571_v12 = vpop.xlane.xlu1 %5210  ;;  %v17445_v49 = vld [vmem:[#allocation49_spill] sm:$0xff] }
 0x2b5   : > { %17432 = vst [vmem:[#allocation135_spill] sm:$0xff] %v12565_v55  ;;  %v3876_v54 = vmul.f32 %v3748_v40, %v12456_v58  ;;  %17433 = vst [vmem:[#allocation136_spill] sm:$0xff] %v12571_v12  ;;  %v4002_v9 = vadd.f32 %v3874_v63, %v12425_v8  ;;  %v3749_v15 = vmul.f32 %v3621_v10, %v12504_v19  ;;  %v4112_v2 = vmul.f32 0.7978846, %v12227_v5  ;;  %v3184_v55 = vpop.f32.mrf.mxu0  ;;  %v2392_v38 = vpop.f32.mrf.mxu1  ;;  %v8875_v12 = vld [vmem:[%s11177_s28 + $0x170] sm:$0xff]  ;;  %v17435_v63 = vld [vmem:[#allocation75_spill] sm:$0xff] }
 0x2b6   : > { %v12576_v34 = vadd.f32 %v3174_v1, %v11835_v30  ;;  %v2375_v21 = vadd.f32 %v12474_v13, %v11163_v23  ;;  %v3750_v28 = vmul.f32 %v3622_v62, %v12513_v47  ;;  %v3751_v40 = vmul.f32 %v3623_v57, %v12516_v59  ;;  %v8878_v18 = vld [vmem:[%s11177_s28 + $0x188] sm:$0xff]  ;;  %v17475_v7 = vld [vmem:[#allocation80_spill] sm:$0xff] }
 0x2b7   : > { %5536 = vadd.xlane.f32.xlu0 %v12063_v46  ;;  %v4493_v1 = vmul.f32 %v12414_v31, %v12138_v4  ;;  %v4494_v10 = vmul.f32 %v4366_v33, %v17435_v63  ;;  %v12590_v5 = vadd.f32 %v3178_v41, %v11821_v52  ;;  %9332 = vtanh.f32 %v4112_v2  ;;  %v3186_v13 = vpop.f32.mrf.mxu0  ;;  %v12596_v57 = vpop.f32.mrf.mxu1  ;;  %v8876_v2 = vld [vmem:[%s11177_s28 + $0x178] sm:$0xff] }
 0x2b8   : > { %17434 = vst [vmem:[#allocation137_spill] sm:$0xff] %v12576_v34  ;;  %v12592_v8 = vmul.f32 %v8875_v12, %v2369_v14  ;;  %v12594_v62 = vmul.f32 0.7978846, %v4000_v60  ;;  %5546 = vadd.xlane.f32.xlu1 %v12292_v53  ;;  %v12599_v46 = vpop.xlane.xlu0 %5208  ;;  %v4003_v44 = vadd.f32 %v3875_v43, %v12453_v24  ;;  %v4004_v4 = vadd.f32 %v3876_v54, %v12456_v58  ;;  %v12607_v33 = vpop.xlane.xlu1 %5130 }
 0x2b9   : > { %17436 = vst [vmem:[#allocation75_spill] sm:$0xff] %v12590_v5  ;;  %17438 = vst [vmem:[#allocation139_spill] sm:$0xff] %v12599_v46  ;;  %v12603_v31 = vmul.f32 0.7978846, %v4001_v32  ;;  %v12605_v41 = vmul.f32 0.7978846, %v4002_v9  ;;  %v3877_v14 = vmul.f32 %v3749_v15, %v12504_v19  ;;  %v3190_v12 = vpop.f32.mrf.mxu0  ;;  %v2381_v53 = vadd.f32 %v12509_v42, %v11163_v23  ;;  %v12616_v63 = vpop.f32.mrf.mxu1 }
 0x2ba   : > { %17437 = vst [vmem:[#allocation138_spill] sm:$0xff] %v12592_v8  ;;  %17441 = vst [vmem:[#allocation142_spill] sm:$0xff] %v12607_v33  ;;  %v3624_v60 = vmul.f32 0.044715, %v12576_v34  ;;  %v2383_v43 = vadd.f32 %v12526_v50, %v11171_v17  ;;  %v3878_v32 = vmul.f32 %v3750_v28, %v12513_v47  ;;  %v3879_v54 = vmul.f32 %v3751_v40, %v12516_v59  ;;  %v17443_v15 = vld [vmem:[#allocation58_spill] sm:$0xff]  ;;  %v17444_v46 = vld [vmem:[#allocation48_spill] sm:$0xff] }
 0x2bb   : > { %17439 = vst [vmem:[#allocation140_spill] sm:$0xff] %v12603_v31  ;;  %17440 = vst [vmem:[#allocation141_spill] sm:$0xff] %v12605_v41  ;;  %v12620_v9 = vmul.f32 %v8876_v2, %v2375_v21  ;;  %5474 = vadd.xlane.f32.xlu0 %v17443_v15  ;;  %v4633_v33 = vmul.f32 %v17444_v46, %v4493_v1  ;;  %v4634_v41 = vmul.f32 %v17445_v49, %v4494_v10  ;;  %v12626_v31 = vpop.f32.mrf.mxu0  ;;  %v12630_v8 = vpop.f32.mrf.mxu1  ;;  %v8877_v10 = vld [vmem:[%s11177_s28 + $0x180] sm:$0xff] }
 0x2bc   : > { %v3625_v42 = vmul.f32 0.044715, %v12590_v5  ;;  %v12628_v50 = vmul.f32 0.7978846, %v4003_v44  ;;  %5548 = vadd.xlane.f32.xlu1 %v12307_v61  ;;  %v12633_v28 = vpop.xlane.xlu0 %5068  ;;  %v12635_v21 = vmul.f32 0.7978846, %v4004_v4  ;;  %v12639_v40 = vadd.f32 %v12544_v48, %v11835_v30  ;;  %v12647_v2 = vpop.xlane.xlu1 %5391 }
 0x2bd   : > { %17442 = vst [vmem:[#allocation143_spill] sm:$0xff] %v12620_v9  ;;  %17446 = vst [vmem:[#allocation58_spill] sm:$0xff] %v12633_v28  ;;  %v12642_v1 = vadd.f32 %v3184_v55, %v11821_v52  ;;  %v2387_v44 = vadd.f32 %v12550_v6, %v11163_v23  ;;  %v4005_v61 = vadd.f32 %v3877_v14, %v12504_v19  ;;  %v3196_v28 = vpop.f32.mrf.mxu0  ;;  %v12658_v55 = vpop.f32.mrf.mxu1  ;;  %9334 = vtanh.f32 %v12320_v37 }
 0x2be   : > { %17447 = vst [vmem:[#allocation48_spill] sm:$0xff] %v12635_v21  ;;  %17448 = vst [vmem:[#allocation49_spill] sm:$0xff] %v12639_v40  ;;  %v3752_v15 = vmul.f32 %v3624_v60, %v12576_v34  ;;  %v12652_v4 = vadd.f32 %v3186_v13, %v11835_v30  ;;  %v12654_v9 = vmul.f32 %v8877_v10, %v2381_v53  ;;  %v8887_v21 = vld [vmem:[%s11177_s28 + $0x1d0] sm:$0xff] }
 0x2bf   : > { %17449 = vst [vmem:[#allocation144_spill] sm:$0xff] %v12642_v1  ;;  %17450 = vst [vmem:[#allocation145_spill] sm:$0xff] %v12647_v2  ;;  %v12656_v48 = vmul.f32 %v8877_v10, %v2383_v43  ;;  %v4006_v36 = vadd.f32 %v3878_v32, %v12513_v47  ;;  %v4007_v6 = vadd.f32 %v3879_v54, %v12516_v59  ;;  %v17452_v2 = vld [vmem:[#allocation67_spill] sm:$0xff]  ;;  %v3198_v43 = vpop.f32.mrf.mxu0  ;;  %v12668_v10 = vpop.f32.mrf.mxu1  ;;  %v3626_v54 = vmul.f32 0.044715, %v12639_v40 }
 0x2c0   : > { %17451 = vst [vmem:[#allocation146_spill] sm:$0xff] %v12652_v4  ;;  %v2389_v14 = vadd.f32 %v12562_v22, %v11171_v17  ;;  %v2393_v60 = vadd.f32 %v2392_v38, %v11163_v23  ;;  %5476 = vadd.xlane.f32.xlu0 %v17452_v2  ;;  %v4763_v13 = vadd.f32 %v4634_v41, %v4633_v33  ;;  %v12671_v32 = vpop.xlane.xlu0 %5132  ;;  %v3627_v47 = vmul.f32 0.044715, %v12642_v1  ;;  %v12681_v33 = vpop.xlane.xlu1 %5070 }
 0x2c1   : > { %v3753_v53 = vmul.f32 %v3625_v42, %v12590_v5  ;;  %5552 = vadd.xlane.f32.xlu1 %v12401_v16  ;;  %17453 = vst [vmem:[#allocation67_spill] sm:$0xff] %v12671_v32  ;;  %v4116_v22 = vmul.f32 0.7978846, %v12311_v3  ;;  %v12677_v38 = vmul.f32 %v8878_v18, %v2387_v44  ;;  %v12679_v41 = vmul.f32 0.7978846, %v4005_v61  ;;  %17455 = vst [vmem:[#allocation148_spill] sm:$0xff] %v12681_v33  ;;  %v3202_v2 = vpop.f32.mrf.mxu0  ;;  %v12690_v3 = vpop.f32.mrf.mxu1 }
 0x2c2   : > { %v3880_v42 = vmul.f32 %v3752_v15, %v12576_v34  ;;  %v3628_v16 = vmul.f32 0.044715, %v12652_v4  ;;  %v8879_v32 = vld [vmem:[%s11177_s28 + $0x190] sm:$0xff]  ;;  %v2395_v19 = vadd.f32 %v12596_v57, %v11171_v17  ;;  %v12688_v59 = vmul.f32 0.7978846, %v4006_v36  ;;  %v9331_v44 = vpop.eup %9330 }
 0x2c3   : > { %17454 = vst [vmem:[#allocation147_spill] sm:$0xff] %v12679_v41  ;;  %v12693_v37 = vadd.f32 %v3190_v12, %v11821_v52  ;;  %9336 = vtanh.f32 %v4116_v22  ;;  %v12695_v61 = vmul.f32 %v8878_v18, %v2389_v14  ;;  %v12697_v33 = vmul.f32 %v8879_v32, %v2393_v60  ;;  %v17460_v41 = vld [vmem:[#allocation73_spill] sm:$0xff]  ;;  %v12703_v57 = vpop.f32.mrf.mxu0  ;;  %v17462_v60 = vld [vmem:[#allocation66_spill] sm:$0xff] }
 0x2c4   : > { %17456 = vst [vmem:[#allocation149_spill] sm:$0xff] %v12688_v59  ;;  %v12699_v15 = vmul.f32 0.7978846, %v4007_v6  ;;  %5540 = vadd.xlane.f32.xlu0 %v17460_v41  ;;  %v3881_v58 = vmul.f32 %v3753_v53, %v12590_v5  ;;  %v9333_v36 = vpop.eup %9332  ;;  %v12705_v59 = vpop.f32.mrf.mxu1  ;;  %v4367_v22 = vadd.f32 1.0, %v9331_v44  ;;  %v3754_v18 = vmul.f32 %v3626_v54, %v12639_v40 }
 0x2c5   : > { %17457 = vst [vmem:[#allocation150_spill] sm:$0xff] %v12693_v37  ;;  %17458 = vst [vmem:[#allocation151_spill] sm:$0xff] %v12697_v33  ;;  %4764 = vadd.xlane.f32.xlu1 %v4763_v13  ;;  %v12707_v12 = vpop.xlane.xlu0 %5389  ;;  %v3755_v14 = vmul.f32 %v3627_v47, %v12642_v1  ;;  %v12712_v6 = vmul.f32 0.5, %v17462_v60  ;;  %v4008_v41 = vadd.f32 %v3880_v42, %v12576_v34  ;;  %v4368_v53 = vadd.f32 1.0, %v9333_v36  ;;  %v17466_v60 = vld [vmem:[#allocation77_spill] sm:$0xff] }
 0x2c6   : > { %17459 = vst [vmem:[#allocation152_spill] sm:$0xff] %v12699_v15  ;;  %17461 = vst [vmem:[#allocation73_spill] sm:$0xff] %v12707_v12  ;;  %v12715_v15 = vpop.xlane.xlu1 %5395  ;;  %v3756_v24 = vmul.f32 %v3628_v16, %v12652_v4  ;;  %v12720_v13 = vadd.f32 %v12626_v31, %v11835_v30  ;;  %v12722_v12 = vpop.f32.mrf.mxu0  ;;  %v12724_v44 = vmul.f32 %v8879_v32, %v2395_v19  ;;  %v3629_v36 = vmul.f32 0.044715, %v12693_v37 }
 0x2c7   : > { %17463 = vst [vmem:[#allocation66_spill] sm:$0xff] %v12715_v15  ;;  %v2399_v47 = vadd.f32 %v12616_v63, %v11163_v23  ;;  %v12728_v54 = vpop.f32.mrf.mxu1  ;;  %v4495_v42 = vmul.f32 %v4367_v22, %v12357_v56  ;;  %v4009_v16 = vadd.f32 %v3881_v58, %v12590_v5  ;;  %v4496_v31 = vmul.f32 %v4368_v53, %v12383_v20 }
 0x2c8   : > { %17464 = vst [vmem:[#allocation153_spill] sm:$0xff] %v12720_v13  ;;  %17465 = vst [vmem:[#allocation154_spill] sm:$0xff] %v12724_v44  ;;  %5478 = vadd.xlane.f32.xlu0 %v17466_v60  ;;  %v12736_v15 = vadd.f32 %v3196_v28, %v11821_v52  ;;  %v12739_v19 = vadd.f32 %v3198_v43, %v11835_v30  ;;  %v12741_v63 = vpop.f32.mrf.mxu0  ;;  %v2401_v32 = vadd.f32 %v12630_v8, %v11171_v17  ;;  %v8880_v28 = vld [vmem:[%s11177_s28 + $0x198] sm:$0xff] }
 0x2c9   : > { %v12745_v56 = vpop.f32.mrf.mxu1  ;;  %v4635_v22 = vmul.f32 %v17444_v46, %v4495_v42  ;;  %v12748_v58 = vpop.xlane.xlu0 %5393  ;;  %v3882_v60 = vmul.f32 %v3754_v18, %v12639_v40  ;;  %v3883_v20 = vmul.f32 %v3755_v14, %v12642_v1  ;;  %v4636_v53 = vmul.f32 %v17445_v49, %v4496_v31 }
 0x2ca   : > { %17467 = vst [vmem:[#allocation77_spill] sm:$0xff] %v12736_v15  ;;  %17468 = vst [vmem:[#allocation155_spill] sm:$0xff] %v12739_v19  ;;  %v12754_v43 = vpop.xlane.xlu1 %5134  ;;  %v3884_v5 = vmul.f32 %v3756_v24, %v12652_v4  ;;  %v3630_v34 = vmul.f32 0.044715, %v12720_v13  ;;  %v12759_v8 = vadd.f32 %v3202_v2, %v11821_v52  ;;  %v12761_v44 = vpop.f32.mrf.mxu0  ;;  %v12763_v42 = vmul.f32 %v8880_v28, %v2399_v47 }
 0x2cb   : > { %17469 = vst [vmem:[#allocation156_spill] sm:$0xff] %v12748_v58  ;;  %17470 = vst [vmem:[#allocation157_spill] sm:$0xff] %v12754_v43  ;;  %v2405_v18 = vadd.f32 %v12658_v55, %v11163_v23  ;;  %v12767_v14 = vmul.f32 0.7978846, %v4008_v41  ;;  %v12769_v31 = vpop.f32.mrf.mxu1  ;;  %v3757_v58 = vmul.f32 %v3629_v36, %v12693_v37  ;;  %v12772_v24 = vmul.f32 0.7978846, %v4009_v16 }
 0x2cc   : > { %17471 = vst [vmem:[#allocation158_spill] sm:$0xff] %v12759_v8  ;;  %17472 = vst [vmem:[#allocation159_spill] sm:$0xff] %v12763_v42  ;;  %v4766_v43 = vadd.f32 %v4636_v53, %v4635_v22  ;;  %5480 = vadd.xlane.f32.xlu0 %v17475_v7  ;;  %v3631_v2 = vmul.f32 0.044715, %v12736_v15  ;;  %v3632_v47 = vmul.f32 0.044715, %v12739_v19  ;;  %v12777_v42 = vpop.f32.mrf.mxu0  ;;  %v12779_v0 = vmul.f32 %v8880_v28, %v2401_v32  ;;  %v9335_v22 = vpop.eup %9334 }
 0x2cd   : > { %17473 = vst [vmem:[#allocation160_spill] sm:$0xff] %v12767_v14  ;;  %17474 = vst [vmem:[#allocation161_spill] sm:$0xff] %v12772_v24  ;;  %v4010_v55 = vadd.f32 %v3882_v60, %v12639_v40  ;;  %v4011_v41 = vadd.f32 %v3883_v20, %v12642_v1  ;;  %v12783_v14 = vpop.f32.mrf.mxu1  ;;  %v12785_v36 = vpop.xlane.xlu0 %5072  ;;  %v3476_v16 = vmul.f32 0.5, %v12154_v51  ;;  %v8881_v7 = vld [vmem:[%s11177_s28 + $0x1a0] sm:$0xff]  ;;  %v4012_v53 = vadd.f32 %v3884_v5, %v12652_v4  ;;  %v17479_v60 = vld [vmem:[#allocation107_spill] sm:$0xff] }
 0x2ce   : > { %17476 = vst [vmem:[#allocation80_spill] sm:$0xff] %v12779_v0  ;;  %17477 = vst [vmem:[#allocation162_spill] sm:$0xff] %v12785_v36  ;;  %4767 = vadd.xlane.f32.xlu1 %v4766_v43  ;;  %v12790_v24 = vpop.xlane.xlu1 %5399  ;;  %v3758_v32 = vmul.f32 %v3630_v34, %v12720_v13  ;;  %v3633_v28 = vmul.f32 0.044715, %v12759_v8  ;;  %v4120_v40 = vmul.f32 0.7978846, %v17479_v60  ;;  %v12795_v20 = vpop.f32.mrf.mxu0  ;;  %v12797_v0 = vmul.f32 %v8881_v7, %v2405_v18 }
 0x2cf   : > { %17478 = vst [vmem:[#allocation163_spill] sm:$0xff] %v12790_v24  ;;  %v12799_v36 = vpop.f32.mrf.mxu1  ;;  %v3885_v51 = vmul.f32 %v3757_v58, %v12693_v37  ;;  %v4371_v1 = vadd.f32 1.0, %v9335_v22  ;;  %v17481_v43 = vld [vmem:[#allocation106_spill] sm:$0xff]  ;;  %v2407_v24 = vadd.f32 %v12668_v10, %v11171_v17  ;;  %v17482_v34 = vld [vmem:[#allocation84_spill] sm:$0xff]  ;;  %v3759_v4 = vmul.f32 %v3631_v2, %v12736_v15 }
 0x2d0   : > { %17480 = vst [vmem:[#allocation107_spill] sm:$0xff] %v12797_v0  ;;  %9338 = vtanh.f32 %v17481_v43  ;;  %v9337_v5 = vpop.eup %9336  ;;  %5482 = vadd.xlane.f32.xlu0 %v17482_v34  ;;  %v3760_v60 = vmul.f32 %v3632_v47, %v12739_v19  ;;  %v12808_v18 = vpop.f32.mrf.mxu0  ;;  %v12810_v0 = vmul.f32 0.7978846, %v4010_v55  ;;  %v12812_v26 = vmul.f32 0.7978846, %v4011_v41  ;;  %v17487_v34 = vld [vmem:[#allocation64_spill] sm:$0xff] }
 0x2d1   : > { %9340 = vtanh.f32 %v4120_v40  ;;  %v12814_v58 = vpop.f32.mrf.mxu1  ;;  %v4372_v22 = vadd.f32 1.0, %v9337_v5  ;;  %v4499_v43 = vmul.f32 %v4371_v1, %v12712_v6  ;;  %v12817_v33 = vpop.xlane.xlu0 %5136  ;;  %v3886_v10 = vmul.f32 %v3758_v32, %v12720_v13  ;;  %v17486_v40 = vld [vmem:[#allocation61_spill] sm:$0xff] }
 0x2d2   : > { %17483 = vst [vmem:[#allocation106_spill] sm:$0xff] %v12810_v0  ;;  %17484 = vst [vmem:[#allocation84_spill] sm:$0xff] %v12812_v26  ;;  %5556 = vadd.xlane.f32.xlu1 %v12479_v29  ;;  %v3761_v2 = vmul.f32 %v3633_v28, %v12759_v8  ;;  %v4106_v47 = vmul.f32 0.7978846, %v17486_v40  ;;  %9342 = vtanh.f32 %v17487_v34  ;;  %v12824_v55 = vpop.f32.mrf.mxu0  ;;  %v2411_v41 = vadd.f32 %v12690_v3, %v11163_v23  ;;  %v12834_v28 = vpop.xlane.xlu1 %5074  ;;  %v17489_v34 = vld [vmem:[#allocation93_spill] sm:$0xff]  ;;  %v17519_v26 = vld [vmem:[#allocation54_spill] sm:$0xff] }
 0x2d3   : > { %17485 = vst [vmem:[#allocation164_spill] sm:$0xff] %v12817_v33  ;;  %v4013_v5 = vadd.f32 %v3885_v51, %v12693_v37  ;;  %v4500_v1 = vmul.f32 %v4372_v22, %v3476_v16  ;;  %v4639_v6 = vmul.f32 %v17444_v46, %v4499_v43  ;;  %v12830_v29 = vpop.f32.mrf.mxu1  ;;  %v2413_v32 = vadd.f32 %v12705_v59, %v11171_v17 }
 0x2d4   : > { %17488 = vst [vmem:[#allocation61_spill] sm:$0xff] %v12834_v28  ;;  %v3887_v40 = vmul.f32 %v3759_v4, %v12736_v15  ;;  %5484 = vadd.xlane.f32.xlu0 %v17489_v34  ;;  %v3888_v33 = vmul.f32 %v3760_v60, %v12739_v19  ;;  %9344 = vtanh.f32 %v4106_v47  ;;  %v12839_v3 = vpop.f32.mrf.mxu0  ;;  %v2417_v16 = vadd.f32 %v12728_v54, %v11163_v23  ;;  %v8882_v34 = vld [vmem:[%s11177_s28 + $0x1a8] sm:$0xff] }
 0x2d5   : > { %v2419_v51 = vadd.f32 %v12745_v56, %v11171_v17  ;;  %v12845_v22 = vmul.f32 0.7978846, %v4012_v53  ;;  %v4640_v59 = vmul.f32 %v17445_v49, %v4500_v1  ;;  %v12848_v43 = vpop.f32.mrf.mxu1  ;;  %v12850_v4 = vpop.xlane.xlu0 %5397  ;;  %v4014_v60 = vadd.f32 %v3886_v10, %v12720_v13 }
 0x2d6   : > { %17491 = vst [vmem:[#allocation93_spill] sm:$0xff] %v12850_v4  ;;  %v3889_v47 = vmul.f32 %v3761_v2, %v12759_v8  ;;  %v12857_v54 = vadd.f32 %v12703_v57, %v11835_v30  ;;  %v12861_v56 = vadd.f32 %v12722_v12, %v11821_v52  ;;  %v12863_v53 = vpop.f32.mrf.mxu0  ;;  %v12865_v1 = vmul.f32 %v8881_v7, %v2407_v24  ;;  %v8883_v2 = vld [vmem:[%s11177_s28 + $0x1b0] sm:$0xff]  ;;  %v17497_v24 = vld [vmem:[#allocation95_spill] sm:$0xff] }
 0x2d7   : > { %17490 = vst [vmem:[#allocation64_spill] sm:$0xff] %v12845_v22  ;;  %v12867_v28 = vmul.f32 %v8882_v34, %v2411_v41  ;;  %v12869_v4 = vmul.f32 0.7978846, %v4013_v5  ;;  %v4772_v37 = vadd.f32 %v4640_v59, %v4639_v6  ;;  %v12871_v10 = vpop.f32.mrf.mxu1  ;;  %v12874_v13 = vmul.f32 %v8882_v34, %v2413_v32 }
 0x2d8   : > { %17492 = vst [vmem:[#allocation165_spill] sm:$0xff] %v12857_v54  ;;  %17493 = vst [vmem:[#allocation166_spill] sm:$0xff] %v12865_v1  ;;  %v2423_v57 = vadd.f32 %v12769_v31, %v11163_v23  ;;  %v4015_v12 = vadd.f32 %v3887_v40, %v12736_v15  ;;  %v4016_v0 = vadd.f32 %v3888_v33, %v12739_v19  ;;  %5486 = vadd.xlane.f32.xlu0 %v17497_v24  ;;  %v12881_v7 = vpop.f32.mrf.mxu0  ;;  %v17500_v31 = vld [vmem:[#allocation76_spill] sm:$0xff] }
 0x2d9   : > { %17494 = vst [vmem:[#allocation167_spill] sm:$0xff] %v12867_v28  ;;  %17495 = vst [vmem:[#allocation168_spill] sm:$0xff] %v12869_v4  ;;  %v12883_v41 = vmul.f32 %v8883_v2, %v2417_v16  ;;  %v12885_v5 = vmul.f32 %v8883_v2, %v2419_v51  ;;  %v2425_v6 = vadd.f32 %v12783_v14, %v11171_v17  ;;  %4773 = vadd.xlane.f32.xlu1 %v4772_v37  ;;  %v12889_v32 = vpop.f32.mrf.mxu1  ;;  %v12892_v40 = vpop.xlane.xlu0 %5401  ;;  %v8884_v2 = vld [vmem:[%s11177_s28 + $0x1b8] sm:$0xff]  ;;  %v17504_v37 = vld [vmem:[#allocation82_spill] sm:$0xff] }
 0x2da   : > { %17496 = vst [vmem:[#allocation169_spill] sm:$0xff] %v12874_v13  ;;  %v3479_v59 = vmul.f32 0.5, %v17500_v31  ;;  %17501 = vst [vmem:[#allocation76_spill] sm:$0xff] %v12892_v40  ;;  %v12894_v34 = vmul.f32 0.7978846, %v4014_v60  ;;  %v4017_v33 = vadd.f32 %v3889_v47, %v12759_v8  ;;  %v12899_v51 = vpop.f32.mrf.mxu0  ;;  %v12902_v4 = vpop.xlane.xlu1 %5403  ;;  %v3480_v14 = vmul.f32 0.5, %v17504_v37 }
 0x2db   : > { %17498 = vst [vmem:[#allocation95_spill] sm:$0xff] %v12883_v41  ;;  %17499 = vst [vmem:[#allocation170_spill] sm:$0xff] %v12885_v5  ;;  %v3634_v24 = vmul.f32 0.044715, %v12857_v54  ;;  %v3635_v16 = vmul.f32 0.044715, %v12861_v56  ;;  %v12905_v5 = vpop.f32.mrf.mxu1  ;;  %v12909_v31 = vadd.f32 %v12741_v63, %v11835_v30  ;;  %v12913_v60 = vadd.f32 %v12761_v44, %v11821_v52 }
 0x2dc   : > { %17502 = vst [vmem:[#allocation171_spill] sm:$0xff] %v12894_v34  ;;  %17503 = vst [vmem:[#allocation172_spill] sm:$0xff] %v12902_v4  ;;  %v12917_v47 = vadd.f32 %v12777_v42, %v11835_v30  ;;  %v12919_v8 = vmul.f32 %v8884_v2, %v2423_v57  ;;  %v2429_v37 = vadd.f32 %v12799_v36, %v11163_v23  ;;  %v12923_v4 = vmul.f32 0.7978846, %v4015_v12  ;;  %v12927_v63 = vpop.f32.mrf.mxu0  ;;  %v17520_v41 = vld [vmem:[#allocation57_spill] sm:$0xff] }
 0x2dd   : > { %17505 = vst [vmem:[#allocation82_spill] sm:$0xff] %v12913_v60  ;;  %v9339_v40 = vpop.eup %9338  ;;  %v12925_v34 = vmul.f32 0.7978846, %v4016_v0  ;;  %v12929_v44 = vmul.f32 %v8884_v2, %v2425_v6  ;;  %v2431_v15 = vadd.f32 %v12814_v58, %v11171_v17  ;;  %5560 = vadd.xlane.f32.xlu1 %v12554_v27  ;;  %v12934_v57 = vpop.f32.mrf.mxu1  ;;  %v12940_v36 = vadd.f32 %v12795_v20, %v11821_v52  ;;  %v8885_v0 = vld [vmem:[%s11177_s28 + $0x1c0] sm:$0xff] }
 0x2de   : > { %17506 = vst [vmem:[#allocation173_spill] sm:$0xff] %v12917_v47  ;;  %17507 = vst [vmem:[#allocation174_spill] sm:$0xff] %v12919_v8  ;;  %v9341_v19 = vpop.eup %9340  ;;  %v4375_v42 = vadd.f32 1.0, %v9339_v40  ;;  %v12936_v13 = vpop.xlane.xlu0 %5076  ;;  %v12943_v12 = vmul.f32 0.7978846, %v4017_v33  ;;  %v3762_v6 = vmul.f32 %v3634_v24, %v12857_v54  ;;  %v3763_v2 = vmul.f32 %v3635_v16, %v12861_v56 }
 0x2df   : > { %17508 = vst [vmem:[#allocation175_spill] sm:$0xff] %v12923_v4  ;;  %17509 = vst [vmem:[#allocation176_spill] sm:$0xff] %v12925_v34  ;;  %v4376_v1 = vadd.f32 1.0, %v9341_v19  ;;  %v12947_v58 = vpop.f32.mrf.mxu0  ;;  %v9343_v27 = vpop.eup %9342  ;;  %v3638_v34 = vmul.f32 0.044715, %v12917_v47  ;;  %v12952_v20 = vmul.f32 %v8885_v0, %v2429_v37  ;;  %v12958_v19 = vadd.f32 %v12808_v18, %v11835_v30 }
 0x2e0   : > { %17510 = vst [vmem:[#allocation177_spill] sm:$0xff] %v12929_v44  ;;  %17511 = vst [vmem:[#allocation178_spill] sm:$0xff] %v12936_v13  ;;  %v4503_v40 = vmul.f32 %v4375_v42, %v3479_v59  ;;  %v3636_v44 = vmul.f32 0.044715, %v12909_v31  ;;  %v3637_v13 = vmul.f32 0.044715, %v12913_v60  ;;  %v12962_v59 = vmul.f32 %v8885_v0, %v2431_v15 }
 0x2e1   : > { %17512 = vst [vmem:[#allocation179_spill] sm:$0xff] %v12940_v36  ;;  %17513 = vst [vmem:[#allocation180_spill] sm:$0xff] %v12943_v12  ;;  %v4504_v4 = vmul.f32 %v4376_v1, %v3480_v14  ;;  %v4361_v33 = vadd.f32 1.0, %v9343_v27  ;;  %v12954_v12 = vpop.f32.mrf.mxu1  ;;  %v12960_v24 = vpop.f32.mrf.mxu0  ;;  %v2435_v42 = vadd.f32 %v12830_v29, %v11163_v23  ;;  %v3639_v14 = vmul.f32 0.044715, %v12940_v36 }
 0x2e2   : > { %17514 = vst [vmem:[#allocation181_spill] sm:$0xff] %v12952_v20  ;;  %17515 = vst [vmem:[#allocation182_spill] sm:$0xff] %v12958_v19  ;;  %v9345_v16 = vpop.eup %9344  ;;  %v4643_v37 = vmul.f32 %v17444_v46, %v4503_v40  ;;  %v12967_v20 = vpop.xlane.xlu1 %5138  ;;  %v3890_v27 = vmul.f32 %v3762_v6, %v12857_v54  ;;  %v3891_v0 = vmul.f32 %v3763_v2, %v12861_v56 }
 0x2e3   : > { %17516 = vst [vmem:[#allocation183_spill] sm:$0xff] %v12962_v59  ;;  %17517 = vst [vmem:[#allocation184_spill] sm:$0xff] %v12967_v20  ;;  %v12969_v1 = vpop.xlane.xlu0 %5140  ;;  %v4644_v18 = vmul.f32 %v17445_v49, %v4504_v4  ;;  %v4362_v22 = vadd.f32 1.0, %v9345_v16  ;;  %v4489_v8 = vmul.f32 %v4361_v33, %v17519_v26  ;;  %v12975_v15 = vpop.f32.mrf.mxu0  ;;  %v3764_v29 = vmul.f32 %v3636_v44, %v12909_v31 }
 0x2e4   : > { %17518 = vst [vmem:[#allocation185_spill] sm:$0xff] %v12969_v1  ;;  %v3765_v40 = vmul.f32 %v3637_v13, %v12913_v60  ;;  %v3766_v20 = vmul.f32 %v3638_v34, %v12917_v47  ;;  %v8886_v1 = vld [vmem:[%s11177_s28 + $0x1c8] sm:$0xff]  ;;  %v2454_v6 = vpop.f32.mrf.mxu1  ;;  %v3640_v16 = vmul.f32 0.044715, %v12958_v19  ;;  %v3767_v2 = vmul.f32 %v3639_v14, %v12940_v36 }
 0x2e5   : > { %v4778_v59 = vadd.f32 %v4644_v18, %v4643_v37  ;;  %v4490_v28 = vmul.f32 %v4362_v22, %v17520_v41  ;;  %v4629_v4 = vmul.f32 %v17444_v46, %v4489_v8  ;;  %v12985_v26 = vpop.f32.mrf.mxu0  ;;  %v12987_v33 = vmul.f32 %v8886_v1, %v2435_v42  ;;  %v17524_v34 = vld [vmem:[#allocation71_spill] sm:$0xff]  ;;  %v17525_v42 = vld [vmem:[#allocation69_spill] sm:$0xff] }
 0x2e6   : > { %v12994_v13 = vadd.f32 %v12824_v55, %v11821_v52  ;;  %v4108_v37 = vmul.f32 0.7978846, %v17524_v34  ;;  %v2437_v8 = vadd.f32 %v12848_v43, %v11171_v17  ;;  %v2441_v22 = vadd.f32 %v12871_v10, %v11163_v23 }
 0x2e7   : > { %17521 = vst [vmem:[#allocation54_spill] sm:$0xff] %v12987_v33  ;;  %v12990_v44 = vpop.xlane.xlu0 %5405  ;;  %4779 = vadd.xlane.f32.xlu1 %v4778_v59  ;;  %v4630_v41 = vmul.f32 %v17445_v49, %v4490_v28  ;;  %9346 = vtanh.f32 %v17525_v42  ;;  %v13003_v14 = vpop.f32.mrf.mxu0  ;;  %v4018_v18 = vadd.f32 %v3890_v27, %v12857_v54  ;;  %v3892_v55 = vmul.f32 %v3764_v29, %v12909_v31 }
 0x2e8   : > { %17522 = vst [vmem:[#allocation57_spill] sm:$0xff] %v12990_v44  ;;  %17523 = vst [vmem:[#allocation186_spill] sm:$0xff] %v12994_v13  ;;  %v13007_v44 = vpop.xlane.xlu1 %5407  ;;  %v3893_v34 = vmul.f32 %v3765_v40, %v12913_v60  ;;  %9348 = vtanh.f32 %v4108_v37  ;;  %v4019_v43 = vadd.f32 %v3891_v0, %v12861_v56  ;;  %v3894_v59 = vmul.f32 %v3766_v20, %v12917_v47  ;;  %v2458_v33 = vpop.f32.mrf.mxu1 }
 0x2e9   : > { %17526 = vst [vmem:[#allocation71_spill] sm:$0xff] %v13007_v44  ;;  %v4757_v10 = vadd.f32 %v4630_v41, %v4629_v4  ;;  %v3768_v28 = vmul.f32 %v3640_v16, %v12958_v19  ;;  %v13013_v42 = vpop.f32.mrf.mxu0  ;;  %v2443_v27 = vadd.f32 %v12889_v32, %v11171_v17  ;;  %v3895_v29 = vmul.f32 %v3767_v2, %v12940_v36 }
 0x2ea   : > { %v3641_v44 = vmul.f32 0.044715, %v12994_v13  ;;  %9350 = vtanh.f32 %v12476_v11  ;;  %v13023_v0 = vmul.f32 %v8886_v1, %v2437_v8  ;;  %v13025_v20 = vmul.f32 %v8887_v21, %v2441_v22  ;;  %v13046_v37 = vpop.f32.mrf.mxu1 }
 0x2eb   : > { %v13021_v40 = vpop.xlane.xlu0 %5409  ;;  %4758 = vadd.xlane.f32.xlu0 %v4757_v10  ;;  %5679 = vadd.xlane.f32.xlu1 %v12654_v9  ;;  %9352 = vtanh.f32 %v12522_v25  ;;  %v13031_v32 = vadd.f32 %v12839_v3, %v11835_v30  ;;  %v13033_v4 = vpop.f32.mrf.mxu0  ;;  %v2447_v11 = vadd.f32 %v12905_v5, %v11163_v23  ;;  %v2449_v1 = vadd.f32 %v12934_v57, %v11171_v17  ;;  %v17535_v10 = vld [vmem:[#allocation100_spill] sm:$0xff] }
 0x2ec   : > { %17527 = vst [vmem:[#allocation69_spill] sm:$0xff] %v13021_v40  ;;  %17528 = vst [vmem:[#allocation187_spill] sm:$0xff] %v13023_v0  ;;  %v4020_v16 = vadd.f32 %v3892_v55, %v12909_v31  ;;  %v4021_v2 = vadd.f32 %v3893_v34, %v12913_v60  ;;  %v13041_v9 = vmul.f32 0.7978846, %v4018_v18  ;;  %v2453_v25 = vadd.f32 %v12954_v12, %v11163_v23  ;;  %v13055_v41 = vpop.xlane.xlu1 %5078  ;;  %v8888_v34 = vld [vmem:[%s11177_s28 + $0x1d8] sm:$0xff] }
 0x2ed   : > { %17529 = vst [vmem:[#allocation188_spill] sm:$0xff] %v13031_v32  ;;  %v4022_v3 = vadd.f32 %v3894_v59, %v12917_v47  ;;  %17531 = vst [vmem:[#allocation190_spill] sm:$0xff] %v13046_v37  ;;  %v3896_v8 = vmul.f32 %v3768_v28, %v12958_v19  ;;  %v13049_v5 = vpop.f32.mrf.mxu0  ;;  %v13051_v22 = vmul.f32 %v8887_v21, %v2443_v27  ;;  %v13053_v57 = vmul.f32 0.7978846, %v4019_v43 }
 0x2ee   : > { %17530 = vst [vmem:[#allocation189_spill] sm:$0xff] %v13041_v9  ;;  %17533 = vst [vmem:[#allocation192_spill] sm:$0xff] %v13055_v41  ;;  %v4023_v18 = vadd.f32 %v3895_v29, %v12940_v36  ;;  %v3769_v55 = vmul.f32 %v3641_v44, %v12994_v13  ;;  %v2455_v59 = vadd.f32 %v2454_v6, %v11171_v17  ;;  %v3642_v43 = vmul.f32 0.044715, %v13031_v32  ;;  %v8889_v44 = vld [vmem:[%s11177_s28 + $0x1e0] sm:$0xff]  ;;  %v2464_v41 = vpop.f32.mrf.mxu1 }
 0x2ef   : > { %17532 = vst [vmem:[#allocation191_spill] sm:$0xff] %v13051_v22  ;;  %v13059_v12 = vpop.xlane.xlu0 %5080  ;;  %5550 = vadd.xlane.f32.xlu0 %v17535_v10  ;;  %5743 = vadd.xlane.f32.xlu1 %v12656_v48  ;;  %v2459_v21 = vadd.f32 %v2458_v33, %v11163_v23  ;;  %v13069_v28 = vadd.f32 %v12863_v53, %v11821_v52  ;;  %v13071_v27 = vpop.f32.mrf.mxu0  ;;  %v13078_v10 = vmul.f32 0.7978846, %v4020_v16  ;;  %v13080_v6 = vmul.f32 0.7978846, %v4021_v2 }
 0x2f0   : > { %17534 = vst [vmem:[#allocation193_spill] sm:$0xff] %v13059_v12  ;;  %v13074_v29 = vmul.f32 %v8888_v34, %v2447_v11  ;;  %v13076_v40 = vmul.f32 %v8888_v34, %v2449_v1  ;;  %v13082_v48 = vmul.f32 %v8889_v44, %v2453_v25  ;;  %v13084_v33 = vmul.f32 0.7978846, %v4022_v3  ;;  %v8890_v11 = vld [vmem:[%s11177_s28 + $0x1e8] sm:$0xff]  ;;  %v17546_v34 = vld [vmem:[#allocation104_spill] sm:$0xff] }
 0x2f1   : > { %17537 = vst [vmem:[#allocation194_spill] sm:$0xff] %v13080_v6  ;;  %v4024_v12 = vadd.f32 %v3896_v8, %v12958_v19  ;;  %v13089_v53 = vadd.f32 %v12881_v7, %v11835_v30  ;;  %v13091_v37 = vpop.f32.mrf.mxu0  ;;  %v13094_v1 = vmul.f32 0.7978846, %v4023_v18  ;;  %v3897_v16 = vmul.f32 %v3769_v55, %v12994_v13 }
 0x2f2   : > { %17536 = vst [vmem:[#allocation100_spill] sm:$0xff] %v13076_v40  ;;  %17538 = vst [vmem:[#allocation195_spill] sm:$0xff] %v13084_v33  ;;  %v13099_v2 = vadd.f32 %v12899_v51, %v11821_v52  ;;  %v13105_v3 = vadd.f32 %v12927_v63, %v11835_v30  ;;  %v13107_v8 = vmul.f32 %v8889_v44, %v2455_v59  ;;  %v3643_v55 = vmul.f32 0.044715, %v13069_v28  ;;  %v17548_v59 = vld [vmem:[#allocation88_spill] sm:$0xff] }
 0x2f3   : > { %17539 = vst [vmem:[#allocation196_spill] sm:$0xff] %v13089_v53  ;;  %17540 = vst [vmem:[#allocation197_spill] sm:$0xff] %v13094_v1  ;;  %v13101_v25 = vpop.xlane.xlu0 %5144  ;;  %v13109_v7 = vmul.f32 %v8890_v11, %v2459_v21  ;;  %5488 = vadd.xlane.f32.xlu0 %v17546_v34  ;;  %5681 = vadd.xlane.f32.xlu1 %v12677_v38  ;;  %v3770_v18 = vmul.f32 %v3642_v43, %v13031_v32  ;;  %v13115_v51 = vpop.f32.mrf.mxu0  ;;  %v3483_v44 = vmul.f32 0.5, %v17548_v59 }
 0x2f4   : > { %17541 = vst [vmem:[#allocation198_spill] sm:$0xff] %v13099_v2  ;;  %17542 = vst [vmem:[#allocation199_spill] sm:$0xff] %v13101_v25  ;;  %v9347_v17 = vpop.eup %9346  ;;  %v13117_v25 = vpop.xlane.xlu1 %5411  ;;  %v13120_v63 = vadd.f32 %v2464_v41, %v11163_v23  ;;  %v3484_v21 = vmul.f32 0.5, %v12315_v45  ;;  %v13126_v11 = vadd.f32 %v12947_v58, %v11821_v52  ;;  %v13128_v43 = vmul.f32 0.7978846, %v4024_v12 }
 0x2f5   : > { %17543 = vst [vmem:[#allocation200_spill] sm:$0xff] %v13105_v3  ;;  %17544 = vst [vmem:[#allocation201_spill] sm:$0xff] %v13107_v8  ;;  %v9349_v38 = vpop.eup %9348  ;;  %v4363_v34 = vadd.f32 1.0, %v9347_v17  ;;  %v3644_v8 = vmul.f32 0.044715, %v13089_v53  ;;  %v13135_v41 = vpop.f32.mrf.mxu0  ;;  %v13138_v59 = vadd.f32 %v3897_v16, %v12994_v13  ;;  %v17553_v17 = vld [vmem:[#allocation60_spill] sm:$0xff]  ;;  %v3898_v6 = vmul.f32 %v3770_v18, %v13031_v32 }
 0x2f6   : > { %17545 = vst [vmem:[#allocation202_spill] sm:$0xff] %v13109_v7  ;;  %17547 = vst [vmem:[#allocation104_spill] sm:$0xff] %v13117_v25  ;;  %v13133_v25 = vadd.f32 %v12960_v24, %v11835_v30  ;;  %v4364_v45 = vadd.f32 1.0, %v9349_v38  ;;  %v3645_v47 = vmul.f32 0.044715, %v13099_v2  ;;  %v3771_v24 = vmul.f32 %v3643_v55, %v13069_v28  ;;  %v17555_v13 = vld [vmem:[#allocation63_spill] sm:$0xff] }
 0x2f7   : > { %17549 = vst [vmem:[#allocation88_spill] sm:$0xff] %v13126_v11  ;;  %17550 = vst [vmem:[#allocation203_spill] sm:$0xff] %v13128_v43  ;;  %v3646_v58 = vmul.f32 0.044715, %v13105_v3  ;;  %v13142_v60 = vpop.xlane.xlu0 %5261  ;;  %v9351_v12 = vpop.eup %9350  ;;  %v4491_v33 = vmul.f32 %v4363_v34, %v17553_v17  ;;  %v13149_v40 = vadd.f32 %v12975_v15, %v11821_v52  ;;  %v3647_v9 = vmul.f32 0.044715, %v13126_v11 }
 0x2f8   : > { %17551 = vst [vmem:[#allocation204_spill] sm:$0xff] %v13133_v25  ;;  %17552 = vst [vmem:[#allocation205_spill] sm:$0xff] %v13142_v60  ;;  %v13151_v16 = vpop.f32.mrf.mxu0  ;;  %v9353_v38 = vpop.eup %9352  ;;  %v4492_v54 = vmul.f32 %v4364_v45, %v17555_v13  ;;  %v4379_v22 = vadd.f32 1.0, %v9351_v12  ;;  %v13157_v60 = vadd.f32 %v12985_v26, %v11835_v30  ;;  %v3772_v55 = vmul.f32 %v3644_v8, %v13089_v53 }
 0x2f9   : > { %17554 = vst [vmem:[#allocation60_spill] sm:$0xff] %v13149_v40  ;;  %v4631_v18 = vmul.f32 %v17444_v46, %v4491_v33  ;;  %v4380_v34 = vadd.f32 1.0, %v9353_v38  ;;  %v3648_v15 = vmul.f32 0.044715, %v13133_v25  ;;  %v13165_v13 = vpop.xlane.xlu1 %5142  ;;  %v3773_v45 = vmul.f32 %v3645_v47, %v13099_v2 }
 0x2fa   : > { %17556 = vst [vmem:[#allocation63_spill] sm:$0xff] %v13157_v60  ;;  %v13162_v17 = vpop.f32.mrf.mxu0  ;;  %v4632_v19 = vmul.f32 %v17445_v49, %v4492_v54  ;;  %v4507_v36 = vmul.f32 %v4379_v22, %v3483_v44  ;;  %17557 = vst [vmem:[#allocation206_spill] sm:$0xff] %v13165_v13  ;;  %v3774_v12 = vmul.f32 %v3646_v58, %v13105_v3  ;;  %v3649_v33 = vmul.f32 0.044715, %v13149_v40 }
 0x2fb   : > { %v13169_v26 = vpop.xlane.xlu0 %5325  ;;  %v4508_v0 = vmul.f32 %v4380_v34, %v3484_v21  ;;  %v3650_v8 = vmul.f32 0.044715, %v13157_v60  ;;  %v13175_v38 = vadd.f32 %v13003_v14, %v11821_v52  ;;  %v3899_v47 = vmul.f32 %v3771_v24, %v13069_v28  ;;  %v17561_v24 = vld [vmem:[#allocation90_spill] sm:$0xff] }
 0x2fc   : > { %17558 = vst [vmem:[#allocation207_spill] sm:$0xff] %v13169_v26  ;;  %v13177_v7 = vpop.f32.mrf.mxu0  ;;  %v4760_v54 = vadd.f32 %v4632_v19, %v4631_v18  ;;  %v4647_v22 = vmul.f32 %v17444_v46, %v4507_v36  ;;  %v3775_v44 = vmul.f32 %v3647_v9, %v13126_v11  ;;  %v3900_v21 = vmul.f32 %v3772_v55, %v13089_v53  ;;  %v17560_v36 = vld [vmem:[#allocation89_spill] sm:$0xff] }
 0x2fd   : > { %17559 = vst [vmem:[#allocation208_spill] sm:$0xff] %v13175_v38  ;;  %v4648_v58 = vmul.f32 %v17445_v49, %v4508_v0  ;;  %v3776_v34 = vmul.f32 %v3648_v15, %v13133_v25  ;;  %v3651_v13 = vmul.f32 0.044715, %v13175_v38  ;;  %v3901_v14 = vmul.f32 %v3773_v45, %v13099_v2  ;;  %v13200_v45 = vpop.xlane.xlu1 %5082 }
 0x2fe   : > { %v13186_v26 = vpop.f32.mrf.mxu0  ;;  %4761 = vadd.xlane.f32.xlu0 %v4760_v54  ;;  %v3902_v19 = vmul.f32 %v3774_v12, %v13105_v3  ;;  %v4114_v18 = vmul.f32 0.7978846, %v17560_v36  ;;  %9354 = vtanh.f32 %v17561_v24  ;;  %v4026_v55 = vadd.f32 %v3898_v6, %v13031_v32  ;;  %17563 = vst [vmem:[#allocation90_spill] sm:$0xff] %v13200_v45 }
 0x2ff   : > { %v13192_v9 = vpop.xlane.xlu0 %5265  ;;  %v4784_v0 = vadd.f32 %v4648_v58, %v4647_v22  ;;  %v3777_v15 = vmul.f32 %v3649_v33, %v13149_v40  ;;  %v3778_v43 = vmul.f32 %v3650_v8, %v13157_v60  ;;  %v4027_v54 = vadd.f32 %v3899_v47, %v13069_v28  ;;  %v17565_v47 = vld [vmem:[#allocation113_spill] sm:$0xff] }
 0x300   : > { %17562 = vst [vmem:[#allocation89_spill] sm:$0xff] %v13192_v9  ;;  %v13197_v1 = vpop.f32.mrf.mxu0  ;;  %v3903_v12 = vmul.f32 %v3775_v44, %v13126_v11  ;;  %v3779_v36 = vmul.f32 %v3651_v13, %v13175_v38  ;;  %9356 = vtanh.f32 %v4114_v18  ;;  %v3904_v22 = vmul.f32 %v3776_v34, %v13133_v25 }
 0x301   : > { %4785 = vadd.xlane.f32.xlu1 %v4784_v0  ;;  %9358 = vtanh.f32 %v12558_v35  ;;  %v13208_v6 = vadd.f32 %v13013_v42, %v11835_v30  ;;  %v13212_v33 = vadd.f32 %v13033_v4, %v11821_v52  ;;  %v4028_v13 = vadd.f32 %v3900_v21, %v13089_v53 }
 0x302   : > { %v13214_v8 = vpop.f32.mrf.mxu0  ;;  %5490 = vadd.xlane.f32.xlu0 %v17565_v47  ;;  %v4029_v44 = vadd.f32 %v3901_v14, %v13099_v2  ;;  %v4030_v58 = vadd.f32 %v3902_v19, %v13105_v3  ;;  %9360 = vtanh.f32 %v12594_v62  ;;  %v13224_v42 = vmul.f32 0.7978846, %v13138_v59  ;;  %v8891_v14 = vld [vmem:[%s11177_s28 + $0x1f0] sm:$0xff]  ;;  %v17586_v2 = vld [vmem:[#allocation109_spill] sm:$0xff] }
 0x303   : > { %17564 = vst [vmem:[#allocation209_spill] sm:$0xff] %v13212_v33  ;;  %v13221_v35 = vpop.xlane.xlu0 %5329  ;;  %v3905_v4 = vmul.f32 %v3777_v15, %v13149_v40  ;;  %v3906_v34 = vmul.f32 %v3778_v43, %v13157_v60  ;;  %v13230_v18 = vadd.f32 %v13049_v5, %v11835_v30  ;;  %v13235_v24 = vmul.f32 0.7978846, %v4026_v55 }
 0x304   : > { %17566 = vst [vmem:[#allocation113_spill] sm:$0xff] %v13221_v35  ;;  %17567 = vst [vmem:[#allocation210_spill] sm:$0xff] %v13224_v42  ;;  %v13232_v21 = vpop.f32.mrf.mxu0  ;;  %v4031_v62 = vadd.f32 %v3903_v12, %v13126_v11  ;;  %v3907_v19 = vmul.f32 %v3779_v36, %v13175_v38  ;;  %v13241_v59 = vadd.f32 %v13071_v27, %v11821_v52  ;;  %v13243_v0 = vmul.f32 0.7978846, %v4027_v54 }
 0x305   : > { %17568 = vst [vmem:[#allocation211_spill] sm:$0xff] %v13230_v18  ;;  %17569 = vst [vmem:[#allocation212_spill] sm:$0xff] %v13235_v24  ;;  %5745 = vadd.xlane.f32.xlu1 %v12695_v61  ;;  %v4032_v5 = vadd.f32 %v3904_v22, %v13133_v25  ;;  %v3652_v43 = vmul.f32 0.044715, %v13208_v6  ;;  %v3653_v15 = vmul.f32 0.044715, %v13212_v33  ;;  %v13252_v12 = vmul.f32 %v8891_v14, %v13120_v63  ;;  %v13261_v61 = vpop.xlane.xlu1 %5146 }
 0x306   : > { %17570 = vst [vmem:[#allocation213_spill] sm:$0xff] %v13241_v59  ;;  %v13249_v55 = vpop.f32.mrf.mxu0  ;;  %v13254_v36 = vmul.f32 0.7978846, %v4028_v13  ;;  %v13256_v47 = vmul.f32 0.7978846, %v4029_v44  ;;  %5554 = vadd.xlane.f32.xlu0 %v12461_v39  ;;  %17573 = vst [vmem:[#allocation216_spill] sm:$0xff] %v13261_v61  ;;  %v4033_v22 = vadd.f32 %v3905_v4, %v13149_v40  ;;  %v4034_v45 = vadd.f32 %v3906_v34, %v13157_v60 }
 0x307   : > { %v13259_v27 = vmul.f32 0.7978846, %v4030_v58  ;;  %v13263_v54 = vpop.xlane.xlu0 %5269  ;;  %v3654_v35 = vmul.f32 0.044715, %v13230_v18  ;;  %9362 = vtanh.f32 %v12628_v50  ;;  %v13271_v13 = vmul.f32 0.7978846, %v4031_v62 }
 0x308   : > { %17571 = vst [vmem:[#allocation214_spill] sm:$0xff] %v13256_v47  ;;  %17574 = vst [vmem:[#allocation217_spill] sm:$0xff] %v13263_v54  ;;  %v13269_v63 = vpop.f32.mrf.mxu0  ;;  %v4035_v39 = vadd.f32 %v3907_v19, %v13175_v38  ;;  %v3655_v44 = vmul.f32 0.044715, %v13241_v59  ;;  %v17575_v58 = vld [vmem:[#allocation48_spill] sm:$0xff]  ;;  %v17576_v14 = vld [vmem:[#allocation151_spill] sm:$0xff]  ;;  %v3780_v4 = vmul.f32 %v3652_v43, %v13208_v6  ;;  %v3781_v34 = vmul.f32 %v3653_v15, %v13212_v33 }
 0x309   : > { %17572 = vst [vmem:[#allocation215_spill] sm:$0xff] %v13259_v27  ;;  %9364 = vtanh.f32 %v17575_v58  ;;  %5683 = vadd.xlane.f32.xlu1 %v17576_v14  ;;  %v13277_v61 = vmul.f32 0.7978846, %v4032_v5  ;;  %v13283_v50 = vadd.f32 %v13091_v37, %v11835_v30  ;;  %v17578_v54 = vld [vmem:[#allocation120_spill] sm:$0xff]  ;;  %v17579_v19 = vld [vmem:[#allocation55_spill] sm:$0xff]  ;;  %v17580_v60 = vld [vmem:[#allocation62_spill] sm:$0xff]  ;;  %v13293_v5 = vadd.f32 %v13115_v51, %v11821_v52 }
 0x30a   : > { %v13285_v62 = vpop.f32.mrf.mxu0  ;;  %5492 = vadd.xlane.f32.xlu0 %v17578_v54  ;;  %v3473_v9 = vmul.f32 0.5, %v17579_v19  ;;  %v3474_v58 = vmul.f32 0.5, %v17580_v60  ;;  %v17581_v40 = vld [vmem:[#allocation99_spill] sm:$0xff]  ;;  %v13297_v3 = vmul.f32 0.7978846, %v4033_v22  ;;  %v3488_v32 = vmul.f32 0.5, %v17586_v2  ;;  %v13305_v60 = vpop.xlane.xlu1 %5263 }
 0x30b   : > { %17577 = vst [vmem:[#allocation48_spill] sm:$0xff] %v13283_v50  ;;  %v3487_v14 = vmul.f32 0.5, %v17581_v40  ;;  %17582 = vst [vmem:[#allocation151_spill] sm:$0xff] %v13293_v5  ;;  %v13295_v43 = vpop.xlane.xlu0 %5333  ;;  %v9355_v15 = vpop.eup %9354  ;;  %v13299_v37 = vmul.f32 0.7978846, %v4034_v45  ;;  %v3782_v54 = vmul.f32 %v3654_v35, %v13230_v18  ;;  %v3783_v51 = vmul.f32 %v3655_v44, %v13241_v59  ;;  %v17589_v47 = vld [vmem:[#allocation116_spill] sm:$0xff] }
 0x30c   : > { %17583 = vst [vmem:[#allocation120_spill] sm:$0xff] %v13295_v43  ;;  %17584 = vst [vmem:[#allocation55_spill] sm:$0xff] %v13297_v3  ;;  %v13303_v19 = vpop.f32.mrf.mxu0  ;;  %v13307_v40 = vmul.f32 0.7978846, %v4035_v39  ;;  %v4369_v27 = vadd.f32 1.0, %v9355_v15  ;;  %v13311_v43 = vmul.f32 0.5, %v17589_v47  ;;  %v3908_v45 = vmul.f32 %v3780_v4, %v13208_v6 }
 0x30d   : > { %17585 = vst [vmem:[#allocation62_spill] sm:$0xff] %v13299_v37  ;;  %17587 = vst [vmem:[#allocation99_spill] sm:$0xff] %v13305_v60  ;;  %v9357_v22 = vpop.eup %9356  ;;  %v17590_v3 = vld [vmem:[#allocation154_spill] sm:$0xff]  ;;  %v3909_v2 = vmul.f32 %v3781_v34, %v13212_v33  ;;  %v3656_v35 = vmul.f32 0.044715, %v13283_v50  ;;  %v17591_v37 = vld [vmem:[#allocation103_spill] sm:$0xff]  ;;  %v3910_v34 = vmul.f32 %v3782_v54, %v13230_v18  ;;  %v3911_v54 = vmul.f32 %v3783_v51, %v13241_v59 }
 0x30e   : > { %17588 = vst [vmem:[#allocation109_spill] sm:$0xff] %v13307_v40  ;;  %5747 = vadd.xlane.f32.xlu1 %v17590_v3  ;;  %v4118_v24 = vmul.f32 0.7978846, %v17591_v37  ;;  %v13318_v60 = vpop.f32.mrf.mxu0  ;;  %v9359_v39 = vpop.eup %9358  ;;  %v17592_v15 = vld [vmem:[#allocation128_spill] sm:$0xff]  ;;  %v4370_v44 = vadd.f32 1.0, %v9357_v22  ;;  %v4497_v42 = vmul.f32 %v4369_v27, %v3473_v9  ;;  %v17593_v38 = vld [vmem:[#allocation117_spill] sm:$0xff]  ;;  %v13328_v37 = vadd.f32 %v13135_v41, %v11835_v30 }
 0x30f   : > { %5494 = vadd.xlane.f32.xlu0 %v17592_v15  ;;  %v3657_v47 = vmul.f32 0.044715, %v13293_v5  ;;  %v3492_v25 = vmul.f32 0.5, %v17593_v38  ;;  %v13323_v3 = vpop.xlane.xlu0 %5273  ;;  %v9361_v4 = vpop.eup %9360  ;;  %v4383_v11 = vadd.f32 1.0, %v9359_v39  ;;  %v17596_v40 = vld [vmem:[#allocation101_spill] sm:$0xff]  ;;  %v13334_v27 = vadd.f32 %v13151_v16, %v11821_v52  ;;  %v17598_v15 = vld [vmem:[#allocation159_spill] sm:$0xff] }
 0x310   : > { %17594 = vst [vmem:[#allocation116_spill] sm:$0xff] %v13323_v3  ;;  %17595 = vst [vmem:[#allocation154_spill] sm:$0xff] %v13328_v37  ;;  %9366 = vtanh.f32 %v17596_v40  ;;  %v4498_v53 = vmul.f32 %v4370_v44, %v3474_v58  ;;  %v4637_v22 = vmul.f32 %v17444_v46, %v4497_v42  ;;  %v4384_v9 = vadd.f32 1.0, %v9361_v4  ;;  %v13336_v38 = vpop.f32.mrf.mxu0  ;;  %v13344_v58 = vpop.xlane.xlu1 %5327 }
 0x311   : > { %17597 = vst [vmem:[#allocation103_spill] sm:$0xff] %v13334_v27  ;;  %v4511_v39 = vmul.f32 %v4383_v11, %v3487_v14  ;;  %9368 = vtanh.f32 %v4118_v24  ;;  %v13342_v41 = vadd.f32 %v13162_v17, %v11835_v30  ;;  %17600 = vst [vmem:[#allocation117_spill] sm:$0xff] %v13344_v58  ;;  %v3784_v16 = vmul.f32 %v3656_v35, %v13283_v50 }
 0x312   : > { %5685 = vadd.xlane.f32.xlu1 %v17598_v15  ;;  %v4638_v42 = vmul.f32 %v17445_v49, %v4498_v53  ;;  %v4512_v40 = vmul.f32 %v4384_v9, %v3488_v32  ;;  %v13350_v44 = vadd.f32 %v13177_v7, %v11821_v52  ;;  %v4036_v24 = vadd.f32 %v3908_v45, %v13208_v6  ;;  %v13361_v7 = vpop.f32.mrf.mxu0 }
 0x313   : > { %17599 = vst [vmem:[#allocation128_spill] sm:$0xff] %v13342_v41  ;;  %v13352_v4 = vpop.xlane.xlu0 %5337  ;;  %v4651_v11 = vmul.f32 %v17444_v46, %v4511_v39  ;;  %v4037_v17 = vadd.f32 %v3909_v2, %v13212_v33  ;;  %v3658_v14 = vmul.f32 0.044715, %v13328_v37  ;;  %v3785_v53 = vmul.f32 %v3657_v47, %v13293_v5 }
 0x314   : > { %17601 = vst [vmem:[#allocation101_spill] sm:$0xff] %v13350_v44  ;;  %17602 = vst [vmem:[#allocation159_spill] sm:$0xff] %v13352_v4  ;;  %v9363_v51 = vpop.eup %9362  ;;  %v4769_v15 = vadd.f32 %v4638_v42, %v4637_v22  ;;  %v4652_v32 = vmul.f32 %v17445_v49, %v4512_v40  ;;  %v3659_v35 = vmul.f32 0.044715, %v13334_v27  ;;  %v4038_v4 = vadd.f32 %v3910_v34, %v13230_v18 }
 0x315   : > { %v3660_v39 = vmul.f32 0.044715, %v13342_v41  ;;  %v3661_v45 = vmul.f32 0.044715, %v13350_v44  ;;  %v13368_v2 = vadd.f32 %v13186_v26, %v11835_v30  ;;  %v4387_v42 = vadd.f32 1.0, %v9363_v51  ;;  %v13381_v26 = vpop.xlane.xlu1 %5267 }
 0x316   : > { %v9365_v9 = vpop.eup %9364  ;;  %4770 = vadd.xlane.f32.xlu0 %v4769_v15  ;;  %v4790_v22 = vadd.f32 %v4652_v32, %v4651_v11  ;;  %v13372_v47 = vadd.f32 %v13197_v1, %v11821_v52  ;;  %v13376_v3 = vmul.f32 0.7978846, %v4036_v24  ;;  %v4039_v34 = vadd.f32 %v3911_v54, %v13241_v59  ;;  %17606 = vst [vmem:[#allocation221_spill] sm:$0xff] %v13381_v26  ;;  %v17608_v15 = vld [vmem:[#allocation118_spill] sm:$0xff]  ;;  %v13388_v32 = vpop.f32.mrf.mxu0 }
 0x317   : > { %17603 = vst [vmem:[#allocation218_spill] sm:$0xff] %v13368_v2  ;;  %v4388_v40 = vadd.f32 1.0, %v9365_v9  ;;  %v13374_v58 = vpop.xlane.xlu0 %5277  ;;  %v3912_v18 = vmul.f32 %v3784_v16, %v13283_v50  ;;  %v3786_v33 = vmul.f32 %v3658_v14, %v13328_v37  ;;  %v13383_v11 = vmul.f32 0.7978846, %v4037_v17  ;;  %v17610_v9 = vld [vmem:[#allocation130_spill] sm:$0xff] }
 0x318   : > { %17604 = vst [vmem:[#allocation219_spill] sm:$0xff] %v13372_v47  ;;  %17605 = vst [vmem:[#allocation220_spill] sm:$0xff] %v13374_v58  ;;  %4791 = vadd.xlane.f32.xlu1 %v4790_v22  ;;  %v3913_v51 = vmul.f32 %v3785_v53, %v13293_v5  ;;  %v3787_v1 = vmul.f32 %v3659_v35, %v13334_v27  ;;  %9370 = vtanh.f32 %v17608_v15  ;;  %v13390_v24 = vmul.f32 0.7978846, %v4038_v4  ;;  %v17611_v35 = vld [vmem:[#allocation121_spill] sm:$0xff]  ;;  %v17651_v59 = vld [vmem:[#allocation174_spill] sm:$0xff] }
 0x319   : > { %17607 = vst [vmem:[#allocation222_spill] sm:$0xff] %v13383_v11  ;;  %v3788_v54 = vmul.f32 %v3660_v39, %v13342_v41  ;;  %v3789_v16 = vmul.f32 %v3661_v45, %v13350_v44  ;;  %v3662_v14 = vmul.f32 0.044715, %v13368_v2  ;;  %v4515_v17 = vmul.f32 %v4387_v42, %v13311_v43  ;;  %v17613_v39 = vld [vmem:[#allocation72_spill] sm:$0xff]  ;;  %v17615_v11 = vld [vmem:[#allocation107_spill] sm:$0xff] }
 0x31a   : > { %17609 = vst [vmem:[#allocation118_spill] sm:$0xff] %v13390_v24  ;;  %5558 = vadd.xlane.f32.xlu0 %v17610_v9  ;;  %v4516_v22 = vmul.f32 %v4388_v40, %v3492_v25  ;;  %v3663_v53 = vmul.f32 0.044715, %v13372_v47  ;;  %9372 = vtanh.f32 %v17611_v35  ;;  %v4040_v4 = vadd.f32 %v3912_v18, %v13283_v50  ;;  %v17614_v45 = vld [vmem:[#allocation152_spill] sm:$0xff]  ;;  %v17616_v42 = vld [vmem:[#allocation79_spill] sm:$0xff]  ;;  %v13410_v35 = vpop.f32.mrf.mxu0  ;;  %v13415_v50 = vpop.xlane.xlu1 %5331 }
 0x31b   : > { %v13399_v15 = vpop.xlane.xlu0 %5341  ;;  %v3914_v58 = vmul.f32 %v3786_v33, %v13328_v37  ;;  %v3477_v26 = vmul.f32 0.5, %v17613_v39  ;;  %9374 = vtanh.f32 %v17614_v45  ;;  %v4041_v43 = vadd.f32 %v3913_v51, %v13293_v5  ;;  %v17617_v9 = vld [vmem:[#allocation160_spill] sm:$0xff]  ;;  %17618 = vst [vmem:[#allocation121_spill] sm:$0xff] %v13415_v50 }
 0x31c   : > { %17612 = vst [vmem:[#allocation130_spill] sm:$0xff] %v13399_v15  ;;  %5687 = vadd.xlane.f32.xlu1 %v17615_v11  ;;  %v3915_v25 = vmul.f32 %v3787_v1, %v13334_v27  ;;  %v3478_v40 = vmul.f32 0.5, %v17616_v42  ;;  %9376 = vtanh.f32 %v17617_v9  ;;  %v3916_v33 = vmul.f32 %v3788_v54, %v13342_v41  ;;  %v17619_v11 = vld [vmem:[#allocation133_spill] sm:$0xff]  ;;  %v17620_v9 = vld [vmem:[#allocation131_spill] sm:$0xff] }
 0x31d   : > { %v9367_v24 = vpop.eup %9366  ;;  %v3917_v39 = vmul.f32 %v3789_v16, %v13350_v44  ;;  %v3790_v45 = vmul.f32 %v3662_v14, %v13368_v2  ;;  %v4655_v51 = vmul.f32 %v17444_v46, %v4515_v17  ;;  %v4656_v1 = vmul.f32 %v17445_v49, %v4516_v22 }
 0x31e   : > { %v4373_v18 = vadd.f32 1.0, %v9367_v24  ;;  %v9369_v15 = vpop.eup %9368  ;;  %5496 = vadd.xlane.f32.xlu0 %v17619_v11  ;;  %v3791_v42 = vmul.f32 %v3663_v53, %v13372_v47  ;;  %9378 = vtanh.f32 %v17620_v9  ;;  %v4042_v54 = vadd.f32 %v3914_v58, %v13328_v37  ;;  %v17623_v11 = vld [vmem:[#allocation167_spill] sm:$0xff]  ;;  %v17625_v53 = vld [vmem:[#allocation134_spill] sm:$0xff]  ;;  %v13438_v9 = vpop.f32.mrf.mxu0  ;;  %v17637_v37 = vld [vmem:[#allocation137_spill] sm:$0xff] }
 0x31f   : > { %v13422_v24 = vpop.xlane.xlu0 %5281  ;;  %v4374_v16 = vadd.f32 1.0, %v9369_v15  ;;  %v13427_v14 = vadd.f32 %v13214_v8, %v11835_v30  ;;  %v13429_v50 = vmul.f32 0.7978846, %v4039_v34  ;;  %v4043_v17 = vadd.f32 %v3915_v25, %v13334_v27 }
 0x320   : > { %17621 = vst [vmem:[#allocation72_spill] sm:$0xff] %v13422_v24  ;;  %v4501_v5 = vmul.f32 %v4373_v18, %v3477_v26  ;;  %5689 = vadd.xlane.f32.xlu1 %v17623_v11  ;;  %v13435_v22 = vadd.f32 %v13232_v21, %v11821_v52  ;;  %9380 = vtanh.f32 %v17625_v53  ;;  %v4044_v8 = vadd.f32 %v3916_v33, %v13342_v41  ;;  %v17626_v18 = vld [vmem:[#allocation138_spill] sm:$0xff]  ;;  %v17650_v41 = vld [vmem:[#allocation143_spill] sm:$0xff] }
 0x321   : > { %17622 = vst [vmem:[#allocation152_spill] sm:$0xff] %v13427_v14  ;;  %v4502_v58 = vmul.f32 %v4374_v16, %v3478_v40  ;;  %v3918_v34 = vmul.f32 %v3790_v45, %v13368_v2  ;;  %v13443_v15 = vmul.f32 0.7978846, %v4040_v4  ;;  %v4796_v25 = vadd.f32 %v4656_v1, %v4655_v51  ;;  %v13456_v45 = vpop.xlane.xlu1 %5271  ;;  %v17632_v51 = vld [vmem:[#allocation86_spill] sm:$0xff] }
 0x322   : > { %17624 = vst [vmem:[#allocation107_spill] sm:$0xff] %v13435_v22  ;;  %v4641_v26 = vmul.f32 %v17444_v46, %v4501_v5  ;;  %5498 = vadd.xlane.f32.xlu0 %v17626_v18  ;;  %v4045_v11 = vadd.f32 %v3917_v39, %v13350_v44  ;;  %v3919_v21 = vmul.f32 %v3791_v42, %v13372_v47  ;;  %v13450_v53 = vmul.f32 0.7978846, %v4041_v43  ;;  %v17633_v39 = vld [vmem:[#allocation87_spill] sm:$0xff]  ;;  %v13463_v18 = vpop.f32.mrf.mxu0 }
 0x323   : > { %v13448_v24 = vpop.xlane.xlu0 %5345  ;;  %v13452_v40 = vmul.f32 0.7978846, %v4042_v54  ;;  %v4642_v5 = vmul.f32 %v17445_v49, %v4502_v58  ;;  %v3664_v33 = vmul.f32 0.044715, %v13427_v14  ;;  %17630 = vst [vmem:[#allocation131_spill] sm:$0xff] %v13456_v45  ;;  %v3481_v1 = vmul.f32 0.5, %v17632_v51 }
 0x324   : > { %17627 = vst [vmem:[#allocation79_spill] sm:$0xff] %v13448_v24  ;;  %17628 = vst [vmem:[#allocation160_spill] sm:$0xff] %v13450_v53  ;;  %4797 = vadd.xlane.f32.xlu1 %v4796_v25  ;;  %v13458_v4 = vmul.f32 0.7978846, %v4043_v17  ;;  %v3482_v16 = vmul.f32 0.5, %v17633_v39  ;;  %v13468_v58 = vadd.f32 %v3918_v34, %v13368_v2  ;;  %v17635_v44 = vld [vmem:[#allocation127_spill] sm:$0xff]  ;;  %v4047_v17 = vadd.f32 %v3919_v21, %v13372_v47 }
 0x325   : > { %17629 = vst [vmem:[#allocation133_spill] sm:$0xff] %v13452_v40  ;;  %v3665_v42 = vmul.f32 0.044715, %v13435_v22  ;;  %v9371_v43 = vpop.eup %9370  ;;  %v4775_v54 = vadd.f32 %v4642_v5, %v4641_v26  ;;  %v13465_v24 = vmul.f32 0.7978846, %v4044_v8  ;;  %v3495_v45 = vmul.f32 0.5, %v17635_v44 }
 0x326   : > { %17631 = vst [vmem:[#allocation167_spill] sm:$0xff] %v13458_v4  ;;  %v13471_v25 = vmul.f32 0.7978846, %v4045_v11  ;;  %v4377_v51 = vadd.f32 1.0, %v9371_v43  ;;  %v3496_v39 = vmul.f32 0.5, %v17637_v37  ;;  %v3792_v26 = vmul.f32 %v3664_v33, %v13427_v14  ;;  %v17641_v34 = vld [vmem:[#allocation140_spill] sm:$0xff]  ;;  %v13490_v33 = vpop.f32.mrf.mxu0 }
 0x327   : > { %17634 = vst [vmem:[#allocation134_spill] sm:$0xff] %v13465_v24  ;;  %v13475_v40 = vpop.xlane.xlu0 %5285  ;;  %v9373_v53 = vpop.eup %9372  ;;  %4776 = vadd.xlane.f32.xlu0 %v4775_v54  ;;  %v13480_v8 = vadd.f32 %v13249_v55, %v11835_v30  ;;  %v13484_v44 = vadd.f32 %v13269_v63, %v11821_v52  ;;  %9382 = vtanh.f32 %v17641_v34  ;;  %v17642_v21 = vld [vmem:[#allocation95_spill] sm:$0xff]  ;;  %v3793_v43 = vmul.f32 %v3665_v42, %v13435_v22  ;;  %v17643_v54 = vld [vmem:[#allocation97_spill] sm:$0xff] }
 0x328   : > { %17636 = vst [vmem:[#allocation138_spill] sm:$0xff] %v13471_v25  ;;  %17638 = vst [vmem:[#allocation86_spill] sm:$0xff] %v13475_v40  ;;  %v9375_v11 = vpop.eup %9374  ;;  %5691 = vadd.xlane.f32.xlu1 %v17642_v21  ;;  %v4378_v37 = vadd.f32 1.0, %v9373_v53  ;;  %v4505_v5 = vmul.f32 %v4377_v51, %v3481_v1  ;;  %v3485_v40 = vmul.f32 0.5, %v17643_v54  ;;  %v13494_v25 = vadd.f32 %v13285_v62, %v11835_v30  ;;  %v17646_v34 = vld [vmem:[#allocation141_spill] sm:$0xff]  ;;  %v13501_v53 = vpop.xlane.xlu1 %5335  ;;  %v17648_v21 = vld [vmem:[#allocation98_spill] sm:$0xff] }
 0x329   : > { %17639 = vst [vmem:[#allocation87_spill] sm:$0xff] %v13480_v8  ;;  %17640 = vst [vmem:[#allocation127_spill] sm:$0xff] %v13484_v44  ;;  %v9377_v2 = vpop.eup %9376  ;;  %v4391_v55 = vadd.f32 1.0, %v9375_v11  ;;  %v13498_v63 = vadd.f32 %v13303_v19, %v11821_v52  ;;  %9384 = vtanh.f32 %v17646_v34  ;;  %v3486_v54 = vmul.f32 0.5, %v17648_v21  ;;  %v13514_v21 = vpop.f32.mrf.mxu0 }
 0x32a   : > { %17644 = vst [vmem:[#allocation137_spill] sm:$0xff] %v13494_v25  ;;  %17647 = vst [vmem:[#allocation95_spill] sm:$0xff] %v13501_v53  ;;  %v4506_v1 = vmul.f32 %v4378_v37, %v3482_v16  ;;  %v4645_v42 = vmul.f32 %v17444_v46, %v4505_v5  ;;  %v4392_v51 = vadd.f32 1.0, %v9377_v2  ;;  %v3920_v27 = vmul.f32 %v3792_v26, %v13427_v14 }
 0x32b   : > { %17645 = vst [vmem:[#allocation140_spill] sm:$0xff] %v13498_v63  ;;  %v13505_v47 = vpop.xlane.xlu0 %5349  ;;  %v9379_v11 = vpop.eup %9378  ;;  %5500 = vadd.xlane.f32.xlu0 %v17650_v41  ;;  %v4519_v62 = vmul.f32 %v4391_v55, %v3495_v45  ;;  %v3666_v19 = vmul.f32 0.044715, %v13480_v8  ;;  %v3667_v34 = vmul.f32 0.044715, %v13484_v44  ;;  %v3921_v2 = vmul.f32 %v3793_v43, %v13435_v22  ;;  %v17652_v55 = vld [vmem:[#allocation84_spill] sm:$0xff] }
 0x32c   : > { %17649 = vst [vmem:[#allocation97_spill] sm:$0xff] %v13505_v47  ;;  %5693 = vadd.xlane.f32.xlu1 %v17651_v59  ;;  %v4646_v16 = vmul.f32 %v17445_v49, %v4506_v1  ;;  %v4520_v37 = vmul.f32 %v4392_v51, %v3496_v39  ;;  %v4381_v5 = vadd.f32 1.0, %v9379_v11  ;;  %v3668_v45 = vmul.f32 0.044715, %v13494_v25  ;;  %v17654_v11 = vld [vmem:[#allocation64_spill] sm:$0xff]  ;;  %v13530_v4 = vpop.xlane.xlu1 %5275 }
 0x32d   : > { %v9381_v47 = vpop.eup %9380  ;;  %v4659_v41 = vmul.f32 %v17444_v46, %v4519_v62  ;;  %v3669_v26 = vmul.f32 0.044715, %v13498_v63  ;;  %9386 = vtanh.f32 %v17652_v55  ;;  %v3794_v43 = vmul.f32 %v3666_v19, %v13480_v8  ;;  %17656 = vst [vmem:[#allocation143_spill] sm:$0xff] %v13530_v4  ;;  %v13537_v19 = vpop.f32.mrf.mxu0  ;;  %v17666_v4 = vld [vmem:[#allocation147_spill] sm:$0xff] }
 0x32e   : > { %v4781_v53 = vadd.f32 %v4646_v16, %v4645_v42  ;;  %v4660_v59 = vmul.f32 %v17445_v49, %v4520_v37  ;;  %v4382_v24 = vadd.f32 1.0, %v9381_v47  ;;  %v4509_v1 = vmul.f32 %v4381_v5, %v3485_v40 }
 0x32f   : > { %v13521_v39 = vpop.xlane.xlu0 %5289  ;;  %v3795_v51 = vmul.f32 %v3667_v34, %v13484_v44  ;;  %9388 = vtanh.f32 %v17654_v11  ;;  %v13528_v62 = vadd.f32 %v13318_v60, %v11835_v30  ;;  %v13535_v40 = vadd.f32 %v13336_v38, %v11821_v52  ;;  %v13568_v11 = vpop.f32.mrf.mxu0 }
 0x330   : > { %17653 = vst [vmem:[#allocation141_spill] sm:$0xff] %v13521_v39  ;;  %4782 = vadd.xlane.f32.xlu0 %v4781_v53  ;;  %v4802_v42 = vadd.f32 %v4660_v59, %v4659_v41  ;;  %v4510_v16 = vmul.f32 %v4382_v24, %v3486_v54  ;;  %v4649_v47 = vmul.f32 %v17444_v46, %v4509_v1  ;;  %v13540_v34 = vmul.f32 0.7978846, %v13468_v58 }
 0x331   : > { %17655 = vst [vmem:[#allocation98_spill] sm:$0xff] %v13528_v62  ;;  %v13542_v37 = vmul.f32 0.7978846, %v4047_v17  ;;  %v4048_v60 = vadd.f32 %v3920_v27, %v13427_v14  ;;  %v3796_v5 = vmul.f32 %v3668_v45, %v13494_v25  ;;  %v3797_v53 = vmul.f32 %v3669_v26, %v13498_v63  ;;  %v17660_v45 = vld [vmem:[#allocation110_spill] sm:$0xff] }
 0x332   : > { %17657 = vst [vmem:[#allocation174_spill] sm:$0xff] %v13540_v34  ;;  %4803 = vadd.xlane.f32.xlu1 %v4802_v42  ;;  %v4650_v24 = vmul.f32 %v17445_v49, %v4510_v16  ;;  %v13550_v38 = vadd.f32 %v13361_v7, %v11835_v30  ;;  %v13554_v54 = vadd.f32 %v13388_v32, %v11821_v52  ;;  %v3489_v55 = vmul.f32 0.5, %v17660_v45  ;;  %v13592_v34 = vpop.f32.mrf.mxu0 }
 0x333   : > { %v13556_v58 = vpop.xlane.xlu0 %5353  ;;  %v4049_v17 = vadd.f32 %v3921_v2, %v13435_v22  ;;  %v3922_v27 = vmul.f32 %v3794_v43, %v13480_v8  ;;  %v3923_v41 = vmul.f32 %v3795_v51, %v13484_v44  ;;  %v3670_v1 = vmul.f32 0.044715, %v13528_v62  ;;  %v17663_v43 = vld [vmem:[#allocation112_spill] sm:$0xff] }
 0x334   : > { %17658 = vst [vmem:[#allocation84_spill] sm:$0xff] %v13554_v54  ;;  %17659 = vst [vmem:[#allocation64_spill] sm:$0xff] %v13556_v58  ;;  %v9383_v59 = vpop.eup %9382  ;;  %v4787_v26 = vadd.f32 %v4650_v24, %v4649_v47  ;;  %v3671_v7 = vmul.f32 0.044715, %v13535_v40  ;;  %v13566_v32 = vadd.f32 %v13410_v35, %v11835_v30  ;;  %v13570_v42 = vmul.f32 0.7978846, %v4048_v60  ;;  %v13574_v58 = vpop.xlane.xlu1 %5339 }
 0x335   : > { %v3924_v2 = vmul.f32 %v3796_v5, %v13494_v25  ;;  %v3490_v51 = vmul.f32 0.5, %v17663_v43  ;;  %v4385_v16 = vadd.f32 1.0, %v9383_v59  ;;  %17664 = vst [vmem:[#allocation112_spill] sm:$0xff] %v13574_v58  ;;  %v17665_v47 = vld [vmem:[#allocation181_spill] sm:$0xff]  ;;  %v3925_v24 = vmul.f32 %v3797_v53, %v13498_v63 }
 0x336   : > { %17661 = vst [vmem:[#allocation110_spill] sm:$0xff] %v13566_v32  ;;  %17662 = vst [vmem:[#allocation223_spill] sm:$0xff] %v13570_v42  ;;  %v9385_v45 = vpop.eup %9384  ;;  %4788 = vadd.xlane.f32.xlu0 %v4787_v26  ;;  %5695 = vadd.xlane.f32.xlu1 %v17665_v47  ;;  %v3672_v35 = vmul.f32 0.044715, %v13550_v38  ;;  %v3673_v39 = vmul.f32 0.044715, %v13554_v54  ;;  %9390 = vtanh.f32 %v17666_v4  ;;  %v4050_v5 = vadd.f32 %v3922_v27, %v13480_v8 }
 0x337   : > { %v13581_v60 = vpop.xlane.xlu0 %5470  ;;  %v4386_v43 = vadd.f32 1.0, %v9385_v45  ;;  %v4513_v59 = vmul.f32 %v4385_v16, %v3489_v55  ;;  %v13586_v58 = vadd.f32 %v13438_v9, %v11821_v52  ;;  %v4051_v26 = vadd.f32 %v3923_v41, %v13484_v44  ;;  %v17669_v55 = vld [vmem:[#allocation144_spill] sm:$0xff]  ;;  %v17671_v8 = vld [vmem:[#allocation54_spill] sm:$0xff] }
 0x338   : > { %17667 = vst [vmem:[#allocation181_spill] sm:$0xff] %v13581_v60  ;;  %v3798_v53 = vmul.f32 %v3670_v1, %v13528_v62  ;;  %v3799_v47 = vmul.f32 %v3671_v7, %v13535_v40  ;;  %v3674_v22 = vmul.f32 0.044715, %v13566_v32  ;;  %v4052_v4 = vadd.f32 %v3924_v2, %v13494_v25  ;;  %v17670_v9 = vld [vmem:[#allocation80_spill] sm:$0xff]  ;;  %v17672_v1 = vld [vmem:[#allocation146_spill] sm:$0xff] }
 0x339   : > { %17668 = vst [vmem:[#allocation147_spill] sm:$0xff] %v13586_v58  ;;  %v4514_v60 = vmul.f32 %v4386_v43, %v3490_v51  ;;  %v4653_v27 = vmul.f32 %v17444_v46, %v4513_v59  ;;  %v3499_v16 = vmul.f32 0.5, %v17669_v55  ;;  %v4053_v41 = vadd.f32 %v3925_v24, %v13498_v63  ;;  %v17674_v59 = vld [vmem:[#allocation149_spill] sm:$0xff]  ;;  %v17677_v63 = vld [vmem:[#allocation176_spill] sm:$0xff] }
 0x33a   : > { %v9387_v45 = vpop.eup %9386  ;;  %5749 = vadd.xlane.f32.xlu0 %v17670_v9  ;;  %5697 = vadd.xlane.f32.xlu1 %v17671_v8  ;;  %v3500_v7 = vmul.f32 0.5, %v17672_v1  ;;  %v3800_v44 = vmul.f32 %v3672_v35, %v13550_v38  ;;  %v3801_v14 = vmul.f32 %v3673_v39, %v13554_v54  ;;  %v3675_v43 = vmul.f32 0.044715, %v13586_v58  ;;  %v13608_v9 = vpop.xlane.xlu1 %5279  ;;  %v17676_v1 = vld [vmem:[#allocation175_spill] sm:$0xff] }
 0x33b   : > { %v13603_v42 = vpop.xlane.xlu0 %5534  ;;  %v4654_v2 = vmul.f32 %v17445_v49, %v4514_v60  ;;  %v4395_v51 = vadd.f32 1.0, %v9387_v45  ;;  %9392 = vtanh.f32 %v17674_v59  ;;  %17675 = vst [vmem:[#allocation80_spill] sm:$0xff] %v13608_v9  ;;  %v3926_v8 = vmul.f32 %v3798_v53, %v13528_v62  ;;  %v13614_v39 = vpop.f32.mrf.mxu0 }
 0x33c   : > { %17673 = vst [vmem:[#allocation144_spill] sm:$0xff] %v13603_v42  ;;  %v9389_v55 = vpop.eup %9388  ;;  %v3927_v24 = vmul.f32 %v3799_v47, %v13535_v40  ;;  %v3802_v35 = vmul.f32 %v3674_v22, %v13566_v32  ;;  %9394 = vtanh.f32 %v17676_v1  ;;  %v13617_v25 = vmul.f32 0.7978846, %v4049_v17  ;;  %v13626_v22 = vpop.f32.mrf.mxu1 }
 0x33d   : > { %v4793_v42 = vadd.f32 %v4654_v2, %v4653_v27  ;;  %v4396_v60 = vadd.f32 1.0, %v9389_v55  ;;  %v4523_v45 = vmul.f32 %v4395_v51, %v3499_v16  ;;  %9396 = vtanh.f32 %v17677_v63  ;;  %17681 = vst [vmem:[#allocation175_spill] sm:$0xff] %v13626_v22  ;;  %v17683_v2 = vld [vmem:[#allocation161_spill] sm:$0xff] }
 0x33e   : > { %17678 = vst [vmem:[#allocation54_spill] sm:$0xff] %v13617_v25  ;;  %v13619_v59 = vmul.f32 0.7978846, %v4050_v5  ;;  %v13621_v9 = vmul.f32 0.7978846, %v4051_v26  ;;  %v3928_v53 = vmul.f32 %v3800_v44, %v13550_v38  ;;  %v3929_v16 = vmul.f32 %v3801_v14, %v13554_v54  ;;  %v13637_v44 = vpop.f32.mrf.mxu0 }
 0x33f   : > { %v13624_v47 = vpop.xlane.xlu0 %5472  ;;  %4794 = vadd.xlane.f32.xlu0 %v4793_v42  ;;  %v4524_v1 = vmul.f32 %v4396_v60, %v3500_v7  ;;  %v4663_v27 = vmul.f32 %v17444_v46, %v4523_v45  ;;  %v3803_v63 = vmul.f32 %v3675_v43, %v13586_v58  ;;  %v13631_v17 = vmul.f32 0.7978846, %v4052_v4  ;;  %v13646_v4 = vpop.xlane.xlu1 %5343  ;;  %v17685_v43 = vld [vmem:[#allocation125_spill] sm:$0xff] }
 0x340   : > { %17679 = vst [vmem:[#allocation146_spill] sm:$0xff] %v13619_v59  ;;  %17680 = vst [vmem:[#allocation149_spill] sm:$0xff] %v13624_v47  ;;  %v13633_v5 = vmul.f32 0.7978846, %v4053_v41  ;;  %v3930_v26 = vmul.f32 %v3802_v35, %v13566_v32  ;;  %9398 = vtanh.f32 %v17683_v2  ;;  %v4054_v42 = vadd.f32 %v3926_v8, %v13528_v62  ;;  %v2470_v45 = vpop.f32.mrf.mxu1  ;;  %v17697_v47 = vld [vmem:[#allocation77_spill] sm:$0xff] }
 0x341   : > { %v4664_v51 = vmul.f32 %v17445_v49, %v4524_v1  ;;  %v4055_v7 = vadd.f32 %v3927_v24, %v13535_v40  ;;  %v13644_v14 = vadd.f32 %v13463_v18, %v11835_v30  ;;  %17684 = vst [vmem:[#allocation161_spill] sm:$0xff] %v13646_v4  ;;  %v4056_v41 = vadd.f32 %v3928_v53, %v13550_v38  ;;  %v17689_v1 = vld [vmem:[#allocation166_spill] sm:$0xff] }
 0x342   : > { %17682 = vst [vmem:[#allocation176_spill] sm:$0xff] %v13633_v5  ;;  %v3493_v55 = vmul.f32 0.5, %v17685_v43  ;;  %v13652_v35 = vadd.f32 %v13490_v33, %v11821_v52  ;;  %v13656_v60 = vadd.f32 %v13514_v21, %v11835_v30  ;;  %v4057_v2 = vadd.f32 %v3929_v16, %v13554_v54  ;;  %v17690_v43 = vld [vmem:[#allocation126_spill] sm:$0xff] }
 0x343   : > { %v13658_v8 = vpop.xlane.xlu0 %5536  ;;  %v9391_v24 = vpop.eup %9390  ;;  %v4808_v18 = vadd.f32 %v4664_v51, %v4663_v27  ;;  %5751 = vadd.xlane.f32.xlu0 %v17689_v1  ;;  %v3931_v53 = vmul.f32 %v3803_v63, %v13586_v58  ;;  %v3494_v4 = vmul.f32 0.5, %v17690_v43  ;;  %v4058_v33 = vadd.f32 %v3930_v26, %v13566_v32 }
 0x344   : > { %17686 = vst [vmem:[#allocation125_spill] sm:$0xff] %v13652_v35  ;;  %17687 = vst [vmem:[#allocation224_spill] sm:$0xff] %v13656_v60  ;;  %v4389_v22 = vadd.f32 1.0, %v9391_v24  ;;  %v13667_v21 = vadd.f32 %v13537_v19, %v11821_v52  ;;  %v3354_v27 = vpop.f32.mrf.mxu0  ;;  %v13673_v51 = vmul.f32 0.7978846, %v4054_v42  ;;  %v13680_v26 = vadd.f32 %v13592_v34, %v11821_v52  ;;  %v17698_v34 = vld [vmem:[#allocation106_spill] sm:$0xff] }
 0x345   : > { %17688 = vst [vmem:[#allocation225_spill] sm:$0xff] %v13658_v8  ;;  %v13671_v8 = vadd.f32 %v13568_v11, %v11835_v30  ;;  %4809 = vadd.xlane.f32.xlu1 %v4808_v18  ;;  %v13675_v16 = vmul.f32 0.7978846, %v4055_v7  ;;  %v3676_v63 = vmul.f32 0.044715, %v13644_v14  ;;  %v13683_v24 = vadd.f32 %v2470_v45, %v11163_v23  ;;  %v17696_v7 = vld [vmem:[#allocation169_spill] sm:$0xff]  ;;  %v13696_v23 = vpop.xlane.xlu1 %5283 }
 0x346   : > { %17691 = vst [vmem:[#allocation166_spill] sm:$0xff] %v13667_v21  ;;  %17692 = vst [vmem:[#allocation126_spill] sm:$0xff] %v13673_v51  ;;  %v13685_v19 = vmul.f32 0.7978846, %v4056_v41  ;;  %v3677_v11 = vmul.f32 0.044715, %v13652_v35  ;;  %v4517_v43 = vmul.f32 %v4389_v22, %v3493_v55  ;;  %9400 = vtanh.f32 %v17698_v34 }
 0x347   : > { %17693 = vst [vmem:[#allocation226_spill] sm:$0xff] %v13680_v26  ;;  %v3678_v1 = vmul.f32 0.044715, %v13656_v60  ;;  %v13689_v18 = vpop.xlane.xlu0 %5474  ;;  %v13691_v42 = vmul.f32 0.7978846, %v4057_v2  ;;  %5753 = vadd.xlane.f32.xlu0 %v17696_v7  ;;  %v3503_v32 = vmul.f32 0.5, %v17697_v47  ;;  %v4059_v45 = vadd.f32 %v3931_v53, %v13586_v58  ;;  %v3358_v2 = vpop.f32.mrf.mxu0 }
 0x348   : > { %17694 = vst [vmem:[#allocation227_spill] sm:$0xff] %v13689_v18  ;;  %v9393_v54 = vpop.eup %9392  ;;  %17699 = vst [vmem:[#allocation169_spill] sm:$0xff] %v13696_v23  ;;  %v13698_v41 = vmul.f32 0.7978846, %v4058_v33  ;;  %v3679_v62 = vmul.f32 0.044715, %v13667_v21  ;;  %v3804_v7 = vmul.f32 %v3676_v63, %v13644_v14  ;;  %9402 = vtanh.f32 %v13053_v57 }
 0x349   : > { %17695 = vst [vmem:[#allocation228_spill] sm:$0xff] %v13691_v42  ;;  %v3680_v18 = vmul.f32 0.044715, %v13671_v8  ;;  %v9395_v42 = vpop.eup %9394  ;;  %5699 = vadd.xlane.f32.xlu1 %v13025_v20  ;;  %v4390_v22 = vadd.f32 1.0, %v9393_v54  ;;  %v17701_v55 = vld [vmem:[#allocation155_spill] sm:$0xff]  ;;  %v3806_v53 = vmul.f32 %v3678_v1, %v13656_v60  ;;  %v4657_v5 = vmul.f32 %v17444_v46, %v4517_v43 }
 0x34a   : > { %17700 = vst [vmem:[#allocation77_spill] sm:$0xff] %v13698_v41  ;;  %v3504_v47 = vmul.f32 0.5, %v17701_v55  ;;  %v3681_v34 = vmul.f32 0.044715, %v13680_v26  ;;  %v9397_v23 = vpop.eup %9396  ;;  %v4399_v33 = vadd.f32 1.0, %v9395_v42  ;;  %v3805_v41 = vmul.f32 %v3677_v11, %v13652_v35  ;;  %v17703_v42 = vld [vmem:[#allocation75_spill] sm:$0xff]  ;;  %v3360_v11 = vpop.f32.mrf.mxu0 }
 0x34b   : > { %v4518_v51 = vmul.f32 %v4390_v22, %v3494_v4  ;;  %v4400_v59 = vadd.f32 1.0, %v9397_v23  ;;  %9404 = vtanh.f32 %v13078_v10  ;;  %v13712_v20 = vpop.xlane.xlu0 %5476  ;;  %v3807_v63 = vmul.f32 %v3679_v62, %v13667_v21 }
 0x34c   : > { %17702 = vst [vmem:[#allocation106_spill] sm:$0xff] %v13712_v20  ;;  %v4527_v54 = vmul.f32 %v4399_v33, %v3503_v32  ;;  %v3808_v55 = vmul.f32 %v3680_v18, %v13671_v8  ;;  %v3497_v25 = vmul.f32 0.5, %v17703_v42  ;;  %v3809_v1 = vmul.f32 %v3681_v34, %v13680_v26  ;;  %v13724_v32 = vpop.xlane.xlu1 %5347  ;;  %v17709_v42 = vld [vmem:[#allocation49_spill] sm:$0xff] }
 0x34d   : > { %v9399_v58 = vpop.eup %9398  ;;  %5701 = vadd.xlane.f32.xlu1 %v13074_v29  ;;  %v4658_v57 = vmul.f32 %v17445_v49, %v4518_v51  ;;  %v4528_v4 = vmul.f32 %v4400_v59, %v3504_v47  ;;  %v13722_v10 = vadd.f32 %v13614_v39, %v11835_v30  ;;  %17705 = vst [vmem:[#allocation75_spill] sm:$0xff] %v13724_v32  ;;  %v13745_v33 = vmul.f32 0.7978846, %v4059_v45 }
 0x34e   : > { %v4667_v62 = vmul.f32 %v17444_v46, %v4527_v54  ;;  %v3932_v18 = vmul.f32 %v3804_v7, %v13644_v14  ;;  %v13730_v43 = vadd.f32 %v13637_v44, %v11821_v52  ;;  %v13733_v29 = vadd.f32 %v3354_v27, %v11835_v30  ;;  %v3364_v44 = vpop.f32.mrf.mxu0 }
 0x34f   : > { %17704 = vst [vmem:[#allocation155_spill] sm:$0xff] %v13722_v10  ;;  %v4799_v59 = vadd.f32 %v4658_v57, %v4657_v5  ;;  %v4668_v51 = vmul.f32 %v17445_v49, %v4528_v4  ;;  %v4393_v23 = vadd.f32 1.0, %v9399_v58  ;;  %v13737_v39 = vadd.f32 %v3358_v2, %v11821_v52  ;;  %v13749_v2 = vpop.xlane.xlu0 %5540 }
 0x350   : > { %v3933_v22 = vmul.f32 %v3805_v41, %v13652_v35  ;;  %v3934_v47 = vmul.f32 %v3806_v53, %v13656_v60  ;;  %v3935_v7 = vmul.f32 %v3807_v63, %v13667_v21  ;;  %v13743_v34 = vadd.f32 %v3360_v11, %v11835_v30  ;;  %17708 = vst [vmem:[#allocation231_spill] sm:$0xff] %v13749_v2  ;;  %v3366_v32 = vpop.f32.mrf.mxu0 }
 0x351   : > { %17706 = vst [vmem:[#allocation229_spill] sm:$0xff] %v13737_v39  ;;  %4800 = vadd.xlane.f32.xlu0 %v4799_v59  ;;  %v4814_v5 = vadd.f32 %v4668_v51, %v4667_v62  ;;  %v3936_v27 = vmul.f32 %v3808_v55, %v13671_v8  ;;  %v3682_v58 = vmul.f32 0.044715, %v13722_v10  ;;  %v3937_v41 = vmul.f32 %v3809_v1, %v13680_v26  ;;  %v13760_v62 = vpop.xlane.xlu1 %5287 }
 0x352   : > { %17707 = vst [vmem:[#allocation230_spill] sm:$0xff] %v13743_v34  ;;  %v3683_v53 = vmul.f32 0.044715, %v13730_v43  ;;  %v3684_v54 = vmul.f32 0.044715, %v13733_v29  ;;  %v13755_v63 = vadd.f32 %v3364_v44, %v11821_v52  ;;  %v4060_v45 = vadd.f32 %v3932_v18, %v13644_v14  ;;  %17710 = vst [vmem:[#allocation49_spill] sm:$0xff] %v13760_v62 }
 0x353   : > { %4815 = vadd.xlane.f32.xlu1 %v4814_v5  ;;  %v3498_v11 = vmul.f32 0.5, %v17709_v42  ;;  %v4521_v57 = vmul.f32 %v4393_v23, %v3497_v25  ;;  %v3685_v55 = vmul.f32 0.044715, %v13737_v39  ;;  %v9401_v4 = vpop.eup %9400  ;;  %v4061_v1 = vadd.f32 %v3933_v22, %v13652_v35  ;;  %v17711_v5 = vld [vmem:[#allocation170_spill] sm:$0xff]  ;;  %v17712_v62 = vld [vmem:[#allocation168_spill] sm:$0xff]  ;;  %v3370_v35 = vpop.f32.mrf.mxu0 }
 0x354   : > { %v4062_v59 = vadd.f32 %v3934_v47, %v13656_v60  ;;  %v4063_v51 = vadd.f32 %v3935_v7, %v13667_v21  ;;  %v3686_v44 = vmul.f32 0.044715, %v13743_v34  ;;  %v4394_v18 = vadd.f32 1.0, %v9401_v4  ;;  %v17715_v21 = vld [vmem:[#allocation177_spill] sm:$0xff] }
 0x355   : > { %5755 = vadd.xlane.f32.xlu0 %v17711_v5  ;;  %v3507_v42 = vmul.f32 0.5, %v12861_v56  ;;  %v3508_v25 = vmul.f32 0.5, %v12909_v31  ;;  %v3810_v23 = vmul.f32 %v3682_v58, %v13722_v10  ;;  %v3811_v2 = vmul.f32 %v3683_v53, %v13730_v43  ;;  %v9403_v7 = vpop.eup %9402  ;;  %v17713_v5 = vld [vmem:[#allocation171_spill] sm:$0xff]  ;;  %v13778_v31 = vpop.xlane.xlu0 %5478 }
 0x356   : > { %v3812_v22 = vmul.f32 %v3684_v54, %v13733_v29  ;;  %v3687_v47 = vmul.f32 0.044715, %v13755_v63  ;;  %9406 = vtanh.f32 %v17712_v62  ;;  %v4522_v20 = vmul.f32 %v4394_v18, %v3498_v11  ;;  %17714 = vst [vmem:[#allocation170_spill] sm:$0xff] %v13778_v31  ;;  %v13787_v18 = vpop.xlane.xlu1 %5351 }
 0x357   : > { %5703 = vadd.xlane.f32.xlu1 %v13082_v48  ;;  %v4661_v4 = vmul.f32 %v17444_v46, %v4521_v57  ;;  %v3813_v56 = vmul.f32 %v3685_v55, %v13737_v39  ;;  %9408 = vtanh.f32 %v17713_v5  ;;  %v4064_v53 = vadd.f32 %v3936_v27, %v13671_v8  ;;  %v17716_v55 = vld [vmem:[#allocation197_spill] sm:$0xff]  ;;  %17717 = vst [vmem:[#allocation168_spill] sm:$0xff] %v13787_v18 }
 0x358   : > { %v9405_v58 = vpop.eup %9404  ;;  %v4065_v54 = vadd.f32 %v3937_v41, %v13680_v26  ;;  %v4403_v60 = vadd.f32 1.0, %v9403_v7  ;;  %v3814_v62 = vmul.f32 %v3686_v44, %v13743_v34  ;;  %v4662_v48 = vmul.f32 %v17445_v49, %v4522_v20  ;;  %v17718_v7 = vld [vmem:[#allocation203_spill] sm:$0xff]  ;;  %v17719_v44 = vld [vmem:[#allocation202_spill] sm:$0xff] }
 0x359   : > { %5757 = vadd.xlane.f32.xlu0 %v17715_v21  ;;  %v4404_v11 = vadd.f32 1.0, %v9405_v58  ;;  %v3938_v57 = vmul.f32 %v3810_v23, %v13722_v10  ;;  %9410 = vtanh.f32 %v17716_v55  ;;  %v3939_v27 = vmul.f32 %v3811_v2, %v13730_v43 }
 0x35a   : > { %v4531_v5 = vmul.f32 %v4403_v60, %v3507_v42  ;;  %v3815_v41 = vmul.f32 %v3687_v47, %v13755_v63  ;;  %9412 = vtanh.f32 %v17718_v7  ;;  %v4805_v31 = vadd.f32 %v4662_v48, %v4661_v4  ;;  %v3372_v42 = vpop.f32.mrf.mxu0 }
 0x35b   : > { %5705 = vadd.xlane.f32.xlu1 %v17719_v44  ;;  %v4532_v21 = vmul.f32 %v4404_v11, %v3508_v25  ;;  %v3940_v20 = vmul.f32 %v3812_v22, %v13733_v29  ;;  %v3941_v58 = vmul.f32 %v3813_v56, %v13737_v39  ;;  %v13795_v23 = vmul.f32 0.7978846, %v4060_v45  ;;  %v13808_v22 = vpop.xlane.xlu0 %5480 }
 0x35c   : > { %v13797_v55 = vmul.f32 0.7978846, %v4061_v1  ;;  %v4671_v60 = vmul.f32 %v17444_v46, %v4531_v5  ;;  %v3942_v2 = vmul.f32 %v3814_v62, %v13743_v34  ;;  %v13801_v47 = vmul.f32 0.7978846, %v4062_v59  ;;  %17720 = vst [vmem:[#allocation171_spill] sm:$0xff] %v13808_v22  ;;  %v13818_v62 = vpop.xlane.xlu1 %5291  ;;  %v3376_v11 = vpop.f32.mrf.mxu0  ;;  %v17724_v5 = vld [vmem:[#allocation150_spill] sm:$0xff] }
 0x35d   : > { %4806 = vadd.xlane.f32.xlu0 %v4805_v31  ;;  %v4672_v7 = vmul.f32 %v17445_v49, %v4532_v21  ;;  %v13805_v25 = vadd.f32 %v3366_v32, %v11835_v30  ;;  %9414 = vtanh.f32 %v13243_v0  ;;  %v13810_v45 = vmul.f32 0.7978846, %v4063_v51  ;;  %17721 = vst [vmem:[#allocation177_spill] sm:$0xff] %v13818_v62  ;;  %v17725_v21 = vld [vmem:[#allocation153_spill] sm:$0xff] }
 0x35e   : > { %v4066_v1 = vadd.f32 %v3938_v57, %v13722_v10  ;;  %v3943_v4 = vmul.f32 %v3815_v41, %v13755_v63  ;;  %9416 = vtanh.f32 %v13254_v36  ;;  %v4067_v56 = vadd.f32 %v3939_v27, %v13730_v43  ;;  %v17723_v57 = vld [vmem:[#allocation183_spill] sm:$0xff] }
 0x35f   : > { %v4820_v59 = vadd.f32 %v4672_v7, %v4671_v60  ;;  %v4068_v31 = vadd.f32 %v3940_v20, %v13733_v29  ;;  %v4069_v32 = vadd.f32 %v3941_v58, %v13737_v39  ;;  %v13820_v0 = vmul.f32 0.7978846, %v4064_v53  ;;  %v8892_v53 = vld [vmem:[%s11177_s28 + $0x1f8] sm:$0xff] }
 0x360   : > { %v4070_v51 = vadd.f32 %v3942_v2, %v13743_v34  ;;  %v13824_v48 = vadd.f32 %v3370_v35, %v11821_v52  ;;  %9418 = vtanh.f32 %v13271_v13  ;;  %v13827_v36 = vmul.f32 0.7978846, %v4065_v54  ;;  %v13861_v62 = vpop.xlane.xlu1 %5355 }
 0x361   : > { %4821 = vadd.xlane.f32.xlu1 %v4820_v59  ;;  %5759 = vadd.xlane.f32.xlu0 %v17723_v57  ;;  %v3501_v27 = vmul.f32 0.5, %v17724_v5  ;;  %v3688_v41 = vmul.f32 0.044715, %v13805_v25  ;;  %9420 = vtanh.f32 %v13277_v61  ;;  %v13834_v44 = vmul.f32 0.7978846, %v4066_v1  ;;  %v13848_v61 = vpop.xlane.xlu0 %5482  ;;  %v3378_v5 = vpop.f32.mrf.mxu0  ;;  %17733 = vst [vmem:[#allocation153_spill] sm:$0xff] %v13861_v62 }
 0x362   : > { %17722 = vst [vmem:[#allocation197_spill] sm:$0xff] %v13824_v48  ;;  %v4071_v35 = vadd.f32 %v3943_v4, %v13755_v63  ;;  %v3502_v20 = vmul.f32 0.5, %v17725_v21  ;;  %v13839_v13 = vadd.f32 %v3372_v42, %v11835_v30  ;;  %v5678_v58 = vmul.f32 %v8892_v53, %v13683_v24  ;;  %17728 = vst [vmem:[#allocation183_spill] sm:$0xff] %v13848_v61  ;;  %v17730_v24 = vld [vmem:[#allocation187_spill] sm:$0xff]  ;;  %v17732_v53 = vld [vmem:[#allocation182_spill] sm:$0xff] }
 0x363   : > { %v9407_v54 = vpop.eup %9406  ;;  %v13842_v60 = vmul.f32 0.7978846, %v4067_v56  ;;  %v13844_v2 = vmul.f32 0.7978846, %v4068_v31  ;;  %v13846_v7 = vmul.f32 0.7978846, %v4069_v32  ;;  %v13854_v42 = vadd.f32 %v3376_v11, %v11821_v52  ;;  %v3382_v62 = vpop.f32.mrf.mxu0 }
 0x364   : > { %17726 = vst [vmem:[#allocation203_spill] sm:$0xff] %v13839_v13  ;;  %v9409_v1 = vpop.eup %9408  ;;  %v13850_v59 = vmul.f32 0.7978846, %v4070_v51  ;;  %v4397_v4 = vadd.f32 1.0, %v9407_v54  ;;  %v3689_v57 = vmul.f32 0.044715, %v13824_v48  ;;  %v3816_v18 = vmul.f32 %v3688_v41, %v13805_v25 }
 0x365   : > { %17727 = vst [vmem:[#allocation202_spill] sm:$0xff] %v13846_v7  ;;  %5707 = vadd.xlane.f32.xlu1 %v13252_v12  ;;  %5761 = vadd.xlane.f32.xlu0 %v17730_v24  ;;  %v4398_v56 = vadd.f32 1.0, %v9409_v1  ;;  %v17731_v31 = vld [vmem:[#allocation179_spill] sm:$0xff]  ;;  %v3512_v21 = vmul.f32 0.5, %v17732_v53  ;;  %v13863_v54 = vmul.f32 0.7978846, %v4071_v35 }
 0x366   : > { %17729 = vst [vmem:[#allocation150_spill] sm:$0xff] %v13850_v59  ;;  %v3511_v32 = vmul.f32 0.5, %v17731_v31  ;;  %v9411_v51 = vpop.eup %9410  ;;  %v4525_v22 = vmul.f32 %v4397_v4, %v3501_v27  ;;  %v3690_v11 = vmul.f32 0.044715, %v13839_v13  ;;  %v17734_v61 = vld [vmem:[#allocation180_spill] sm:$0xff]  ;;  %v3515_v1 = vmul.f32 0.5, %v13069_v28 }
 0x367   : > { %9422 = vtanh.f32 %v17734_v61  ;;  %v9413_v12 = vpop.eup %9412  ;;  %v4526_v34 = vmul.f32 %v4398_v56, %v3502_v20  ;;  %v4407_v24 = vadd.f32 1.0, %v9411_v51  ;;  %v17735_v31 = vld [vmem:[#allocation196_spill] sm:$0xff]  ;;  %v3817_v10 = vmul.f32 %v3689_v57, %v13824_v48  ;;  %v17736_v20 = vld [vmem:[#allocation189_spill] sm:$0xff]  ;;  %v13875_v56 = vpop.xlane.xlu0 %5484 }
 0x368   : > { %v3516_v39 = vmul.f32 0.5, %v17735_v31  ;;  %v4665_v53 = vmul.f32 %v17444_v46, %v4525_v22  ;;  %v4408_v41 = vadd.f32 1.0, %v9413_v12  ;;  %v3691_v35 = vmul.f32 0.044715, %v13854_v42  ;;  %17737 = vst [vmem:[#allocation187_spill] sm:$0xff] %v13875_v56  ;;  %v17738_v57 = vld [vmem:[#allocation109_spill] sm:$0xff] }
 0x369   : > { %5709 = vadd.xlane.f32.xlu1 %v5678_v58  ;;  %v4666_v27 = vmul.f32 %v17445_v49, %v4526_v34  ;;  %v4535_v4 = vmul.f32 %v4407_v24, %v3511_v32  ;;  %v3944_v61 = vmul.f32 %v3816_v18, %v13805_v25  ;;  %9424 = vtanh.f32 %v17736_v20  ;;  %v13884_v18 = vpop.xlane.xlu1 %5538 }
 0x36a   : > { %v9415_v28 = vpop.eup %9414  ;;  %v4536_v51 = vmul.f32 %v4408_v41, %v3512_v21  ;;  %v3818_v22 = vmul.f32 %v3690_v11, %v13839_v13  ;;  %v13879_v12 = vadd.f32 %v3378_v5, %v11835_v30  ;;  %9426 = vtanh.f32 %v17738_v57  ;;  %17739 = vst [vmem:[#allocation179_spill] sm:$0xff] %v13884_v18  ;;  %v17740_v21 = vld [vmem:[#allocation88_spill] sm:$0xff]  ;;  %v3384_v5 = vpop.f32.mrf.mxu0 }
 0x36b   : > { %v9417_v31 = vpop.eup %9416  ;;  %v4811_v58 = vadd.f32 %v4666_v27, %v4665_v53  ;;  %v4675_v34 = vmul.f32 %v17444_v46, %v4535_v4  ;;  %v4411_v32 = vadd.f32 1.0, %v9415_v28  ;;  %9428 = vtanh.f32 %v13376_v3  ;;  %v17742_v28 = vld [vmem:[#allocation204_spill] sm:$0xff]  ;;  %v13898_v7 = vpop.xlane.xlu0 %5486 }
 0x36c   : > { %v4676_v24 = vmul.f32 %v17445_v49, %v4536_v51  ;;  %v4412_v20 = vadd.f32 1.0, %v9417_v31  ;;  %v3519_v41 = vmul.f32 0.5, %v17740_v21  ;;  %v13889_v11 = vadd.f32 %v3382_v62, %v11821_v52  ;;  %17743 = vst [vmem:[#allocation180_spill] sm:$0xff] %v13898_v7 }
 0x36d   : > { %v9419_v56 = vpop.eup %9418  ;;  %4812 = vadd.xlane.f32.xlu0 %v4811_v58  ;;  %v3945_v53 = vmul.f32 %v3817_v10, %v13824_v48  ;;  %v4539_v27 = vmul.f32 %v4411_v32, %v3515_v1  ;;  %v3819_v4 = vmul.f32 %v3691_v35, %v13854_v42  ;;  %v3520_v3 = vmul.f32 0.5, %v17742_v28  ;;  %v13909_v32 = vpop.xlane.xlu1 %5542 }
 0x36e   : > { %17741 = vst [vmem:[#allocation182_spill] sm:$0xff] %v13889_v11  ;;  %v9421_v57 = vpop.eup %9420  ;;  %v4826_v18 = vadd.f32 %v4676_v24, %v4675_v34  ;;  %v4072_v51 = vadd.f32 %v3944_v61, %v13805_v25  ;;  %v4540_v31 = vmul.f32 %v4412_v20, %v3516_v39  ;;  %v4415_v59 = vadd.f32 1.0, %v9419_v56  ;;  %v3388_v34 = vpop.f32.mrf.mxu0  ;;  %v17744_v61 = vld [vmem:[#allocation191_spill] sm:$0xff]  ;;  %17746 = vst [vmem:[#allocation189_spill] sm:$0xff] %v13909_v32  ;;  %v17747_v24 = vld [vmem:[#allocation158_spill] sm:$0xff] }
 0x36f   : > { %v4679_v21 = vmul.f32 %v17444_v46, %v4539_v27  ;;  %v3946_v62 = vmul.f32 %v3818_v22, %v13839_v13  ;;  %v4416_v26 = vadd.f32 1.0, %v9421_v57  ;;  %v3692_v58 = vmul.f32 0.044715, %v13879_v12  ;;  %v17748_v27 = vld [vmem:[#allocation165_spill] sm:$0xff] }
 0x370   : > { %4827 = vadd.xlane.f32.xlu1 %v4826_v18  ;;  %v4680_v10 = vmul.f32 %v17445_v49, %v4540_v31  ;;  %v4543_v1 = vmul.f32 %v4415_v59, %v3519_v41  ;;  %v3693_v35 = vmul.f32 0.044715, %v13889_v11  ;;  %9430 = vtanh.f32 %v13429_v50 }
 0x371   : > { %v4073_v39 = vadd.f32 %v3945_v53, %v13824_v48  ;;  %5763 = vadd.xlane.f32.xlu0 %v17744_v61  ;;  %v4544_v56 = vmul.f32 %v4416_v26, %v3520_v3  ;;  %v13906_v22 = vadd.f32 %v3384_v5, %v11835_v30  ;;  %9432 = vtanh.f32 %v13443_v15 }
 0x372   : > { %v4832_v18 = vadd.f32 %v4680_v10, %v4679_v21  ;;  %v4683_v59 = vmul.f32 %v17444_v46, %v4543_v1  ;;  %v3505_v20 = vmul.f32 0.5, %v17747_v24  ;;  %v13914_v41 = vadd.f32 %v3388_v34, %v11821_v52  ;;  %v3390_v21 = vpop.f32.mrf.mxu0  ;;  %v17749_v1 = vld [vmem:[#allocation100_spill] sm:$0xff] }
 0x373   : > { %17745 = vst [vmem:[#allocation196_spill] sm:$0xff] %v13906_v22  ;;  %v3947_v53 = vmul.f32 %v3819_v4, %v13854_v42  ;;  %v4684_v26 = vmul.f32 %v17445_v49, %v4544_v56  ;;  %v3820_v5 = vmul.f32 %v3692_v58, %v13879_v12  ;;  %v3506_v28 = vmul.f32 0.5, %v17748_v27  ;;  %v17750_v4 = vld [vmem:[#allocation208_spill] sm:$0xff]  ;;  %v17751_v58 = vld [vmem:[#allocation194_spill] sm:$0xff] }
 0x374   : > { %v9423_v50 = vpop.eup %9422  ;;  %v13920_v15 = vmul.f32 0.7978846, %v4072_v51  ;;  %4833 = vadd.xlane.f32.xlu1 %v4832_v18  ;;  %v4074_v3 = vadd.f32 %v3946_v62, %v13839_v13  ;;  %v3821_v57 = vmul.f32 %v3693_v35, %v13889_v11  ;;  %v13924_v10 = vmul.f32 0.7978846, %v4073_v39  ;;  %v13930_v56 = vpop.xlane.xlu0 %4758  ;;  %v17753_v35 = vld [vmem:[#allocation195_spill] sm:$0xff] }
 0x375   : > { %v4401_v31 = vadd.f32 1.0, %v9423_v50  ;;  %5765 = vadd.xlane.f32.xlu0 %v17749_v1  ;;  %v3523_v34 = vmul.f32 0.5, %v17750_v4  ;;  %v3694_v61 = vmul.f32 0.044715, %v13906_v22  ;;  %9434 = vtanh.f32 %v17751_v58  ;;  %17752 = vst [vmem:[#allocation109_spill] sm:$0xff] %v13930_v56  ;;  %v13939_v58 = vpop.xlane.xlu1 %5544 }
 0x376   : > { %v9425_v51 = vpop.eup %9424  ;;  %v4838_v18 = vadd.f32 %v4684_v26, %v4683_v59  ;;  %v3695_v62 = vmul.f32 0.044715, %v13914_v41  ;;  %9436 = vtanh.f32 %v17753_v35  ;;  %v3948_v39 = vmul.f32 %v3820_v5, %v13879_v12  ;;  %17754 = vst [vmem:[#allocation88_spill] sm:$0xff] %v13939_v58 }
 0x377   : > { %v4529_v24 = vmul.f32 %v4401_v31, %v3505_v20  ;;  %v9427_v50 = vpop.eup %9426  ;;  %v4402_v27 = vadd.f32 1.0, %v9425_v51  ;;  %v3524_v1 = vmul.f32 0.5, %v13208_v6  ;;  %v13937_v4 = vadd.f32 %v3390_v21, %v11835_v30  ;;  %v3394_v31 = vpop.f32.mrf.mxu0  ;;  %v17755_v6 = vld [vmem:[#allocation167_spill] sm:$0xff] }
 0x378   : > { %v9429_v32 = vpop.eup %9428  ;;  %v13941_v56 = vmul.f32 0.7978846, %v4074_v3  ;;  %v4075_v59 = vadd.f32 %v3947_v53, %v13854_v42  ;;  %4839 = vadd.xlane.f32.xlu1 %v4838_v18  ;;  %v3949_v20 = vmul.f32 %v3821_v57, %v13889_v11  ;;  %v4419_v26 = vadd.f32 1.0, %v9427_v50  ;;  %v17756_v3 = vld [vmem:[#allocation134_spill] sm:$0xff] }
 0x379   : > { %v4530_v35 = vmul.f32 %v4402_v27, %v3506_v28  ;;  %v4669_v5 = vmul.f32 %v17444_v46, %v4529_v24  ;;  %v4420_v51 = vadd.f32 1.0, %v9429_v32  ;;  %9438 = vtanh.f32 %v17755_v6  ;;  %v13953_v28 = vpop.xlane.xlu0 %5550 }
 0x37a   : > { %v4547_v21 = vmul.f32 %v4419_v26, %v3523_v34  ;;  %v3822_v7 = vmul.f32 %v3694_v61, %v13906_v22  ;;  %v3823_v58 = vmul.f32 %v3695_v62, %v13914_v41  ;;  %9440 = vtanh.f32 %v17756_v3  ;;  %17757 = vst [vmem:[#allocation204_spill] sm:$0xff] %v13953_v28  ;;  %v17758_v34 = vld [vmem:[#allocation213_spill] sm:$0xff]  ;;  %v3396_v62 = vpop.f32.mrf.mxu0  ;;  %v13965_v28 = vpop.xlane.xlu1 %5546 }
 0x37b   : > { %v4076_v53 = vadd.f32 %v3948_v39, %v13879_v12  ;;  %v4670_v18 = vmul.f32 %v17445_v49, %v4530_v35  ;;  %v4548_v57 = vmul.f32 %v4420_v51, %v3524_v1  ;;  %v3696_v50 = vmul.f32 0.044715, %v13937_v4  ;;  %v17760_v35 = vld [vmem:[#allocation48_spill] sm:$0xff]  ;;  %17761 = vst [vmem:[#allocation158_spill] sm:$0xff] %v13965_v28 }
 0x37c   : > { %v4077_v32 = vadd.f32 %v3949_v20, %v13889_v11  ;;  %v4687_v24 = vmul.f32 %v17444_v46, %v4547_v21  ;;  %v3527_v27 = vmul.f32 0.5, %v17758_v34  ;;  %v13959_v61 = vadd.f32 %v3394_v31, %v11821_v52  ;;  %v17762_v11 = vld [vmem:[#allocation210_spill] sm:$0xff] }
 0x37d   : > { %v9431_v26 = vpop.eup %9430  ;;  %v13961_v6 = vmul.f32 0.7978846, %v4075_v59  ;;  %v4817_v39 = vadd.f32 %v4670_v18, %v4669_v5  ;;  %v4688_v1 = vmul.f32 %v17445_v49, %v4548_v57  ;;  %v3528_v51 = vmul.f32 0.5, %v17760_v35  ;;  %v17763_v5 = vld [vmem:[#allocation212_spill] sm:$0xff] }
 0x37e   : > { %17759 = vst [vmem:[#allocation191_spill] sm:$0xff] %v13959_v61  ;;  %v9433_v3 = vpop.eup %9432  ;;  %v3950_v20 = vmul.f32 %v3822_v7, %v13906_v22  ;;  %v3951_v21 = vmul.f32 %v3823_v58, %v13914_v41  ;;  %v4423_v34 = vadd.f32 1.0, %v9431_v26  ;;  %9442 = vtanh.f32 %v17762_v11  ;;  %v3400_v7 = vpop.f32.mrf.mxu0  ;;  %v17765_v26 = vld [vmem:[#allocation82_spill] sm:$0xff] }
 0x37f   : > { %4818 = vadd.xlane.f32.xlu0 %v4817_v39  ;;  %v4844_v31 = vadd.f32 %v4688_v1, %v4687_v24  ;;  %v4424_v13 = vadd.f32 1.0, %v9433_v3  ;;  %v3824_v59 = vmul.f32 %v3696_v50, %v13937_v4  ;;  %9444 = vtanh.f32 %v17763_v5  ;;  %v13982_v50 = vpop.xlane.xlu0 %5488  ;;  %v17768_v1 = vld [vmem:[#allocation223_spill] sm:$0xff]  ;;  %v13994_v5 = vpop.xlane.xlu1 %5548 }
 0x380   : > { %v13972_v18 = vmul.f32 0.7978846, %v4076_v53  ;;  %v13974_v57 = vmul.f32 0.7978846, %v4077_v32  ;;  %v4551_v35 = vmul.f32 %v4423_v34, %v3527_v27  ;;  %v3697_v28 = vmul.f32 0.044715, %v13959_v61 }
 0x381   : > { %4845 = vadd.xlane.f32.xlu1 %v4844_v31  ;;  %v4552_v58 = vmul.f32 %v4424_v13, %v3528_v51  ;;  %v3509_v48 = vmul.f32 0.5, %v17765_v26  ;;  %v13979_v11 = vadd.f32 %v3400_v7, %v11821_v52  ;;  %9446 = vtanh.f32 %v13542_v37  ;;  %17766 = vst [vmem:[#allocation100_spill] sm:$0xff] %v13982_v50  ;;  %v17767_v27 = vld [vmem:[#allocation173_spill] sm:$0xff]  ;;  %17770 = vst [vmem:[#allocation208_spill] sm:$0xff] %v13994_v5  ;;  %v3402_v26 = vpop.f32.mrf.mxu0  ;;  %v17774_v52 = vld [vmem:[#allocation128_spill] sm:$0xff] }
 0x382   : > { %17764 = vst [vmem:[#allocation165_spill] sm:$0xff] %v13974_v57  ;;  %v9435_v24 = vpop.eup %9434  ;;  %v4079_v53 = vadd.f32 %v3951_v21, %v13914_v41  ;;  %v4691_v32 = vmul.f32 %v17444_v46, %v4551_v35  ;;  %v3510_v39 = vmul.f32 0.5, %v17767_v27  ;;  %9448 = vtanh.f32 %v17768_v1  ;;  %v17769_v51 = vld [vmem:[#allocation201_spill] sm:$0xff]  ;;  %v17772_v27 = vld [vmem:[#allocation214_spill] sm:$0xff] }
 0x383   : > { %v9437_v3 = vpop.eup %9436  ;;  %v13989_v13 = vadd.f32 %v3950_v20, %v13906_v22  ;;  %5767 = vadd.xlane.f32.xlu0 %v17769_v51  ;;  %v4692_v34 = vmul.f32 %v17445_v49, %v4552_v58  ;;  %v3952_v37 = vmul.f32 %v3824_v59, %v13937_v4  ;;  %v4405_v31 = vadd.f32 1.0, %v9435_v24  ;;  %v17773_v51 = vld [vmem:[#allocation103_spill] sm:$0xff] }
 0x384   : > { %v13997_v21 = vmul.f32 %v3697_v28, %v13959_v61  ;;  %v4406_v35 = vadd.f32 1.0, %v9437_v3  ;;  %v14000_v7 = vadd.f32 %v3396_v62, %v11835_v30  ;;  %9450 = vtanh.f32 %v17772_v27  ;;  %v17775_v22 = vld [vmem:[#allocation215_spill] sm:$0xff]  ;;  %v17796_v61 = vld [vmem:[#allocation133_spill] sm:$0xff] }
 0x385   : > { %v4850_v20 = vadd.f32 %v4692_v34, %v4691_v32  ;;  %v4533_v1 = vmul.f32 %v4405_v31, %v3509_v48  ;;  %v3531_v50 = vmul.f32 0.5, %v17773_v51  ;;  %v3699_v58 = vmul.f32 0.044715, %v13979_v11  ;;  %v17779_v51 = vld [vmem:[#allocation188_spill] sm:$0xff] }
 0x386   : > { %17771 = vst [vmem:[#allocation194_spill] sm:$0xff] %v13997_v21  ;;  %v9439_v59 = vpop.eup %9438  ;;  %v14005_v24 = vmul.f32 0.7978846, %v4079_v53  ;;  %v4534_v5 = vmul.f32 %v4406_v35, %v3510_v39  ;;  %v3532_v28 = vmul.f32 0.5, %v17774_v52  ;;  %9452 = vtanh.f32 %v17775_v22  ;;  %v17777_v35 = vld [vmem:[#allocation186_spill] sm:$0xff] }
 0x387   : > { %v9441_v3 = vpop.eup %9440  ;;  %4851 = vadd.xlane.f32.xlu1 %v4850_v20  ;;  %v14010_v62 = vadd.f32 %v3952_v37, %v13937_v4  ;;  %v4673_v32 = vmul.f32 %v17444_v46, %v4533_v1  ;;  %v4427_v48 = vadd.f32 1.0, %v9439_v59  ;;  %v14014_v34 = vadd.f32 %v3402_v26, %v11835_v30  ;;  %v14016_v31 = vpop.xlane.xlu0 %4761  ;;  %v17781_v30 = vld [vmem:[#allocation219_spill] sm:$0xff]  ;;  %v17787_v21 = vld [vmem:[#allocation222_spill] sm:$0xff] }
 0x388   : > { %17776 = vst [vmem:[#allocation195_spill] sm:$0xff] %v14016_v31  ;;  %v4674_v53 = vmul.f32 %v17445_v49, %v4534_v5  ;;  %v4428_v39 = vadd.f32 1.0, %v9441_v3  ;;  %v14020_v52 = vmul.f32 0.044715, %v14000_v7  ;;  %9454 = vtanh.f32 %v13621_v9  ;;  %v14026_v20 = vpop.xlane.xlu1 %5552  ;;  %v17780_v5 = vld [vmem:[#allocation55_spill] sm:$0xff] }
 0x389   : > { %v4555_v22 = vmul.f32 %v4427_v48, %v3531_v50  ;;  %v3827_v37 = vmul.f32 %v3699_v58, %v13979_v11  ;;  %v3513_v27 = vmul.f32 0.5, %v17777_v35  ;;  %9456 = vtanh.f32 %v13631_v17  ;;  %17778 = vst [vmem:[#allocation167_spill] sm:$0xff] %v14026_v20  ;;  %v17782_v58 = vld [vmem:[#allocation62_spill] sm:$0xff] }
 0x38a   : > { %v4823_v26 = vadd.f32 %v4674_v53, %v4673_v32  ;;  %v4556_v1 = vmul.f32 %v4428_v39, %v3532_v28  ;;  %v3514_v59 = vmul.f32 0.5, %v17779_v51  ;;  %9458 = vtanh.f32 %v17780_v5  ;;  %v17784_v53 = vld [vmem:[#allocation152_spill] sm:$0xff] }
 0x38b   : > { %v9443_v3 = vpop.eup %9442  ;;  %v4695_v31 = vmul.f32 %v17444_v46, %v4555_v22  ;;  %v3535_v9 = vmul.f32 0.5, %v17781_v30  ;;  %v3700_v50 = vmul.f32 0.044715, %v14014_v34  ;;  %9460 = vtanh.f32 %v17782_v58  ;;  %v14034_v48 = vpop.xlane.xlu0 %5490  ;;  %v17785_v30 = vld [vmem:[#allocation198_spill] sm:$0xff] }
 0x38c   : > { %17783 = vst [vmem:[#allocation134_spill] sm:$0xff] %v14034_v48  ;;  %v9445_v17 = vpop.eup %9444  ;;  %4824 = vadd.xlane.f32.xlu0 %v4823_v26  ;;  %v4696_v32 = vmul.f32 %v17445_v49, %v4556_v1  ;;  %v4409_v28 = vadd.f32 1.0, %v9443_v3  ;;  %v3536_v39 = vmul.f32 0.5, %v17784_v53  ;;  %9462 = vtanh.f32 %v13675_v16  ;;  %v17786_v48 = vld [vmem:[#allocation200_spill] sm:$0xff] }
 0x38d   : > { %v14040_v35 = vmul.f32 %v3827_v37, %v13979_v11  ;;  %v4410_v22 = vadd.f32 1.0, %v9445_v17  ;;  %v3517_v51 = vmul.f32 0.5, %v17785_v30  ;;  %9464 = vtanh.f32 %v13685_v19  ;;  %v17788_v37 = vld [vmem:[#allocation118_spill] sm:$0xff]  ;;  %v14052_v30 = vpop.xlane.xlu1 %4764 }
 0x38e   : > { %v9447_v5 = vpop.eup %9446  ;;  %v4856_v58 = vadd.f32 %v4696_v32, %v4695_v31  ;;  %v4537_v20 = vmul.f32 %v4409_v28, %v3513_v27  ;;  %v3518_v26 = vmul.f32 0.5, %v17786_v48  ;;  %9466 = vtanh.f32 %v17787_v21  ;;  %17790 = vst [vmem:[#allocation48_spill] sm:$0xff] %v14052_v30  ;;  %v17791_v27 = vld [vmem:[#allocation127_spill] sm:$0xff] }
 0x38f   : > { %v9449_v1 = vpop.eup %9448  ;;  %v4538_v3 = vmul.f32 %v4410_v22, %v3514_v59  ;;  %v4431_v53 = vadd.f32 1.0, %v9447_v5  ;;  %v14047_v16 = vmul.f32 %v3700_v50, %v14014_v34  ;;  %9468 = vtanh.f32 %v17788_v37  ;;  %v14050_v17 = vpop.xlane.xlu0 %5554  ;;  %v17792_v50 = vld [vmem:[#allocation137_spill] sm:$0xff]  ;;  %v17793_v37 = vld [vmem:[#allocation60_spill] sm:$0xff]  ;;  %v17795_v30 = vld [vmem:[#allocation63_spill] sm:$0xff] }
 0x390   : > { %17789 = vst [vmem:[#allocation213_spill] sm:$0xff] %v14050_v17  ;;  %4857 = vadd.xlane.f32.xlu1 %v4856_v58  ;;  %v4677_v19 = vmul.f32 %v17444_v46, %v4537_v20  ;;  %v4432_v31 = vadd.f32 1.0, %v9449_v1  ;;  %v3539_v48 = vmul.f32 0.5, %v17791_v27  ;;  %9470 = vtanh.f32 %v13745_v33  ;;  %v17794_v58 = vld [vmem:[#allocation160_spill] sm:$0xff] }
 0x391   : > { %v9451_v21 = vpop.eup %9450  ;;  %v4678_v59 = vmul.f32 %v17445_v49, %v4538_v3  ;;  %v4559_v32 = vmul.f32 %v4431_v53, %v3535_v9  ;;  %v3540_v28 = vmul.f32 0.5, %v17792_v50  ;;  %9472 = vtanh.f32 %v13795_v23  ;;  %v17798_v50 = vld [vmem:[#allocation209_spill] sm:$0xff] }
 0x392   : > { %v4560_v22 = vmul.f32 %v4432_v31, %v3536_v39  ;;  %v4413_v5 = vadd.f32 1.0, %v9451_v21  ;;  %v3521_v17 = vmul.f32 0.5, %v17793_v37  ;;  %9474 = vtanh.f32 %v17794_v58 }
 0x393   : > { %v9453_v20 = vpop.eup %9452  ;;  %v4829_v1 = vadd.f32 %v4678_v59, %v4677_v19  ;;  %v4699_v27 = vmul.f32 %v17444_v46, %v4559_v32  ;;  %v3522_v33 = vmul.f32 0.5, %v17795_v30  ;;  %9476 = vtanh.f32 %v17796_v61  ;;  %v14065_v3 = vpop.xlane.xlu0 %5492  ;;  %v17799_v59 = vld [vmem:[#allocation211_spill] sm:$0xff] }
 0x394   : > { %17797 = vst [vmem:[#allocation210_spill] sm:$0xff] %v14065_v3  ;;  %v4700_v9 = vmul.f32 %v17445_v49, %v4560_v22  ;;  %v4414_v53 = vadd.f32 1.0, %v9453_v20  ;;  %v4541_v23 = vmul.f32 %v4413_v5, %v3517_v51  ;;  %v3543_v39 = vmul.f32 0.5, %v13535_v40  ;;  %v14073_v61 = vpop.xlane.xlu1 %4767  ;;  %v17801_v20 = vld [vmem:[#allocation147_spill] sm:$0xff] }
 0x395   : > { %v9455_v31 = vpop.eup %9454  ;;  %4830 = vadd.xlane.f32.xlu0 %v4829_v1  ;;  %v3544_v21 = vmul.f32 0.5, %v13550_v38  ;;  %v3525_v19 = vmul.f32 0.5, %v17798_v50  ;;  %v3526_v32 = vmul.f32 0.5, %v17799_v59  ;;  %9478 = vtanh.f32 %v13810_v45  ;;  %17800 = vst [vmem:[#allocation212_spill] sm:$0xff] %v14073_v61  ;;  %v17802_v61 = vld [vmem:[#allocation138_spill] sm:$0xff] }
 0x396   : > { %v9457_v30 = vpop.eup %9456  ;;  %v4862_v37 = vadd.f32 %v4700_v9, %v4699_v27  ;;  %v4542_v58 = vmul.f32 %v4414_v53, %v3518_v26  ;;  %v4681_v22 = vmul.f32 %v17444_v46, %v4541_v23  ;;  %v4435_v51 = vadd.f32 1.0, %v9455_v31  ;;  %v17803_v53 = vld [vmem:[#allocation151_spill] sm:$0xff]  ;;  %v17804_v31 = vld [vmem:[#allocation174_spill] sm:$0xff] }
 0x397   : > { %v9459_v5 = vpop.eup %9458  ;;  %v4436_v40 = vadd.f32 1.0, %v9457_v30  ;;  %v3547_v1 = vmul.f32 0.5, %v17801_v20  ;;  %v3548_v38 = vmul.f32 0.5, %v13644_v14  ;;  %9480 = vtanh.f32 %v13820_v0 }
 0x398   : > { %v9461_v50 = vpop.eup %9460  ;;  %4863 = vadd.xlane.f32.xlu1 %v4862_v37  ;;  %v4682_v45 = vmul.f32 %v17445_v49, %v4542_v58  ;;  %v4563_v59 = vmul.f32 %v4435_v51, %v3539_v48  ;;  %v4417_v3 = vadd.f32 1.0, %v9459_v5  ;;  %9482 = vtanh.f32 %v17802_v61  ;;  %v14083_v30 = vpop.xlane.xlu0 %5494 }
 0x399   : > { %v9463_v26 = vpop.eup %9462  ;;  %v4564_v27 = vmul.f32 %v4436_v40, %v3540_v28  ;;  %v4418_v9 = vadd.f32 1.0, %v9461_v50  ;;  %v3529_v23 = vmul.f32 0.5, %v17803_v53  ;;  %9484 = vtanh.f32 %v17804_v31  ;;  %v14088_v5 = vpop.xlane.xlu1 %5556 }
 0x39a   : > { %v9465_v14 = vpop.eup %9464  ;;  %v4835_v20 = vadd.f32 %v4682_v45, %v4681_v22  ;;  %v4703_v0 = vmul.f32 %v17444_v46, %v4563_v59  ;;  %v4545_v37 = vmul.f32 %v4417_v3, %v3521_v17  ;;  %v4439_v57 = vadd.f32 1.0, %v9463_v26  ;;  %17805 = vst [vmem:[#allocation82_spill] sm:$0xff] %v14088_v5 }
 0x39b   : > { %v9467_v58 = vpop.eup %9466  ;;  %v4704_v48 = vmul.f32 %v17445_v49, %v4564_v27  ;;  %v4546_v51 = vmul.f32 %v4418_v9, %v3522_v33  ;;  %v4440_v61 = vadd.f32 1.0, %v9465_v14  ;;  %9486 = vtanh.f32 %v13842_v60  ;;  %v17806_v9 = vld [vmem:[#allocation154_spill] sm:$0xff] }
 0x39c   : > { %v9469_v28 = vpop.eup %9468  ;;  %4836 = vadd.xlane.f32.xlu0 %v4835_v20  ;;  %v4685_v40 = vmul.f32 %v17444_v46, %v4545_v37  ;;  %v4567_v50 = vmul.f32 %v4439_v57, %v3543_v39  ;;  %v4421_v53 = vadd.f32 1.0, %v9467_v58  ;;  %9488 = vtanh.f32 %v13844_v2 }
 0x39d   : > { %v9471_v22 = vpop.eup %9470  ;;  %v4868_v17 = vadd.f32 %v4704_v48, %v4703_v0  ;;  %v4686_v3 = vmul.f32 %v17445_v49, %v4546_v51  ;;  %v4568_v45 = vmul.f32 %v4440_v61, %v3544_v21  ;;  %v4422_v59 = vadd.f32 1.0, %v9469_v28  ;;  %v17807_v51 = vld [vmem:[#allocation166_spill] sm:$0xff] }
 0x39e   : > { %v9473_v33 = vpop.eup %9472  ;;  %v4707_v26 = vmul.f32 %v17444_v46, %v4567_v50  ;;  %v4549_v60 = vmul.f32 %v4421_v53, %v3525_v19  ;;  %v4443_v27 = vadd.f32 1.0, %v9471_v22  ;;  %v3530_v31 = vmul.f32 0.5, %v17806_v9  ;;  %v14101_v22 = vpop.xlane.xlu1 %4773  ;;  %v17810_v9 = vld [vmem:[#allocation101_spill] sm:$0xff] }
 0x39f   : > { %v9475_v14 = vpop.eup %9474  ;;  %4869 = vadd.xlane.f32.xlu1 %v4868_v17  ;;  %v4841_v20 = vadd.f32 %v4686_v3, %v4685_v40  ;;  %v4708_v57 = vmul.f32 %v17445_v49, %v4568_v45  ;;  %v4550_v39 = vmul.f32 %v4422_v59, %v3526_v32  ;;  %v4444_v2 = vadd.f32 1.0, %v9473_v33  ;;  %v14096_v37 = vpop.xlane.xlu0 %4770  ;;  %v17808_v45 = vld [vmem:[#allocation54_spill] sm:$0xff] }
 0x3a0   : > { %v9477_v0 = vpop.eup %9476  ;;  %v4689_v21 = vmul.f32 %v17444_v46, %v4549_v60  ;;  %v4571_v58 = vmul.f32 %v4443_v27, %v3547_v1  ;;  %v4425_v48 = vadd.f32 1.0, %v9475_v14  ;;  %v3551_v61 = vmul.f32 0.5, %v17807_v51 }
 0x3a1   : > { %4842 = vadd.xlane.f32.xlu0 %v4841_v20  ;;  %v4874_v19 = vadd.f32 %v4708_v57, %v4707_v26  ;;  %v4690_v28 = vmul.f32 %v17445_v49, %v4550_v39  ;;  %v4572_v50 = vmul.f32 %v4444_v2, %v3548_v38  ;;  %v4426_v53 = vadd.f32 1.0, %v9477_v0  ;;  %v17811_v20 = vld [vmem:[#allocation218_spill] sm:$0xff] }
 0x3a2   : > { %v9479_v40 = vpop.eup %9478  ;;  %v4711_v32 = vmul.f32 %v17444_v46, %v4571_v58  ;;  %v4553_v17 = vmul.f32 %v4425_v48, %v3529_v23  ;;  %v3552_v3 = vmul.f32 0.5, %v13671_v8  ;;  %9490 = vtanh.f32 %v17808_v45  ;;  %v17812_v23 = vld [vmem:[#allocation146_spill] sm:$0xff] }
 0x3a3   : > { %4875 = vadd.xlane.f32.xlu1 %v4874_v19  ;;  %v4847_v1 = vadd.f32 %v4690_v28, %v4689_v21  ;;  %v4712_v59 = vmul.f32 %v17445_v49, %v4572_v50  ;;  %v4554_v33 = vmul.f32 %v4426_v53, %v3530_v31  ;;  %v4447_v26 = vadd.f32 1.0, %v9479_v40  ;;  %v14107_v60 = vpop.xlane.xlu0 %5558 }
 0x3a4   : > { %17809 = vst [vmem:[#allocation173_spill] sm:$0xff] %v14107_v60  ;;  %v9481_v38 = vpop.eup %9480  ;;  %v4693_v27 = vmul.f32 %v17444_v46, %v4553_v17  ;;  %v3533_v14 = vmul.f32 0.5, %v17810_v9  ;;  %v3534_v57 = vmul.f32 0.5, %v17811_v20  ;;  %9492 = vtanh.f32 %v17812_v23  ;;  %v14123_v17 = vpop.xlane.xlu1 %5560 }
 0x3a5   : > { %v9483_v8 = vpop.eup %9482  ;;  %4848 = vadd.xlane.f32.xlu0 %v4847_v1  ;;  %v4880_v39 = vadd.f32 %v4712_v59, %v4711_v32  ;;  %v4694_v2 = vmul.f32 %v17445_v49, %v4554_v33  ;;  %v4448_v0 = vadd.f32 1.0, %v9481_v38  ;;  %v4575_v21 = vmul.f32 %v4447_v26, %v3551_v61  ;;  %17813 = vst [vmem:[#allocation223_spill] sm:$0xff] %v14123_v17  ;;  %v17814_v59 = vld [vmem:[#allocation176_spill] sm:$0xff]  ;;  %v17815_v38 = vld [vmem:[#allocation126_spill] sm:$0xff] }
 0x3a6   : > { %v9485_v31 = vpop.eup %9484  ;;  %v3956_v58 = vmul.f32 %v14047_v16, %v14014_v34  ;;  %v4429_v48 = vadd.f32 1.0, %v9483_v8  ;;  %v3555_v51 = vmul.f32 0.5, %v13730_v43  ;;  %9494 = vtanh.f32 %v13863_v54 }
 0x3a7   : > { %4881 = vadd.xlane.f32.xlu1 %v4880_v39  ;;  %v4853_v19 = vadd.f32 %v4694_v2, %v4693_v27  ;;  %v4576_v28 = vmul.f32 %v4448_v0, %v3552_v3  ;;  %v4715_v50 = vmul.f32 %v17444_v46, %v4575_v21  ;;  %v4430_v53 = vadd.f32 1.0, %v9485_v31  ;;  %v14119_v40 = vpop.xlane.xlu0 %5496  ;;  %v17816_v2 = vld [vmem:[#allocation228_spill] sm:$0xff]  ;;  %v17817_v21 = vld [vmem:[#allocation107_spill] sm:$0xff]  ;;  %v17818_v31 = vld [vmem:[#allocation77_spill] sm:$0xff] }
 0x3a8   : > { %v9487_v32 = vpop.eup %9486  ;;  %v4083_v61 = vadd.f32 %v14040_v35, %v13979_v11  ;;  %v4557_v16 = vmul.f32 %v4429_v48, %v3533_v14  ;;  %v3556_v45 = vmul.f32 0.5, %v13733_v29  ;;  %9496 = vtanh.f32 %v13920_v15  ;;  %v14147_v0 = vpop.xlane.xlu1 %4779 }
 0x3a9   : > { %v9489_v43 = vpop.eup %9488  ;;  %4854 = vadd.xlane.f32.xlu0 %v4853_v19  ;;  %v4716_v54 = vmul.f32 %v17445_v49, %v4576_v28  ;;  %v4558_v3 = vmul.f32 %v4430_v53, %v3534_v57  ;;  %v4451_v1 = vadd.f32 1.0, %v9487_v32  ;;  %9498 = vtanh.f32 %v17814_v59 }
 0x3aa   : > { %v4084_v33 = vadd.f32 %v3956_v58, %v14014_v34  ;;  %v4697_v26 = vmul.f32 %v17444_v46, %v4557_v16  ;;  %v4452_v35 = vadd.f32 1.0, %v9489_v43  ;;  %9500 = vtanh.f32 %v17815_v38 }
 0x3ab   : > { %v4886_v27 = vadd.f32 %v4716_v54, %v4715_v50  ;;  %v4698_v29 = vmul.f32 %v17445_v49, %v4558_v3  ;;  %v4579_v9 = vmul.f32 %v4451_v1, %v3555_v51  ;;  %9502 = vtanh.f32 %v13961_v6  ;;  %v14134_v15 = vpop.xlane.xlu0 %5498  ;;  %v17822_v1 = vld [vmem:[#allocation84_spill] sm:$0xff] }
 0x3ac   : > { %v14137_v14 = vmul.f32 0.7978846, %v13989_v13  ;;  %v4208_v20 = vmul.f32 0.7978846, %v14010_v62  ;;  %v4580_v57 = vmul.f32 %v4452_v35, %v3556_v45  ;;  %9504 = vtanh.f32 %v13972_v18  ;;  %v17821_v45 = vld [vmem:[#allocation98_spill] sm:$0xff]  ;;  %v14169_v38 = vpop.xlane.xlu1 %5679 }
 0x3ad   : > { %v14143_v23 = vmul.f32 %v14020_v52, %v14000_v7  ;;  %4887 = vadd.xlane.f32.xlu1 %v4886_v27  ;;  %v4859_v8 = vadd.f32 %v4698_v29, %v4697_v26  ;;  %v4719_v39 = vmul.f32 %v17444_v46, %v4579_v9  ;;  %9506 = vtanh.f32 %v17816_v2  ;;  %v17819_v52 = vld [vmem:[#allocation87_spill] sm:$0xff]  ;;  %v17824_v9 = vld [vmem:[#allocation125_spill] sm:$0xff] }
 0x3ae   : > { %v4211_v6 = vmul.f32 0.7978846, %v4083_v61  ;;  %v4720_v13 = vmul.f32 %v17445_v49, %v4580_v57  ;;  %v3537_v62 = vmul.f32 0.5, %v17817_v21  ;;  %9508 = vtanh.f32 %v17818_v31  ;;  %v17820_v61 = vld [vmem:[#allocation140_spill] sm:$0xff]  ;;  %v17826_v31 = vld [vmem:[#allocation202_spill] sm:$0xff] }
 0x3af   : > { %v9491_v18 = vpop.eup %9490  ;;  %v4212_v58 = vmul.f32 0.7978846, %v4084_v33  ;;  %4860 = vadd.xlane.f32.xlu0 %v4859_v8  ;;  %v3538_v48 = vmul.f32 0.5, %v17819_v52  ;;  %v3559_v51 = vmul.f32 0.5, %v13755_v63  ;;  %9510 = vtanh.f32 %v14005_v24  ;;  %v17823_v33 = vld [vmem:[#allocation110_spill] sm:$0xff]  ;;  %v17825_v57 = vld [vmem:[#allocation224_spill] sm:$0xff] }
 0x3b0   : > { %v4892_v19 = vadd.f32 %v4720_v13, %v4719_v39  ;;  %v4433_v28 = vadd.f32 1.0, %v9491_v18  ;;  %v3560_v50 = vmul.f32 0.5, %v13805_v25  ;;  %9512 = vtanh.f32 %v4208_v20  ;;  %v14156_v53 = vpop.xlane.xlu0 %4776 }
 0x3b1   : > { %v9493_v32 = vpop.eup %9492  ;;  %v3541_v16 = vmul.f32 0.5, %v17820_v61  ;;  %v3542_v43 = vmul.f32 0.5, %v17821_v45  ;;  %v3563_v54 = vmul.f32 0.5, %v13854_v42  ;;  %9514 = vtanh.f32 %v13797_v55  ;;  %v17828_v61 = vld [vmem:[#allocation150_spill] sm:$0xff]  ;;  %v14200_v45 = vpop.xlane.xlu1 %5743 }
 0x3b2   : > { %4893 = vadd.xlane.f32.xlu1 %v4892_v19  ;;  %v4434_v63 = vadd.f32 1.0, %v9493_v32  ;;  %v4561_v3 = vmul.f32 %v4433_v28, %v3537_v62  ;;  %v3564_v24 = vmul.f32 0.5, %v13879_v12  ;;  %9516 = vtanh.f32 %v13801_v47 }
 0x3b3   : > { %v9495_v25 = vpop.eup %9494  ;;  %v3545_v59 = vmul.f32 0.5, %v17822_v1  ;;  %v3546_v26 = vmul.f32 0.5, %v17823_v33  ;;  %v14167_v35 = vmul.f32 0.5, %v13914_v41  ;;  %9518 = vtanh.f32 %v4211_v6 }
 0x3b4   : > { %v4562_v42 = vmul.f32 %v4434_v63, %v3538_v48  ;;  %v4701_v55 = vmul.f32 %v17444_v46, %v4561_v3  ;;  %v4455_v27 = vadd.f32 1.0, %v9495_v25  ;;  %9520 = vtanh.f32 %v4212_v58  ;;  %v14172_v29 = vpop.xlane.xlu0 %5500 }
 0x3b5   : > { %v9497_v12 = vpop.eup %9496  ;;  %v14175_v47 = vmul.f32 0.5, %v13937_v4  ;;  %v14178_v20 = vmul.f32 0.5, %v17824_v9  ;;  %v14181_v41 = vmul.f32 0.5, %v17825_v57  ;;  %9522 = vtanh.f32 %v13827_v36 }
 0x3b6   : > { %v9499_v8 = vpop.eup %9498  ;;  %v4702_v39 = vmul.f32 %v17445_v49, %v4562_v42  ;;  %v4456_v2 = vadd.f32 1.0, %v9497_v12  ;;  %v4583_v6 = vmul.f32 %v4455_v27, %v3559_v51  ;;  %9524 = vtanh.f32 %v13834_v44  ;;  %v17827_v44 = vld [vmem:[#allocation226_spill] sm:$0xff] }
 0x3b7   : > { %v9501_v13 = vpop.eup %9500  ;;  %v4437_v21 = vadd.f32 1.0, %v9499_v8  ;;  %v14187_v4 = vmul.f32 0.5, %v13979_v11  ;;  %v14190_v62 = vmul.f32 0.5, %v14014_v34  ;;  %9526 = vtanh.f32 %v17826_v31 }
 0x3b8   : > { %v9503_v18 = vpop.eup %9502  ;;  %v4865_v58 = vadd.f32 %v4702_v39, %v4701_v55  ;;  %v4584_v36 = vmul.f32 %v4456_v2, %v3560_v50  ;;  %v4723_v52 = vmul.f32 %v17444_v46, %v4583_v6  ;;  %v4438_v48 = vadd.f32 1.0, %v9501_v13  ;;  %v17829_v2 = vld [vmem:[#allocation165_spill] sm:$0xff] }
 0x3b9   : > { %v9505_v19 = vpop.eup %9504  ;;  %v4565_v51 = vmul.f32 %v4437_v21, %v3541_v16  ;;  %v4459_v28 = vadd.f32 1.0, %v9503_v18  ;;  %v14195_v32 = vmul.f32 0.5, %v17827_v44  ;;  %9528 = vtanh.f32 %v17828_v61  ;;  %v14198_v11 = vpop.xlane.xlu0 %4782  ;;  %v17830_v61 = vld [vmem:[#allocation155_spill] sm:$0xff] }
 0x3ba   : > { %v9507_v34 = vpop.eup %9506  ;;  %4866 = vadd.xlane.f32.xlu0 %v4865_v58  ;;  %v4724_v63 = vmul.f32 %v17445_v49, %v4584_v36  ;;  %v4566_v50 = vmul.f32 %v4438_v48, %v3542_v43  ;;  %v4460_v3 = vadd.f32 1.0, %v9505_v19  ;;  %9530 = vtanh.f32 %v13924_v10  ;;  %v14215_v36 = vpop.xlane.xlu1 %5681 }
 0x3bb   : > { %v9509_v25 = vpop.eup %9508  ;;  %v4705_v16 = vmul.f32 %v17444_v46, %v4565_v51  ;;  %v4587_v1 = vmul.f32 %v4459_v28, %v3563_v54  ;;  %v4441_v33 = vadd.f32 1.0, %v9507_v34  ;;  %9532 = vtanh.f32 %v13941_v56 }
 0x3bc   : > { %v9511_v42 = vpop.eup %9510  ;;  %v4898_v55 = vadd.f32 %v4724_v63, %v4723_v52  ;;  %v4706_v27 = vmul.f32 %v17445_v49, %v4566_v50  ;;  %v4588_v12 = vmul.f32 %v4460_v3, %v3564_v24  ;;  %v4442_v9 = vadd.f32 1.0, %v9509_v25 }
 0x3bd   : > { %v9513_v57 = vpop.eup %9512  ;;  %v4727_v8 = vmul.f32 %v17444_v46, %v4587_v1  ;;  %v4569_v43 = vmul.f32 %v4441_v33, %v3545_v59  ;;  %v4463_v39 = vadd.f32 1.0, %v9511_v42  ;;  %9534 = vtanh.f32 %v17829_v2  ;;  %v17831_v42 = vld [vmem:[#allocation229_spill] sm:$0xff] }
 0x3be   : > { %v9515_v10 = vpop.eup %9514  ;;  %4899 = vadd.xlane.f32.xlu1 %v4898_v55  ;;  %v4871_v6 = vadd.f32 %v4706_v27, %v4705_v16  ;;  %v4728_v54 = vmul.f32 %v17445_v49, %v4588_v12  ;;  %v4570_v13 = vmul.f32 %v4442_v9, %v3546_v26  ;;  %v4464_v56 = vadd.f32 1.0, %v9513_v57 }
 0x3bf   : > { %v9517_v21 = vpop.eup %9516  ;;  %v4709_v31 = vmul.f32 %v17444_v46, %v4569_v43  ;;  %v4591_v24 = vmul.f32 %v4463_v39, %v14167_v35  ;;  %v4445_v18 = vadd.f32 1.0, %v9515_v10  ;;  %9536 = vtanh.f32 %v14137_v14  ;;  %v14213_v58 = vpop.xlane.xlu0 %4788  ;;  %v17833_v39 = vld [vmem:[#allocation230_spill] sm:$0xff] }
 0x3c0   : > { %v9519_v59 = vpop.eup %9518  ;;  %4872 = vadd.xlane.f32.xlu0 %v4871_v6  ;;  %v4904_v52 = vadd.f32 %v4728_v54, %v4727_v8  ;;  %v4710_v48 = vmul.f32 %v17445_v49, %v4570_v13  ;;  %v4592_v26 = vmul.f32 %v4464_v56, %v14175_v47  ;;  %v4446_v19 = vadd.f32 1.0, %v9517_v21  ;;  %v14234_v6 = vpop.xlane.xlu1 %4785  ;;  %v17834_v21 = vld [vmem:[#allocation197_spill] sm:$0xff] }
 0x3c1   : > { %v9521_v51 = vpop.eup %9520  ;;  %v4731_v28 = vmul.f32 %v17444_v46, %v4591_v24  ;;  %v4573_v35 = vmul.f32 %v4445_v18, %v14178_v20  ;;  %v4467_v44 = vadd.f32 1.0, %v9519_v59  ;;  %v3554_v14 = vmul.f32 0.5, %v17830_v61 }
 0x3c2   : > { %v9523_v34 = vpop.eup %9522  ;;  %4905 = vadd.xlane.f32.xlu1 %v4904_v52  ;;  %v4877_v63 = vadd.f32 %v4710_v48, %v4709_v31  ;;  %v4732_v50 = vmul.f32 %v17445_v49, %v4592_v26  ;;  %v4574_v3 = vmul.f32 %v4446_v19, %v14181_v41  ;;  %v4468_v25 = vadd.f32 1.0, %v9521_v51  ;;  %v17835_v52 = vld [vmem:[#allocation203_spill] sm:$0xff] }
 0x3c3   : > { %v9525_v16 = vpop.eup %9524  ;;  %v4713_v47 = vmul.f32 %v17444_v46, %v4573_v35  ;;  %v4595_v1 = vmul.f32 %v4467_v44, %v14187_v4  ;;  %v4449_v33 = vadd.f32 1.0, %v9523_v34  ;;  %v3557_v55 = vmul.f32 0.5, %v17831_v42  ;;  %v14227_v20 = vpop.xlane.xlu0 %5749  ;;  %v17837_v35 = vld [vmem:[#allocation191_spill] sm:$0xff]  ;;  %v17838_v44 = vld [vmem:[#allocation194_spill] sm:$0xff] }
 0x3c4   : > { %17832 = vst [vmem:[#allocation201_spill] sm:$0xff] %v14227_v20  ;;  %v9527_v27 = vpop.eup %9526  ;;  %4878 = vadd.xlane.f32.xlu0 %v4877_v63  ;;  %v4910_v12 = vadd.f32 %v4732_v50, %v4731_v28  ;;  %v4714_v9 = vmul.f32 %v17445_v49, %v4574_v3  ;;  %v4596_v57 = vmul.f32 %v4468_v25, %v14190_v62  ;;  %v4450_v8 = vadd.f32 1.0, %v9525_v16  ;;  %v17839_v63 = vld [vmem:[#allocation182_spill] sm:$0xff] }
 0x3c5   : > { %v4735_v41 = vmul.f32 %v17444_v46, %v4595_v1  ;;  %v4577_v43 = vmul.f32 %v4449_v33, %v14195_v32  ;;  %v3558_v2 = vmul.f32 0.5, %v17833_v39  ;;  %v4453_v4 = vadd.f32 1.0, %v9527_v27 }
 0x3c6   : > { %v9529_v10 = vpop.eup %9528  ;;  %4911 = vadd.xlane.f32.xlu1 %v4910_v12  ;;  %v4883_v54 = vadd.f32 %v4714_v9, %v4713_v47  ;;  %v4736_v13 = vmul.f32 %v17445_v49, %v4596_v57  ;;  %v4578_v56 = vmul.f32 %v4450_v8, %v3554_v14  ;;  %v3561_v31 = vmul.f32 0.5, %v17834_v21  ;;  %v14251_v57 = vpop.xlane.xlu1 %5745 }
 0x3c7   : > { %v9531_v24 = vpop.eup %9530  ;;  %v4717_v62 = vmul.f32 %v17444_v46, %v4577_v43  ;;  %v4454_v18 = vadd.f32 1.0, %v9529_v10  ;;  %v4581_v59 = vmul.f32 %v4453_v4, %v3557_v55  ;;  %v3562_v32 = vmul.f32 0.5, %v17835_v52  ;;  %v17840_v55 = vld [vmem:[#allocation196_spill] sm:$0xff] }
 0x3c8   : > { %v9533_v48 = vpop.eup %9532  ;;  %4884 = vadd.xlane.f32.xlu0 %v4883_v54  ;;  %v4916_v26 = vadd.f32 %v4736_v13, %v4735_v41  ;;  %v4718_v19 = vmul.f32 %v17445_v49, %v4578_v56  ;;  %v4457_v51 = vadd.f32 1.0, %v9531_v24  ;;  %v14241_v28 = vpop.xlane.xlu0 %4794  ;;  %v3953_v61 = vmul.f32 %v17838_v44, %v17837_v35 }
 0x3c9   : > { %17836 = vst [vmem:[#allocation214_spill] sm:$0xff] %v14241_v28  ;;  %v4582_v14 = vmul.f32 %v4454_v18, %v3558_v2  ;;  %v4458_v34 = vadd.f32 1.0, %v9533_v48  ;;  %v3565_v50 = vmul.f32 0.5, %v17839_v63  ;;  %v3954_v25 = vmul.f32 %v14143_v23, %v14000_v7  ;;  %v14254_v41 = vpop.f32.mrf.mxu0 }
 0x3ca   : > { %v9535_v3 = vpop.eup %9534  ;;  %4917 = vadd.xlane.f32.xlu1 %v4916_v26  ;;  %v4889_v16 = vadd.f32 %v4718_v19, %v4717_v62  ;;  %v4721_v47 = vmul.f32 %v17444_v46, %v4581_v59  ;;  %v4585_v1 = vmul.f32 %v4457_v51, %v3561_v31  ;;  %v3566_v27 = vmul.f32 0.5, %v17840_v55  ;;  %v14265_v18 = vpop.xlane.xlu1 %5683 }
 0x3cb   : > { %v4722_v33 = vmul.f32 %v17445_v49, %v4582_v14  ;;  %v4586_v42 = vmul.f32 %v4458_v34, %v3562_v32  ;;  %v4461_v12 = vadd.f32 1.0, %v9535_v3  ;;  %v4081_v23 = vadd.f32 %v3953_v61, %v17837_v35  ;;  %v14262_v31 = vpop.f32.mrf.mxu0 }
 0x3cc   : > { %v9537_v9 = vpop.eup %9536  ;;  %4890 = vadd.xlane.f32.xlu0 %v4889_v16  ;;  %v4725_v8 = vmul.f32 %v17444_v46, %v4585_v1  ;;  %v14258_v10 = vpop.xlane.xlu0 %5751  ;;  %v4082_v54 = vadd.f32 %v3954_v25, %v14000_v7  ;;  %v3569_v63 = vmul.f32 0.5, %v17837_v35  ;;  %v3570_v25 = vmul.f32 0.5, %v14000_v7  ;;  %v17849_v35 = vld [vmem:[#allocation47_spill] sm:$0xff] }
 0x3cd   : > { %v4726_v43 = vmul.f32 %v17445_v49, %v4586_v42  ;;  %v4462_v39 = vadd.f32 1.0, %v9537_v9  ;;  %v4589_v2 = vmul.f32 %v4461_v12, %v3565_v50  ;;  %v4895_v4 = vadd.f32 %v4722_v33, %v4721_v47  ;;  %17841 = vst [vmem:[#allocation103_spill] sm:$0xff] %v14258_v10  ;;  %v3412_v48 = vpop.f32.mrf.mxu0  ;;  %v17847_v9 = vld [vmem:[#allocation45_spill] sm:$0xff] }
 0x3ce   : > { %v4209_v24 = vmul.f32 0.7978846, %v4081_v23  ;;  %v4210_v59 = vmul.f32 0.7978846, %v4082_v54  ;;  %v14269_v26 = vpop.xlane.xlu1 %5747 }
 0x3cf   : > { %v4590_v13 = vmul.f32 %v4462_v39, %v3566_v27  ;;  %v4901_v56 = vadd.f32 %v4726_v43, %v4725_v8  ;;  %v4729_v21 = vmul.f32 %v17444_v46, %v4589_v2  ;;  %17843 = vst [vmem:[#allocation215_spill] sm:$0xff] %v14269_v26  ;;  %v3414_v19 = vpop.f32.mrf.mxu0  ;;  %v14287_v27 = vld [vmem:[#allocation2] ss:$0 sm:$0xff]  ;;  %v3413_v8 = vadd.f32 %v3412_v48, %v17847_v9 }
 0x3d0   : > { %4896 = vadd.xlane.f32.xlu0 %v4895_v4  ;;  %v14267_v32 = vpop.xlane.xlu0 %5753  ;;  %9538 = vtanh.f32 %v4209_v24  ;;  %v3415_v43 = vadd.f32 %v3414_v19, %v17849_v35 }
 0x3d1   : > { %v4730_v62 = vmul.f32 %v17445_v49, %v4590_v13  ;;  %17842 = vst [vmem:[#allocation128_spill] sm:$0xff] %v14267_v32  ;;  %9540 = vtanh.f32 %v4210_v59  ;;  %v14273_v44 = vpop.f32.mrf.mxu0  ;;  %v17850_v13 = vld [vmem:[#allocation205_spill] sm:$0xff]  ;;  %v3703_v24 = vmul.f32 0.044715, %v3413_v8 }
 0x3d2   : > { %v14275_v61 = vpop.xlane.xlu1 %5685  ;;  %v3704_v59 = vmul.f32 0.044715, %v3415_v43 }
 0x3d3   : > { %v4907_v52 = vadd.f32 %v4730_v62, %v4729_v21  ;;  %v14279_v34 = vpop.f32.mrf.mxu0  ;;  %v3831_v19 = vmul.f32 %v3703_v24, %v3413_v8 }
 0x3d4   : > { %4902 = vadd.xlane.f32.xlu0 %v4901_v56 }
 0x3d5   : > { %v3424_v33 = vpop.f32.mrf.mxu0 }
 0x3d6   : > { %v14285_v1 = vpop.xlane.xlu1 %4791  ;;  %v3425_v62 = vadd.f32 %v3424_v33, %v17847_v9 }
 0x3d7   : > { %v3426_v2 = vpop.f32.mrf.mxu0 }
 0x3d8   : > { %4908 = vadd.xlane.f32.xlu0 %v4907_v52  ;;  %v3427_v52 = vadd.f32 %v3426_v2, %v17849_v35 }
 0x3da   : > { %v14271_v51 = vpop.xlane.xlu0 %4800  ;;  %v14296_v54 = vpop.xlane.xlu1 %5687 }
 0x3db   : > { %17844 = vst [vmem:[#allocation186_spill] sm:$0xff] %v14271_v51 }
 0x3dd   : > { %v9539_v50 = vpop.eup %9538 }
 0x3de   : > { %v14277_v14 = vpop.xlane.xlu0 %5755  ;;  %v4465_v16 = vadd.f32 1.0, %v9539_v50  ;;  %v9541_v47 = vpop.eup %9540  ;;  %v3832_v50 = vmul.f32 %v3704_v59, %v3415_v43  ;;  %v17855_v59 = vld [vmem:[#allocation89_spill] sm:$0xff] }
 0x3df   : > { %17845 = vst [vmem:[#allocation188_spill] sm:$0xff] %v14277_v14  ;;  %v4466_v42 = vadd.f32 1.0, %v9541_v47 }
 0x3e0   : > { %v4593_v55 = vmul.f32 %v4465_v16, %v3569_v63  ;;  %v3707_v63 = vmul.f32 0.044715, %v3425_v62  ;;  %v14305_v16 = vpop.xlane.xlu1 %5689 }
 0x3e1   : > { %v4594_v39 = vmul.f32 %v4466_v42, %v3570_v25  ;;  %v3708_v25 = vmul.f32 0.044715, %v3427_v52  ;;  %v3959_v42 = vmul.f32 %v3831_v19, %v3413_v8 }
 0x3e2   : > { %v14282_v3 = vpop.xlane.xlu0 %5757  ;;  %v4733_v7 = vmul.f32 %v17444_v46, %v4593_v55  ;;  %v3835_v55 = vmul.f32 %v3707_v63, %v3425_v62 }
 0x3e3   : > { %17846 = vst [vmem:[#allocation55_spill] sm:$0xff] %v14282_v3  ;;  %v4734_v4 = vmul.f32 %v17445_v49, %v4594_v39  ;;  %v3836_v39 = vmul.f32 %v3708_v25, %v3427_v52 }
 0x3e4   : > { %v14309_v33 = vpop.xlane.xlu1 %4797 }
 0x3e5   : > { %v4913_v48 = vadd.f32 %v4734_v4, %v4733_v7  ;;  %17853 = vst [vmem:[#allocation198_spill] sm:$0xff] %v14309_v33  ;;  %v3963_v7 = vmul.f32 %v3835_v55, %v3425_v62  ;;  %v3964_v24 = vmul.f32 %v3836_v39, %v3427_v52 }
 0x3e6   : > { %v4807_v12 = vpop.xlane.xlu0 %4806 }
 0x3e7   : > { %v14291_v23 = vadd.f32 %v14287_v27, %v4807_v12  ;;  %v3960_v12 = vmul.f32 %v3832_v50, %v3415_v43  ;;  %v4091_v5 = vadd.f32 %v3963_v7, %v3425_v62  ;;  %v4092_v19 = vadd.f32 %v3964_v24, %v3427_v52 }
 0x3e8   : > { %v14317_v63 = vpop.xlane.xlu1 %5691  ;;  %v3576_v7 = vmul.f32 0.5, %v3415_v43 }
 0x3e9   : > { %17848 = vst [vmem:[#allocation219_spill] sm:$0xff] %v14291_v23  ;;  %v5293_v56 = vadd.f32 %v17850_v13, %v14291_v23  ;;  %v4087_v13 = vadd.f32 %v3959_v42, %v3413_v8  ;;  %v4219_v50 = vmul.f32 0.7978846, %v4091_v5  ;;  %v4220_v25 = vmul.f32 0.7978846, %v4092_v19  ;;  %v3430_v19 = vpop.f32.mrf.mxu0 }
 0x3ea   : > { %v14300_v21 = vpop.xlane.xlu0 %5759 }
 0x3eb   : > { %17851 = vst [vmem:[#allocation62_spill] sm:$0xff] %v14300_v21  ;;  %v4215_v60 = vmul.f32 0.7978846, %v4087_v13 }
 0x3ec   : > { %v14319_v42 = vpop.xlane.xlu1 %5693 }
 0x3ed   : > { %9542 = vtanh.f32 %v4215_v60 }
 0x3ee   : > { %5871 = vrot.lane.b32.xlu0 %v5293_v56, %s9901_s17  ;;  %v14307_v47 = vpop.xlane.xlu0 %5761  ;;  %v4088_v56 = vadd.f32 %v3960_v12, %v3415_v43  ;;  %v14325_v12 = vadd.f32 %v14254_v41, %v17847_v9  ;;  %v3432_v43 = vpop.f32.mrf.mxu0 }
 0x3ef   : > { %17852 = vst [vmem:[#allocation152_spill] sm:$0xff] %v14307_v47  ;;  %v3580_v47 = vmul.f32 0.5, %v3427_v52 }
 0x3f0   : > { %v4216_v21 = vmul.f32 0.7978846, %v4088_v56  ;;  %v14321_v55 = vpop.xlane.xlu1 %4803  ;;  %v3701_v60 = vmul.f32 0.044715, %v14325_v12 }
 0x3f1   : > { %17856 = vst [vmem:[#allocation222_spill] sm:$0xff] %v14321_v55 }
 0x3f2   : > { %9544 = vtanh.f32 %v4216_v21 }
 0x3f3   : > { %9546 = vtanh.f32 %v4219_v50  ;;  %v3829_v50 = vmul.f32 %v3701_v60, %v14325_v12 }
 0x3f4   : > { %9548 = vtanh.f32 %v4220_v25  ;;  %v14331_v5 = vpop.xlane.xlu1 %5695  ;;  %v3579_v25 = vmul.f32 0.5, %v3425_v62 }
 0x3f6   : > { %v4813_v2 = vpop.xlane.xlu0 %4812 }
 0x3f7   : > { %v14312_v4 = vadd.f32 %v14287_v27, %v4813_v2  ;;  %v3575_v2 = vmul.f32 0.5, %v3413_v8 }
 0x3f8   : > { %v14338_v10 = vpop.xlane.xlu1 %5697 }
 0x3f9   : > { %17854 = vst [vmem:[#allocation200_spill] sm:$0xff] %v14312_v4  ;;  %v5295_v17 = vadd.f32 %v17855_v59, %v14312_v4 }
 0x3fa   : > { %v9543_v39 = vpop.eup %9542 }
 0x3fb   : > { %5875 = vrot.lane.b32.xlu1 %v5295_v17, %s9901_s17  ;;  %v14329_v17 = vadd.f32 %v14262_v31, %v17849_v35  ;;  %v4471_v56 = vadd.f32 1.0, %v9543_v39  ;;  %v14336_v31 = vpop.xlane.xlu0 %5763  ;;  %v3957_v39 = vmul.f32 %v3829_v50, %v14325_v12  ;;  %v3433_v50 = vadd.f32 %v3432_v43, %v17849_v35  ;;  %v17860_v43 = vld [vmem:[#allocation99_spill] sm:$0xff] }
 0x3fc   : > { %17857 = vst [vmem:[#allocation118_spill] sm:$0xff] %v14336_v31 }
 0x3fd   : > { %v3702_v41 = vmul.f32 0.044715, %v14329_v17 }
 0x3ff   : > { %v9545_v13 = vpop.eup %9544  ;;  %v3830_v8 = vmul.f32 %v3702_v41, %v14329_v17  ;;  %v14345_v31 = vpop.xlane.xlu0 %5765 }
 0x400   : > { %v9547_v21 = vpop.eup %9546  ;;  %v4472_v24 = vadd.f32 1.0, %v9545_v13  ;;  %17858 = vst [vmem:[#allocation127_spill] sm:$0xff] %v14345_v31 }
 0x401   : > { %v9549_v59 = vpop.eup %9548  ;;  %v4475_v14 = vadd.f32 1.0, %v9547_v21  ;;  %v3958_v52 = vmul.f32 %v3830_v8, %v14329_v17  ;;  %v4810_v21 = vpop.xlane.xlu1 %4809 }
 0x402   : > { %v4600_v3 = vmul.f32 %v4472_v24, %v3576_v7  ;;  %v4476_v32 = vadd.f32 1.0, %v9549_v59  ;;  %v4085_v7 = vadd.f32 %v3957_v39, %v14325_v12 }
 0x403   : > { %v4603_v60 = vmul.f32 %v4475_v14, %v3579_v25  ;;  %v4086_v14 = vadd.f32 %v3958_v52, %v14329_v17 }
 0x404   : > { %v4740_v20 = vmul.f32 %v17445_v49, %v4600_v3  ;;  %v4604_v62 = vmul.f32 %v4476_v32, %v3580_v47  ;;  %v14354_v32 = vadd.f32 %v14287_v27, %v4810_v21  ;;  %v4213_v25 = vmul.f32 0.7978846, %v4085_v7 }
 0x405   : > { %v4743_v59 = vmul.f32 %v17444_v46, %v4603_v60  ;;  %v4214_v39 = vmul.f32 0.7978846, %v4086_v14 }
 0x406   : > { %v4744_v41 = vmul.f32 %v17445_v49, %v4604_v62  ;;  %17859 = vst [vmem:[#allocation137_spill] sm:$0xff] %v14354_v32  ;;  %v5294_v60 = vadd.f32 %v17860_v43, %v14354_v32  ;;  %9550 = vtanh.f32 %v4213_v25 }
 0x407   : > { %9552 = vtanh.f32 %v4214_v39 }
 0x408   : > { %v4928_v8 = vadd.f32 %v4744_v41, %v4743_v59 }
 0x40d   : > { %4914 = vadd.xlane.f32.xlu0 %v4913_v48  ;;  %v4599_v48 = vmul.f32 %v4471_v56, %v3575_v2  ;;  %v3436_v2 = vpop.f32.mrf.mxu0  ;;  %v3431_v56 = vadd.f32 %v3430_v19, %v17847_v9  ;;  %v3710_v19 = vmul.f32 0.044715, %v3433_v50 }
 0x40f   : > { %v4739_v13 = vmul.f32 %v17444_v46, %v4599_v48  ;;  %v3438_v3 = vpop.f32.mrf.mxu0  ;;  %v3709_v47 = vmul.f32 0.044715, %v3431_v56  ;;  %v14356_v48 = vpop.xlane.xlu0 %4818  ;;  %v3838_v52 = vmul.f32 %v3710_v19, %v3433_v50 }
 0x411   : > { %v4922_v24 = vadd.f32 %v4740_v20, %v4739_v13  ;;  %v14359_v20 = vadd.f32 %v3436_v2, %v17847_v9  ;;  %v14362_v13 = vadd.f32 %v3438_v3, %v17849_v35  ;;  %v3837_v62 = vmul.f32 %v3709_v47, %v3431_v56 }
 0x412   : > { %v3966_v59 = vmul.f32 %v3838_v52, %v3433_v50 }
 0x413   : > { %v3711_v21 = vmul.f32 0.044715, %v14359_v20  ;;  %v3712_v7 = vmul.f32 0.044715, %v14362_v13  ;;  %v14369_v2 = vpop.xlane.xlu0 %5767 }
 0x414   : > { %17861 = vst [vmem:[#allocation60_spill] sm:$0xff] %v14369_v2 }
 0x415   : > { %v3839_v41 = vmul.f32 %v3711_v21, %v14359_v20  ;;  %v3840_v14 = vmul.f32 %v3712_v7, %v14362_v13  ;;  %v17863_v7 = vld [vmem:[#allocation116_spill] sm:$0xff] }
 0x417   : > { %v4825_v47 = vpop.xlane.xlu0 %4824  ;;  %v3967_v43 = vmul.f32 %v3839_v41, %v14359_v20  ;;  %v3968_v19 = vmul.f32 %v3840_v14, %v14362_v13  ;;  %v3573_v41 = vmul.f32 0.5, %v14325_v12 }
 0x418   : > { %v14376_v25 = vadd.f32 %v14287_v27, %v4825_v47 }
 0x419   : > { %v4095_v2 = vadd.f32 %v3967_v43, %v14359_v20  ;;  %v4096_v52 = vadd.f32 %v3968_v19, %v14362_v13 }
 0x41a   : > { %17862 = vst [vmem:[#allocation160_spill] sm:$0xff] %v14376_v25 }
 0x41b   : > { %v4224_v14 = vmul.f32 0.7978846, %v4096_v52 }
 0x41f   : > { %4923 = vadd.xlane.f32.xlu1 %v4922_v24  ;;  %v3965_v24 = vmul.f32 %v3837_v62, %v3431_v56  ;;  %v9551_v62 = vpop.eup %9550 }
 0x420   : > { %v9553_v21 = vpop.eup %9552  ;;  %v4469_v47 = vadd.f32 1.0, %v9551_v62  ;;  %v14391_v62 = vadd.f32 %v14273_v44, %v17847_v9  ;;  %v3584_v44 = vmul.f32 0.5, %v14362_v13 }
 0x421   : > { %v4093_v3 = vadd.f32 %v3965_v24, %v3431_v56  ;;  %v5299_v24 = vadd.f32 %v17863_v7, %v14376_v25  ;;  %v3582_v25 = vmul.f32 0.5, %v3433_v50 }
 0x422   : > { %v4597_v43 = vmul.f32 %v4469_v47, %v3573_v41  ;;  %v3583_v47 = vmul.f32 0.5, %v14359_v20 }
 0x423   : > { %4929 = vadd.xlane.f32.xlu1 %v4928_v8  ;;  %5873 = vrot.lane.b32.xlu0 %v5294_v60, %s9901_s17  ;;  %v4094_v8 = vadd.f32 %v3966_v59, %v3433_v50  ;;  %v4221_v60 = vmul.f32 0.7978846, %v4093_v3  ;;  %v4223_v59 = vmul.f32 0.7978846, %v4095_v2  ;;  %v3574_v3 = vmul.f32 0.5, %v14329_v17  ;;  %v14387_v17 = vpop.xlane.xlu1 %5699 }
 0x424   : > { %v4737_v19 = vmul.f32 %v17444_v46, %v4597_v43 }
 0x425   : > { %v4222_v39 = vmul.f32 0.7978846, %v4094_v8  ;;  %9554 = vtanh.f32 %v4221_v60  ;;  %v4470_v8 = vadd.f32 1.0, %v9553_v21  ;;  %v3581_v60 = vmul.f32 0.5, %v3431_v56 }
 0x426   : > { %v14396_v56 = vadd.f32 %v14279_v34, %v17849_v35 }
 0x427   : > { %9556 = vtanh.f32 %v4222_v39  ;;  %v4598_v31 = vmul.f32 %v4470_v8, %v3574_v3  ;;  %v14404_v43 = vpop.xlane.xlu1 %5701 }
 0x428   : > { %9558 = vtanh.f32 %v4223_v59 }
 0x429   : > { %9560 = vtanh.f32 %v4224_v14  ;;  %v4738_v7 = vmul.f32 %v17445_v49, %v4598_v31  ;;  %v3442_v14 = vpop.f32.mrf.mxu0 }
 0x42b   : > { %v4919_v39 = vadd.f32 %v4738_v7, %v4737_v19  ;;  %v3706_v19 = vmul.f32 0.044715, %v14396_v56  ;;  %v3444_v7 = vpop.f32.mrf.mxu0 }
 0x42c   : > { %v3445_v20 = vadd.f32 %v3444_v7, %v17849_v35  ;;  %v17865_v7 = vld [vmem:[#allocation221_spill] sm:$0xff] }
 0x432   : > { %v9555_v2 = vpop.eup %9554 }
 0x433   : > { %v4477_v55 = vadd.f32 1.0, %v9555_v2 }
 0x434   : > { %5883 = vrot.lane.b32.xlu1 %v5299_v24, %s9901_s17  ;;  %v9557_v12 = vpop.eup %9556 }
 0x435   : > { %v4478_v24 = vadd.f32 1.0, %v9557_v12  ;;  %v4605_v52 = vmul.f32 %v4477_v55, %v3581_v60  ;;  %v9559_v59 = vpop.eup %9558  ;;  %v3705_v55 = vmul.f32 0.044715, %v14391_v62  ;;  %v3834_v12 = vmul.f32 %v3706_v19, %v14396_v56 }
 0x436   : > { %v9561_v31 = vpop.eup %9560 }
 0x437   : > { %v4606_v21 = vmul.f32 %v4478_v24, %v3582_v25  ;;  %v4745_v41 = vmul.f32 %v17444_v46, %v4605_v52  ;;  %v4479_v25 = vadd.f32 1.0, %v9559_v59  ;;  %v4480_v8 = vadd.f32 1.0, %v9561_v31  ;;  %v3448_v24 = vpop.f32.mrf.mxu0  ;;  %v4816_v52 = vpop.xlane.xlu1 %4815 }
 0x438   : > { %v3833_v34 = vmul.f32 %v3705_v55, %v14391_v62  ;;  %v14416_v31 = vadd.f32 %v14287_v27, %v4816_v52 }
 0x439   : > { %v4746_v50 = vmul.f32 %v17445_v49, %v4606_v21  ;;  %v4607_v60 = vmul.f32 %v4479_v25, %v3583_v47  ;;  %v4608_v2 = vmul.f32 %v4480_v8, %v3584_v44  ;;  %v3450_v55 = vpop.f32.mrf.mxu0  ;;  %v3714_v47 = vmul.f32 0.044715, %v3445_v20 }
 0x43a   : > { %v3961_v13 = vmul.f32 %v3833_v34, %v14391_v62  ;;  %17864 = vst [vmem:[#allocation63_spill] sm:$0xff] %v14416_v31  ;;  %v14420_v25 = vadd.f32 %v3448_v24, %v17847_v9  ;;  %v14424_v19 = vadd.f32 %v3450_v55, %v17849_v35  ;;  %v5296_v34 = vadd.f32 %v17865_v7, %v14416_v31 }
 0x43b   : > { %v14400_v3 = vadd.f32 %v4746_v50, %v4745_v41  ;;  %v4747_v21 = vmul.f32 %v17444_v46, %v4607_v60  ;;  %v4748_v59 = vmul.f32 %v17445_v49, %v4608_v2  ;;  %v3962_v41 = vmul.f32 %v3834_v12, %v14396_v56 }
 0x43c   : > { %v14430_v60 = vadd.f32 %v14287_v27, %v14356_v48  ;;  %v3842_v12 = vmul.f32 %v3714_v47, %v3445_v20  ;;  %v3715_v24 = vmul.f32 0.044715, %v14420_v25 }
 0x43d   : > { %v4934_v44 = vadd.f32 %v4748_v59, %v4747_v21  ;;  %v4090_v8 = vadd.f32 %v3962_v41, %v14396_v56  ;;  %v3716_v21 = vmul.f32 0.044715, %v14424_v19  ;;  %v17867_v59 = vld [vmem:[#allocation217_spill] sm:$0xff] }
 0x43e   : > { %17866 = vst [vmem:[#allocation133_spill] sm:$0xff] %v14430_v60  ;;  %v5297_v41 = vadd.f32 %v17867_v59, %v14430_v60  ;;  %v3970_v7 = vmul.f32 %v3842_v12, %v3445_v20  ;;  %v3843_v48 = vmul.f32 %v3715_v24, %v14420_v25 }
 0x442   : > { %4920 = vadd.xlane.f32.xlu0 %v4919_v39  ;;  %v3443_v39 = vadd.f32 %v3442_v14, %v17847_v9  ;;  %v4089_v14 = vadd.f32 %v3961_v13, %v14391_v62  ;;  %v4218_v13 = vmul.f32 0.7978846, %v4090_v8  ;;  %v3971_v8 = vmul.f32 %v3843_v48, %v14420_v25 }
 0x443   : > { %v3577_v48 = vmul.f32 0.5, %v14391_v62 }
 0x444   : > { %v3713_v50 = vmul.f32 0.044715, %v3443_v39  ;;  %v4217_v52 = vmul.f32 0.7978846, %v4089_v14  ;;  %v4098_v14 = vadd.f32 %v3970_v7, %v3445_v20  ;;  %v4099_v12 = vadd.f32 %v3971_v8, %v14420_v25 }
 0x445   : > { %v3585_v8 = vmul.f32 0.5, %v3443_v39 }
 0x446   : > { %v3841_v2 = vmul.f32 %v3713_v50, %v3443_v39  ;;  %9562 = vtanh.f32 %v4217_v52  ;;  %v3844_v50 = vmul.f32 %v3716_v21, %v14424_v19  ;;  %v17869_v52 = vld [vmem:[#allocation220_spill] sm:$0xff]  ;;  %v4227_v21 = vmul.f32 0.7978846, %v4099_v12 }
 0x447   : > { %9564 = vtanh.f32 %v4218_v13 }
 0x448   : > { %v3969_v55 = vmul.f32 %v3841_v2, %v3443_v39  ;;  %v4226_v2 = vmul.f32 0.7978846, %v4098_v14 }
 0x44a   : > { %v4097_v47 = vadd.f32 %v3969_v55, %v3443_v39  ;;  %v3454_v39 = vpop.f32.mrf.mxu0 }
 0x44c   : > { %v4225_v31 = vmul.f32 0.7978846, %v4097_v47 }
 0x44e   : > { %9566 = vtanh.f32 %v4225_v31 }
 0x44f   : > { %9568 = vtanh.f32 %v4226_v2 }
 0x450   : > { %9570 = vtanh.f32 %v4227_v21 }
 0x458   : > { %4935 = vadd.xlane.f32.xlu1 %v4934_v44  ;;  %5877 = vrot.lane.b32.xlu0 %v5296_v34, %s9901_s17  ;;  %v4831_v44 = vpop.xlane.xlu0 %4830  ;;  %v3972_v34 = vmul.f32 %v3844_v50, %v14424_v19  ;;  %v3578_v50 = vmul.f32 0.5, %v14396_v56 }
 0x459   : > { %v14443_v59 = vadd.f32 %v14287_v27, %v4831_v44 }
 0x45a   : > { %v4100_v24 = vadd.f32 %v3972_v34, %v14424_v19 }
 0x45b   : > { %17868 = vst [vmem:[#allocation209_spill] sm:$0xff] %v14443_v59  ;;  %v5301_v13 = vadd.f32 %v17869_v52, %v14443_v59  ;;  %v3586_v52 = vmul.f32 0.5, %v3445_v20  ;;  %v14458_v20 = vpop.xlane.xlu1 %5703 }
 0x45c   : > { %5879 = vrot.lane.b32.xlu0 %v5297_v41, %s9901_s17  ;;  %v9563_v41 = vpop.eup %9562  ;;  %v4228_v55 = vmul.f32 0.7978846, %v4100_v24 }
 0x45d   : > { %v9565_v7 = vpop.eup %9564  ;;  %v4473_v47 = vadd.f32 1.0, %v9563_v41 }
 0x45e   : > { %v4474_v14 = vadd.f32 1.0, %v9565_v7  ;;  %9572 = vtanh.f32 %v4228_v55  ;;  %v9567_v34 = vpop.eup %9566 }
 0x45f   : > { %v4601_v44 = vmul.f32 %v4473_v47, %v3577_v48  ;;  %v9569_v2 = vpop.eup %9568  ;;  %v4481_v12 = vadd.f32 1.0, %v9567_v34  ;;  %v3588_v47 = vmul.f32 0.5, %v14424_v19  ;;  %v14462_v34 = vpop.xlane.xlu1 %5705 }
 0x460   : > { %v4602_v31 = vmul.f32 %v4474_v14, %v3578_v50  ;;  %v9571_v56 = vpop.eup %9570  ;;  %v3587_v50 = vmul.f32 0.5, %v14420_v25 }
 0x461   : > { %v4741_v59 = vmul.f32 %v17444_v46, %v4601_v44  ;;  %v4609_v60 = vmul.f32 %v4481_v12, %v3585_v8  ;;  %v4483_v14 = vadd.f32 1.0, %v9571_v56 }
 0x462   : > { %v4742_v24 = vmul.f32 %v17445_v49, %v4602_v31  ;;  %v3456_v31 = vpop.f32.mrf.mxu0 }
 0x463   : > { %v4749_v21 = vmul.f32 %v17444_v46, %v4609_v60  ;;  %v4611_v8 = vmul.f32 %v4483_v14, %v3587_v50  ;;  %v17871_v14 = vld [vmem:[#allocation131_spill] sm:$0xff] }
 0x464   : > { %v4925_v41 = vadd.f32 %v4742_v24, %v4741_v59  ;;  %v3455_v59 = vadd.f32 %v3454_v39, %v17847_v9 }
 0x465   : > { %v4751_v12 = vmul.f32 %v17444_v46, %v4611_v8 }
 0x469   : > { %5887 = vrot.lane.b32.xlu1 %v5301_v13, %s9901_s17  ;;  %v4482_v13 = vadd.f32 1.0, %v9569_v2  ;;  %v3457_v2 = vadd.f32 %v3456_v31, %v17849_v35 }
 0x46b   : > { %v4610_v62 = vmul.f32 %v4482_v13, %v3586_v52  ;;  %v9573_v7 = vpop.eup %9572  ;;  %v3460_v52 = vpop.f32.mrf.mxu0  ;;  %v3717_v13 = vmul.f32 0.044715, %v3455_v59  ;;  %v3718_v19 = vmul.f32 0.044715, %v3457_v2 }
 0x46c   : > { %v4484_v44 = vadd.f32 1.0, %v9573_v7  ;;  %v3461_v56 = vadd.f32 %v3460_v52, %v17847_v9 }
 0x46d   : > { %v4750_v55 = vmul.f32 %v17445_v49, %v4610_v62  ;;  %v3462_v25 = vpop.f32.mrf.mxu0  ;;  %v4822_v62 = vpop.xlane.xlu1 %4821  ;;  %v3845_v7 = vmul.f32 %v3717_v13, %v3455_v59  ;;  %v3846_v39 = vmul.f32 %v3718_v19, %v3457_v2 }
 0x46e   : > { %v4612_v60 = vmul.f32 %v4484_v44, %v3588_v47  ;;  %v3719_v50 = vmul.f32 0.044715, %v3461_v56 }
 0x46f   : > { %v14456_v48 = vadd.f32 %v4750_v55, %v4749_v21  ;;  %v14471_v55 = vadd.f32 %v14287_v27, %v4822_v62  ;;  %v3973_v31 = vmul.f32 %v3845_v7, %v3455_v59  ;;  %v3974_v8 = vmul.f32 %v3846_v39, %v3457_v2  ;;  %v17873_v7 = vld [vmem:[#allocation72_spill] sm:$0xff] }
 0x470   : > { %v4752_v24 = vmul.f32 %v17445_v49, %v4612_v60  ;;  %v3847_v60 = vmul.f32 %v3719_v50, %v3461_v56 }
 0x471   : > { %17870 = vst [vmem:[#allocation211_spill] sm:$0xff] %v14471_v55  ;;  %v5298_v44 = vadd.f32 %v17871_v14, %v14471_v55  ;;  %v4101_v9 = vadd.f32 %v3973_v31, %v3455_v59  ;;  %v4102_v52 = vadd.f32 %v3974_v8, %v3457_v2  ;;  %v14482_v31 = vpop.xlane.xlu1 %5707  ;;  %v3590_v8 = vmul.f32 0.5, %v3457_v2 }
 0x472   : > { %v4940_v21 = vadd.f32 %v4752_v24, %v4751_v12  ;;  %v3975_v24 = vmul.f32 %v3847_v60, %v3461_v56 }
 0x473   : > { %v4229_v62 = vmul.f32 0.7978846, %v4101_v9  ;;  %v4230_v19 = vmul.f32 0.7978846, %v4102_v52 }
 0x475   : > { %9574 = vtanh.f32 %v4229_v62  ;;  %v14485_v62 = vpop.xlane.xlu1 %5709 }
 0x476   : > { %9576 = vtanh.f32 %v4230_v19 }
 0x47b   : > { %4926 = vadd.xlane.f32.xlu0 %v4925_v41  ;;  %v3463_v41 = vadd.f32 %v3462_v25, %v17849_v35  ;;  %v4837_v35 = vpop.xlane.xlu0 %4836 }
 0x47c   : > { %v14477_v13 = vadd.f32 %v14287_v27, %v4837_v35 }
 0x47d   : > { %v3720_v47 = vmul.f32 0.044715, %v3463_v41 }
 0x47e   : > { %17872 = vst [vmem:[#allocation147_spill] sm:$0xff] %v14477_v13  ;;  %v5303_v39 = vadd.f32 %v17873_v7, %v14477_v13  ;;  %v3592_v7 = vmul.f32 0.5, %v3463_v41 }
 0x47f   : > { %v3848_v12 = vmul.f32 %v3720_v47, %v3463_v41  ;;  %v3589_v47 = vmul.f32 0.5, %v3455_v59 }
 0x481   : > { %v3976_v25 = vmul.f32 %v3848_v12, %v3463_v41 }
 0x483   : > { %v4104_v51 = vadd.f32 %v3976_v25, %v3463_v41 }
 0x485   : > { %v4232_v50 = vmul.f32 0.7978846, %v4104_v51 }
 0x48d   : > { %4941 = vadd.xlane.f32.xlu1 %v4940_v21  ;;  %v4103_v21 = vadd.f32 %v3975_v24, %v3461_v56 }
 0x48f   : > { %v4231_v14 = vmul.f32 0.7978846, %v4103_v21  ;;  %v3591_v21 = vmul.f32 0.5, %v3461_v56  ;;  %v17875_v56 = vld [vmem:[#allocation143_spill] sm:$0xff] }
 0x491   : > { %5881 = vrot.lane.b32.xlu0 %v5298_v44, %s9901_s17  ;;  %9578 = vtanh.f32 %v4231_v14  ;;  %v9575_v44 = vpop.eup %9574  ;;  %v4828_v14 = vpop.xlane.xlu1 %4827 }
 0x492   : > { %9580 = vtanh.f32 %v4232_v50  ;;  %v9577_v60 = vpop.eup %9576  ;;  %v4485_v12 = vadd.f32 1.0, %v9575_v44  ;;  %v4843_v44 = vpop.xlane.xlu0 %4842 }
 0x493   : > { %v4486_v9 = vadd.f32 1.0, %v9577_v60 }
 0x494   : > { %v4613_v52 = vmul.f32 %v4485_v12, %v3589_v47 }
 0x495   : > { %v4614_v35 = vmul.f32 %v4486_v9, %v3590_v8  ;;  %v4834_v8 = vpop.xlane.xlu1 %4833 }
 0x496   : > { %v4753_v24 = vmul.f32 %v17444_v46, %v4613_v52  ;;  %v4849_v9 = vpop.xlane.xlu0 %4848 }
 0x497   : > { %v4754_v19 = vmul.f32 %v17445_v49, %v4614_v35  ;;  %v14494_v35 = vadd.f32 %v14287_v27, %v4828_v14 }
 0x499   : > { %v14489_v59 = vadd.f32 %v4754_v19, %v4753_v24  ;;  %17874 = vst [vmem:[#allocation138_spill] sm:$0xff] %v14494_v35  ;;  %v5300_v41 = vadd.f32 %v17875_v56, %v14494_v35  ;;  %v17883_v56 = vld [vmem:[#allocation183_spill] sm:$0xff] }
 0x49a   : > { %v4855_v24 = vpop.xlane.xlu0 %4854 }
 0x49e   : > { %5891 = vrot.lane.b32.xlu1 %v5303_v39, %s9901_s17  ;;  %v9579_v25 = vpop.eup %9578  ;;  %v14503_v19 = vpop.xlane.xlu0 %4860 }
 0x49f   : > { %v9581_v51 = vpop.eup %9580  ;;  %v4487_v2 = vadd.f32 1.0, %v9579_v25 }
 0x4a0   : > { %v4488_v39 = vadd.f32 1.0, %v9581_v51 }
 0x4a1   : > { %v4615_v50 = vmul.f32 %v4487_v2, %v3591_v21  ;;  %v17877_v21 = vld [vmem:[#allocation86_spill] sm:$0xff]  ;;  %v14515_v2 = vadd.f32 %v14287_v27, %v4855_v24 }
 0x4a2   : > { %v4616_v47 = vmul.f32 %v4488_v39, %v3592_v7  ;;  %v14510_v51 = vpop.xlane.xlu0 %4866 }
 0x4a3   : > { %v4755_v60 = vmul.f32 %v17444_v46, %v4615_v50  ;;  %17878 = vst [vmem:[#allocation174_spill] sm:$0xff] %v14515_v2  ;;  %v17880_v50 = vld [vmem:[#allocation181_spill] sm:$0xff] }
 0x4a4   : > { %v4756_v12 = vmul.f32 %v17445_v49, %v4616_v47  ;;  %v14508_v49 = vadd.f32 %v14287_v27, %v4843_v44  ;;  %v5502_v47 = vadd.f32 %v17880_v50, %v14515_v2  ;;  %v17881_v44 = vld [vmem:[#allocation149_spill] sm:$0xff] }
 0x4a6   : > { %v4946_v52 = vadd.f32 %v4756_v12, %v4755_v60  ;;  %17876 = vst [vmem:[#allocation151_spill] sm:$0xff] %v14508_v49  ;;  %v5305_v7 = vadd.f32 %v17877_v21, %v14508_v49  ;;  %v4873_v60 = vpop.xlane.xlu0 %4872  ;;  %v14537_v21 = vadd.f32 %v14287_v27, %v4834_v8 }
 0x4a8   : > { %17884 = vst [vmem:[#allocation54_spill] sm:$0xff] %v14537_v21 }
 0x4b0   : > { %4932 = vadd.xlane.f32.xlu0 %v14400_v3  ;;  %v14496_v3 = vpop.xlane.xlu1 %4839 }
 0x4b4   : > { %v14500_v25 = vpop.xlane.xlu1 %4845 }
 0x4b8   : > { %v14505_v46 = vpop.xlane.xlu1 %4851 }
 0x4bc   : > { %v4858_v39 = vpop.xlane.xlu1 %4857 }
 0x4bd   : > { %v14519_v14 = vadd.f32 %v14287_v27, %v4858_v39  ;;  %v17885_v39 = vld [vmem:[#allocation80_spill] sm:$0xff] }
 0x4be   : > { %v5302_v50 = vadd.f32 %v17885_v39, %v14537_v21 }
 0x4bf   : > { %17879 = vst [vmem:[#allocation154_spill] sm:$0xff] %v14519_v14  ;;  %v5503_v12 = vadd.f32 %v17881_v44, %v14519_v14  ;;  %v17886_v44 = vld [vmem:[#allocation9_spill] sm:$0xff] }
 0x4c0   : > { %v14534_v24 = vpop.xlane.xlu1 %4863 }
 0x4c2   : > { %4947 = vadd.xlane.f32.xlu1 %v4946_v52  ;;  %v14527_v52 = vadd.f32 %v14287_v27, %v4873_v60 }
 0x4c4   : > { %17882 = vst [vmem:[#allocation166_spill] sm:$0xff] %v14527_v52 }
 0x4c6   : > { %5885 = vrot.lane.b32.xlu0 %v5300_v41, %s9901_s17  ;;  %v5508_v41 = vadd.f32 %v17883_v56, %v14527_v52 }
 0x4d3   : > { %5895 = vrot.lane.b32.xlu1 %v5305_v7, %s9901_s17  ;;  %v4879_v7 = vpop.xlane.xlu0 %4878 }
 0x4d4   : > { %v14556_v21 = vadd.f32 %v14287_v27, %v4879_v7 }
 0x4d6   : > { %17888 = vst [vmem:[#allocation101_spill] sm:$0xff] %v14556_v21 }
 0x4d7   : > { %5935 = vrot.lane.b32.xlu1 %v5502_v47, %s9902_s20  ;;  %v14541_v47 = vpop.xlane.xlu1 %4869  ;;  %v4885_v60 = vpop.xlane.xlu0 %4884 }
 0x4d8   : > { %v14563_v33 = vadd.f32 %v14287_v27, %v4885_v60 }
 0x4da   : > { %17890 = vst [vmem:[#allocation218_spill] sm:$0xff] %v14563_v33 }
 0x4db   : > { %5937 = vrot.lane.b32.xlu1 %v5503_v12, %s9902_s20  ;;  %v17887_v12 = vld [vmem:[#allocation122_spill] sm:$0xff]  ;;  %v4891_v13 = vpop.xlane.xlu0 %4890 }
 0x4dc   : > { %v2377_v56 = vadd.f32 %v17887_v12, %v17886_v44  ;;  %v17889_v12 = vld [vmem:[#allocation180_spill] sm:$0xff]  ;;  %v14569_v28 = vadd.f32 %v14287_v27, %v4891_v13  ;;  %v17894_v13 = vld [vmem:[#allocation141_spill] sm:$0xff] }
 0x4dd   : > { %v5510_v55 = vadd.f32 %v17889_v12, %v14556_v21  ;;  %v14577_v12 = vadd.f32 %v14287_v27, %v4849_v9 }
 0x4de   : > { %17892 = vst [vmem:[#allocation146_spill] sm:$0xff] %v14569_v28  ;;  %v5514_v60 = vadd.f32 %v14083_v30, %v14569_v28 }
 0x4df   : > { %5947 = vrot.lane.b32.xlu1 %v5508_v41, %s9902_s20  ;;  %v14546_v41 = vpop.xlane.xlu1 %4875  ;;  %v4897_v35 = vpop.xlane.xlu0 %4896  ;;  %17893 = vst [vmem:[#allocation176_spill] sm:$0xff] %v14577_v12 }
 0x4e0   : > { %v14588_v21 = vadd.f32 %v14287_v27, %v4897_v35 }
 0x4e2   : > { %17895 = vst [vmem:[#allocation126_spill] sm:$0xff] %v14588_v21  ;;  %v5516_v30 = vadd.f32 %v14134_v15, %v14588_v21 }
 0x4e3   : > { %v14549_v8 = vpop.xlane.xlu1 %4881  ;;  %v14553_v39 = vpop.xlane.xlu0 %4902 }
 0x4e5   : > { %4938 = vadd.xlane.f32.xlu0 %v14456_v48  ;;  %v9838_v48 = vld [vmem:[%s11177_s28 + $0x178] sm:$0xff] }
 0x4e6   : > { %v5533_v49 = vmul.f32 %v9838_v48, %v2377_v56 }
 0x4e7   : > { %v14551_v52 = vpop.xlane.xlu1 %4887  ;;  %v4909_v56 = vpop.xlane.xlu0 %4908 }
 0x4eb   : > { %v14573_v7 = vpop.permute.xlu0 %5871 }
 0x4fb   : > { %5889 = vrot.lane.b32.xlu0 %v5302_v50, %s9901_s17  ;;  %v14558_v50 = vpop.xlane.xlu1 %4893 }
 0x4ff   : > { %v14571_v26 = vpop.xlane.xlu1 %4899 }
 0x503   : > { %5564 = vadd.xlane.f32.xlu1 %v5533_v49  ;;  %v17891_v49 = vld [vmem:[#allocation134_spill] sm:$0xff] }
 0x504   : > { %v5512_v48 = vadd.f32 %v17891_v49, %v14563_v33  ;;  %v14583_v49 = vpop.xlane.xlu1 %4905  ;;  %v5307_v33 = vadd.f32 %v17894_v13, %v14577_v12 }
 0x514   : > { %5951 = vrot.lane.b32.xlu1 %v5510_v55, %s9902_s20  ;;  %v4915_v55 = vpop.xlane.xlu0 %4914 }
 0x518   : > { %5955 = vrot.lane.b32.xlu1 %v5512_v48, %s9902_s20  ;;  %v14591_v9 = vpop.permute.xlu0 %5873  ;;  %v4912_v48 = vpop.xlane.xlu1 %4911 }
 0x519   : > { %v14600_v28 = vadd.f32 %v14287_v27, %v4912_v48 }
 0x51a   : > { %4944 = vadd.xlane.f32.xlu0 %v14489_v59  ;;  %v14596_v59 = vadd.f32 %v14287_v27, %v4909_v56  ;;  %v14612_v56 = vadd.f32 %v14287_v27, %v4915_v55 }
 0x51b   : > { %17897 = vst [vmem:[#allocation107_spill] sm:$0xff] %v14600_v28  ;;  %v5714_v15 = vadd.f32 %v14275_v61, %v14600_v28 }
 0x51c   : > { %5959 = vrot.lane.b32.xlu1 %v5514_v60, %s9902_s20  ;;  %17896 = vst [vmem:[#allocation228_spill] sm:$0xff] %v14596_v59  ;;  %v4921_v60 = vpop.xlane.xlu0 %4920  ;;  %v5713_v35 = vadd.f32 %v14265_v18, %v14596_v59  ;;  %17899 = vst [vmem:[#allocation87_spill] sm:$0xff] %v14612_v56  ;;  %v4918_v13 = vpop.xlane.xlu1 %4917  ;;  %v17900_v18 = vld [vmem:[#allocation169_spill] sm:$0xff] }
 0x520   : > { %5899 = vrot.lane.b32.xlu1 %v5307_v33, %s9901_s17  ;;  %v14607_v33 = vadd.f32 %v14287_v27, %v14496_v3  ;;  %v5715_v3 = vadd.f32 %v14296_v54, %v14612_v56  ;;  %v14624_v21 = vpop.permute.xlu1 %5875 }
 0x522   : > { %17898 = vst [vmem:[#allocation77_spill] sm:$0xff] %v14607_v33  ;;  %v5304_v48 = vadd.f32 %v17900_v18, %v14607_v33 }
 0x524   : > { %5963 = vrot.lane.b32.xlu1 %v5516_v30, %s9902_s20  ;;  %v14614_v30 = vpop.permute.xlu0 %5877  ;;  %v4924_v18 = vpop.xlane.xlu1 %4923 }
 0x525   : > { %v14637_v54 = vadd.f32 %v14287_v27, %v4924_v18 }
 0x527   : > { %17903 = vst [vmem:[#allocation84_spill] sm:$0xff] %v14637_v54  ;;  %v5718_v12 = vadd.f32 %v14319_v42, %v14637_v54 }
 0x528   : > { %6003 = vrot.lane.b32.xlu1 %v5713_v35, %s9903_s21  ;;  %v14620_v35 = vadd.f32 %v14287_v27, %v4918_v13  ;;  %v14628_v61 = vpop.permute.xlu0 %5879 }
 0x52a   : > { %17901 = vst [vmem:[#allocation140_spill] sm:$0xff] %v14620_v35  ;;  %v5716_v55 = vadd.f32 %v14305_v16, %v14620_v35 }
 0x52c   : > { %6005 = vrot.lane.b32.xlu1 %v5714_v15, %s9903_s21  ;;  %v14633_v15 = vadd.f32 %v14287_v27, %v4921_v60  ;;  %v4927_v13 = vpop.xlane.xlu0 %4926 }
 0x52d   : > { %v14645_v16 = vadd.f32 %v14287_v27, %v4927_v13 }
 0x52e   : > { %17902 = vst [vmem:[#allocation98_spill] sm:$0xff] %v14633_v15 }
 0x52f   : > { %17904 = vst [vmem:[#allocation110_spill] sm:$0xff] %v14645_v16 }
 0x530   : > { %6007 = vrot.lane.b32.xlu1 %v5715_v3, %s9903_s21  ;;  %5893 = vrot.lane.b32.xlu0 %v5304_v48, %s9901_s17  ;;  %v5717_v3 = vadd.f32 %v14317_v63, %v14633_v15  ;;  %v4930_v48 = vpop.xlane.xlu1 %4929  ;;  %v14647_v60 = vpop.permute.xlu0 %5881  ;;  %v5719_v63 = vadd.f32 %v14331_v5, %v14645_v16 }
 0x534   : > { %6009 = vrot.lane.b32.xlu1 %v5716_v55, %s9903_s21  ;;  %v14651_v55 = vadd.f32 %v14287_v27, %v4930_v48  ;;  %v14655_v18 = vpop.permute.xlu1 %5883 }
 0x536   : > { %17905 = vst [vmem:[#allocation125_spill] sm:$0xff] %v14651_v55  ;;  %v5720_v42 = vadd.f32 %v14338_v10, %v14651_v55 }
 0x538   : > { %6011 = vrot.lane.b32.xlu1 %v5717_v3, %s9903_s21 }
 0x539   : > { %v4933_v3 = vpop.xlane.xlu0 %4932 }
 0x53a   : > { %v14661_v13 = vadd.f32 %v14287_v27, %v4933_v3  ;;  %v17909_v3 = vld [vmem:[#allocation114_spill] sm:$0xff] }
 0x53b   : > { %v2371_v16 = vadd.f32 %v17909_v3, %v17886_v44 }
 0x53c   : > { %6013 = vrot.lane.b32.xlu1 %v5718_v12, %s9903_s21  ;;  %17906 = vst [vmem:[#allocation224_spill] sm:$0xff] %v14661_v13  ;;  %v4936_v12 = vpop.xlane.xlu1 %4935  ;;  %v5721_v5 = vadd.f32 %v14387_v17, %v14661_v13  ;;  %v17910_v17 = vld [vmem:[#allocation175_spill] sm:$0xff] }
 0x53d   : > { %v14665_v48 = vadd.f32 %v14287_v27, %v4936_v12  ;;  %v9840_v12 = vld [vmem:[%s11177_s28 + $0x170] sm:$0xff]  ;;  %v2467_v13 = vadd.f32 %v17910_v17, %v17886_v44  ;;  %v14714_v17 = vadd.f32 %v14287_v27, %v14541_v47  ;;  %v14732_v47 = vadd.f32 %v14287_v27, %v14500_v25 }
 0x53e   : > { %v5532_v54 = vmul.f32 %v9840_v12, %v2371_v16  ;;  %v17913_v16 = vld [vmem:[#allocation227_spill] sm:$0xff]  ;;  %v17926_v25 = vld [vmem:[#allocation100_spill] sm:$0xff] }
 0x53f   : > { %17907 = vst [vmem:[#allocation202_spill] sm:$0xff] %v14665_v48  ;;  %v5722_v10 = vadd.f32 %v14404_v43, %v14665_v48  ;;  %v14684_v43 = vadd.f32 %v14287_v27, %v14503_v19  ;;  %v14701_v19 = vadd.f32 %v14287_v27, %v14510_v51  ;;  %17918 = vst [vmem:[#allocation230_spill] sm:$0xff] %v14714_v17 }
 0x540   : > { %6015 = vrot.lane.b32.xlu1 %v5719_v63, %s9903_s21  ;;  %v17908_v63 = vld [vmem:[#allocation190_spill] sm:$0xff]  ;;  %17922 = vst [vmem:[#allocation203_spill] sm:$0xff] %v14732_v47 }
 0x541   : > { %v2461_v33 = vadd.f32 %v17908_v63, %v17886_v44  ;;  %17911 = vst [vmem:[#allocation226_spill] sm:$0xff] %v14684_v43  ;;  %v14686_v63 = vpop.permute.xlu1 %5887  ;;  %17915 = vst [vmem:[#allocation165_spill] sm:$0xff] %v14701_v19 }
 0x544   : > { %6017 = vrot.lane.b32.xlu1 %v5720_v42, %s9903_s21  ;;  %v9839_v42 = vld [vmem:[%s11177_s28 + $0x1e8] sm:$0xff] }
 0x545   : > { %v5740_v55 = vmul.f32 %v9839_v42, %v2461_v33  ;;  %v14692_v33 = vadd.f32 %v14287_v27, %v14534_v24 }
 0x547   : > { %17912 = vst [vmem:[#allocation150_spill] sm:$0xff] %v14692_v33 }
 0x548   : > { %6019 = vrot.lane.b32.xlu1 %v5721_v5, %s9903_s21  ;;  %v9841_v5 = vld [vmem:[%s11177_s28 + $0x1f0] sm:$0xff] }
 0x549   : > { %v5741_v15 = vmul.f32 %v9841_v5, %v2467_v13  ;;  %v17919_v5 = vld [vmem:[#allocation170_spill] sm:$0xff] }
 0x54c   : > { %6021 = vrot.lane.b32.xlu1 %v5722_v10, %s9903_s21  ;;  %v14688_v10 = vpop.permute.xlu0 %5885 }
 0x54f   : > { %5769 = vadd.xlane.f32.xlu0 %v5740_v55  ;;  %v5504_v55 = vadd.f32 %v17913_v16, %v14684_v43  ;;  %v5506_v16 = vadd.f32 %v17919_v5, %v14701_v19  ;;  %v17959_v19 = vld [vmem:[#allocation212_spill] sm:$0xff] }
 0x553   : > { %5562 = vadd.xlane.f32.xlu0 %v5532_v54  ;;  %v4942_v54 = vpop.xlane.xlu1 %4941 }
 0x554   : > { %v14707_v24 = vadd.f32 %v14287_v27, %v4942_v54 }
 0x556   : > { %17917 = vst [vmem:[#allocation229_spill] sm:$0xff] %v14707_v24  ;;  %v5724_v51 = vadd.f32 %v14462_v34, %v14707_v24  ;;  %v9847_v24 = vld [vmem:[%s11177_s28 + $0x110] sm:$0xff] }
 0x557   : > { %5771 = vadd.xlane.f32.xlu0 %v5741_v15  ;;  %v17914_v15 = vld [vmem:[#allocation106_spill] sm:$0xff] }
 0x558   : > { %v5505_v3 = vadd.f32 %v17914_v15, %v14692_v33  ;;  %v17924_v15 = vld [vmem:[#allocation49_spill] sm:$0xff] }
 0x56d   : > { %5939 = vrot.lane.b32.xlu0 %v5504_v55, %s9902_s20  ;;  %v17920_v55 = vld [vmem:[#allocation171_spill] sm:$0xff] }
 0x56e   : > { %v4939_v13 = vpop.xlane.xlu0 %4938  ;;  %v5507_v54 = vadd.f32 %v17920_v55, %v14714_v17  ;;  %v17957_v17 = vld [vmem:[#allocation53_spill] sm:$0xff] }
 0x56f   : > { %v14704_v42 = vadd.f32 %v14287_v27, %v4939_v13  ;;  %v17923_v13 = vld [vmem:[#allocation187_spill] sm:$0xff] }
 0x571   : > { %17916 = vst [vmem:[#allocation155_spill] sm:$0xff] %v14704_v42  ;;  %v5723_v12 = vadd.f32 %v14458_v20, %v14704_v42  ;;  %5941 = vrot.lane.b32.xlu0 %v5505_v3, %s9902_s20  ;;  %v14726_v20 = vadd.f32 %v14287_v27, %v14546_v41  ;;  %v5306_v3 = vadd.f32 %v17924_v15, %v14732_v47  ;;  %v17949_v47 = vld [vmem:[#allocation33_spill] sm:$0xff] }
 0x572   : > { %v14741_v41 = vadd.f32 %v14287_v27, %v14549_v8  ;;  %v17928_v8 = vld [vmem:[#allocation210_spill] sm:$0xff] }
 0x573   : > { %6023 = vrot.lane.b32.xlu1 %v5723_v12, %s9903_s21  ;;  %17921 = vst [vmem:[#allocation197_spill] sm:$0xff] %v14726_v20  ;;  %v5509_v34 = vadd.f32 %v17923_v13, %v14726_v20  ;;  %v6577_v12 = vld [vmem:[%s17065_s10] sm:$0xff] }
 0x574   : > { %17925 = vst [vmem:[#allocation191_spill] sm:$0xff] %v14741_v41  ;;  %v5511_v5 = vadd.f32 %v17926_v25, %v14741_v41  ;;  %v9842_v25 = vld [vmem:[%s11177_s28 + $0x1f8] sm:$0xff] }
 0x575   : > { %5943 = vrot.lane.b32.xlu0 %v5506_v16, %s9902_s20  ;;  %v14751_v16 = vadd.f32 %v14287_v27, %v14551_v52  ;;  %v14765_v52 = vadd.f32 %v14287_v27, %v14583_v49  ;;  %v14780_v49 = vpop.permute.xlu0 %5889 }
 0x577   : > { %6025 = vrot.lane.b32.xlu1 %v5724_v51, %s9903_s21  ;;  %17927 = vst [vmem:[#allocation194_spill] sm:$0xff] %v14751_v16  ;;  %v6591_v51 = vcombine.high %v6577_v12, %v6577_v12  ;;  %v5513_v55 = vadd.f32 %v17928_v8, %v14751_v16  ;;  %17930 = vst [vmem:[#allocation196_spill] sm:$0xff] %v14765_v52  ;;  %v17934_v8 = vld [vmem:[#allocation31_spill] sm:$0xff] }
 0x579   : > { %5945 = vrot.lane.b32.xlu0 %v5507_v54, %s9902_s20  ;;  %8893 = vmatprep.subr.msk.mxu1 %vm1339_vm0, %v6591_v51  ;;  %v14760_v54 = vadd.f32 %v14287_v27, %v14553_v39  ;;  %v5712_v39 = vadd.f32 %v14215_v36, %v14765_v52  ;;  %v2472_v36 = vpop.f32.mrf.mxu1  ;;  %v17933_v51 = vld [vmem:[#allocation8_spill] sm:$0xff] }
 0x57a   : > { %8894 = vmatpush1.msk.msra.mxu1 %vm1339_vm0, %v6577_v12  ;;  %v2473_v12 = vadd.f32 %v2472_v36, %v17886_v44  ;;  %v17936_v44 = vld [vmem:[#allocation13_spill] sm:$0xff]  ;;  %v2792_v42 = vadd.f32 %v17949_v47, %v17933_v51  ;;  %v17954_v47 = vld [vmem:[#allocation50_spill] sm:$0xff] }
 0x57b   : > { %17929 = vst [vmem:[#allocation182_spill] sm:$0xff] %v14760_v54  ;;  %v5711_v13 = vadd.f32 %v14169_v38, %v14760_v54 }
 0x57d   : > { %5949 = vrot.lane.b32.xlu0 %v5509_v34, %s9902_s20  ;;  %v14772_v34 = vadd.f32 %v14287_v27, %v14558_v50 }
 0x57f   : > { %17931 = vst [vmem:[#allocation45_spill] sm:$0xff] %v14772_v34  ;;  %v5515_v15 = vadd.f32 %v14119_v40, %v14772_v34  ;;  %v5742_v40 = vmul.f32 %v9842_v25, %v2473_v12  ;;  %v9844_v12 = vld [vmem:[%s11177_s28 + $0x108] sm:$0xff] }
 0x581   : > { %5897 = vrot.lane.b32.xlu0 %v5306_v3, %s9901_s17 }
 0x585   : > { %5953 = vrot.lane.b32.xlu0 %v5511_v5, %s9902_s20  ;;  %v14790_v5 = vpop.permute.xlu1 %5891 }
 0x589   : > { %5957 = vrot.lane.b32.xlu0 %v5513_v55, %s9902_s20  ;;  %v2782_v55 = vadd.f32 %v17934_v8, %v17933_v51 }
 0x58d   : > { %5999 = vrot.lane.b32.xlu0 %v5711_v13, %s9903_s21  ;;  %v4948_v13 = vpop.xlane.xlu1 %4947 }
 0x591   : > { %6001 = vrot.lane.b32.xlu0 %v5712_v39, %s9903_s21  ;;  %v9843_v39 = vld [vmem:[%s11177_s28 + $0x180] sm:$0xff] }
 0x595   : > { %5961 = vrot.lane.b32.xlu0 %v5515_v15, %s9902_s20  ;;  %v5791_v15 = vmul.f32 %v9843_v39, %v2782_v55 }
 0x5a3   : > { %v4945_v38 = vpop.xlane.xlu0 %4944 }
 0x5a4   : > { %v14783_v3 = vadd.f32 %v14287_v27, %v4945_v38  ;;  %v17935_v27 = vld [vmem:[#allocation16_spill] sm:$0xff] }
 0x5a6   : > { %17932 = vst [vmem:[#allocation47_spill] sm:$0xff] %v14783_v3  ;;  %v5725_v50 = vadd.f32 %v14482_v31, %v14783_v3  ;;  %v14796_v31 = vpop.permute.xlu1 %5895 }
 0x5a8   : > { %6027 = vrot.lane.b32.xlu1 %v5725_v50, %s9903_s21  ;;  %v2707_v50 = vadd.f32 %v17936_v44, %v17933_v51 }
 0x5aa   : > { %v14798_v38 = vpop.permute.xlu1 %5935  ;;  %v5583_v25 = vmul.f32 %v9844_v12, %v2707_v50  ;;  %v14824_v12 = vpop.permute.xlu0 %5893 }
 0x5ae   : > { %v14802_v36 = vpop.permute.xlu1 %5937 }
 0x5b2   : > { %v14811_v55 = vpop.permute.xlu1 %5947 }
 0x5b4   : > { %5773 = vadd.xlane.f32.xlu0 %v5742_v40  ;;  %v14805_v40 = vld [vmem:[#allocation2] ss:$0 sm:$0xff] }
 0x5b5   : > { %v14809_v8 = vadd.f32 %v14805_v40, %v14505_v46  ;;  %v14828_v46 = vadd.f32 %v14805_v40, %v4948_v13  ;;  %v17946_v13 = vld [vmem:[#allocation144_spill] sm:$0xff] }
 0x5b6   : > { %v14819_v44 = vpop.xlane.xlu1 %5564 }
 0x5b7   : > { %17937 = vst [vmem:[#allocation205_spill] sm:$0xff] %v14809_v8  ;;  %17940 = vst [vmem:[#allocation99_spill] sm:$0xff] %v14819_v44 }
 0x5b8   : > { %5598 = vadd.xlane.f32.xlu0 %v17935_v27  ;;  %v17938_v27 = vld [vmem:[#allocation177_spill] sm:$0xff]  ;;  %17941 = vst [vmem:[#allocation116_spill] sm:$0xff] %v14828_v46 }
 0x5b9   : > { %v5308_v39 = vadd.f32 %v17938_v27, %v14809_v8  ;;  %v5566_v8 = vadd.f32 %v17946_v13, %v14515_v2 }
 0x5bc   : > { %5807 = vadd.xlane.f32.xlu0 %v5791_v15  ;;  %v14817_v15 = vadd.f32 %v14805_v40, %v14571_v26  ;;  %v5726_v26 = vadd.f32 %v14485_v62, %v14828_v46 }
 0x5be   : > { %17939 = vst [vmem:[#allocation89_spill] sm:$0xff] %v14817_v15  ;;  %v5517_v50 = vadd.f32 %v14172_v29, %v14817_v15  ;;  %v17944_v29 = vld [vmem:[#allocation207_spill] sm:$0xff] }
 0x5bf   : > { %v5357_v15 = vadd.f32 %v17944_v29, %v14291_v23 }
 0x5cc   : > { %5600 = vadd.xlane.f32.xlu1 %v5583_v25  ;;  %v14830_v25 = vpop.permute.xlu1 %5951 }
 0x5d2   : > { %5901 = vrot.lane.b32.xlu0 %v5308_v39, %s9901_s17  ;;  %v14839_v39 = vpop.permute.xlu1 %5955 }
 0x5d6   : > { %5965 = vrot.lane.b32.xlu0 %v5517_v50, %s9902_s20  ;;  %v14848_v3 = vpop.permute.xlu1 %5959 }
 0x5d8   : > { %v14832_v27 = vpop.xlane.xlu0 %5769 }
 0x5d9   : > { %17942 = vst [vmem:[#allocation221_spill] sm:$0xff] %v14832_v27  ;;  %v9846_v27 = vld [vmem:[%s11177_s28 + $0x188] sm:$0xff] }
 0x5da   : > { %v14854_v29 = vpop.permute.xlu1 %5899 }
 0x5dc   : > { %v14836_v44 = vpop.xlane.xlu0 %5562 }
 0x5dd   : > { %17943 = vst [vmem:[#allocation217_spill] sm:$0xff] %v14836_v44  ;;  %6029 = vrot.lane.b32.xlu1 %v5726_v26, %s9903_s21  ;;  %v5775_v26 = vadd.f32 %v14200_v45, %v14760_v54 }
 0x5de   : > { %v14860_v2 = vpop.permute.xlu1 %5963 }
 0x5e0   : > { %v14843_v50 = vpop.xlane.xlu0 %5771 }
 0x5e1   : > { %17945 = vst [vmem:[#allocation220_spill] sm:$0xff] %v14843_v50  ;;  %6113 = vrot.lane.b32.xlu1 %v5357_v15, %s9901_s17  ;;  %v17947_v15 = vld [vmem:[#allocation30_spill] sm:$0xff] }
 0x5e2   : > { %v2787_v13 = vadd.f32 %v17947_v15, %v17933_v51  ;;  %v9848_v15 = vld [vmem:[%s11177_s28 + $0x190] sm:$0xff] }
 0x5e3   : > { %v5793_v16 = vmul.f32 %v9848_v15, %v2792_v42  ;;  %v17955_v42 = vld [vmem:[#allocation48_spill] sm:$0xff] }
 0x5e4   : > { %v5940_v62 = vpop.permute.xlu0 %5939  ;;  %v5792_v45 = vmul.f32 %v9846_v27, %v2787_v13  ;;  %v14891_v15 = vadd.f32 %v14805_v40, %v17955_v42 }
 0x5e5   : > { %6177 = vrot.lane.b32.xlu1 %v5566_v8, %s9902_s20  ;;  %v17948_v8 = vld [vmem:[#allocation17_spill] sm:$0xff] }
 0x5e6   : > { %v2712_v50 = vadd.f32 %v17948_v8, %v17933_v51  ;;  %v17950_v8 = vld [vmem:[#allocation109_spill] sm:$0xff]  ;;  %17956 = vst [vmem:[#allocation143_spill] sm:$0xff] %v14891_v15 }
 0x5e7   : > { %v14879_v27 = vadd.f32 %v14805_v40, %v17950_v8 }
 0x5e8   : > { %v5942_v44 = vpop.permute.xlu0 %5941  ;;  %v5584_v34 = vmul.f32 %v9847_v24, %v2712_v50  ;;  %v17952_v24 = vld [vmem:[#allocation195_spill] sm:$0xff] }
 0x5e9   : > { %6241 = vrot.lane.b32.xlu1 %v5775_v26, %s9903_s21  ;;  %v6004_v26 = vpop.permute.xlu1 %6003  ;;  %17951 = vst [vmem:[#allocation131_spill] sm:$0xff] %v14879_v27  ;;  %v14885_v50 = vadd.f32 %v14805_v40, %v17952_v24 }
 0x5eb   : > { %17953 = vst [vmem:[#allocation72_spill] sm:$0xff] %v14885_v50  ;;  %v5085_v24 = vadd.f32 %v17957_v17, %v14885_v50 }
 0x5ec   : > { %v14856_v23 = vpop.permute.xlu0 %5943 }
 0x5ed   : > { %v6006_v41 = vpop.permute.xlu1 %6005 }
 0x5f0   : > { %v14862_v46 = vpop.permute.xlu0 %5945 }
 0x5f4   : > { %v14867_v54 = vpop.permute.xlu0 %5949 }
 0x5f5   : > { %5809 = vadd.xlane.f32.xlu0 %v5792_v45  ;;  %v6008_v45 = vpop.permute.xlu1 %6007 }
 0x5f8   : > { %v14872_v48 = vpop.permute.xlu0 %5897 }
 0x5f9   : > { %5602 = vadd.xlane.f32.xlu0 %v5584_v34  ;;  %v5084_v34 = vadd.f32 %v17954_v47, %v14879_v27  ;;  %v17958_v47 = vld [vmem:[#allocation15_spill] sm:$0xff]  ;;  %v14905_v27 = vadd.f32 %v14805_v40, %v17959_v19  ;;  %v6010_v17 = vpop.permute.xlu1 %6009 }
 0x5fa   : > { %v2717_v42 = vadd.f32 %v17958_v47, %v17933_v51 }
 0x5fb   : > { %v6048_v8 = vsel %vm6047_vm5, %v5084_v34, %v14573_v7  ;;  %17960 = vst [vmem:[#allocation86_spill] sm:$0xff] %v14905_v27  ;;  %v17961_v7 = vld [vmem:[#allocation70_spill] sm:$0xff]  ;;  %v6049_v34 = vsel %vm6047_vm5, %v5085_v24, %v14591_v9  ;;  %v14922_v9 = vadd.f32 %v14805_v40, %v14096_v37  ;;  %v17964_v24 = vld [vmem:[#allocation81_spill] sm:$0xff]  ;;  %v14934_v37 = vadd.f32 %v14805_v40, %v14101_v22 }
 0x5fc   : > { %v14875_v20 = vpop.permute.xlu0 %5953  ;;  %v17968_v22 = vld [vmem:[#allocation105_spill] sm:$0xff] }
 0x5fd   : > { %5811 = vadd.xlane.f32.xlu0 %v5793_v16  ;;  %v6064_v16 = vsel %vm2882_vm4, %v6048_v8, %v14798_v38  ;;  %v5086_v38 = vadd.f32 %v17961_v7, %v14891_v15  ;;  %v17962_v8 = vmov 0.0   ;;  %v9849_v7 = vld [vmem:[%s11177_s28 + $0x118] sm:$0xff]  ;;  %17963 = vst [vmem:[#allocation181_spill] sm:$0xff] %v14922_v9  ;;  %17965 = vst [vmem:[#allocation149_spill] sm:$0xff] %v14934_v37 }
 0x5fe   : > { %v5585_v15 = vmul.f32 %v9849_v7, %v2717_v42  ;;  %v17966_v42 = vld [vmem:[#allocation94_spill] sm:$0xff] }
 0x600   : > { %v14881_v13 = vpop.permute.xlu0 %5957 }
 0x604   : > { %v6000_v35 = vpop.permute.xlu0 %5999 }
 0x605   : > { %v6081_v56 = vsel %vm6080_vm6, %v6064_v16, %v6000_v35  ;;  %v6065_v35 = vsel %vm2882_vm4, %v6049_v34, %v14802_v36  ;;  %v6050_v16 = vsel %vm6047_vm5, %v5086_v38, %v14624_v21  ;;  %v5087_v36 = vadd.f32 %v17964_v24, %v14905_v27 }
 0x606   : > { %8895 = vmatmul.mubr.msk.f32.vlgmr.msra.gmra.mxu1 %vm1146_vm1, %v6081_v56  ;;  %v6066_v19 = vsel %vm2882_vm4, %v6050_v16, %v5940_v62  ;;  %v6012_v62 = vpop.permute.xlu1 %6011  ;;  %v5089_v16 = vadd.f32 %v17968_v22, %v14934_v37 }
 0x607   : > { %6810 = vmatprep.mubr.f32.mxu1 %v17962_v8  ;;  %v6051_v21 = vsel %vm6047_vm5, %v5087_v36, %v14614_v30  ;;  %v6083_v38 = vsel %vm6080_vm6, %v6066_v19, %v6004_v26  ;;  %v14953_v19 = vadd.f32 %v14805_v40, %v14156_v53  ;;  %v14965_v36 = vadd.f32 %v14805_v40, %v14147_v0  ;;  %v17972_v53 = vld [vmem:[#allocation123_spill] sm:$0xff] }
 0x608   : > { %v6002_v56 = vpop.permute.xlu0 %6001  ;;  %v6067_v34 = vsel %vm2882_vm4, %v6051_v21, %v5942_v44  ;;  %v5776_v0 = vadd.f32 %v14251_v57, %v14765_v52  ;;  %v14995_v57 = vadd.f32 %v14805_v40, %v14234_v6  ;;  %v17978_v6 = vld [vmem:[#allocation148_spill] sm:$0xff] }
 0x609   : > { %v6082_v47 = vsel %vm6080_vm6, %v6065_v35, %v6002_v56  ;;  %v5088_v35 = vadd.f32 %v17966_v42, %v14922_v9  ;;  %v17967_v56 = vld [vmem:[#allocation117_spill] sm:$0xff]  ;;  %17969 = vst [vmem:[#allocation183_spill] sm:$0xff] %v14953_v19  ;;  %17971 = vst [vmem:[#allocation80_spill] sm:$0xff] %v14965_v36  ;;  %v5090_v21 = vadd.f32 %v17972_v53, %v14953_v19 }
 0x60a   : > { %8896 = vmatmul.mubr.msk.f32.gmra.mxu1 %vm1146_vm1, %v6082_v47  ;;  %v5358_v30 = vadd.f32 %v17967_v56, %v14354_v32  ;;  %v6014_v47 = vpop.permute.xlu1 %6013  ;;  %17975 = vst [vmem:[#allocation122_spill] sm:$0xff] %v14995_v57 }
 0x60b   : > { %6816 = vmatprep.mubr.f32.mxu1 %v17962_v8  ;;  %v6052_v26 = vsel %vm6047_vm5, %v5088_v35, %v14628_v61  ;;  %v17970_v61 = vld [vmem:[#allocation225_spill] sm:$0xff] }
 0x60c   : > { %v6068_v44 = vsel %vm2882_vm4, %v6052_v26, %v14856_v23  ;;  %v6053_v23 = vsel %vm6047_vm5, %v5089_v16, %v14647_v60 }
 0x60d   : > { %5604 = vadd.xlane.f32.xlu1 %v5585_v15  ;;  %v6084_v15 = vsel %vm6080_vm6, %v6067_v34, %v6006_v41  ;;  %v5567_v41 = vadd.f32 %v17970_v61, %v14519_v14  ;;  %v6085_v7 = vsel %vm6080_vm6, %v6068_v44, %v6008_v45  ;;  %v6069_v24 = vsel %vm2882_vm4, %v6053_v23, %v14862_v46  ;;  %v17973_v45 = vld [vmem:[#allocation132_spill] sm:$0xff]  ;;  %v17979_v44 = vld [vmem:[#allocation179_spill] sm:$0xff] }
 0x60e   : > { %8897 = vmatmul.mubr.msk.f32.gmra.mxu1 %vm1146_vm1, %v6083_v38  ;;  %v6086_v60 = vsel %vm6080_vm6, %v6069_v24, %v6010_v17  ;;  %v6016_v38 = vpop.permute.xlu1 %6015  ;;  %v6054_v46 = vsel %vm6047_vm5, %v5090_v21, %v14655_v18  ;;  %v5091_v34 = vadd.f32 %v17973_v45, %v14965_v36  ;;  %v14984_v17 = vadd.f32 %v14805_v40, %v14198_v11  ;;  %v17976_v11 = vld [vmem:[#allocation113_spill] sm:$0xff] }
 0x60f   : > { %6822 = vmatprep.mubr.f32.mxu1 %v17962_v8  ;;  %v6070_v42 = vsel %vm2882_vm4, %v6054_v46, %v14811_v55  ;;  %v5359_v55 = vadd.f32 %v17976_v11, %v14312_v4  ;;  %v5568_v22 = vadd.f32 %v17979_v44, %v14684_v43  ;;  %v17985_v46 = vld [vmem:[#allocation214_spill] sm:$0xff] }
 0x610   : > { %17974 = vst [vmem:[#allocation9_spill] sm:$0xff] %v14984_v17  ;;  %v6055_v35 = vsel %vm6047_vm5, %v5091_v34, %v14688_v10  ;;  %v6087_v18 = vsel %vm6080_vm6, %v6070_v42, %v6012_v62  ;;  %v17977_v10 = vld [vmem:[#allocation58_spill] sm:$0xff]  ;;  %v15046_v45 = vadd.f32 %v14805_v40, %v17985_v46 }
 0x611   : > { %v6071_v56 = vsel %vm2882_vm4, %v6055_v35, %v14867_v54  ;;  %v5092_v62 = vadd.f32 %v17977_v10, %v14984_v17  ;;  %v17987_v42 = vld [vmem:[#allocation198_spill] sm:$0xff] }
 0x612   : > { %8898 = vmatmul.mubr.msk.f32.gmra.mxu1 %vm1146_vm1, %v6084_v15  ;;  %v6088_v26 = vsel %vm6080_vm6, %v6071_v56, %v6014_v47  ;;  %v5093_v15 = vadd.f32 %v17978_v6, %v14995_v57  ;;  %v15016_v47 = vadd.f32 %v14805_v40, %v14213_v58  ;;  %v17982_v58 = vld [vmem:[#allocation215_spill] sm:$0xff]  ;;  %17986 = vst [vmem:[#allocation141_spill] sm:$0xff] %v15046_v45  ;;  %v9850_v6 = vld [vmem:[%s11177_s28 + $0x198] sm:$0xff] }
 0x613   : > { %6115 = vrot.lane.b32.xlu0 %v5358_v30, %s9901_s17  ;;  %6828 = vmatprep.mubr.f32.mxu1 %v17962_v8  ;;  %v6018_v30 = vpop.permute.xlu1 %6017  ;;  %v6056_v54 = vsel %vm6047_vm5, %v5092_v62, %v14686_v63  ;;  %v15056_v35 = vadd.f32 %v14805_v40, %v17987_v42  ;;  %v5962_v62 = vpop.permute.xlu0 %5961  ;;  %v9853_v42 = vld [vmem:[%s11177_s28 + $0x128] sm:$0xff] }
 0x614   : > { %v6072_v16 = vsel %vm2882_vm4, %v6056_v54, %v14830_v25  ;;  %17980 = vst [vmem:[#allocation180_spill] sm:$0xff] %v15016_v47  ;;  %v6057_v61 = vsel %vm6047_vm5, %v5093_v15, %v14780_v49  ;;  %v15027_v25 = vadd.f32 %v14805_v40, %v14285_v1  ;;  %v17983_v49 = vld [vmem:[#allocation162_spill] sm:$0xff]  ;;  %v17984_v1 = vld [vmem:[#allocation61_spill] sm:$0xff] }
 0x615   : > { %v6089_v63 = vsel %vm6080_vm6, %v6072_v16, %v6016_v38  ;;  %v6073_v23 = vsel %vm2882_vm4, %v6057_v61, %v14875_v20  ;;  %v5094_v24 = vadd.f32 %v17983_v49, %v15016_v47  ;;  %17988 = vst [vmem:[#allocation169_spill] sm:$0xff] %v15056_v35  ;;  %v17996_v49 = vld [vmem:[#allocation193_spill] sm:$0xff] }
 0x616   : > { %8899 = vmatmul.mubr.msk.f32.gmra.mxu1 %vm1146_vm1, %v6085_v7  ;;  %17981 = vst [vmem:[#allocation134_spill] sm:$0xff] %v15027_v25  ;;  %v5777_v7 = vadd.f32 %v17982_v58, %v14596_v59  ;;  %v6090_v53 = vsel %vm6080_vm6, %v6073_v23, %v6018_v30  ;;  %v5095_v21 = vadd.f32 %v17984_v1, %v15027_v25  ;;  %v17991_v30 = vld [vmem:[#allocation192_spill] sm:$0xff]  ;;  %v9851_v23 = vld [vmem:[%s11177_s28 + $0x120] sm:$0xff]  ;;  %v17995_v58 = vld [vmem:[#allocation35_spill] sm:$0xff] }
 0x617   : > { %6179 = vrot.lane.b32.xlu0 %v5567_v41, %s9902_s20  ;;  %6834 = vmatprep.mubr.f32.mxu1 %v17962_v8  ;;  %v6020_v41 = vpop.permute.xlu1 %6019  ;;  %v6058_v20 = vsel %vm6047_vm5, %v5094_v24, %v14790_v5  ;;  %v5097_v10 = vadd.f32 %v17991_v30, %v15056_v35  ;;  %v9852_v1 = vld [vmem:[%s11177_s28 + $0x1a0] sm:$0xff]  ;;  %v18006_v30 = vld [vmem:[#allocation231_spill] sm:$0xff] }
 0x618   : > { %v6059_v34 = vsel %vm6047_vm5, %v5095_v21, %v14824_v12  ;;  %v17990_v12 = vld [vmem:[#allocation178_spill] sm:$0xff] }
 0x619   : > { %v6075_v5 = vsel %vm2882_vm4, %v6059_v34, %v14881_v13  ;;  %v5096_v11 = vadd.f32 %v17990_v12, %v15046_v45  ;;  %v6061_v61 = vsel %vm6047_vm5, %v5097_v10, %v14872_v48  ;;  %v18003_v12 = vld [vmem:[#allocation63_spill] sm:$0xff]  ;;  %v5569_v10 = vadd.f32 %v18006_v30, %v14692_v33  ;;  %v9855_v30 = vld [vmem:[%s11177_s28 + $0x130] sm:$0xff] }
 0x61a   : > { %8900 = vmatmul.mubr.msk.f32.gmra.mxu1 %vm1146_vm1, %v6086_v60  ;;  %v6074_v60 = vsel %vm2882_vm4, %v6058_v20, %v14839_v39  ;;  %v17989_v39 = vld [vmem:[#allocation32_spill] sm:$0xff] }
 0x61b   : > { %6840 = vmatprep.mubr.f32.mxu1 %v17962_v8  ;;  %v6022_v38 = vpop.permute.xlu1 %6021  ;;  %v6060_v13 = vsel %vm6047_vm5, %v5096_v11, %v14796_v31  ;;  %v18004_v11 = vld [vmem:[#allocation121_spill] sm:$0xff] }
 0x61c   : > { %v6076_v44 = vsel %vm2882_vm4, %v6060_v13, %v14848_v3 }
 0x61e   : > { %6243 = vrot.lane.b32.xlu1 %v5776_v0, %s9903_s21  ;;  %8901 = vmatmul.mubr.msk.f32.gmra.mxu1 %vm1146_vm1, %v6087_v18  ;;  %v6091_v0 = vsel %vm6080_vm6, %v6074_v60, %v6020_v41  ;;  %v2797_v18 = vadd.f32 %v17989_v39, %v17933_v51  ;;  %v6077_v41 = vsel %vm2882_vm4, %v6061_v61, %v5962_v62  ;;  %v18007_v62 = vld [vmem:[#allocation90_spill] sm:$0xff] }
 0x61f   : > { %6846 = vmatprep.mubr.f32.mxu1 %v17962_v8  ;;  %v6024_v56 = vpop.permute.xlu1 %6023 }
 0x620   : > { %v5794_v15 = vmul.f32 %v9850_v6, %v2797_v18  ;;  %v6093_v31 = vsel %vm6080_vm6, %v6076_v44, %v6024_v56  ;;  %v18001_v18 = vld [vmem:[#allocation222_spill] sm:$0xff] }
 0x621   : > { %v15112_v56 = vadd.f32 %v14805_v40, %v18001_v18 }
 0x622   : > { %6117 = vrot.lane.b32.xlu1 %v5359_v55, %s9901_s17  ;;  %8902 = vmatmul.mubr.msk.f32.gmra.mxu1 %vm1146_vm1, %v6088_v26  ;;  %v6092_v55 = vsel %vm6080_vm6, %v6075_v5, %v6022_v38  ;;  %v17992_v26 = vld [vmem:[#allocation19_spill] sm:$0xff] }
 0x623   : > { %6852 = vmatprep.mubr.f32.mxu1 %v17962_v8  ;;  %v2722_v54 = vadd.f32 %v17992_v26, %v17933_v51  ;;  %18002 = vst [vmem:[#allocation106_spill] sm:$0xff] %v15112_v56  ;;  %v5099_v26 = vadd.f32 %v18007_v62, %v15112_v56  ;;  %v18019_v62 = vld [vmem:[#allocation37_spill] sm:$0xff] }
 0x625   : > { %v5586_v3 = vmul.f32 %v9851_v23, %v2722_v54 }
 0x626   : > { %6181 = vrot.lane.b32.xlu1 %v5568_v22, %s9902_s20  ;;  %8903 = vmatmul.mubr.msk.f32.gmra.mxu1 %vm1146_vm1, %v6089_v63  ;;  %v17993_v22 = vld [vmem:[#allocation186_spill] sm:$0xff]  ;;  %v6026_v63 = vpop.permute.xlu1 %6025 }
 0x627   : > { %6858 = vmatprep.mubr.f32.mxu1 %v17962_v8  ;;  %v15077_v16 = vadd.f32 %v14805_v40, %v17993_v22  ;;  %v18008_v22 = vld [vmem:[#allocation201_spill] sm:$0xff] }
 0x629   : > { %17994 = vst [vmem:[#allocation190_spill] sm:$0xff] %v15077_v16  ;;  %v5098_v24 = vadd.f32 %v17996_v49, %v15077_v16 }
 0x62a   : > { %6245 = vrot.lane.b32.xlu1 %v5777_v7, %s9903_s21  ;;  %8904 = vmatmul.mubr.msk.f32.gmra.mxu1 %vm1146_vm1, %v6090_v53  ;;  %v2802_v7 = vadd.f32 %v17995_v58, %v17933_v51  ;;  %v6094_v53 = vsel %vm6080_vm6, %v6077_v41, %v6026_v63  ;;  %v6028_v48 = vpop.permute.xlu1 %6027  ;;  %v18009_v63 = vld [vmem:[#allocation133_spill] sm:$0xff]  ;;  %v18010_v41 = vld [vmem:[#allocation120_spill] sm:$0xff]  ;;  %v18011_v58 = vld [vmem:[#allocation131_spill] sm:$0xff] }
 0x62b   : > { %6864 = vmatprep.mubr.f32.mxu1 %v17962_v8  ;;  %v6062_v20 = vsel %vm6047_vm5, %v5098_v24, %v14854_v29  ;;  %v17999_v29 = vld [vmem:[#allocation18_spill] sm:$0xff]  ;;  %v5361_v23 = vadd.f32 %v18010_v41, %v18009_v63 }
 0x62c   : > { %v5795_v21 = vmul.f32 %v9852_v1, %v2802_v7  ;;  %v6078_v60 = vsel %vm2882_vm4, %v6062_v20, %v14860_v2  ;;  %v18012_v7 = vld [vmem:[#allocation52_spill] sm:$0xff] }
 0x62d   : > { %v6095_v38 = vsel %vm6080_vm6, %v6078_v60, %v6028_v48  ;;  %v5148_v49 = vadd.f32 %v18012_v7, %v18011_v58  ;;  %v18014_v48 = vld [vmem:[#allocation189_spill] sm:$0xff]  ;;  %v18025_v7 = vld [vmem:[#allocation95_spill] sm:$0xff] }
 0x62e   : > { %8905 = vmatmul.mubr.msk.f32.gmra.mxu1 %vm1146_vm1, %v6091_v0  ;;  %v2727_v0 = vadd.f32 %v17999_v29, %v17933_v51  ;;  %v18016_v29 = vld [vmem:[#allocation103_spill] sm:$0xff] }
 0x62f   : > { %6870 = vmatprep.mubr.f32.mxu1 %v17962_v8 }
 0x630   : > { %v5587_v39 = vmul.f32 %v9853_v42, %v2727_v0  ;;  %v18017_v42 = vld [vmem:[#allocation34_spill] sm:$0xff] }
 0x632   : > { %8906 = vmatmul.mubr.msk.f32.gmra.mxu1 %vm1146_vm1, %v6092_v55  ;;  %v5360_v55 = vadd.f32 %v18004_v11, %v18003_v12  ;;  %v9854_v11 = vld [vmem:[%s11177_s28 + $0x1a8] sm:$0xff] }
 0x633   : > { %6876 = vmatprep.mubr.f32.mxu1 %v17962_v8 }
 0x636   : > { %5813 = vadd.xlane.f32.xlu0 %v5794_v15  ;;  %8907 = vmatmul.mubr.msk.f32.gmra.mxu1 %vm1146_vm1, %v6093_v31  ;;  %v5778_v31 = vadd.f32 %v18008_v22, %v14600_v28 }
 0x637   : > { %6882 = vmatprep.mubr.f32.mxu1 %v17962_v8 }
 0x63a   : > { %5606 = vadd.xlane.f32.xlu0 %v5586_v3  ;;  %8908 = vmatmul.mubr.msk.f32.gmra.mxu1 %vm1146_vm1, %v6094_v53  ;;  %v18013_v53 = vld [vmem:[#allocation165_spill] sm:$0xff] }
 0x63b   : > { %6888 = vmatprep.mubr.f32.mxu1 %v17962_v8  ;;  %v5570_v20 = vadd.f32 %v18014_v48, %v18013_v53  ;;  %v18027_v48 = vld [vmem:[#allocation230_spill] sm:$0xff] }
 0x63d   : > { %v15099_v46 = vpop.xlane.xlu0 %5773 }
 0x63e   : > { %17997 = vst [vmem:[#allocation114_spill] sm:$0xff] %v15099_v46  ;;  %5815 = vadd.xlane.f32.xlu0 %v5795_v21  ;;  %8909 = vmatmul.mubr.msk.f32.gmra.mxu1 %vm1146_vm1, %v6095_v38  ;;  %v18015_v38 = vld [vmem:[#allocation87_spill] sm:$0xff] }
 0x63f   : > { %6894 = vmatprep.mubr.f32.mxu1 %v17962_v8  ;;  %v5779_v0 = vadd.f32 %v18016_v29, %v18015_v38 }
 0x641   : > { %v15103_v34 = vpop.xlane.xlu0 %5598 }
 0x642   : > { %17998 = vst [vmem:[#allocation175_spill] sm:$0xff] %v15103_v34 }
 0x645   : > { %v15107_v5 = vpop.xlane.xlu0 %5807 }
 0x646   : > { %18000 = vst [vmem:[#allocation227_spill] sm:$0xff] %v15107_v5 }
 0x649   : > { %v5902_v2 = vpop.permute.xlu0 %5901 }
 0x64a   : > { %v6063_v6 = vsel %vm6047_vm5, %v5099_v26, %v5902_v2  ;;  %v18018_v2 = vld [vmem:[#allocation21_spill] sm:$0xff]  ;;  %v2812_v26 = vadd.f32 %v18019_v62, %v17933_v51  ;;  %v18033_v62 = vld [vmem:[#allocation159_spill] sm:$0xff] }
 0x64b   : > { %v2732_v18 = vadd.f32 %v18018_v2, %v17933_v51 }
 0x64d   : > { %v5966_v54 = vpop.permute.xlu0 %5965 }
 0x64e   : > { %5608 = vadd.xlane.f32.xlu1 %v5587_v39  ;;  %v6079_v40 = vsel %vm2882_vm4, %v6063_v6, %v5966_v54  ;;  %v2807_v39 = vadd.f32 %v18017_v42, %v17933_v51  ;;  %v9856_v54 = vld [vmem:[%s11177_s28 + $0x1b0] sm:$0xff] }
 0x64f   : > { %v5797_v6 = vmul.f32 %v9856_v54, %v2812_v26 }
 0x654   : > { %6119 = vrot.lane.b32.xlu0 %v5360_v55, %s9901_s17  ;;  %v5796_v55 = vmul.f32 %v9854_v11, %v2807_v39  ;;  %v18031_v11 = vld [vmem:[#allocation128_spill] sm:$0xff] }
 0x655   : > { %v15117_v13 = vpop.xlane.xlu1 %5600 }
 0x656   : > { %18005 = vst [vmem:[#allocation170_spill] sm:$0xff] %v15117_v13 }
 0x658   : > { %6183 = vrot.lane.b32.xlu0 %v5569_v10, %s9902_s20  ;;  %v5588_v10 = vmul.f32 %v9855_v30, %v2732_v18  ;;  %v18030_v18 = vld [vmem:[#allocation140_spill] sm:$0xff] }
 0x659   : > { %v6030_v15 = vpop.permute.xlu1 %6029 }
 0x65a   : > { %v6096_v44 = vsel %vm6080_vm6, %v6079_v40, %v6030_v15 }
 0x65b   : > { %8910 = vmatmul.mubr.msk.f32.gmra.mxu1 %vm1146_vm1, %v6096_v44  ;;  %v18022_v44 = vld [vmem:[#allocation20_spill] sm:$0xff] }
 0x65c   : > { %6900 = vmatprep.mubr.f32.mxu1 %v17962_v8  ;;  %v2737_v22 = vadd.f32 %v18022_v44, %v17933_v51  ;;  %v18035_v44 = vld [vmem:[#allocation78_spill] sm:$0xff] }
 0x65d   : > { %v6114_v61 = vpop.permute.xlu1 %6113 }
 0x65e   : > { %v6289_v24 = vsel %vm6047_vm5, %v5148_v49, %v6114_v61  ;;  %v9857_v61 = vld [vmem:[%s11177_s28 + $0x138] sm:$0xff] }
 0x65f   : > { %6247 = vrot.lane.b32.xlu1 %v5778_v31, %s9903_s21  ;;  %v5589_v41 = vmul.f32 %v9857_v61, %v2737_v22 }
 0x661   : > { %v6178_v3 = vpop.permute.xlu1 %6177 }
 0x662   : > { %v6305_v1 = vsel %vm2882_vm4, %v6289_v24, %v6178_v3  ;;  %v18024_v3 = vld [vmem:[#allocation211_spill] sm:$0xff] }
 0x663   : > { %6121 = vrot.lane.b32.xlu1 %v5361_v23, %s9901_s17  ;;  %v5362_v49 = vadd.f32 %v18025_v7, %v18024_v3  ;;  %v18067_v3 = vld [vmem:[#allocation167_spill] sm:$0xff] }
 0x665   : > { %v6242_v21 = vpop.permute.xlu1 %6241 }
 0x666   : > { %v6321_v60 = vsel %vm6080_vm6, %v6305_v1, %v6242_v21  ;;  %v18029_v21 = vld [vmem:[#allocation68_spill] sm:$0xff] }
 0x667   : > { %6185 = vrot.lane.b32.xlu1 %v5570_v20, %s9902_s20  ;;  %8911 = vmatmul.mubr.msk.f32.gmra.mxu1 %vm1146_vm1, %v6321_v60  ;;  %v18028_v20 = vld [vmem:[#allocation88_spill] sm:$0xff]  ;;  %v5149_v60 = vadd.f32 %v18029_v21, %v14885_v50  ;;  %v18038_v21 = vld [vmem:[#allocation98_spill] sm:$0xff] }
 0x668   : > { %6906 = vmatprep.mubr.f32.mxu1 %v17962_v8  ;;  %v5571_v1 = vadd.f32 %v18028_v20, %v18027_v48 }
 0x66b   : > { %6249 = vrot.lane.b32.xlu1 %v5779_v0, %s9903_s21 }
 0x677   : > { %5817 = vadd.xlane.f32.xlu0 %v5796_v55  ;;  %v5780_v55 = vadd.f32 %v18031_v11, %v18030_v18  ;;  %v9858_v11 = vld [vmem:[%s11177_s28 + $0x1b8] sm:$0xff]  ;;  %v18061_v18 = vld [vmem:[#allocation130_spill] sm:$0xff] }
 0x67b   : > { %5610 = vadd.xlane.f32.xlu0 %v5588_v10  ;;  %v18032_v10 = vld [vmem:[#allocation160_spill] sm:$0xff] }
 0x67c   : > { %v5363_v26 = vadd.f32 %v18033_v62, %v18032_v10 }
 0x67e   : > { %v15157_v40 = vpop.xlane.xlu0 %5809 }
 0x67f   : > { %18020 = vst [vmem:[#allocation171_spill] sm:$0xff] %v15157_v40  ;;  %5819 = vadd.xlane.f32.xlu0 %v5797_v6  ;;  %v18034_v6 = vld [vmem:[#allocation143_spill] sm:$0xff] }
 0x680   : > { %v5150_v22 = vadd.f32 %v18035_v44, %v18034_v6  ;;  %v9860_v44 = vld [vmem:[%s11177_s28 + $0x1c0] sm:$0xff] }
 0x682   : > { %v15159_v15 = vpop.xlane.xlu0 %5602 }
 0x683   : > { %18021 = vst [vmem:[#allocation187_spill] sm:$0xff] %v15159_v15 }
 0x686   : > { %v15163_v31 = vpop.xlane.xlu0 %5811 }
 0x687   : > { %18023 = vst [vmem:[#allocation49_spill] sm:$0xff] %v15163_v31 }
 0x68a   : > { %v6116_v23 = vpop.permute.xlu0 %6115 }
 0x68b   : > { %v6290_v0 = vsel %vm6047_vm5, %v5149_v60, %v6116_v23  ;;  %v18037_v23 = vld [vmem:[#allocation158_spill] sm:$0xff]  ;;  %v18039_v60 = vld [vmem:[#allocation188_spill] sm:$0xff] }
 0x68e   : > { %v6180_v29 = vpop.permute.xlu0 %6179 }
 0x68f   : > { %5612 = vadd.xlane.f32.xlu1 %v5589_v41  ;;  %v6306_v42 = vsel %vm2882_vm4, %v6290_v0, %v6180_v29  ;;  %v18036_v41 = vld [vmem:[#allocation166_spill] sm:$0xff]  ;;  %v5781_v29 = vadd.f32 %v18039_v60, %v18038_v21  ;;  %v18040_v0 = vld [vmem:[#allocation36_spill] sm:$0xff] }
 0x690   : > { %v5572_v7 = vadd.f32 %v18037_v23, %v18036_v41  ;;  %v6578_v23 = vld [vmem:[%s17066_s11] sm:$0x3] }
 0x695   : > { %6123 = vrot.lane.b32.xlu0 %v5362_v49, %s9901_s17 }
 0x696   : > { %v15169_v24 = vpop.xlane.xlu1 %5604 }
 0x697   : > { %18026 = vst [vmem:[#allocation100_spill] sm:$0xff] %v15169_v24  ;;  %v9865_v24 = vld [vmem:[%s11177_s28 + $0x1d0] sm:$0xff] }
 0x699   : > { %6187 = vrot.lane.b32.xlu0 %v5571_v1, %s9902_s20 }
 0x69a   : > { %v6244_v39 = vpop.permute.xlu1 %6243 }
 0x69b   : > { %v6322_v2 = vsel %vm6080_vm6, %v6306_v42, %v6244_v39  ;;  %v2817_v42 = vadd.f32 %v18040_v0, %v17933_v51  ;;  %v18041_v39 = vld [vmem:[#allocation23_spill] sm:$0xff] }
 0x69c   : > { %8912 = vmatmul.mubr.msk.f32.gmra.mxu1 %vm1146_vm1, %v6322_v2  ;;  %v2742_v2 = vadd.f32 %v18041_v39, %v17933_v51 }
 0x69d   : > { %6912 = vmatprep.mubr.f32.mxu1 %v17962_v8 }
 0x69e   : > { %v6118_v30 = vpop.permute.xlu1 %6117 }
 0x69f   : > { %v6291_v61 = vsel %vm6047_vm5, %v5150_v22, %v6118_v30  ;;  %v9859_v30 = vld [vmem:[%s11177_s28 + $0x140] sm:$0xff] }
 0x6a0   : > { %6251 = vrot.lane.b32.xlu1 %v5780_v55, %s9903_s21  ;;  %v5798_v55 = vmul.f32 %v9858_v11, %v2817_v42  ;;  %v5590_v62 = vmul.f32 %v9859_v30, %v2742_v2  ;;  %v18047_v2 = vld [vmem:[#allocation22_spill] sm:$0xff] }
 0x6a1   : > { %v2747_v11 = vadd.f32 %v18047_v2, %v17933_v51  ;;  %v9861_v2 = vld [vmem:[%s11177_s28 + $0x148] sm:$0xff] }
 0x6a2   : > { %v6182_v54 = vpop.permute.xlu1 %6181 }
 0x6a3   : > { %v6307_v49 = vsel %vm2882_vm4, %v6291_v61, %v6182_v54  ;;  %v5591_v6 = vmul.f32 %v9861_v2, %v2747_v11  ;;  %v9862_v2 = vld [vmem:[%s11177_s28 + $0x158] sm:$0xff] }
 0x6a4   : > { %6125 = vrot.lane.b32.xlu1 %v5363_v26, %s9901_s17  ;;  %v18042_v26 = vld [vmem:[#allocation39_spill] sm:$0xff] }
 0x6a5   : > { %v2822_v54 = vadd.f32 %v18042_v26, %v17933_v51 }
 0x6a6   : > { %v6246_v20 = vpop.permute.xlu1 %6245 }
 0x6a7   : > { %v6323_v1 = vsel %vm6080_vm6, %v6307_v49, %v6246_v20  ;;  %v5799_v22 = vmul.f32 %v9860_v44, %v2822_v54  ;;  %v18045_v20 = vld [vmem:[#allocation7_spill] sm:$0xff]  ;;  %v18049_v44 = vld [vmem:[#allocation24_spill] sm:$0xff] }
 0x6a8   : > { %6189 = vrot.lane.b32.xlu1 %v5572_v7, %s9902_s20  ;;  %8913 = vmatmul.mubr.msk.f32.gmra.mxu1 %vm1146_vm1, %v6323_v1  ;;  %v18044_v7 = vld [vmem:[#allocation6_spill] sm:$0xff]  ;;  %v15218_v1 = vrot.slane %v6578_v23, %v18045_v20 }
 0x6a9   : > { %6918 = vmatprep.mubr.f32.mxu1 %v17962_v8  ;;  %v15215_v49 = vrot.slane %v6578_v23, %v18044_v7  ;;  %v18050_v23 = vld [vmem:[#allocation25_spill] sm:$0xff] }
 0x6ac   : > { %6253 = vrot.lane.b32.xlu1 %v5781_v29, %s9903_s21 }
 0x6b8   : > { %5821 = vadd.xlane.f32.xlu0 %v5798_v55 }
 0x6bc   : > { %5614 = vadd.xlane.f32.xlu0 %v5590_v62 }
 0x6bf   : > { %v15209_v61 = vpop.xlane.xlu0 %5813 }
 0x6c0   : > { %18043 = vst [vmem:[#allocation210_spill] sm:$0xff] %v15209_v61  ;;  %5823 = vadd.xlane.f32.xlu0 %v5799_v22  ;;  %v2757_v22 = vadd.f32 %v18049_v44, %v17933_v51  ;;  %v18052_v44 = vld [vmem:[#allocation41_spill] sm:$0xff] }
 0x6c1   : > { %v2832_v35 = vadd.f32 %v18052_v44, %v17933_v51 }
 0x6c2   : > { %v15255_v10 = vmul.f32 %v9862_v2, %v2757_v22  ;;  %v18053_v2 = vld [vmem:[#allocation138_spill] sm:$0xff] }
 0x6c3   : > { %v15220_v60 = vpop.xlane.xlu0 %5606  ;;  %v15270_v22 = vmul.f32 %v9865_v24, %v2832_v35  ;;  %v18057_v35 = vld [vmem:[#allocation119_spill] sm:$0xff] }
 0x6c4   : > { %18046 = vst [vmem:[#allocation31_spill] sm:$0xff] %v15220_v60  ;;  %v15287_v24 = vadd.f32 %v18057_v35, %v14934_v37 }
 0x6c6   : > { %v6806_v29 = vpop.f32.mrf.mxu1 }
 0x6c7   : > { %v15223_v0 = vadd.f32 %v6806_v29, %v15215_v49  ;;  %v15234_v26 = vpop.xlane.xlu0 %5815  ;;  %v2752_v29 = vadd.f32 %v18050_v23, %v17933_v51 }
 0x6c8   : > { %v6808_v42 = vpop.f32.mrf.mxu1  ;;  %18048 = vst [vmem:[#allocation16_spill] sm:$0xff] %v15234_v26  ;;  %v9864_v26 = vld [vmem:[%s11177_s28 + $0x1c8] sm:$0xff] }
 0x6c9   : > { %v15226_v39 = vadd.f32 %v6808_v42, %v15218_v1  ;;  %v7189_v62 = vmul.f32 0.044715, %v15223_v0 }
 0x6ca   : > { %v6812_v55 = vpop.f32.mrf.mxu1 }
 0x6cb   : > { %v15231_v30 = vadd.f32 %v6812_v55, %v15215_v49  ;;  %v7190_v42 = vmul.f32 0.044715, %v15226_v39  ;;  %v18051_v55 = vld [vmem:[#allocation38_spill] sm:$0xff]  ;;  %v7285_v21 = vmul.f32 %v7189_v62, %v15223_v0  ;;  %v6120_v62 = vpop.permute.xlu0 %6119 }
 0x6cc   : > { %v6814_v54 = vpop.f32.mrf.mxu1  ;;  %v2827_v50 = vadd.f32 %v18051_v55, %v17933_v51  ;;  %v9863_v55 = vld [vmem:[%s11177_s28 + $0x150] sm:$0xff] }
 0x6cd   : > { %v7191_v58 = vmul.f32 0.044715, %v15231_v30  ;;  %v15246_v56 = vadd.f32 %v6814_v54, %v15218_v1  ;;  %v15258_v48 = vmul.f32 %v9863_v55, %v2752_v29  ;;  %v7286_v54 = vmul.f32 %v7190_v42, %v15226_v39  ;;  %v18054_v29 = vld [vmem:[#allocation112_spill] sm:$0xff] }
 0x6ce   : > { %v6818_v16 = vpop.f32.mrf.mxu1  ;;  %v15262_v38 = vmul.f32 %v9864_v26, %v2827_v50  ;;  %v5364_v55 = vadd.f32 %v18054_v29, %v18053_v2  ;;  %v18055_v42 = vld [vmem:[#allocation92_spill] sm:$0xff]  ;;  %v18058_v29 = vld [vmem:[#allocation54_spill] sm:$0xff]  ;;  %v18059_v2 = vld [vmem:[#allocation161_spill] sm:$0xff] }
 0x6cf   : > { %v15252_v23 = vadd.f32 %v6818_v16, %v15215_v49  ;;  %v7287_v44 = vmul.f32 %v7191_v58, %v15231_v30  ;;  %v7192_v63 = vmul.f32 0.044715, %v15246_v56  ;;  %v5151_v33 = vadd.f32 %v18055_v42, %v14905_v27  ;;  %v18060_v27 = vld [vmem:[#allocation209_spill] sm:$0xff] }
 0x6d0   : > { %5616 = vadd.xlane.f32.xlu1 %v5591_v6  ;;  %v6820_v11 = vpop.f32.mrf.mxu1  ;;  %v7381_v58 = vmul.f32 %v7285_v21, %v15223_v0  ;;  %v15291_v59 = vadd.f32 %v18059_v2, %v18058_v29  ;;  %v7382_v42 = vmul.f32 %v7286_v54, %v15226_v39  ;;  %v15300_v45 = vadd.f32 %v18061_v18, %v18060_v27  ;;  %v18062_v2 = vld [vmem:[#allocation129_spill] sm:$0xff]  ;;  %v18065_v29 = vld [vmem:[#allocation208_spill] sm:$0xff] }
 0x6d1   : > { %v15267_v16 = vadd.f32 %v6820_v11, %v15218_v1  ;;  %v7193_v50 = vmul.f32 0.044715, %v15252_v23  ;;  %v18056_v11 = vld [vmem:[#allocation102_spill] sm:$0xff]  ;;  %v7288_v35 = vmul.f32 %v7192_v63, %v15246_v56  ;;  %v18064_v54 = vld [vmem:[#allocation197_spill] sm:$0xff]  ;;  %v18070_v27 = vld [vmem:[#allocation204_spill] sm:$0xff] }
 0x6d2   : > { %v6824_v6 = vpop.f32.mrf.mxu1  ;;  %v15283_v31 = vadd.f32 %v18056_v11, %v14922_v9  ;;  %v7383_v11 = vmul.f32 %v7287_v44, %v15231_v30  ;;  %v15307_v9 = vadd.f32 %v18062_v2, %v14953_v19  ;;  %v5573_v4 = vadd.f32 %v18065_v29, %v18064_v54  ;;  %v18071_v2 = vld [vmem:[#allocation84_spill] sm:$0xff]  ;;  %v18072_v19 = vld [vmem:[#allocation55_spill] sm:$0xff]  ;;  %v6184_v54 = vpop.permute.xlu0 %6183 }
 0x6d3   : > { %v15279_v26 = vadd.f32 %v6824_v6, %v15215_v49  ;;  %v7194_v21 = vmul.f32 0.044715, %v15267_v16  ;;  %v7289_v18 = vmul.f32 %v7193_v50, %v15252_v23  ;;  %v5782_v60 = vadd.f32 %v18072_v19, %v18071_v2 }
 0x6d4   : > { %v6826_v41 = vpop.f32.mrf.mxu1  ;;  %18063 = vst [vmem:[#allocation13_spill] sm:$0xff] %v15307_v9  ;;  %v7477_v29 = vadd.f32 %v7381_v58, %v15223_v0  ;;  %v7478_v50 = vadd.f32 %v7382_v42, %v15226_v39  ;;  %v7479_v19 = vadd.f32 %v7383_v11, %v15231_v30  ;;  %v6292_v58 = vsel %vm6047_vm5, %v5151_v33, %v6120_v62 }
 0x6d5   : > { %v15296_v6 = vadd.f32 %v6826_v41, %v15218_v1  ;;  %v18066_v41 = vld [vmem:[#allocation191_spill] sm:$0xff]  ;;  %v7384_v2 = vmul.f32 %v7288_v35, %v15246_v56  ;;  %v6308_v61 = vsel %vm2882_vm4, %v6292_v58, %v6184_v54  ;;  %v18077_v35 = vld [vmem:[#allocation62_spill] sm:$0xff] }
 0x6d6   : > { %6127 = vrot.lane.b32.xlu0 %v5364_v55, %s9901_s17  ;;  %v6830_v37 = vpop.f32.mrf.mxu1  ;;  %v15313_v13 = vadd.f32 %v18067_v3, %v18066_v41  ;;  %v18069_v55 = vld [vmem:[#allocation101_spill] sm:$0xff]  ;;  %v7195_v3 = vmul.f32 0.044715, %v15279_v26 }
 0x6d7   : > { %v15317_v44 = vadd.f32 %v6830_v37, %v15215_v49  ;;  %v15319_v63 = vpop.xlane.xlu1 %5608  ;;  %v15323_v14 = vadd.f32 %v18070_v27, %v18069_v55  ;;  %v7290_v37 = vmul.f32 %v7194_v21, %v15267_v16  ;;  %v7196_v53 = vmul.f32 0.044715, %v15296_v6  ;;  %v18073_v27 = vld [vmem:[#allocation125_spill] sm:$0xff]  ;;  %v18074_v55 = vld [vmem:[#allocation152_spill] sm:$0xff] }
 0x6d8   : > { %18068 = vst [vmem:[#allocation177_spill] sm:$0xff] %v15319_v63  ;;  %v6832_v41 = vpop.f32.mrf.mxu1  ;;  %v15337_v5 = vadd.f32 %v18074_v55, %v18073_v27  ;;  %v7385_v21 = vmul.f32 %v7289_v18, %v15252_v23  ;;  %v7573_v55 = vmul.f32 0.7978846, %v7477_v29  ;;  %v7291_v27 = vmul.f32 %v7195_v3, %v15279_v26 }
 0x6d9   : > { %v15333_v63 = vadd.f32 %v6832_v41, %v15218_v1  ;;  %v7197_v41 = vmul.f32 0.044715, %v15317_v44  ;;  %v7574_v18 = vmul.f32 0.7978846, %v7478_v50  ;;  %v7386_v54 = vmul.f32 %v7290_v37, %v15267_v16 }
 0x6da   : > { %18075 = vst [vmem:[#allocation207_spill] sm:$0xff] %v15337_v5  ;;  %6191 = vrot.lane.b32.xlu0 %v5573_v4, %s9902_s20  ;;  %v6836_v42 = vpop.f32.mrf.mxu1  ;;  %v18076_v4 = vld [vmem:[#allocation110_spill] sm:$0xff]  ;;  %v7292_v58 = vmul.f32 %v7196_v53, %v15296_v6  ;;  %v15359_v29 = vmul.f32 0.7978846, %v7479_v19  ;;  %v7480_v3 = vadd.f32 %v7384_v2, %v15246_v56  ;;  %v7481_v50 = vadd.f32 %v7385_v21, %v15252_v23 }
 0x6db   : > { %v7198_v28 = vmul.f32 0.044715, %v15333_v63  ;;  %v6248_v12 = vpop.permute.xlu1 %6247  ;;  %v15349_v11 = vadd.f32 %v6836_v42, %v15215_v49  ;;  %v15354_v15 = vadd.f32 %v18077_v35, %v18076_v4  ;;  %v7293_v37 = vmul.f32 %v7197_v41, %v15317_v44 }
 0x6dc   : > { %v6324_v33 = vsel %vm6080_vm6, %v6308_v61, %v6248_v12  ;;  %v6838_v62 = vpop.f32.mrf.mxu1  ;;  %v7387_v2 = vmul.f32 %v7291_v27, %v15279_v26  ;;  %9582 = vtanh.f32 %v7573_v55  ;;  %v7482_v43 = vadd.f32 %v7386_v54, %v15267_v16 }
 0x6dd   : > { %8914 = vmatmul.mubr.msk.f32.gmra.mxu1 %vm1146_vm1, %v6324_v33  ;;  %v7199_v42 = vmul.f32 0.044715, %v15349_v11  ;;  %v15364_v12 = vadd.f32 %v6838_v62, %v15218_v1  ;;  %v7294_v53 = vmul.f32 %v7198_v28, %v15333_v63  ;;  %v7388_v21 = vmul.f32 %v7292_v58, %v15296_v6 }
 0x6de   : > { %v6842_v61 = vpop.f32.mrf.mxu1  ;;  %6924 = vmatprep.mubr.f32.mxu1 %v17962_v8  ;;  %9584 = vtanh.f32 %v7574_v18  ;;  %v7389_v55 = vmul.f32 %v7293_v37, %v15317_v44  ;;  %v7577_v32 = vmul.f32 0.7978846, %v7481_v50  ;;  %v7578_v18 = vmul.f32 0.7978846, %v7482_v43 }
 0x6df   : > { %v15371_v33 = vadd.f32 %v6842_v61, %v15215_v49  ;;  %v6122_v19 = vpop.permute.xlu1 %6121  ;;  %v7295_v35 = vmul.f32 %v7199_v42, %v15349_v11  ;;  %v7200_v62 = vmul.f32 0.044715, %v15364_v12  ;;  %v7576_v61 = vmul.f32 0.7978846, %v7480_v3 }
 0x6e0   : > { %v6844_v4 = vpop.f32.mrf.mxu1  ;;  %v15385_v42 = vmul.f32 0.5, %v15223_v0  ;;  %v7390_v54 = vmul.f32 %v7294_v53, %v15333_v63  ;;  %v15398_v0 = vmul.f32 0.5, %v15231_v30  ;;  %v7483_v37 = vadd.f32 %v7387_v2, %v15279_v26 }
 0x6e1   : > { %v7201_v41 = vmul.f32 0.044715, %v15371_v33  ;;  %v15380_v28 = vadd.f32 %v6844_v4, %v15218_v1  ;;  %6255 = vrot.lane.b32.xlu1 %v5782_v60, %s9903_s21  ;;  %v7296_v27 = vmul.f32 %v7200_v62, %v15364_v12  ;;  %v7391_v60 = vmul.f32 %v7295_v35, %v15349_v11 }
 0x6e2   : > { %v6848_v40 = vpop.f32.mrf.mxu1  ;;  %v15395_v62 = vmul.f32 0.5, %v15226_v39  ;;  %v7484_v53 = vadd.f32 %v7388_v21, %v15296_v6  ;;  %v6293_v50 = vsel %vm6047_vm5, %v15283_v31, %v6122_v19  ;;  %v7485_v43 = vadd.f32 %v7389_v55, %v15317_v44 }
 0x6e3   : > { %v7202_v58 = vmul.f32 0.044715, %v15380_v28  ;;  %v15391_v52 = vadd.f32 %v6848_v40, %v15215_v49  ;;  %v6186_v4 = vpop.permute.xlu1 %6185  ;;  %v7297_v34 = vmul.f32 %v7201_v41, %v15371_v33  ;;  %v7392_v40 = vmul.f32 %v7296_v27, %v15364_v12 }
 0x6e4   : > { %v6850_v3 = vpop.f32.mrf.mxu1  ;;  %v7486_v2 = vadd.f32 %v7390_v54, %v15333_v63  ;;  %v6309_v21 = vsel %vm2882_vm4, %v6293_v50, %v6186_v4  ;;  %v7487_v27 = vadd.f32 %v7391_v60, %v15349_v11  ;;  %9586 = vtanh.f32 %v7577_v32 }
 0x6e5   : > { %18078 = vst [vmem:[#allocation144_spill] sm:$0xff] %v15391_v52  ;;  %6129 = vrot.lane.b32.xlu1 %v15300_v45, %s9901_s17  ;;  %v7298_v39 = vmul.f32 %v7202_v58, %v15380_v28  ;;  %v7203_v30 = vmul.f32 0.044715, %v15391_v52  ;;  %v15414_v41 = vadd.f32 %v6850_v3, %v15218_v1  ;;  %v15419_v19 = vmul.f32 0.5, %v15246_v56 }
 0x6e6   : > { %v6854_v35 = vpop.f32.mrf.mxu1  ;;  %v15421_v58 = vmul.f32 0.7978846, %v7483_v37  ;;  %v15423_v55 = vmul.f32 0.7978846, %v7484_v53  ;;  %v7393_v54 = vmul.f32 %v7297_v34, %v15371_v33  ;;  %v15430_v4 = vmul.f32 0.5, %v15252_v23 }
 0x6e7   : > { %18079 = vst [vmem:[#allocation30_spill] sm:$0xff] %v15414_v41  ;;  %v6250_v45 = vpop.permute.xlu1 %6249  ;;  %v7488_v60 = vadd.f32 %v7392_v40, %v15364_v12  ;;  %v7394_v32 = vmul.f32 %v7298_v39, %v15380_v28  ;;  %v7299_v56 = vmul.f32 %v7203_v30, %v15391_v52  ;;  %9588 = vtanh.f32 %v7578_v18  ;;  %v7957_v40 = vld [vmem:[%s17067_s12] sm:$0x3] }
 0x6e8   : > { %v6325_v46 = vsel %vm6080_vm6, %v6309_v21, %v6250_v45  ;;  %v6856_v31 = vpop.f32.mrf.mxu1  ;;  %v7581_v37 = vmul.f32 0.7978846, %v7485_v43  ;;  %v15436_v34 = vmul.f32 0.7978846, %v7486_v2  ;;  %v15442_v23 = vmul.f32 0.7978846, %v7487_v27 }
 0x6e9   : > { %6193 = vrot.lane.b32.xlu1 %v15323_v14, %s9902_s20  ;;  %8915 = vmatmul.mubr.msk.f32.gmra.mxu1 %vm1146_vm1, %v6325_v46  ;;  %v7204_v14 = vmul.f32 0.044715, %v15414_v41  ;;  %v15440_v46 = vadd.f32 %v6854_v35, %v15215_v49  ;;  %v15448_v50 = vmul.f32 0.5, %v15267_v16  ;;  %v15451_v18 = vmul.f32 0.5, %v15317_v44  ;;  %v9583_v39 = vpop.eup %9582 }
 0x6ea   : > { %v6860_v3 = vpop.f32.mrf.mxu1  ;;  %6930 = vmatprep.mubr.f32.mxu1 %v17962_v8  ;;  %9590 = vtanh.f32 %v15359_v29  ;;  %v7489_v30 = vadd.f32 %v7393_v54, %v15371_v33  ;;  %v15456_v35 = vadd.f32 %v6856_v31, %v15218_v1  ;;  %v15463_v16 = vmul.f32 0.7978846, %v7488_v60 }
 0x6eb   : > { %v15459_v43 = vadd.f32 %v6860_v3, %v15215_v49  ;;  %9592 = vtanh.f32 %v7576_v61  ;;  %v7490_v44 = vadd.f32 %v7394_v32, %v15380_v28  ;;  %v7395_v2 = vmul.f32 %v7299_v56, %v15391_v52  ;;  %v9585_v45 = vpop.eup %9584 }
 0x6ec   : > { %v6862_v53 = vpop.f32.mrf.mxu1  ;;  %v7765_v21 = vadd.f32 1.0, %v9583_v39  ;;  %v7300_v27 = vmul.f32 %v7204_v14, %v15414_v41  ;;  %v7205_v31 = vmul.f32 0.044715, %v15440_v46  ;;  %v15473_v3 = vrot.slane %v7957_v40, %v18044_v7 }
 0x6ed   : > { %6257 = vrot.lane.b32.xlu1 %v15354_v15, %s9903_s21  ;;  %v15470_v54 = vadd.f32 %v6862_v53, %v15218_v1  ;;  %v15479_v60 = vrot.slane %v7957_v40, %v18045_v20  ;;  %v7766_v32 = vadd.f32 1.0, %v9585_v45  ;;  %v15482_v39 = vmul.f32 0.7978846, %v7489_v30 }
 0x6ee   : > { %v6866_v29 = vpop.f32.mrf.mxu1  ;;  %v7861_v56 = vmul.f32 %v7765_v21, %v15385_v42  ;;  %v7206_v14 = vmul.f32 0.044715, %v15456_v35  ;;  %v7207_v53 = vmul.f32 0.044715, %v15459_v43  ;;  %v15489_v7 = vmul.f32 0.7978846, %v7490_v44 }
 0x6ef   : > { %v15476_v15 = vadd.f32 %v6866_v29, %v15215_v49  ;;  %v7491_v29 = vadd.f32 %v7395_v2, %v15391_v52  ;;  %v7862_v20 = vmul.f32 %v7766_v32, %v15395_v62  ;;  %v15494_v40 = vmul.f32 0.5, %v15333_v63 }
 0x6f0   : > { %v6868_v61 = vpop.f32.mrf.mxu1  ;;  %v7396_v42 = vmul.f32 %v7300_v27, %v15414_v41  ;;  %v7301_v30 = vmul.f32 %v7205_v31, %v15440_v46  ;;  %v7208_v21 = vmul.f32 0.044715, %v15470_v54  ;;  %v15500_v45 = vmul.f32 0.5, %v15279_v26 }
 0x6f1   : > { %v15487_v25 = vadd.f32 %v6868_v61, %v15218_v1  ;;  %v7209_v44 = vmul.f32 0.044715, %v15476_v15  ;;  %v7969_v62 = vmul.f32 %v15473_v3, %v7861_v56  ;;  %v7970_v63 = vmul.f32 %v15479_v60, %v7862_v20  ;;  %v9587_v32 = vpop.eup %9586 }
 0x6f2   : > { %v6872_v47 = vpop.f32.mrf.mxu1  ;;  %18080 = vst [vmem:[#allocation17_spill] sm:$0xff] %v15500_v45  ;;  %v7302_v27 = vmul.f32 %v7206_v14, %v15456_v35  ;;  %v7303_v31 = vmul.f32 %v7207_v53, %v15459_v43  ;;  %9594 = vtanh.f32 %v7581_v37  ;;  %v7769_v51 = vadd.f32 1.0, %v9587_v32 }
 0x6f3   : > { %v15504_v61 = vadd.f32 %v6872_v47, %v15215_v49  ;;  %v7210_v57 = vmul.f32 0.044715, %v15487_v25  ;;  %v15515_v36 = vadd.f32 %v7970_v63, %v7969_v62  ;;  %v15517_v9 = vmul.f32 0.7978846, %v7491_v29 }
 0x6f4   : > { %v6874_v2 = vpop.f32.mrf.mxu1  ;;  %v9589_v56 = vpop.eup %9588  ;;  %v7492_v20 = vadd.f32 %v7396_v42, %v15414_v41  ;;  %v7304_v14 = vmul.f32 %v7208_v21, %v15470_v54  ;;  %v7305_v37 = vmul.f32 %v7209_v44, %v15476_v15  ;;  %v7865_v62 = vmul.f32 %v7769_v51, %v15430_v4 }
 0x6f5   : > { %v7211_v26 = vmul.f32 0.044715, %v15504_v61  ;;  %v15513_v17 = vadd.f32 %v6874_v2, %v15218_v1  ;;  %18081 = vst [vmem:[#allocation33_spill] sm:$0xff] %v15515_v36  ;;  %v7770_v8 = vadd.f32 1.0, %v9589_v56  ;;  %v7397_v29 = vmul.f32 %v7301_v30, %v15440_v46 }
 0x6f6   : > { %v6878_v47 = vpop.f32.mrf.mxu1  ;;  %v7306_v32 = vmul.f32 %v7210_v57, %v15487_v25  ;;  %v7399_v56 = vmul.f32 %v7303_v31, %v15459_v43  ;;  %v7400_v57 = vmul.f32 %v7304_v14, %v15470_v54  ;;  %9596 = vtanh.f32 %v15436_v34 }
 0x6f7   : > { %v15522_v53 = vadd.f32 %v6878_v47, %v15215_v49  ;;  %v7212_v5 = vmul.f32 0.044715, %v15513_v17  ;;  %v15527_v63 = vpop.eup %9590  ;;  %v7398_v47 = vmul.f32 %v7302_v27, %v15456_v35  ;;  %v7307_v51 = vmul.f32 %v7211_v26, %v15504_v61 }
 0x6f8   : > { %v6880_v2 = vpop.f32.mrf.mxu1  ;;  %v15536_v44 = vpop.eup %9592  ;;  %v7866_v30 = vmul.f32 %v7770_v8, %v15448_v50  ;;  %v7973_v27 = vmul.f32 %v15473_v3, %v7865_v62  ;;  %v7402_v8 = vmul.f32 %v7306_v32, %v15487_v25  ;;  %v7493_v14 = vadd.f32 %v7397_v29, %v15440_v46 }
 0x6f9   : > { %v7213_v42 = vmul.f32 0.044715, %v15522_v53  ;;  %v15533_v21 = vadd.f32 %v6880_v2, %v15218_v1  ;;  %5825 = vadd.xlane.f32.xlu0 %v15262_v38  ;;  %v7308_v36 = vmul.f32 %v7212_v5, %v15513_v17  ;;  %v7401_v38 = vmul.f32 %v7305_v37, %v15476_v15 }
 0x6fa   : > { %v6884_v4 = vpop.f32.mrf.mxu1  ;;  %v7974_v31 = vmul.f32 %v15479_v60, %v7866_v30  ;;  %v7403_v37 = vmul.f32 %v7307_v51, %v15504_v61  ;;  %v15564_v34 = vmul.f32 0.7978846, %v7492_v20  ;;  %v7494_v32 = vadd.f32 %v7398_v47, %v15456_v35 }
 0x6fb   : > { %v7214_v2 = vmul.f32 0.044715, %v15533_v21  ;;  %v15546_v41 = vadd.f32 %v6884_v4, %v15215_v49  ;;  %v7309_v50 = vmul.f32 %v7213_v42, %v15522_v53  ;;  %v7495_v42 = vadd.f32 %v7399_v56, %v15459_v43 }
 0x6fc   : > { %v6886_v52 = vpop.f32.mrf.mxu1  ;;  %v15562_v30 = vadd.f32 %v7974_v31, %v7973_v27  ;;  %v7497_v45 = vadd.f32 %v7401_v38, %v15476_v15  ;;  %9598 = vtanh.f32 %v15482_v39  ;;  %v7496_v20 = vadd.f32 %v7400_v57, %v15470_v54 }
 0x6fd   : > { %v7215_v5 = vmul.f32 0.044715, %v15546_v41  ;;  %v15556_v26 = vadd.f32 %v6886_v52, %v15218_v1  ;;  %5618 = vadd.xlane.f32.xlu0 %v15258_v48  ;;  %v7310_v62 = vmul.f32 %v7214_v2, %v15533_v21  ;;  %v7404_v52 = vmul.f32 %v7308_v36, %v15513_v17 }
 0x6fe   : > { %v6890_v4 = vpop.f32.mrf.mxu1  ;;  %18082 = vst [vmem:[#allocation109_spill] sm:$0xff] %v15562_v30  ;;  %v7498_v47 = vadd.f32 %v7402_v8, %v15487_v25  ;;  %v7405_v56 = vmul.f32 %v7309_v50, %v15522_v53  ;;  %v7589_v27 = vmul.f32 0.7978846, %v7493_v14  ;;  %v7499_v31 = vadd.f32 %v7403_v37, %v15504_v61 }
 0x6ff   : > { %v7216_v48 = vmul.f32 0.044715, %v15556_v26  ;;  %v15572_v29 = vadd.f32 %v6890_v4, %v15215_v49  ;;  %v7311_v36 = vmul.f32 %v7215_v5, %v15546_v41  ;;  %v9595_v38 = vpop.eup %9594  ;;  %v7406_v4 = vmul.f32 %v7310_v62, %v15533_v21 }
 0x700   : > { %v6892_v51 = vpop.f32.mrf.mxu1  ;;  %v15574_v2 = vpop.xlane.xlu0 %5817  ;;  %v7590_v39 = vmul.f32 0.7978846, %v7494_v32  ;;  %v7500_v57 = vadd.f32 %v7404_v52, %v15513_v17  ;;  %9600 = vtanh.f32 %v15489_v7  ;;  %v15590_v50 = vmul.f32 0.7978846, %v7495_v42 }
 0x701   : > { %18083 = vst [vmem:[#allocation195_spill] sm:$0xff] %v15574_v2  ;;  %5827 = vadd.xlane.f32.xlu0 %v15270_v22  ;;  %v15585_v30 = vadd.f32 %v6892_v51, %v15218_v1  ;;  %v7217_v8 = vmul.f32 0.044715, %v15572_v29  ;;  %v7593_v5 = vmul.f32 0.7978846, %v7497_v45  ;;  %v7312_v22 = vmul.f32 %v7216_v48, %v15556_v26 }
 0x702   : > { %v15594_v37 = vmul.f32 0.7978846, %v7496_v20  ;;  %v7594_v62 = vmul.f32 0.7978846, %v7498_v47  ;;  %v7501_v51 = vadd.f32 %v7405_v56, %v15522_v53  ;;  %v7407_v32 = vmul.f32 %v7311_v36, %v15546_v41 }
 0x703   : > { %v7218_v14 = vmul.f32 0.044715, %v15585_v30  ;;  %v15600_v52 = vmul.f32 0.7978846, %v7499_v31  ;;  %v7502_v7 = vadd.f32 %v7406_v4, %v15533_v21  ;;  %v7773_v42 = vadd.f32 1.0, %v9595_v38  ;;  %v9597_v31 = vpop.eup %9596 }
 0x704   : > { %v15598_v2 = vpop.xlane.xlu0 %5610  ;;  %9602 = vtanh.f32 %v7589_v27  ;;  %v15603_v45 = vmul.f32 0.7978846, %v7500_v57  ;;  %v7313_v48 = vmul.f32 %v7217_v8, %v15572_v29  ;;  %v7105_v20 = vmul.f32 0.5, %v15371_v33 }
 0x705   : > { %18084 = vst [vmem:[#allocation50_spill] sm:$0xff] %v15598_v2  ;;  %9604 = vtanh.f32 %v7590_v39  ;;  %v7408_v47 = vmul.f32 %v7312_v22, %v15556_v26  ;;  %v7314_v56 = vmul.f32 %v7218_v14, %v15585_v30  ;;  %v7106_v36 = vmul.f32 0.5, %v15380_v28 }
 0x706   : > { %9606 = vtanh.f32 %v7593_v5  ;;  %v7597_v2 = vmul.f32 0.7978846, %v7501_v51  ;;  %v7503_v4 = vadd.f32 %v7407_v32, %v15546_v41  ;;  %v7767_v38 = vadd.f32 1.0, %v15527_v63 }
 0x707   : > { %v7768_v27 = vadd.f32 1.0, %v15536_v44  ;;  %v7598_v57 = vmul.f32 0.7978846, %v7502_v7  ;;  %v7774_v8 = vadd.f32 1.0, %v9597_v31  ;;  %v7869_v33 = vmul.f32 %v7773_v42, %v15451_v18 }
 0x708   : > { %9608 = vtanh.f32 %v7594_v62  ;;  %v7409_v39 = vmul.f32 %v7313_v48, %v15572_v29  ;;  %v15615_v22 = vpop.xlane.xlu0 %5819  ;;  %v7863_v28 = vmul.f32 %v7767_v38, %v15398_v0  ;;  %v7504_v14 = vadd.f32 %v7408_v47, %v15556_v26 }
 0x709   : > { %v7864_v5 = vmul.f32 %v7768_v27, %v15419_v19  ;;  %9610 = vtanh.f32 %v15421_v58  ;;  %v7410_v63 = vmul.f32 %v7314_v56, %v15585_v30  ;;  %v7870_v44 = vmul.f32 %v7774_v8, %v15494_v40  ;;  %v9599_v18 = vpop.eup %9598 }
 0x70a   : > { %9612 = vtanh.f32 %v15423_v55  ;;  %v7599_v62 = vmul.f32 0.7978846, %v7503_v4  ;;  %v7109_v51 = vmul.f32 0.5, %v15440_v46  ;;  %v7971_v32 = vmul.f32 %v15473_v3, %v7863_v28 }
 0x70b   : > { %v7972_v0 = vmul.f32 %v15479_v60, %v7864_v5  ;;  %v7977_v19 = vmul.f32 %v15473_v3, %v7869_v33  ;;  %v7978_v58 = vmul.f32 %v15479_v60, %v7870_v44  ;;  %v7777_v7 = vadd.f32 1.0, %v9599_v18 }
 0x70c   : > { %9614 = vtanh.f32 %v15442_v23  ;;  %v7505_v42 = vadd.f32 %v7409_v39, %v15572_v29  ;;  %v7110_v40 = vmul.f32 0.5, %v15456_v35  ;;  %v7600_v48 = vmul.f32 0.7978846, %v7504_v14  ;;  %v6124_v31 = vpop.permute.xlu0 %6123 }
 0x70d   : > { %v15632_v55 = vadd.f32 %v7972_v0, %v7971_v32  ;;  %9616 = vtanh.f32 %v15463_v16  ;;  %v9601_v46 = vpop.eup %9600  ;;  %v7506_v47 = vadd.f32 %v7410_v63, %v15585_v30  ;;  %v15636_v56 = vadd.f32 %v7978_v58, %v7977_v19 }
 0x70e   : > { %9618 = vtanh.f32 %v7597_v2  ;;  %v7778_v4 = vadd.f32 1.0, %v9601_v46  ;;  %v7873_v23 = vmul.f32 %v7777_v7, %v7105_v20  ;;  %v7113_v38 = vmul.f32 0.5, %v15476_v15 }
 0x70f   : > { %18085 = vst [vmem:[#allocation48_spill] sm:$0xff] %v15632_v55  ;;  %18086 = vst [vmem:[#allocation53_spill] sm:$0xff] %v15636_v56  ;;  %9620 = vtanh.f32 %v15517_v9  ;;  %v7114_v35 = vmul.f32 0.5, %v15487_v25  ;;  %v15643_v16 = vmul.f32 0.5, %v15522_v53  ;;  %v15646_v27 = vmul.f32 0.5, %v15533_v21  ;;  %v18184_v55 = vld [vmem:[#allocation170_spill] sm:$0xff] }
 0x710   : > { %9622 = vtanh.f32 %v7598_v57  ;;  %v7601_v2 = vmul.f32 0.7978846, %v7505_v42  ;;  %v7874_v33 = vmul.f32 %v7778_v4, %v7106_v36  ;;  %v7602_v15 = vmul.f32 0.7978846, %v7506_v47  ;;  %v6188_v5 = vpop.permute.xlu0 %6187  ;;  %v18089_v42 = vld [vmem:[#allocation17_spill] sm:$0xff] }
 0x711   : > { %5620 = vadd.xlane.f32.xlu1 %v15255_v10  ;;  %v9603_v8 = vpop.eup %9602  ;;  %v7100_v10 = vmul.f32 0.5, %v15296_v6  ;;  %9624 = vtanh.f32 %v15564_v34  ;;  %v7103_v9 = vmul.f32 0.5, %v15349_v11  ;;  %v7981_v53 = vmul.f32 %v15473_v3, %v7873_v23  ;;  %v18194_v56 = vld [vmem:[#allocation49_spill] sm:$0xff] }
 0x712   : > { %v9605_v20 = vpop.eup %9604  ;;  %v7781_v39 = vadd.f32 1.0, %v9603_v8  ;;  %9626 = vtanh.f32 %v15590_v50  ;;  %v7982_v21 = vmul.f32 %v15479_v60, %v7874_v33  ;;  %v6294_v6 = vsel %vm6047_vm5, %v15287_v24, %v6124_v31  ;;  %v18090_v33 = vld [vmem:[#allocation144_spill] sm:$0xff] }
 0x713   : > { %v9607_v25 = vpop.eup %9606  ;;  %v7782_v57 = vadd.f32 1.0, %v9605_v20  ;;  %9628 = vtanh.f32 %v15594_v37  ;;  %v7104_v14 = vmul.f32 0.5, %v15364_v12  ;;  %v15667_v18 = vmul.f32 0.5, %v15572_v29 }
 0x714   : > { %v7877_v36 = vmul.f32 %v7781_v39, %v7109_v51  ;;  %v7785_v34 = vadd.f32 1.0, %v9607_v25  ;;  %9630 = vtanh.f32 %v15600_v52  ;;  %v15660_v11 = vadd.f32 %v7982_v21, %v7981_v53 }
 0x715   : > { %v9609_v28 = vpop.eup %9608  ;;  %v7878_v50 = vmul.f32 %v7782_v57, %v7110_v40  ;;  %9632 = vtanh.f32 %v15603_v45  ;;  %v6310_v12 = vsel %vm2882_vm4, %v6294_v6, %v6188_v5  ;;  %v7107_v20 = vmul.f32 0.5, %v18090_v33 }
 0x716   : > { %18087 = vst [vmem:[#allocation15_spill] sm:$0xff] %v15660_v11  ;;  %v9611_v37 = vpop.eup %9610  ;;  %v7786_v24 = vadd.f32 1.0, %v9609_v28  ;;  %v7881_v44 = vmul.f32 %v7785_v34, %v7113_v38  ;;  %9634 = vtanh.f32 %v7601_v2  ;;  %v7985_v51 = vmul.f32 %v15473_v3, %v7877_v36  ;;  %v18191_v11 = vld [vmem:[#allocation140_spill] sm:$0xff] }
 0x717   : > { %6131 = vrot.lane.b32.xlu0 %v15291_v59, %s9901_s17  ;;  %v9613_v52 = vpop.eup %9612  ;;  %v7986_v59 = vmul.f32 %v15479_v60, %v7878_v50  ;;  %v7771_v32 = vadd.f32 1.0, %v9611_v37  ;;  %9636 = vtanh.f32 %v7599_v62  ;;  %v18092_v21 = vmov 0.0  }
 0x718   : > { %v15664_v63 = vpop.xlane.xlu1 %5612  ;;  %v7882_v0 = vmul.f32 %v7786_v24, %v7114_v35  ;;  %9638 = vtanh.f32 %v7602_v15  ;;  %v7772_v45 = vadd.f32 1.0, %v9613_v52  ;;  %v7989_v7 = vmul.f32 %v15473_v3, %v7881_v44  ;;  %v18093_v44 = vld [vmem:[#allocation30_spill] sm:$0xff] }
 0x719   : > { %v9615_v19 = vpop.eup %9614  ;;  %v15674_v29 = vadd.f32 %v7986_v59, %v7985_v51  ;;  %v7867_v40 = vmul.f32 %v7771_v32, %v18089_v42  ;;  %9640 = vtanh.f32 %v7600_v48  ;;  %v7122_v24 = vmul.f32 0.5, %v15585_v30 }
 0x71a   : > { %v9617_v46 = vpop.eup %9616  ;;  %v7990_v31 = vmul.f32 %v15479_v60, %v7882_v0  ;;  %v7868_v4 = vmul.f32 %v7772_v45, %v7100_v10  ;;  %v7775_v23 = vadd.f32 1.0, %v9615_v19  ;;  %v7108_v52 = vmul.f32 0.5, %v18093_v44 }
 0x71b   : > { %6195 = vrot.lane.b32.xlu0 %v15313_v13, %s9902_s20  ;;  %v6896_v58 = vpop.f32.mrf.mxu1  ;;  %18088 = vst [vmem:[#allocation212_spill] sm:$0xff] %v15674_v29  ;;  %v9619_v38 = vpop.eup %9618  ;;  %v7975_v8 = vmul.f32 %v15473_v3, %v7867_v40  ;;  %v7776_v2 = vadd.f32 1.0, %v9617_v46  ;;  %v7112_v19 = vmul.f32 0.5, %v15470_v54 }
 0x71c   : > { %v15679_v62 = vadd.f32 %v6896_v58, %v15215_v49  ;;  %v6252_v47 = vpop.permute.xlu1 %6251  ;;  %v9621_v15 = vpop.eup %9620  ;;  %v15690_v25 = vadd.f32 %v7990_v31, %v7989_v7  ;;  %v7789_v10 = vadd.f32 1.0, %v9619_v38  ;;  %v7976_v57 = vmul.f32 %v15479_v60, %v7868_v4 }
 0x71d   : > { %v6326_v13 = vsel %vm6080_vm6, %v6310_v12, %v6252_v47  ;;  %v6898_v35 = vpop.f32.mrf.mxu1  ;;  %v9623_v53 = vpop.eup %9622  ;;  %v7871_v6 = vmul.f32 %v7775_v23, %v7103_v9  ;;  %v7872_v36 = vmul.f32 %v7776_v2, %v7104_v14  ;;  %v7779_v34 = vadd.f32 1.0, %v9621_v15 }
 0x71e   : > { %v7219_v48 = vmul.f32 0.044715, %v15679_v62  ;;  %v15687_v39 = vadd.f32 %v6898_v35, %v15218_v1  ;;  %8916 = vmatmul.mubr.msk.f32.gmra.mxu1 %vm1146_vm1, %v6326_v13  ;;  %18091 = vst [vmem:[#allocation70_spill] sm:$0xff] %v15690_v25  ;;  %v9625_v28 = vpop.eup %9624  ;;  %v7790_v50 = vadd.f32 1.0, %v9623_v53  ;;  %v7885_v37 = vmul.f32 %v7789_v10, %v15643_v16  ;;  %v18095_v16 = vld [vmem:[#allocation207_spill] sm:$0xff]  ;;  %v18097_v35 = vld [vmem:[#allocation13_spill] sm:$0xff] }
 0x71f   : > { %6936 = vmatprep.mubr.f32.mxu1 %v18092_v21  ;;  %v9627_v51 = vpop.eup %9626  ;;  %v15697_v59 = vadd.f32 %v7976_v57, %v7975_v8  ;;  %v7979_v32 = vmul.f32 %v15473_v3, %v7871_v6  ;;  %v7980_v12 = vmul.f32 %v15479_v60, %v7872_v36  ;;  %v7111_v9 = vmul.f32 0.5, %v15459_v43  ;;  %v18190_v25 = vld [vmem:[#allocation185_spill] sm:$0xff] }
 0x720   : > { %v6126_v5 = vpop.permute.xlu1 %6125  ;;  %v9629_v14 = vpop.eup %9628  ;;  %v7315_v0 = vmul.f32 %v7219_v48, %v15679_v62  ;;  %v7220_v45 = vmul.f32 0.044715, %v15687_v39  ;;  %v7886_v30 = vmul.f32 %v7790_v50, %v15646_v27  ;;  %v7780_v42 = vadd.f32 1.0, %v9625_v28 }
 0x721   : > { %18094 = vst [vmem:[#allocation81_spill] sm:$0xff] %v15697_v59  ;;  %v9631_v58 = vpop.eup %9630  ;;  %v15708_v7 = vadd.f32 %v7980_v12, %v7979_v32  ;;  %v7875_v40 = vmul.f32 %v7779_v34, %v7107_v20  ;;  %v7783_v46 = vadd.f32 1.0, %v9627_v51  ;;  %v7993_v31 = vmul.f32 %v15473_v3, %v7885_v37 }
 0x722   : > { %6259 = vrot.lane.b32.xlu1 %v18095_v16, %s9903_s21  ;;  %v9633_v47 = vpop.eup %9632  ;;  %v7994_v4 = vmul.f32 %v15479_v60, %v7886_v30  ;;  %v7784_v23 = vadd.f32 1.0, %v9629_v14  ;;  %v7115_v38 = vmul.f32 0.5, %v15504_v61  ;;  %v6295_v27 = vsel %vm6047_vm5, %v18097_v35, %v6126_v5 }
 0x723   : > { %18096 = vst [vmem:[#allocation94_spill] sm:$0xff] %v15708_v7  ;;  %v9635_v13 = vpop.eup %9634  ;;  %v7876_v54 = vmul.f32 %v7780_v42, %v7108_v52  ;;  %v7879_v8 = vmul.f32 %v7783_v46, %v7111_v9  ;;  %v7116_v2 = vmul.f32 0.5, %v15513_v17  ;;  %v7411_v20 = vmul.f32 %v7315_v0, %v15679_v62  ;;  %v18164_v7 = vld [vmem:[#allocation73_spill] sm:$0xff] }
 0x724   : > { %v6190_v43 = vpop.permute.xlu1 %6189  ;;  %v9637_v33 = vpop.eup %9636  ;;  %v7316_v15 = vmul.f32 %v7220_v45, %v15687_v39  ;;  %v15718_v48 = vadd.f32 %v7994_v4, %v7993_v31  ;;  %v7793_v10 = vadd.f32 1.0, %v9635_v13  ;;  %v7983_v57 = vmul.f32 %v15473_v3, %v7875_v40 }
 0x725   : > { %v9639_v53 = vpop.eup %9638  ;;  %v7984_v61 = vmul.f32 %v15479_v60, %v7876_v54  ;;  %v7880_v6 = vmul.f32 %v7784_v23, %v7112_v19  ;;  %v7787_v36 = vadd.f32 1.0, %v9631_v58  ;;  %v6311_v28 = vsel %vm2882_vm4, %v6295_v27, %v6190_v43  ;;  %v18104_v27 = vld [vmem:[#allocation8_spill] sm:$0xff] }
 0x726   : > { %18098 = vst [vmem:[#allocation117_spill] sm:$0xff] %v15718_v48  ;;  %v9641_v34 = vpop.eup %9640  ;;  %v7794_v17 = vadd.f32 1.0, %v9639_v53  ;;  %v7889_v50 = vmul.f32 %v7793_v10, %v15667_v18  ;;  %v7987_v37 = vmul.f32 %v15473_v3, %v7879_v8  ;;  %v7788_v32 = vadd.f32 1.0, %v9633_v47  ;;  %v18105_v54 = vld [vmem:[#allocation40_spill] sm:$0xff] }
 0x727   : > { %v15726_v52 = vadd.f32 %v7984_v61, %v7983_v57  ;;  %v7988_v51 = vmul.f32 %v15479_v60, %v7880_v6  ;;  %v7412_v12 = vmul.f32 %v7316_v15, %v15687_v39  ;;  %v7119_v14 = vmul.f32 0.5, %v15546_v41 }
 0x728   : > { %v6254_v5 = vpop.permute.xlu1 %6253  ;;  %v7890_v9 = vmul.f32 %v7794_v17, %v7122_v24  ;;  %v7883_v18 = vmul.f32 %v7787_v36, %v7115_v38  ;;  %v7884_v45 = vmul.f32 %v7788_v32, %v7116_v2  ;;  %v7791_v16 = vadd.f32 1.0, %v9637_v33  ;;  %v9866_v2 = vld [vmem:[%s11177_s28 + $0x1d8] sm:$0xff] }
 0x729   : > { %v6327_v44 = vsel %vm6080_vm6, %v6311_v28, %v6254_v5  ;;  %18099 = vst [vmem:[#allocation105_spill] sm:$0xff] %v15726_v52  ;;  %v15733_v0 = vadd.f32 %v7988_v51, %v7987_v37  ;;  %v7997_v30 = vmul.f32 %v15473_v3, %v7889_v50  ;;  %v7120_v58 = vmul.f32 0.5, %v15556_v26  ;;  %v18109_v51 = vld [vmem:[#allocation79_spill] sm:$0xff] }
 0x72a   : > { %8917 = vmatmul.mubr.msk.f32.gmra.mxu1 %vm1146_vm1, %v6327_v44  ;;  %v7998_v19 = vmul.f32 %v15479_v60, %v7890_v9  ;;  %v7792_v42 = vadd.f32 1.0, %v9641_v34  ;;  %v7507_v40 = vadd.f32 %v7411_v20, %v15679_v62  ;;  %v7991_v24 = vmul.f32 %v15473_v3, %v7883_v18  ;;  %v18106_v34 = vld [vmem:[#allocation12_spill] sm:$0xff]  ;;  %v18108_v44 = vld [vmem:[#allocation147_spill] sm:$0xff]  ;;  %v18111_v9 = vld [vmem:[#allocation213_spill] sm:$0xff] }
 0x72b   : > { %6942 = vmatprep.mubr.f32.mxu1 %v18092_v21  ;;  %18100 = vst [vmem:[#allocation225_spill] sm:$0xff] %v15733_v0  ;;  %v7992_v41 = vmul.f32 %v15479_v60, %v7884_v45  ;;  %v7887_v46 = vmul.f32 %v7791_v16, %v7119_v14  ;;  %v7508_v31 = vadd.f32 %v7412_v12, %v15687_v39  ;;  %v7123_v10 = vmul.f32 0.5, %v15679_v62  ;;  %v18110_v12 = vld [vmem:[#allocation218_spill] sm:$0xff]  ;;  %v18112_v45 = vld [vmem:[#allocation80_spill] sm:$0xff]  ;;  %v18163_v52 = vld [vmem:[#allocation219_spill] sm:$0xff] }
 0x72c   : > { %v15741_v47 = vadd.f32 %v7998_v19, %v7997_v30  ;;  %v7888_v43 = vmul.f32 %v7792_v42, %v7120_v58  ;;  %v7603_v38 = vmul.f32 0.7978846, %v7507_v40  ;;  %v2837_v8 = vadd.f32 %v18105_v54, %v18104_v27  ;;  %v18113_v16 = vld [vmem:[#allocation142_spill] sm:$0xff] }
 0x72d   : > { %v15744_v4 = vadd.f32 %v7992_v41, %v7991_v24  ;;  %v7995_v23 = vmul.f32 %v15473_v3, %v7887_v46  ;;  %v7604_v35 = vmul.f32 0.7978846, %v7508_v31  ;;  %v7124_v61 = vmul.f32 0.5, %v15687_v39  ;;  %v18115_v31 = vld [vmem:[#allocation67_spill] sm:$0xff] }
 0x72e   : > { %18101 = vst [vmem:[#allocation123_spill] sm:$0xff] %v15741_v47  ;;  %v7996_v26 = vmul.f32 %v15479_v60, %v7888_v43  ;;  %9642 = vtanh.f32 %v7603_v38  ;;  %v5802_v33 = vmul.f32 %v9866_v2, %v2837_v8  ;;  %v5367_v62 = vadd.f32 %v18109_v51, %v18108_v44  ;;  %v18114_v43 = vld [vmem:[#allocation9_spill] sm:$0xff]  ;;  %v18116_v38 = vld [vmem:[#allocation27_spill] sm:$0xff] }
 0x72f   : > { %18102 = vst [vmem:[#allocation132_spill] sm:$0xff] %v15744_v4  ;;  %9644 = vtanh.f32 %v7604_v35  ;;  %v5576_v14 = vadd.f32 %v18111_v9, %v18110_v12  ;;  %v5155_v30 = vadd.f32 %v18113_v16, %v18112_v45  ;;  %v2762_v35 = vadd.f32 %v18116_v38, %v18104_v27  ;;  %v18121_v51 = vld [vmem:[#allocation75_spill] sm:$0xff]  ;;  %v18122_v16 = vld [vmem:[#allocation122_spill] sm:$0xff]  ;;  %v18161_v4 = vld [vmem:[#allocation116_spill] sm:$0xff] }
 0x730   : > { %v15748_v13 = vadd.f32 %v7996_v26, %v7995_v23  ;;  %v5156_v23 = vadd.f32 %v18115_v31, %v18114_v43  ;;  %v18125_v31 = vld [vmem:[#allocation26_spill] sm:$0xff] }
 0x732   : > { %18103 = vst [vmem:[#allocation113_spill] sm:$0xff] %v15748_v13  ;;  %v18159_v13 = vld [vmem:[#allocation99_spill] sm:$0xff] }
 0x73a   : > { %5829 = vadd.xlane.f32.xlu0 %v5802_v33  ;;  %v9867_v33 = vld [vmem:[%s11177_s28 + $0x160] sm:$0xff] }
 0x73b   : > { %v9643_v20 = vpop.eup %9642 }
 0x73c   : > { %v7795_v53 = vadd.f32 1.0, %v9643_v20  ;;  %v9645_v57 = vpop.eup %9644  ;;  %v5594_v20 = vmul.f32 %v9867_v33, %v2762_v35  ;;  %v18126_v35 = vld [vmem:[#allocation194_spill] sm:$0xff]  ;;  %v18129_v33 = vld [vmem:[#allocation127_spill] sm:$0xff] }
 0x73d   : > { %v7796_v6 = vadd.f32 1.0, %v9645_v57  ;;  %v9868_v57 = vld [vmem:[%s11177_s28 + $0x1e0] sm:$0xff] }
 0x73e   : > { %v7891_v36 = vmul.f32 %v7795_v53, %v7123_v10  ;;  %v18117_v10 = vld [vmem:[#allocation43_spill] sm:$0xff] }
 0x73f   : > { %v7892_v28 = vmul.f32 %v7796_v6, %v7124_v61  ;;  %v2842_v53 = vadd.f32 %v18117_v10, %v18104_v27  ;;  %v18118_v6 = vld [vmem:[#allocation224_spill] sm:$0xff]  ;;  %v18130_v10 = vld [vmem:[#allocation42_spill] sm:$0xff] }
 0x740   : > { %v7999_v17 = vmul.f32 %v15473_v3, %v7891_v36  ;;  %v18119_v36 = vld [vmem:[#allocation118_spill] sm:$0xff] }
 0x741   : > { %v15753_v15 = vpop.xlane.xlu0 %5821  ;;  %v8000_v50 = vmul.f32 %v15479_v60, %v7892_v28  ;;  %v5803_v61 = vmul.f32 %v9868_v57, %v2842_v53  ;;  %v2847_v53 = vadd.f32 %v18130_v10, %v18104_v27  ;;  %v9870_v57 = vld [vmem:[%s11177_s28 + $0x1e8] sm:$0xff]  ;;  %v9871_v10 = vld [vmem:[%s11177_s28 + $0x170] sm:$0xff] }
 0x743   : > { %v15762_v37 = vadd.f32 %v8000_v50, %v7999_v17  ;;  %v18120_v50 = vld [vmem:[#allocation77_spill] sm:$0xff] }
 0x745   : > { %v15758_v5 = vpop.xlane.xlu0 %5614  ;;  %18107 = vst [vmem:[#allocation58_spill] sm:$0xff] %v15762_v37  ;;  %v9874_v37 = vld [vmem:[%s11177_s28 + $0x178] sm:$0xff] }
 0x746   : > { %5413 = vadd.xlane.f32.xlu1 %v18106_v34  ;;  %v5785_v34 = vadd.f32 %v18119_v36, %v18118_v6  ;;  %v18131_v36 = vld [vmem:[#allocation14_spill] sm:$0xff] }
 0x749   : > { %v15766_v32 = vpop.xlane.xlu0 %5823 }
 0x74d   : > { %v6128_v39 = vpop.permute.xlu0 %6127 }
 0x74e   : > { %v6296_v58 = vsel %vm6047_vm5, %v5155_v30, %v6128_v39  ;;  %v18123_v30 = vld [vmem:[#allocation157_spill] sm:$0xff] }
 0x750   : > { %6133 = vrot.lane.b32.xlu0 %v5367_v62, %s9901_s17  ;;  %v5368_v62 = vadd.f32 %v18121_v51, %v18120_v50  ;;  %v18133_v51 = vld [vmem:[#allocation97_spill] sm:$0xff] }
 0x751   : > { %v6192_v19 = vpop.permute.xlu0 %6191 }
 0x752   : > { %v6312_v42 = vsel %vm2882_vm4, %v6296_v58, %v6192_v19  ;;  %v5157_v19 = vadd.f32 %v18123_v30, %v18122_v16 }
 0x757   : > { %6197 = vrot.lane.b32.xlu1 %v5576_v14, %s9902_s20 }
 0x759   : > { %v15772_v18 = vpop.xlane.xlu1 %5616 }
 0x75d   : > { %v6256_v40 = vpop.permute.xlu1 %6255 }
 0x75e   : > { %v6328_v24 = vsel %vm6080_vm6, %v6312_v42, %v6256_v40 }
 0x75f   : > { %8918 = vmatmul.mubr.msk.f32.gmra.mxu1 %vm1146_vm1, %v6328_v24 }
 0x760   : > { %6948 = vmatprep.mubr.f32.mxu1 %v18092_v21 }
 0x761   : > { %v6130_v41 = vpop.permute.xlu1 %6129 }
 0x762   : > { %v6297_v26 = vsel %vm6047_vm5, %v5156_v23, %v6130_v41  ;;  %v2767_v23 = vadd.f32 %v18125_v31, %v18104_v27 }
 0x765   : > { %v6194_v46 = vpop.permute.xlu1 %6193 }
 0x766   : > { %v6313_v54 = vsel %vm2882_vm4, %v6297_v26, %v6194_v46  ;;  %v18124_v46 = vld [vmem:[#allocation10_spill] sm:$0xff]  ;;  %v9869_v26 = vld [vmem:[%s11177_s28 + $0x168] sm:$0xff] }
 0x767   : > { %v5595_v38 = vmul.f32 %v9869_v26, %v2767_v23 }
 0x769   : > { %v6258_v8 = vpop.permute.xlu1 %6257 }
 0x76a   : > { %v6329_v2 = vsel %vm6080_vm6, %v6313_v54, %v6258_v8  ;;  %v18127_v54 = vld [vmem:[#allocation82_spill] sm:$0xff] }
 0x76b   : > { %8919 = vmatmul.mubr.msk.f32.gmra.mxu1 %vm1146_vm1, %v6329_v2  ;;  %v5577_v8 = vadd.f32 %v18127_v54, %v18126_v35  ;;  %v18128_v2 = vld [vmem:[#allocation202_spill] sm:$0xff] }
 0x76c   : > { %6954 = vmatprep.mubr.f32.mxu1 %v18092_v21 }
 0x76f   : > { %5622 = vadd.xlane.f32.xlu0 %v5594_v20  ;;  %v5786_v20 = vadd.f32 %v18129_v33, %v18128_v2  ;;  %v18138_v33 = vld [vmem:[#allocation29_spill] sm:$0xff] }
 0x77b   : > { %5831 = vadd.xlane.f32.xlu1 %v5803_v61  ;;  %v5804_v61 = vmul.f32 %v9870_v57, %v2847_v53  ;;  %v18139_v57 = vld [vmem:[#allocation46_spill] sm:$0xff] }
 0x782   : > { %v15796_v28 = vpop.xlane.xlu0 %5825 }
 0x785   : > { %6261 = vrot.lane.b32.xlu0 %v5785_v34, %s9903_s21  ;;  %v18132_v34 = vld [vmem:[#allocation151_spill] sm:$0xff] }
 0x786   : > { %v15799_v17 = vpop.xlane.xlu0 %5618 }
 0x78a   : > { %v15804_v39 = vpop.xlane.xlu0 %5827 }
 0x78c   : > { %6135 = vrot.lane.b32.xlu1 %v5368_v62, %s9901_s17  ;;  %v5369_v62 = vadd.f32 %v18133_v51, %v18132_v34 }
 0x78e   : > { %v6132_v9 = vpop.permute.xlu0 %6131 }
 0x78f   : > { %v6298_v42 = vsel %vm6047_vm5, %v5157_v19, %v6132_v9  ;;  %v18134_v19 = vld [vmem:[#allocation146_spill] sm:$0xff] }
 0x792   : > { %v6196_v58 = vpop.permute.xlu0 %6195 }
 0x793   : > { %v6314_v40 = vsel %vm2882_vm4, %v6298_v42, %v6196_v58  ;;  %v18135_v58 = vld [vmem:[#allocation173_spill] sm:$0xff] }
 0x794   : > { %v5578_v42 = vadd.f32 %v18135_v58, %v18134_v19  ;;  %v18141_v58 = vld [vmem:[#allocation60_spill] sm:$0xff] }
 0x79a   : > { %v15806_v14 = vpop.xlane.xlu1 %5620 }
 0x79e   : > { %v6260_v24 = vpop.permute.xlu1 %6259 }
 0x79f   : > { %v6330_v41 = vsel %vm6080_vm6, %v6314_v40, %v6260_v24 }
 0x7a0   : > { %8920 = vmatmul.mubr.msk.f32.gmra.mxu1 %vm1146_vm1, %v6330_v41  ;;  %v18136_v41 = vld [vmem:[#allocation180_spill] sm:$0xff] }
 0x7a1   : > { %6960 = vmatprep.mubr.f32.mxu1 %v18092_v21 }
 0x7a4   : > { %5415 = vadd.xlane.f32.xlu0 %v18124_v46  ;;  %v18137_v46 = vld [vmem:[#allocation164_spill] sm:$0xff] }
 0x7a5   : > { %v5158_v31 = vadd.f32 %v18137_v46, %v18136_v41  ;;  %v18143_v46 = vld [vmem:[#allocation168_spill] sm:$0xff] }
 0x7b0   : > { %5624 = vadd.xlane.f32.xlu1 %v5595_v38 }
 0x7ba   : > { %6199 = vrot.lane.b32.xlu0 %v5577_v8, %s9902_s20 }
 0x7c1   : > { %6263 = vrot.lane.b32.xlu1 %v5786_v20, %s9903_s21  ;;  %v2772_v20 = vadd.f32 %v18138_v33, %v18104_v27  ;;  %v18145_v33 = vld [vmem:[#allocation184_spill] sm:$0xff] }
 0x7c3   : > { %v15831_v9 = vpop.xlane.xlu0 %5829  ;;  %v5596_v53 = vmul.f32 %v9871_v10, %v2772_v20 }
 0x7c7   : > { %v6134_v40 = vpop.permute.xlu0 %6133 }
 0x7c8   : > { %v6299_v26 = vsel %vm6047_vm5, %v5158_v31, %v6134_v40  ;;  %v18142_v40 = vld [vmem:[#allocation203_spill] sm:$0xff] }
 0x7c9   : > { %v5370_v31 = vadd.f32 %v18143_v46, %v18142_v40 }
 0x7cf   : > { %v15834_v30 = vpop.xlane.xlu1 %5413 }
 0x7d3   : > { %v6198_v23 = vpop.permute.xlu1 %6197 }
 0x7d4   : > { %v6315_v38 = vsel %vm2882_vm4, %v6299_v26, %v6198_v23 }
 0x7d9   : > { %5833 = vadd.xlane.f32.xlu0 %v5804_v61  ;;  %v2852_v61 = vadd.f32 %v18139_v57, %v18104_v27  ;;  %v18146_v57 = vld [vmem:[#allocation11_spill] sm:$0xff] }
 0x7e5   : > { %5417 = vadd.xlane.f32.xlu1 %v18131_v36  ;;  %v9872_v36 = vld [vmem:[%s11177_s28 + $0x1f0] sm:$0xff] }
 0x7e6   : > { %v5805_v51 = vmul.f32 %v9872_v36, %v2852_v61  ;;  %v2697_v61 = vadd.f32 %v18146_v57, %v18104_v27  ;;  %v18149_v57 = vld [vmem:[#allocation223_spill] sm:$0xff] }
 0x7ef   : > { %6137 = vrot.lane.b32.xlu0 %v5369_v62, %s9901_s17  ;;  %v18140_v62 = vld [vmem:[#allocation155_spill] sm:$0xff] }
 0x7f6   : > { %6201 = vrot.lane.b32.xlu1 %v5578_v42, %s9902_s20  ;;  %v5787_v42 = vadd.f32 %v18141_v58, %v18140_v62 }
 0x7f8   : > { %v15839_v24 = vpop.xlane.xlu0 %5622 }
 0x7fc   : > { %v6262_v54 = vpop.permute.xlu0 %6261 }
 0x7fd   : > { %v6331_v8 = vsel %vm6080_vm6, %v6315_v38, %v6262_v54 }
 0x7fe   : > { %8921 = vmatmul.mubr.msk.f32.gmra.mxu1 %vm1146_vm1, %v6331_v8  ;;  %v18144_v8 = vld [vmem:[#allocation134_spill] sm:$0xff] }
 0x7ff   : > { %6966 = vmatprep.mubr.f32.mxu1 %v18092_v21  ;;  %v5159_v20 = vadd.f32 %v18145_v33, %v18144_v8 }
 0x804   : > { %v15860_v23 = vpop.xlane.xlu1 %5831 }
 0x808   : > { %v6136_v38 = vpop.permute.xlu1 %6135 }
 0x80e   : > { %5626 = vadd.xlane.f32.xlu0 %v5596_v53  ;;  %v6300_v53 = vsel %vm6047_vm5, %v5159_v20, %v6136_v38  ;;  %v18148_v20 = vld [vmem:[#allocation45_spill] sm:$0xff] }
 0x81a   : > { %5835 = vadd.xlane.f32.xlu1 %v5805_v51 }
 0x824   : > { %6265 = vrot.lane.b32.xlu0 %v5787_v42, %s9903_s21  ;;  %v9873_v42 = vld [vmem:[%s11177_s28 + $0xf8] sm:$0xff] }
 0x825   : > { %v5388_v46 = vmul.f32 %v9873_v42, %v2697_v61  ;;  %v18153_v61 = vld [vmem:[#allocation64_spill] sm:$0xff] }
 0x82b   : > { %6139 = vrot.lane.b32.xlu1 %v5370_v31, %s9901_s17  ;;  %v18147_v31 = vld [vmem:[#allocation28_spill] sm:$0xff] }
 0x82c   : > { %v2777_v33 = vadd.f32 %v18147_v31, %v18104_v27  ;;  %v18155_v31 = vld [vmem:[#allocation220_spill] sm:$0xff] }
 0x82d   : > { %v15862_v26 = vpop.xlane.xlu0 %5415 }
 0x82e   : > { %v5597_v38 = vmul.f32 %v9874_v37, %v2777_v33  ;;  %v18156_v33 = vld [vmem:[#allocation205_spill] sm:$0xff] }
 0x831   : > { %v6200_v10 = vpop.permute.xlu0 %6199 }
 0x832   : > { %v6316_v36 = vsel %vm2882_vm4, %v6300_v53, %v6200_v10  ;;  %v5579_v10 = vadd.f32 %v18149_v57, %v18148_v20  ;;  %v18150_v53 = vld [vmem:[#allocation229_spill] sm:$0xff] }
 0x839   : > { %v15864_v54 = vpop.xlane.xlu1 %5624 }
 0x83d   : > { %v6264_v51 = vpop.permute.xlu1 %6263 }
 0x83e   : > { %v6332_v58 = vsel %vm6080_vm6, %v6316_v36, %v6264_v51  ;;  %v18151_v36 = vld [vmem:[#allocation221_spill] sm:$0xff] }
 0x83f   : > { %8922 = vmatmul.mubr.msk.f32.gmra.mxu1 %vm1146_vm1, %v6332_v58  ;;  %v5788_v51 = vadd.f32 %v18151_v36, %v18150_v53  ;;  %v18152_v58 = vld [vmem:[#allocation176_spill] sm:$0xff] }
 0x840   : > { %6972 = vmatprep.mubr.f32.mxu1 %v18092_v21  ;;  %v5371_v42 = vadd.f32 %v18153_v61, %v18152_v58 }
 0x843   : > { %5419 = vadd.xlane.f32.xlu0 %v5388_v46  ;;  %v18154_v46 = vld [vmem:[#allocation47_spill] sm:$0xff] }
 0x844   : > { %v5789_v37 = vadd.f32 %v18155_v31, %v18154_v46  ;;  %v9875_v31 = vld [vmem:[%s11177_s28 + $0x1f8] sm:$0xff]  ;;  %s8533_s28 = sshll.u32 %s8520_s9, 4 }
 0x845   : > { %p1066_p8 = scmp.lt.s32.totalorder %s8533_s28, 63 }
 0x847   : > { %s18279_s28 = smov (!%p1066_p8, %s8533_s28), 63 }
 0x848   : > { %s8534_s29 = sshll.u32 %s18279_s28, 3 }
 0x84f   : > { %5628 = vadd.xlane.f32.xlu1 %v5597_v38  ;;  %v18157_v38 = vld [vmem:[#allocation153_spill] sm:$0xff] }
 0x850   : > { %v5372_v57 = vadd.f32 %v18157_v38, %v18156_v33  ;;  %v5421_v38 = vadd.f32 %v18164_v7, %v18163_v52  ;;  %v18172_v7 = vld [vmem:[#allocation187_spill] sm:$0xff] }
 0x859   : > { %6203 = vrot.lane.b32.xlu0 %v5579_v10, %s9902_s20  ;;  %v18158_v10 = vld [vmem:[#allocation89_spill] sm:$0xff] }
 0x85a   : > { %v5581_v36 = vadd.f32 %v18159_v13, %v18158_v10  ;;  %v18166_v13 = vld [vmem:[#allocation175_spill] sm:$0xff] }
 0x860   : > { %6267 = vrot.lane.b32.xlu1 %v5788_v51, %s9903_s21  ;;  %v18160_v51 = vld [vmem:[#allocation44_spill] sm:$0xff] }
 0x861   : > { %v2857_v61 = vadd.f32 %v18160_v51, %v18104_v27  ;;  %v18168_v27 = vld [vmem:[#allocation145_spill] sm:$0xff] }
 0x864   : > { %6141 = vrot.lane.b32.xlu1 %v5371_v42, %s9901_s17  ;;  %v18162_v42 = vld [vmem:[#allocation114_spill] sm:$0xff] }
 0x865   : > { %v5790_v0 = vadd.f32 %v18162_v42, %v18161_v4  ;;  %v18169_v42 = vld [vmem:[#allocation196_spill] sm:$0xff] }
 0x868   : > { %6269 = vrot.lane.b32.xlu1 %v5789_v37, %s9903_s21  ;;  %v5806_v37 = vmul.f32 %v9875_v31, %v2857_v61  ;;  %v18171_v61 = vld [vmem:[#allocation226_spill] sm:$0xff]  ;;  %v18173_v31 = vld [vmem:[#allocation63_spill] sm:$0xff] }
 0x869   : > { %v5632_v52 = vadd.f32 %v18172_v7, %v18171_v61  ;;  %v18181_v7 = vld [vmem:[#allocation165_spill] sm:$0xff] }
 0x86c   : > { %6143 = vrot.lane.b32.xlu1 %v5372_v57, %s9901_s17  ;;  %v18165_v57 = vld [vmem:[#allocation174_spill] sm:$0xff] }
 0x86d   : > { %v5630_v59 = vadd.f32 %v18166_v13, %v18165_v57  ;;  %v18175_v57 = vld [vmem:[#allocation126_spill] sm:$0xff] }
 0x870   : > { %6207 = vrot.lane.b32.xlu1 %v5581_v36, %s9902_s20  ;;  %v18167_v36 = vld [vmem:[#allocation137_spill] sm:$0xff] }
 0x871   : > { %v5422_v51 = vadd.f32 %v18168_v27, %v18167_v36  ;;  %v15923_v36 = vpop.xlane.xlu0 %5833  ;;  %v18177_v27 = vld [vmem:[#allocation107_spill] sm:$0xff] }
 0x874   : > { %6271 = vrot.lane.b32.xlu1 %v5790_v0, %s9903_s21  ;;  %v18170_v0 = vld [vmem:[#allocation171_spill] sm:$0xff] }
 0x875   : > { %v5840_v47 = vadd.f32 %v18170_v0, %v18169_v42  ;;  %v18180_v0 = vld [vmem:[#allocation227_spill] sm:$0xff] }
 0x878   : > { %5837 = vadd.xlane.f32.xlu0 %v5806_v37  ;;  %6353 = vrot.lane.b32.xlu1 %v5421_v38, %s9901_s17  ;;  %v18174_v37 = vld [vmem:[#allocation66_spill] sm:$0xff] }
 0x879   : > { %v5424_v38 = vadd.f32 %v18174_v37, %v18173_v31  ;;  %v15933_v37 = vpop.xlane.xlu1 %5417 }
 0x87c   : > { %6417 = vrot.lane.b32.xlu1 %v5630_v59, %s9902_s20  ;;  %v18176_v59 = vld [vmem:[#allocation217_spill] sm:$0xff] }
 0x87d   : > { %v5580_v13 = vadd.f32 %v18176_v59, %v18175_v57  ;;  %v18183_v59 = vld [vmem:[#allocation154_spill] sm:$0xff] }
 0x87e   : > { %v5631_v48 = vadd.f32 %v18184_v55, %v18183_v59  ;;  %v18192_v55 = vld [vmem:[#allocation195_spill] sm:$0xff] }
 0x87f   : > { %v5844_v59 = vadd.f32 %v18192_v55, %v18191_v11  ;;  %v18197_v11 = vld [vmem:[#allocation150_spill] sm:$0xff]  ;;  %v18201_v55 = vld [vmem:[#allocation133_spill] sm:$0xff] }
 0x880   : > { %6355 = vrot.lane.b32.xlu1 %v5422_v51, %s9901_s17  ;;  %v18178_v51 = vld [vmem:[#allocation210_spill] sm:$0xff] }
 0x881   : > { %v5842_v42 = vadd.f32 %v18178_v51, %v18177_v27  ;;  %v18185_v27 = vld [vmem:[#allocation211_spill] sm:$0xff] }
 0x884   : > { %6483 = vrot.lane.b32.xlu1 %v5840_v47, %s9903_s21  ;;  %v18179_v47 = vld [vmem:[#allocation182_spill] sm:$0xff] }
 0x885   : > { %v5839_v61 = vadd.f32 %v18180_v0, %v18179_v47  ;;  %v18188_v0 = vld [vmem:[#allocation156_spill] sm:$0xff] }
 0x888   : > { %6421 = vrot.lane.b32.xlu1 %v5632_v52, %s9902_s20  ;;  %v18182_v52 = vld [vmem:[#allocation31_spill] sm:$0xff] }
 0x889   : > { %v5634_v31 = vadd.f32 %v18182_v52, %v18181_v7  ;;  %v18189_v52 = vld [vmem:[#allocation141_spill] sm:$0xff] }
 0x88a   : > { %v5160_v29 = vadd.f32 %v18190_v25, %v18189_v52  ;;  %v18195_v25 = vld [vmem:[#allocation166_spill] sm:$0xff] }
 0x88c   : > { %6359 = vrot.lane.b32.xlu1 %v5424_v38, %s9901_s17  ;;  %v6138_v38 = vpop.permute.xlu0 %6137 }
 0x88e   : > { %6205 = vrot.lane.b32.xlu0 %v5580_v13, %s9902_s20  ;;  %v18186_v13 = vld [vmem:[#allocation163_spill] sm:$0xff] }
 0x88f   : > { %v5426_v51 = vadd.f32 %v18186_v13, %v18185_v27  ;;  %v18193_v13 = vld [vmem:[#allocation228_spill] sm:$0xff] }
 0x890   : > { %6487 = vrot.lane.b32.xlu1 %v5842_v42, %s9903_s21  ;;  %v18187_v42 = vld [vmem:[#allocation200_spill] sm:$0xff]  ;;  %v5841_v8 = vadd.f32 %v18194_v56, %v18193_v13 }
 0x891   : > { %v5423_v7 = vadd.f32 %v18188_v0, %v18187_v42  ;;  %v18200_v56 = vld [vmem:[#allocation172_spill] sm:$0xff] }
 0x892   : > { %6481 = vrot.lane.b32.xlu0 %v5839_v61, %s9903_s21  ;;  %v6202_v61 = vpop.permute.xlu1 %6201  ;;  %v18205_v13 = vld [vmem:[#allocation16_spill] sm:$0xff] }
 0x894   : > { %6425 = vrot.lane.b32.xlu1 %v5634_v31, %s9902_s20  ;;  %v6301_v31 = vsel %vm6047_vm5, %v5160_v29, %v6138_v38  ;;  %v18198_v29 = vld [vmem:[#allocation100_spill] sm:$0xff] }
 0x895   : > { %v5633_v38 = vadd.f32 %v18198_v29, %v18197_v11  ;;  %v18207_v11 = vld [vmem:[#allocation230_spill] sm:$0xff]  ;;  %v18208_v29 = vld [vmem:[#allocation177_spill] sm:$0xff] }
 0x896   : > { %6419 = vrot.lane.b32.xlu0 %v5631_v48, %s9902_s20  ;;  %v6317_v48 = vsel %vm2882_vm4, %v6301_v31, %v6202_v61 }
 0x897   : > { %v15942_v47 = vpop.xlane.xlu0 %5626 }
 0x898   : > { %6363 = vrot.lane.b32.xlu1 %v5426_v51, %s9901_s17  ;;  %v18196_v51 = vld [vmem:[#allocation50_spill] sm:$0xff] }
 0x899   : > { %v5636_v0 = vadd.f32 %v18196_v51, %v18195_v25  ;;  %v6902_v25 = vpop.f32.mrf.mxu1  ;;  %v18206_v51 = vld [vmem:[#allocation101_spill] sm:$0xff] }
 0x89a   : > { %6357 = vrot.lane.b32.xlu0 %v5423_v7, %s9901_s17  ;;  %v18199_v7 = vld [vmem:[#allocation138_spill] sm:$0xff] }
 0x89b   : > { %v6266_v27 = vpop.permute.xlu0 %6265  ;;  %v5428_v61 = vadd.f32 %v18200_v56, %v18199_v7  ;;  %v6904_v7 = vpop.f32.mrf.mxu1  ;;  %v18210_v56 = vld [vmem:[#allocation71_spill] sm:$0xff] }
 0x89c   : > { %v6333_v42 = vsel %vm6080_vm6, %v6317_v48, %v6266_v27  ;;  %6491 = vrot.lane.b32.xlu1 %v5844_v59, %s9903_s21  ;;  %v18202_v59 = vld [vmem:[#allocation93_spill] sm:$0xff]  ;;  %v18203_v48 = vld [vmem:[#allocation84_spill] sm:$0xff]  ;;  %v18204_v27 = vld [vmem:[#allocation87_spill] sm:$0xff] }
 0x89d   : > { %8923 = vmatmul.mubr.msk.f32.gmra.mxu1 %vm1146_vm1, %v6333_v42  ;;  %v5425_v31 = vadd.f32 %v18202_v59, %v18201_v55  ;;  %v5843_v42 = vadd.f32 %v18205_v13, %v18204_v27  ;;  %v15986_v55 = vpop.f32.mrf.mxu1  ;;  %v18211_v59 = vld [vmem:[#allocation160_spill] sm:$0xff]  ;;  %v18214_v13 = vld [vmem:[#allocation98_spill] sm:$0xff] }
 0x89e   : > { %6485 = vrot.lane.b32.xlu0 %v5841_v8, %s9903_s21  ;;  %6978 = vmatprep.mubr.f32.mxu1 %v18092_v21  ;;  %v5846_v8 = vadd.f32 %v15753_v15, %v18203_v48  ;;  %v18209_v15 = vld [vmem:[#allocation54_spill] sm:$0xff] }
 0x8a0   : > { %6429 = vrot.lane.b32.xlu1 %v5636_v0, %s9902_s20  ;;  %v5638_v0 = vadd.f32 %v15758_v5, %v18206_v51  ;;  %v15992_v5 = vpop.f32.mrf.mxu1 }
 0x8a2   : > { %6423 = vrot.lane.b32.xlu0 %v5633_v38, %s9902_s20  ;;  %v5635_v38 = vadd.f32 %v18208_v29, %v18207_v11  ;;  %v6914_v51 = vpop.f32.mrf.mxu1  ;;  %v18215_v11 = vld [vmem:[#allocation197_spill] sm:$0xff] }
 0x8a3   : > { %v5637_v29 = vadd.f32 %v15664_v63, %v18215_v11  ;;  %v18219_v63 = vld [vmem:[#allocation110_spill] sm:$0xff]  ;;  %v5852_v11 = vadd.f32 %v15923_v36, %v18150_v53  ;;  %v5644_v53 = vadd.f32 %v15942_v47, %v18175_v57  ;;  %v16061_v36 = vpop.xlane.xlu1 %5835 }
 0x8a4   : > { %6367 = vrot.lane.b32.xlu1 %v5428_v61, %s9901_s17  ;;  %v5430_v61 = vadd.f32 %v18210_v56, %v18209_v15 }
 0x8a6   : > { %6361 = vrot.lane.b32.xlu0 %v5425_v31, %s9901_s17  ;;  %v18212_v31 = vld [vmem:[#allocation76_spill] sm:$0xff] }
 0x8a7   : > { %v5427_v48 = vadd.f32 %v18212_v31, %v18211_v59  ;;  %v5847_v31 = vadd.f32 %v15766_v32, %v18219_v63 }
 0x8a8   : > { %6495 = vrot.lane.b32.xlu1 %v5846_v8, %s9903_s21  ;;  %v18213_v8 = vld [vmem:[#allocation125_spill] sm:$0xff] }
 0x8a9   : > { %v5848_v27 = vadd.f32 %v15796_v28, %v18213_v8  ;;  %v18216_v28 = vld [vmem:[#allocation104_spill] sm:$0xff]  ;;  %v16022_v8 = vadd.f32 %v6904_v7, %v15218_v1 }
 0x8aa   : > { %6489 = vrot.lane.b32.xlu0 %v5843_v42, %s9903_s21  ;;  %v5845_v42 = vadd.f32 %v15615_v22, %v18214_v13  ;;  %v5432_v15 = vadd.f32 %v18216_v28, %v18120_v50  ;;  %v18217_v22 = vld [vmem:[#allocation209_spill] sm:$0xff]  ;;  %v5642_v50 = vadd.f32 %v15839_v24, %v18134_v19 }
 0x8ab   : > { %v7222_v19 = vmul.f32 0.044715, %v16022_v8  ;;  %v18221_v24 = vld [vmem:[#allocation69_spill] sm:$0xff] }
 0x8ac   : > { %6433 = vrot.lane.b32.xlu1 %v5638_v0, %s9902_s20  ;;  %v5640_v0 = vadd.f32 %v15799_v17, %v18110_v12  ;;  %v5850_v17 = vadd.f32 %v15831_v9, %v18128_v2  ;;  %v16028_v9 = vadd.f32 %v6902_v25, %v15215_v49  ;;  %v5431_v7 = vadd.f32 %v18221_v24, %v18108_v44 }
 0x8ad   : > { %v5849_v44 = vadd.f32 %v15804_v39, %v18118_v6  ;;  %v5641_v39 = vadd.f32 %v15806_v14, %v18126_v35  ;;  %v5851_v24 = vadd.f32 %v15860_v23, %v18140_v62 }
 0x8ae   : > { %6427 = vrot.lane.b32.xlu0 %v5635_v38, %s9902_s20  ;;  %v6916_v38 = vpop.f32.mrf.mxu1 }
 0x8b0   : > { %6371 = vrot.lane.b32.xlu1 %v5430_v61, %s9901_s17  ;;  %v6920_v56 = vpop.f32.mrf.mxu1  ;;  %v18218_v61 = vld [vmem:[#allocation57_spill] sm:$0xff] }
 0x8b1   : > { %v5429_v59 = vadd.f32 %v18218_v61, %v18217_v22  ;;  %v16072_v57 = vadd.f32 %v6920_v56, %v15215_v49 }
 0x8b2   : > { %6365 = vrot.lane.b32.xlu0 %v5427_v48, %s9901_s17  ;;  %v6922_v12 = vpop.f32.mrf.mxu1 }
 0x8b3   : > { %v16081_v35 = vadd.f32 %v6922_v12, %v15218_v1 }
 0x8b4   : > { %6499 = vrot.lane.b32.xlu1 %v5848_v27, %s9903_s21  ;;  %v6926_v48 = vpop.f32.mrf.mxu1  ;;  %v18220_v27 = vld [vmem:[#allocation191_spill] sm:$0xff] }
 0x8b5   : > { %v5639_v13 = vadd.f32 %v15772_v18, %v18220_v27  ;;  %v7221_v18 = vmul.f32 0.044715, %v16028_v9 }
 0x8b6   : > { %6493 = vrot.lane.b32.xlu0 %v5845_v42, %s9903_s21  ;;  %v6928_v2 = vpop.f32.mrf.mxu1  ;;  %v5434_v42 = vadd.f32 %v15862_v26, %v18142_v40  ;;  %v7318_v40 = vmul.f32 %v7222_v19, %v16022_v8  ;;  %v16050_v26 = vadd.f32 %v6916_v38, %v15218_v1 }
 0x8b7   : > { %v16094_v19 = vadd.f32 %v6928_v2, %v15218_v1 }
 0x8b8   : > { %6437 = vrot.lane.b32.xlu1 %v5640_v0, %s9902_s20  ;;  %v16030_v32 = vpop.f32.mrf.mxu1  ;;  %v16041_v0 = vadd.f32 %v6914_v51, %v15215_v49  ;;  %v7317_v51 = vmul.f32 %v7221_v18, %v16028_v9  ;;  %v7414_v38 = vmul.f32 %v7318_v40, %v16022_v8  ;;  %v18223_v40 = vld [vmem:[#allocation206_spill] sm:$0xff] }
 0x8b9   : > { %v16241_v41 = vadd.f32 %v16030_v32, %v15215_v49  ;;  %v7134_v43 = vmul.f32 0.5, %v16094_v19 }
 0x8ba   : > { %6431 = vrot.lane.b32.xlu0 %v5637_v29, %s9902_s20  ;;  %v16043_v25 = vpop.f32.mrf.mxu1  ;;  %v7225_v28 = vmul.f32 0.044715, %v16041_v0  ;;  %v7413_v61 = vmul.f32 %v7317_v51, %v16028_v9  ;;  %v7510_v63 = vadd.f32 %v7414_v38, %v16022_v8  ;;  %v7230_v38 = vmul.f32 0.044715, %v16094_v19 }
 0x8bc   : > { %6375 = vrot.lane.b32.xlu1 %v5432_v15, %s9901_s17  ;;  %v16054_v29 = vpop.f32.mrf.mxu1  ;;  %v7226_v15 = vmul.f32 0.044715, %v16050_v26  ;;  %v7509_v56 = vadd.f32 %v7413_v61, %v16028_v9 }
 0x8be   : > { %6369 = vrot.lane.b32.xlu0 %v5429_v59, %s9901_s17  ;;  %v6940_v22 = vpop.f32.mrf.mxu1  ;;  %v7321_v59 = vmul.f32 %v7225_v28, %v16041_v0  ;;  %v7322_v14 = vmul.f32 %v7226_v15, %v16050_v26  ;;  %v7605_v28 = vmul.f32 0.7978846, %v7509_v56 }
 0x8c0   : > { %6503 = vrot.lane.b32.xlu1 %v5850_v17, %s9903_s21  ;;  %v16074_v47 = vpop.f32.mrf.mxu1  ;;  %v7417_v27 = vmul.f32 %v7321_v59, %v16041_v0  ;;  %v7418_v12 = vmul.f32 %v7322_v14, %v16050_v26 }
 0x8c2   : > { %6497 = vrot.lane.b32.xlu0 %v5847_v31, %s9903_s21  ;;  %v5433_v31 = vadd.f32 %v15834_v30, %v18132_v34  ;;  %v7228_v34 = vmul.f32 0.044715, %v16081_v35  ;;  %v16098_v30 = vadd.f32 %v6926_v48, %v15215_v49  ;;  %v7514_v48 = vadd.f32 %v7418_v12, %v16050_v26 }
 0x8c3   : > { %v16136_v12 = vadd.f32 %v6940_v22, %v15218_v1 }
 0x8c4   : > { %6441 = vrot.lane.b32.xlu1 %v5642_v50, %s9902_s20  ;;  %v6140_v50 = vpop.permute.xlu1 %6139  ;;  %v7324_v23 = vmul.f32 %v7228_v34, %v16081_v35  ;;  %v7229_v15 = vmul.f32 0.044715, %v16098_v30 }
 0x8c6   : > { %6435 = vrot.lane.b32.xlu0 %v5639_v13, %s9902_s20  ;;  %v16089_v13 = vpop.f32.mrf.mxu1  ;;  %v7420_v56 = vmul.f32 %v7324_v23, %v16081_v35 }
 0x8c8   : > { %6379 = vrot.lane.b32.xlu1 %v5434_v42, %s9901_s17  ;;  %v7606_v42 = vmul.f32 0.7978846, %v7510_v63 }
 0x8ca   : > { %6373 = vrot.lane.b32.xlu0 %v5431_v7, %s9901_s17  ;;  %v16102_v7 = vpop.f32.mrf.mxu1  ;;  %9646 = vtanh.f32 %v7606_v42 }
 0x8cb   : > { %9648 = vtanh.f32 %v7605_v28 }
 0x8cc   : > { %6507 = vrot.lane.b32.xlu1 %v5852_v11, %s9903_s21  ;;  %v5420_v6 = vpop.xlane.xlu0 %5419  ;;  %v18222_v11 = vld [vmem:[#allocation169_spill] sm:$0xff] }
 0x8cd   : > { %v5436_v17 = vadd.f32 %v5420_v6, %v18156_v33  ;;  %v7227_v33 = vmul.f32 0.044715, %v16072_v57  ;;  %v6952_v6 = vpop.f32.mrf.mxu1 }
 0x8ce   : > { %6501 = vrot.lane.b32.xlu0 %v5849_v44, %s9903_s21  ;;  %v5161_v44 = vadd.f32 %v18223_v40, %v18222_v11 }
 0x8cf   : > { %v7323_v2 = vmul.f32 %v7227_v33, %v16072_v57  ;;  %v5435_v33 = vadd.f32 %v15933_v37, %v18152_v58  ;;  %v7516_v37 = vadd.f32 %v7420_v56, %v16081_v35 }
 0x8d0   : > { %6445 = vrot.lane.b32.xlu1 %v5644_v53, %s9902_s20  ;;  %v6204_v51 = vpop.permute.xlu0 %6203  ;;  %v7513_v53 = vadd.f32 %v7417_v27, %v16041_v0  ;;  %v6302_v62 = vsel %vm6047_vm5, %v5161_v44, %v6140_v50  ;;  %v16125_v50 = vadd.f32 %v15986_v55, %v15215_v49  ;;  %v7325_v27 = vmul.f32 %v7229_v15, %v16098_v30 }
 0x8d1   : > { %v6318_v61 = vsel %vm2882_vm4, %v6302_v62, %v6204_v51  ;;  %v7419_v14 = vmul.f32 %v7323_v2, %v16072_v57  ;;  %v16140_v55 = vadd.f32 %v15992_v5, %v15218_v1  ;;  %v16152_v5 = vadd.f32 %v16054_v29, %v15215_v49 }
 0x8d2   : > { %6439 = vrot.lane.b32.xlu0 %v5641_v39, %s9902_s20  ;;  %v5643_v39 = vadd.f32 %v15864_v54, %v18148_v20  ;;  %v7609_v63 = vmul.f32 0.7978846, %v7513_v53  ;;  %v7610_v54 = vmul.f32 0.7978846, %v7514_v48  ;;  %v7326_v20 = vmul.f32 %v7230_v38, %v16094_v19 }
 0x8d3   : > { %v7515_v34 = vadd.f32 %v7419_v14, %v16072_v57  ;;  %v7223_v40 = vmul.f32 0.044715, %v16125_v50  ;;  %v7421_v22 = vmul.f32 %v7325_v27, %v16098_v30  ;;  %v5853_v44 = vadd.f32 %v16061_v36, %v18154_v46 }
 0x8d4   : > { %6383 = vrot.lane.b32.xlu1 %v5436_v17, %s9901_s17  ;;  %9650 = vtanh.f32 %v7609_v63  ;;  %v7422_v58 = vmul.f32 %v7326_v20, %v16094_v19  ;;  %v7234_v53 = vmul.f32 0.044715, %v16136_v12  ;;  %v7224_v2 = vmul.f32 0.044715, %v16140_v55 }
 0x8d5   : > { %9652 = vtanh.f32 %v7610_v54  ;;  %v7611_v48 = vmul.f32 0.7978846, %v7515_v34  ;;  %v7319_v38 = vmul.f32 %v7223_v40, %v16125_v50  ;;  %v16164_v29 = vadd.f32 %v6952_v6, %v15218_v1 }
 0x8d6   : > { %6377 = vrot.lane.b32.xlu0 %v5433_v31, %s9901_s17  ;;  %v16119_v31 = vpop.f32.mrf.mxu1  ;;  %v7518_v62 = vadd.f32 %v7422_v58, %v16094_v19  ;;  %v7612_v15 = vmul.f32 0.7978846, %v7516_v37  ;;  %v7517_v46 = vadd.f32 %v7421_v22, %v16098_v30  ;;  %v7233_v36 = vmul.f32 0.044715, %v16152_v5 }
 0x8d7   : > { %v9647_v23 = vpop.eup %9646  ;;  %v16174_v63 = vadd.f32 %v16102_v7, %v15215_v49  ;;  %v7320_v6 = vmul.f32 %v7224_v2, %v16140_v55  ;;  %9654 = vtanh.f32 %v7611_v48  ;;  %v7238_v20 = vmul.f32 0.044715, %v16164_v29  ;;  %v18226_v48 = vld [vmem:[#allocation106_spill] sm:$0xff] }
 0x8d8   : > { %v5629_v18 = vpop.xlane.xlu1 %5628  ;;  %v9649_v14 = vpop.eup %9648  ;;  %v7614_v54 = vmul.f32 0.7978846, %v7518_v62  ;;  %v7613_v27 = vmul.f32 0.7978846, %v7517_v46  ;;  %9656 = vtanh.f32 %v7612_v15  ;;  %v7126_v37 = vmul.f32 0.5, %v16022_v8 }
 0x8d9   : > { %v7237_v40 = vmul.f32 0.044715, %v16174_v63  ;;  %v7416_v22 = vmul.f32 %v7320_v6, %v16140_v55  ;;  %v7334_v46 = vmul.f32 %v7238_v20, %v16164_v29  ;;  %v7125_v6 = vmul.f32 0.5, %v16028_v9 }
 0x8da   : > { %6505 = vrot.lane.b32.xlu0 %v5851_v24, %s9903_s21  ;;  %v16143_v24 = vpop.f32.mrf.mxu1  ;;  %9658 = vtanh.f32 %v7614_v54 }
 0x8db   : > { %9660 = vtanh.f32 %v7613_v27  ;;  %v7512_v54 = vadd.f32 %v7416_v22, %v16140_v55  ;;  %v7430_v9 = vmul.f32 %v7334_v46, %v16164_v29 }
 0x8dc   : > { %v6268_v59 = vpop.permute.xlu1 %6267  ;;  %v6962_v51 = vpop.f32.mrf.mxu1 }
 0x8dd   : > { %v6334_v17 = vsel %vm6080_vm6, %v6318_v61, %v6268_v59  ;;  %v5645_v61 = vadd.f32 %v5629_v18, %v18158_v10  ;;  %v7798_v10 = vadd.f32 1.0, %v9647_v23  ;;  %v7415_v18 = vmul.f32 %v7319_v38, %v16125_v50  ;;  %v18227_v38 = vld [vmem:[#allocation216_spill] sm:$0xff] }
 0x8de   : > { %6443 = vrot.lane.b32.xlu0 %v5643_v39, %s9902_s20  ;;  %8924 = vmatmul.mubr.msk.f32.gmra.mxu1 %vm1146_vm1, %v6334_v17  ;;  %v6964_v39 = vpop.f32.mrf.mxu1  ;;  %v7330_v17 = vmul.f32 %v7234_v53, %v16136_v12  ;;  %v16189_v58 = vadd.f32 %v6962_v51, %v15215_v49  ;;  %v18225_v53 = vld [vmem:[#allocation199_spill] sm:$0xff]  ;;  %v16199_v62 = vadd.f32 %v18227_v38, %v18226_v48  ;;  %v7797_v23 = vadd.f32 1.0, %v9649_v14  ;;  %v18229_v48 = vld [vmem:[#allocation56_spill] sm:$0xff] }
 0x8df   : > { %6984 = vmatprep.mubr.f32.mxu1 %v18092_v21  ;;  %v16180_v56 = vadd.f32 %v6964_v39, %v15218_v1  ;;  %v7894_v51 = vmul.f32 %v7798_v10, %v7126_v37  ;;  %v7511_v8 = vadd.f32 %v7415_v18, %v16125_v50  ;;  %v7333_v14 = vmul.f32 %v7237_v40, %v16174_v63  ;;  %v18228_v38 = vld [vmem:[#allocation131_spill] sm:$0xff]  ;;  %v18230_v18 = vld [vmem:[#allocation72_spill] sm:$0xff] }
 0x8e0   : > { %v16133_v42 = vpop.permute.xlu1 %6141  ;;  %v7426_v34 = vmul.f32 %v7330_v17, %v16136_v12  ;;  %v7241_v20 = vmul.f32 0.044715, %v16189_v58  ;;  %v16213_v10 = vadd.f32 %v18229_v48, %v18228_v38  ;;  %v18231_v37 = vld [vmem:[#allocation51_spill] sm:$0xff]  ;;  %v16225_v48 = vadd.f32 %v16043_v25, %v15218_v1  ;;  %v18233_v25 = vld [vmem:[#allocation65_spill] sm:$0xff] }
 0x8e1   : > { %v9651_v15 = vpop.eup %9650  ;;  %v7607_v52 = vmul.f32 0.7978846, %v7511_v8 }
 0x8e2   : > { %6381 = vrot.lane.b32.xlu0 %v5435_v33, %s9901_s17  ;;  %v7329_v33 = vmul.f32 %v7233_v36, %v16152_v5  ;;  %v7242_v36 = vmul.f32 0.044715, %v16180_v56  ;;  %v9653_v39 = vpop.eup %9652  ;;  %v7801_v11 = vadd.f32 1.0, %v9651_v15  ;;  %v7429_v15 = vmul.f32 %v7333_v14, %v16174_v63 }
 0x8e3   : > { %v7802_v40 = vadd.f32 1.0, %v9653_v39  ;;  %v7337_v46 = vmul.f32 %v7241_v20, %v16189_v58  ;;  %9662 = vtanh.f32 %v7607_v52  ;;  %v7231_v52 = vmul.f32 0.044715, %v16241_v41 }
 0x8e4   : > { %v16156_v28 = vpop.permute.xlu1 %6269  ;;  %v7338_v27 = vmul.f32 %v7242_v36, %v16180_v56  ;;  %v7130_v36 = vmul.f32 0.5, %v16050_v26  ;;  %v7232_v26 = vmul.f32 0.044715, %v16225_v48  ;;  %v7525_v32 = vadd.f32 %v7429_v15, %v16174_v63 }
 0x8e6   : > { %6509 = vrot.lane.b32.xlu0 %v5853_v44, %s9903_s21  ;;  %v18224_v44 = vld [vmem:[#allocation190_spill] sm:$0xff]  ;;  %v7898_v14 = vmul.f32 %v7802_v40, %v7130_v36 }
 0x8e7   : > { %v16195_v2 = vadd.f32 %v18225_v53, %v18224_v44  ;;  %v7522_v53 = vadd.f32 %v7426_v34, %v16136_v12  ;;  %v7893_v44 = vmul.f32 %v7797_v23, %v7125_v6  ;;  %v8002_v34 = vmul.f32 %v15479_v60, %v7894_v51  ;;  %v18232_v6 = vld [vmem:[#allocation143_spill] sm:$0xff] }
 0x8e8   : > { %v16169_v59 = vpop.permute.xlu1 %6143  ;;  %v7608_v51 = vmul.f32 0.7978846, %v7512_v54  ;;  %v8006_v36 = vmul.f32 %v15479_v60, %v7898_v14 }
 0x8e9   : > { %v7618_v23 = vmul.f32 0.7978846, %v7522_v53  ;;  %v8001_v39 = vmul.f32 %v15473_v3, %v7893_v44  ;;  %v7434_v53 = vmul.f32 %v7338_v27, %v16180_v56  ;;  %v16258_v27 = vadd.f32 %v16074_v47, %v15215_v49 }
 0x8ea   : > { %6447 = vrot.lane.b32.xlu0 %v5645_v61, %s9902_s20  ;;  %v7425_v61 = vmul.f32 %v7329_v33, %v16152_v5  ;;  %v16218_v33 = vadd.f32 %v18231_v37, %v18230_v18  ;;  %v7129_v18 = vmul.f32 0.5, %v16041_v0  ;;  %v16237_v37 = vadd.f32 %v18233_v25, %v18232_v6 }
 0x8eb   : > { %v7526_v0 = vadd.f32 %v7430_v9, %v16164_v29  ;;  %v7433_v9 = vmul.f32 %v7337_v46, %v16189_v58  ;;  %9664 = vtanh.f32 %v7618_v23  ;;  %v7131_v23 = vmul.f32 0.5, %v16072_v57 }
 0x8ec   : > { %v16184_v7 = vpop.permute.xlu1 %6207  ;;  %v7521_v22 = vadd.f32 %v7425_v61, %v16152_v5  ;;  %v7897_v8 = vmul.f32 %v7801_v11, %v7129_v18  ;;  %v9655_v61 = vpop.eup %9654  ;;  %v16248_v11 = vadd.f32 %v8002_v34, %v8001_v39  ;;  %v16252_v18 = vadd.f32 %v16089_v13, %v15218_v1 }
 0x8ed   : > { %v9657_v44 = vpop.eup %9656  ;;  %v7803_v34 = vadd.f32 1.0, %v9655_v61  ;;  %9666 = vtanh.f32 %v7608_v51  ;;  %v7530_v13 = vadd.f32 %v7434_v53, %v16180_v56  ;;  %v7132_v47 = vmul.f32 0.5, %v16081_v35 }
 0x8ee   : > { %v7617_v20 = vmul.f32 0.7978846, %v7521_v22  ;;  %v16261_v40 = vmul.f32 %v15473_v3, %v7897_v8  ;;  %v7622_v22 = vmul.f32 0.7978846, %v7526_v0  ;;  %v9659_v15 = vpop.eup %9658  ;;  %v7804_v46 = vadd.f32 1.0, %v9657_v44 }
 0x8ef   : > { %v9661_v8 = vpop.eup %9660  ;;  %v7328_v6 = vmul.f32 %v7232_v26, %v16225_v48  ;;  %v7236_v51 = vmul.f32 0.044715, %v16252_v18  ;;  %v7621_v25 = vmul.f32 0.7978846, %v7525_v32  ;;  %v7529_v61 = vadd.f32 %v7433_v9, %v16189_v58 }
 0x8f0   : > { %v16205_v17 = vpop.permute.xlu1 %6271  ;;  %9668 = vtanh.f32 %v7617_v20  ;;  %v7235_v0 = vmul.f32 0.044715, %v16258_v27  ;;  %v16276_v53 = vadd.f32 %v16143_v24, %v15218_v1  ;;  %v7899_v14 = vmul.f32 %v7803_v34, %v7131_v23 }
 0x8f1   : > { %v7133_v57 = vmul.f32 0.5, %v16098_v30  ;;  %v7327_v35 = vmul.f32 %v7231_v52, %v16241_v41  ;;  %v7626_v20 = vmul.f32 0.7978846, %v7530_v13  ;;  %v7806_v16 = vadd.f32 1.0, %v9659_v15 }
 0x8f2   : > { %9670 = vtanh.f32 %v7622_v22  ;;  %v16282_v26 = vadd.f32 %v16119_v31, %v15215_v49  ;;  %v7900_v9 = vmul.f32 %v7804_v46, %v7132_v47  ;;  %v7805_v24 = vadd.f32 1.0, %v9661_v8 }
 0x8f3   : > { %v7424_v34 = vmul.f32 %v7328_v6, %v16225_v48  ;;  %v7332_v30 = vmul.f32 %v7236_v51, %v16252_v18  ;;  %v7625_v23 = vmul.f32 0.7978846, %v7529_v61  ;;  %9672 = vtanh.f32 %v7621_v25 }
 0x8f4   : > { %v16228_v38 = vpop.permute.xlu1 %6353  ;;  %v7331_v22 = vmul.f32 %v7235_v0, %v16258_v27  ;;  %v7240_v15 = vmul.f32 0.044715, %v16276_v53  ;;  %v7423_v19 = vmul.f32 %v7327_v35, %v16241_v41  ;;  %v8007_v46 = vmul.f32 %v15473_v3, %v7899_v14 }
 0x8f5   : > { %v7902_v8 = vmul.f32 %v7806_v16, %v7134_v43  ;;  %9674 = vtanh.f32 %v7626_v20  ;;  %v7239_v6 = vmul.f32 0.044715, %v16282_v26  ;;  %v8008_v61 = vmul.f32 %v15479_v60, %v7900_v9 }
 0x8f6   : > { %v7901_v0 = vmul.f32 %v7805_v24, %v7133_v57  ;;  %v7428_v14 = vmul.f32 %v7332_v30, %v16252_v18  ;;  %v6303_v43 = vsel %vm6047_vm5, %v16195_v2, %v16133_v42  ;;  %9676 = vtanh.f32 %v7625_v23 }
 0x8f7   : > { %v7427_v20 = vmul.f32 %v7331_v22, %v16258_v27  ;;  %v8119_v42 = vadd.f32 %v8006_v36, %v16261_v40  ;;  %v8010_v2 = vmul.f32 %v15479_v60, %v7902_v8  ;;  %v7335_v23 = vmul.f32 %v7239_v6, %v16282_v26 }
 0x8f8   : > { %v16246_v54 = vpop.permute.xlu1 %6417 }
 0x8f9   : > { %v7523_v8 = vadd.f32 %v7427_v20, %v16258_v27 }
 0x8fc   : > { %v16266_v39 = vpop.permute.xlu1 %6355 }
 0x8ff   : > { %v6968_v44 = vpop.f32.mrf.mxu1 }
 0x900   : > { %v16284_v32 = vpop.permute.xlu1 %6483  ;;  %v16299_v51 = vadd.f32 %v6968_v44, %v15215_v49  ;;  %v7336_v44 = vmul.f32 %v7240_v15, %v16276_v53  ;;  %v8122_v15 = vadd.f32 %v8008_v61, %v8007_v46 }
 0x901   : > { %v6970_v52 = vpop.f32.mrf.mxu1  ;;  %v5838_v13 = vpop.xlane.xlu0 %5837 }
 0x902   : > { %v16292_v31 = vadd.f32 %v6970_v52, %v15218_v1  ;;  %v5854_v47 = vadd.f32 %v5838_v13, %v18161_v4  ;;  %v16305_v52 = vpop.eup %9662  ;;  %v7520_v4 = vadd.f32 %v7424_v34, %v16225_v48  ;;  %v7519_v34 = vadd.f32 %v7423_v19, %v16241_v41 }
 0x903   : > { %v9665_v35 = vpop.eup %9664  ;;  %v7243_v13 = vmul.f32 0.044715, %v16299_v51  ;;  %v7432_v46 = vmul.f32 %v7336_v44, %v16276_v53 }
 0x904   : > { %v16301_v25 = vpop.permute.xlu1 %6421  ;;  %6511 = vrot.lane.b32.xlu1 %v5854_v47, %s9903_s21  ;;  %v7244_v9 = vmul.f32 0.044715, %v16292_v31  ;;  %v16316_v24 = vpop.eup %9666  ;;  %v8009_v47 = vmul.f32 %v15473_v3, %v7901_v0  ;;  %v7616_v19 = vmul.f32 0.7978846, %v7520_v4  ;;  %v7810_v36 = vadd.f32 1.0, %v9665_v35 }
 0x905   : > { %v6206_v16 = vpop.permute.xlu0 %6205  ;;  %v7615_v0 = vmul.f32 0.7978846, %v7519_v34  ;;  %v7339_v35 = vmul.f32 %v7243_v13, %v16299_v51  ;;  %v6530_v13 = vsel %vm6047_vm5, %v16218_v33, %v16266_v39  ;;  %v7142_v39 = vmul.f32 0.5, %v16164_v29 }
 0x906   : > { %v6319_v57 = vsel %vm2882_vm4, %v6303_v43, %v6206_v16  ;;  %v9669_v43 = vpop.eup %9668  ;;  %v7524_v16 = vadd.f32 %v7428_v14, %v16252_v18  ;;  %v7340_v61 = vmul.f32 %v7244_v9, %v16292_v31  ;;  %v7431_v14 = vmul.f32 %v7335_v23, %v16282_v26 }
 0x907   : > { %v6335_v30 = vsel %vm6080_vm6, %v6319_v57, %v16156_v28  ;;  %v6304_v28 = vsel %vm6047_vm5, %v16199_v62, %v16169_v59  ;;  %v8125_v59 = vadd.f32 %v8010_v2, %v8009_v47  ;;  %v7138_v62 = vmul.f32 0.5, %v16136_v12 }
 0x908   : > { %v16325_v22 = vpop.permute.xlu1 %6359  ;;  %8925 = vmatmul.mubr.msk.f32.gmra.mxu1 %vm1146_vm1, %v6335_v30  ;;  %v6320_v6 = vsel %vm2882_vm4, %v6304_v28, %v16184_v7  ;;  %v7137_v7 = vmul.f32 0.5, %v16152_v5  ;;  %v7809_v44 = vadd.f32 1.0, %v9669_v43  ;;  %v7620_v9 = vmul.f32 0.7978846, %v7524_v16 }
 0x909   : > { %8114 = vadd.xlane.f32.xlu0 %v16248_v11  ;;  %v6482_v40 = vpop.permute.xlu0 %6481  ;;  %6990 = vmatprep.mubr.f32.mxu1 %v18092_v21  ;;  %v6336_v4 = vsel %vm6080_vm6, %v6320_v6, %v16205_v17  ;;  %v9671_v11 = vpop.eup %9670  ;;  %v6529_v17 = vsel %vm6047_vm5, %v16213_v10, %v16228_v38  ;;  %v7906_v12 = vmul.f32 %v7810_v36, %v7138_v62  ;;  %9678 = vtanh.f32 %v7616_v19 }
 0x90a   : > { %v9673_v34 = vpop.eup %9672  ;;  %v7619_v30 = vmul.f32 0.7978846, %v7523_v8  ;;  %v7528_v2 = vadd.f32 %v7432_v46, %v16276_v53  ;;  %v6545_v23 = vsel %vm2882_vm4, %v6529_v17, %v16246_v54  ;;  %v7436_v5 = vmul.f32 %v7340_v61, %v16292_v31  ;;  %v18235_v17 = vld [vmem:[#allocation59_spill] sm:$0xff] }
 0x90b   : > { %v6561_v10 = vsel %vm6080_vm6, %v6545_v23, %v6482_v40  ;;  %v7814_v38 = vadd.f32 1.0, %v9671_v11  ;;  %9680 = vtanh.f32 %v7615_v0  ;;  %v7527_v47 = vadd.f32 %v7431_v14, %v16282_v26 }
 0x90c   : > { %v16345_v20 = vpop.permute.xlu1 %6487  ;;  %8926 = vmatmul.mubr.msk.f32.gmra.mxu1 %vm1146_vm1, %v6336_v4  ;;  %v7435_v43 = vmul.f32 %v7339_v35, %v16299_v51  ;;  %v7905_v54 = vmul.f32 %v7809_v44, %v7137_v7  ;;  %v8014_v33 = vmul.f32 %v15479_v60, %v7906_v12  ;;  %v7813_v40 = vadd.f32 1.0, %v9673_v34 }
 0x90d   : > { %8120 = vadd.xlane.f32.xlu0 %v8119_v42  ;;  %v6420_v57 = vpop.permute.xlu0 %6419  ;;  %6996 = vmatprep.mubr.f32.mxu1 %v18092_v21  ;;  %v9675_v42 = vpop.eup %9674  ;;  %9682 = vtanh.f32 %v7620_v9  ;;  %v7624_v8 = vmul.f32 0.7978846, %v7528_v2  ;;  %v7532_v46 = vadd.f32 %v7436_v5, %v16292_v31  ;;  %v7141_v61 = vmul.f32 0.5, %v16174_v63  ;;  %v18234_v9 = vld [vmem:[#allocation86_spill] sm:$0xff] }
 0x90e   : > { %v6546_v19 = vsel %vm2882_vm4, %v6530_v13, %v6420_v57  ;;  %v9677_v36 = vpop.eup %9676  ;;  %9684 = vtanh.f32 %v7619_v30  ;;  %v7910_v0 = vmul.f32 %v7814_v38, %v7142_v39  ;;  %v7818_v4 = vadd.f32 1.0, %v9675_v42 }
 0x90f   : > { %v7623_v62 = vmul.f32 0.7978846, %v7527_v47  ;;  %v7531_v29 = vadd.f32 %v7435_v43, %v16299_v51  ;;  %v8013_v14 = vmul.f32 %v15473_v3, %v7905_v54  ;;  %v7146_v63 = vmul.f32 0.5, %v16180_v56 }
 0x910   : > { %v16364_v16 = vpop.permute.xlu1 %6425  ;;  %8927 = vmatmul.mubr.msk.f32.gmra.mxu1 %vm1146_vm1, %v6561_v10  ;;  %v7817_v7 = vadd.f32 1.0, %v9677_v36  ;;  %v7628_v44 = vmul.f32 0.7978846, %v7532_v46  ;;  %v5215_v57 = vadd.f32 %v18235_v17, %v18234_v9  ;;  %9686 = vtanh.f32 %v7624_v8  ;;  %v18238_v9 = vld [vmem:[#allocation149_spill] sm:$0xff] }
 0x911   : > { %8123 = vadd.xlane.f32.xlu0 %v8122_v15  ;;  %v6358_v28 = vpop.permute.xlu0 %6357  ;;  %7002 = vmatprep.mubr.f32.mxu1 %v18092_v21  ;;  %v6562_v15 = vsel %vm6080_vm6, %v6546_v19, %v16284_v32  ;;  %v7909_v32 = vmul.f32 %v7813_v40, %v7141_v61  ;;  %v8131_v34 = vadd.f32 %v8014_v33, %v8013_v14  ;;  %v7145_v30 = vmul.f32 0.5, %v16189_v58  ;;  %v18237_v33 = vld [vmem:[#allocation83_spill] sm:$0xff] }
 0x912   : > { %v6531_v6 = vsel %vm6047_vm5, %v16237_v37, %v6358_v28  ;;  %v7627_v2 = vmul.f32 0.7978846, %v7531_v29  ;;  %9688 = vtanh.f32 %v7623_v62  ;;  %v6532_v56 = vsel %vm6047_vm5, %v5215_v57, %v16325_v22  ;;  %v18236_v28 = vld [vmem:[#allocation181_spill] sm:$0xff] }
 0x913   : > { %v6547_v37 = vsel %vm2882_vm4, %v6531_v6, %v16301_v25  ;;  %v7914_v25 = vmul.f32 %v7818_v4, %v7146_v63  ;;  %v8017_v13 = vmul.f32 %v15473_v3, %v7909_v32  ;;  %v7913_v10 = vmul.f32 %v7817_v7, %v7145_v30 }
 0x914   : > { %v16377_v11 = vpop.permute.xlu1 %6363  ;;  %8928 = vmatmul.mubr.msk.f32.gmra.mxu1 %vm1146_vm1, %v6562_v15  ;;  %v7800_v42 = vadd.f32 1.0, %v16316_v24  ;;  %9690 = vtanh.f32 %v7628_v44  ;;  %v5216_v39 = vadd.f32 %v18237_v33, %v18236_v28  ;;  %v7128_v40 = vmul.f32 0.5, %v16140_v55 }
 0x915   : > { %8126 = vadd.xlane.f32.xlu0 %v8125_v59  ;;  %v6486_v35 = vpop.permute.xlu0 %6485  ;;  %7008 = vmatprep.mubr.f32.mxu1 %v18092_v21  ;;  %v8018_v59 = vmul.f32 %v15479_v60, %v7910_v0  ;;  %v8022_v19 = vmul.f32 %v15479_v60, %v7914_v25  ;;  %v7799_v36 = vadd.f32 1.0, %v16305_v52  ;;  %9692 = vtanh.f32 %v7627_v2 }
 0x916   : > { %v6563_v12 = vsel %vm6080_vm6, %v6547_v37, %v6486_v35  ;;  %v9679_v38 = vpop.eup %9678  ;;  %v7127_v15 = vmul.f32 0.5, %v16125_v50  ;;  %v7896_v61 = vmul.f32 %v7800_v42, %v7128_v40  ;;  %v7136_v55 = vmul.f32 0.5, %v16225_v48  ;;  %v18239_v48 = vld [vmem:[#allocation74_spill] sm:$0xff] }
 0x917   : > { %v8137_v43 = vadd.f32 %v8018_v59, %v8017_v13  ;;  %v7808_v8 = vadd.f32 1.0, %v9679_v38  ;;  %v7135_v35 = vmul.f32 0.5, %v16241_v41  ;;  %v5217_v17 = vadd.f32 %v18239_v48, %v18238_v9  ;;  %v18243_v9 = vld [vmem:[#allocation9_spill] sm:$0xff]  ;;  %v18244_v48 = vld [vmem:[#allocation108_spill] sm:$0xff] }
 0x918   : > { %v16390_v23 = vpop.permute.xlu1 %6491  ;;  %8929 = vmatmul.mubr.msk.f32.gmra.mxu1 %vm1146_vm1, %v6563_v12  ;;  %v9681_v22 = vpop.eup %9680  ;;  %v7895_v29 = vmul.f32 %v7799_v36, %v7127_v15  ;;  %v8004_v7 = vmul.f32 %v15479_v60, %v7896_v61  ;;  %v7140_v12 = vmul.f32 0.5, %v16252_v18 }
 0x919   : > { %8132 = vadd.xlane.f32.xlu0 %v8131_v34  ;;  %v6424_v5 = vpop.permute.xlu0 %6423  ;;  %7014 = vmatprep.mubr.f32.mxu1 %v18092_v21  ;;  %v7807_v62 = vadd.f32 1.0, %v9681_v22  ;;  %v7904_v32 = vmul.f32 %v7808_v8, %v7136_v55  ;;  %v6534_v30 = vsel %vm6047_vm5, %v5217_v17, %v16377_v11  ;;  %v18240_v11 = vld [vmem:[#allocation183_spill] sm:$0xff]  ;;  %v5220_v17 = vadd.f32 %v18244_v48, %v18243_v9 }
 0x91a   : > { %v6548_v58 = vsel %vm2882_vm4, %v6532_v56, %v6424_v5  ;;  %v9683_v46 = vpop.eup %9682  ;;  %v8003_v41 = vmul.f32 %v15473_v3, %v7895_v29  ;;  %v7139_v56 = vmul.f32 0.5, %v16258_v27  ;;  %v7144_v27 = vmul.f32 0.5, %v16276_v53 }
 0x91b   : > { %v6564_v47 = vsel %vm6080_vm6, %v6548_v58, %v16345_v20  ;;  %v8021_v20 = vmul.f32 %v15473_v3, %v7913_v10  ;;  %v9685_v0 = vpop.eup %9684  ;;  %v7812_v63 = vadd.f32 1.0, %v9683_v46  ;;  %v7903_v57 = vmul.f32 %v7807_v62, %v7135_v35 }
 0x91c   : > { %v16402_v54 = vpop.permute.xlu1 %6429  ;;  %8930 = vmatmul.mubr.msk.f32.gmra.mxu1 %vm1146_vm1, %v6564_v47  ;;  %v7811_v34 = vadd.f32 1.0, %v9685_v0  ;;  %v8012_v2 = vmul.f32 %v15479_v60, %v7904_v32  ;;  %v8116_v10 = vadd.f32 %v8004_v7, %v8003_v41  ;;  %v7148_v53 = vmul.f32 0.5, %v16292_v31 }
 0x91d   : > { %8138 = vadd.xlane.f32.xlu0 %v8137_v43  ;;  %v6362_v24 = vpop.permute.xlu0 %6361  ;;  %7020 = vmatprep.mubr.f32.mxu1 %v18092_v21  ;;  %v8143_v4 = vadd.f32 %v8022_v19, %v8021_v20  ;;  %v9687_v44 = vpop.eup %9686  ;;  %v7908_v5 = vmul.f32 %v7812_v63, %v7140_v12  ;;  %v8011_v42 = vmul.f32 %v15473_v3, %v7903_v57  ;;  %v18241_v19 = vld [vmem:[#allocation91_spill] sm:$0xff] }
 0x91e   : > { %v6533_v6 = vsel %vm6047_vm5, %v5216_v39, %v6362_v24  ;;  %v7816_v18 = vadd.f32 1.0, %v9687_v44  ;;  %v7907_v47 = vmul.f32 %v7811_v34, %v7139_v56  ;;  %v5218_v22 = vadd.f32 %v18241_v19, %v18240_v11 }
 0x91f   : > { %v6549_v14 = vsel %vm2882_vm4, %v6533_v6, %v16364_v16  ;;  %v9689_v59 = vpop.eup %9688  ;;  %v8128_v40 = vadd.f32 %v8012_v2, %v8011_v42  ;;  %v7143_v24 = vmul.f32 0.5, %v16282_v26  ;;  %v7147_v26 = vmul.f32 0.5, %v16299_v51  ;;  %v18246_v2 = vld [vmem:[#allocation96_spill] sm:$0xff]  ;;  %v18248_v42 = vld [vmem:[#allocation115_spill] sm:$0xff] }
 0x920   : > { %v16414_v52 = vpop.permute.xlu1 %6367  ;;  %v7815_v28 = vadd.f32 1.0, %v9689_v59  ;;  %v7912_v20 = vmul.f32 %v7816_v18, %v7144_v27  ;;  %v8015_v46 = vmul.f32 %v15473_v3, %v7907_v47 }
 0x921   : > { %8144 = vadd.xlane.f32.xlu0 %v8143_v4  ;;  %v6490_v37 = vpop.permute.xlu0 %6489  ;;  %v9691_v38 = vpop.eup %9690 }
 0x922   : > { %v6565_v50 = vsel %vm6080_vm6, %v6549_v14, %v6490_v37  ;;  %v9693_v33 = vpop.eup %9692  ;;  %v7820_v8 = vadd.f32 1.0, %v9691_v38  ;;  %v7911_v15 = vmul.f32 %v7815_v28, %v7143_v24  ;;  %v8020_v29 = vmul.f32 %v15479_v60, %v7912_v20  ;;  %v18242_v37 = vld [vmem:[#allocation85_spill] sm:$0xff] }
 0x923   : > { %8931 = vmatmul.mubr.msk.f32.gmra.mxu1 %vm1146_vm1, %v6565_v50  ;;  %v7819_v61 = vadd.f32 1.0, %v9693_v33  ;;  %v5219_v35 = vadd.f32 %v18242_v37, %v18112_v45  ;;  %v18249_v33 = vld [vmem:[#allocation134_spill] sm:$0xff] }
 0x924   : > { %v6496_v16 = vpop.permute.xlu1 %6495  ;;  %7026 = vmatprep.mubr.f32.mxu1 %v18092_v21  ;;  %v7916_v14 = vmul.f32 %v7820_v8, %v7148_v53  ;;  %v8019_v31 = vmul.f32 %v15473_v3, %v7911_v15 }
 0x925   : > { %v6428_v25 = vpop.permute.xlu0 %6427  ;;  %v6536_v32 = vsel %vm6047_vm5, %v5219_v35, %v16414_v52 }
 0x926   : > { %v6550_v13 = vsel %vm2882_vm4, %v6534_v30, %v6428_v25  ;;  %v8140_v51 = vadd.f32 %v8020_v29, %v8019_v31  ;;  %v8024_v44 = vmul.f32 %v15479_v60, %v7916_v14  ;;  %v18245_v25 = vld [vmem:[#allocation122_spill] sm:$0xff]  ;;  %v18253_v29 = vld [vmem:[#allocation169_spill] sm:$0xff] }
 0x927   : > { %v6566_v58 = vsel %vm6080_vm6, %v6550_v13, %v16390_v23  ;;  %v8016_v23 = vmul.f32 %v15479_v60, %v7908_v5  ;;  %v5221_v56 = vadd.f32 %v18246_v2, %v18245_v25 }
 0x928   : > { %v6434_v43 = vpop.permute.xlu1 %6433  ;;  %8117 = vadd.xlane.f32.xlu1 %v8116_v10  ;;  %8932 = vmatmul.mubr.msk.f32.gmra.mxu1 %vm1146_vm1, %v6566_v58  ;;  %v18247_v58 = vld [vmem:[#allocation180_spill] sm:$0xff] }
 0x929   : > { %v6366_v39 = vpop.permute.xlu0 %6365  ;;  %7032 = vmatprep.mubr.f32.mxu1 %v18092_v21  ;;  %v8134_v55 = vadd.f32 %v8016_v23, %v8015_v46  ;;  %v5222_v47 = vadd.f32 %v18248_v42, %v18247_v58  ;;  %v18251_v46 = vld [vmem:[#allocation141_spill] sm:$0xff]  ;;  %v18258_v58 = vld [vmem:[#allocation136_spill] sm:$0xff] }
 0x92a   : > { %v6535_v36 = vsel %vm6047_vm5, %v5218_v22, %v6366_v39  ;;  %v18250_v39 = vld [vmem:[#allocation111_spill] sm:$0xff] }
 0x92b   : > { %v6551_v0 = vsel %vm2882_vm4, %v6535_v36, %v16402_v54  ;;  %v7915_v54 = vmul.f32 %v7819_v61, %v7147_v26  ;;  %v18254_v26 = vld [vmem:[#allocation124_spill] sm:$0xff] }
 0x92c   : > { %v6372_v6 = vpop.permute.xlu1 %6371  ;;  %8129 = vadd.xlane.f32.xlu1 %v8128_v40  ;;  %v5223_v40 = vadd.f32 %v18250_v39, %v18249_v33  ;;  %v5225_v14 = vadd.f32 %v18254_v26, %v18253_v29 }
 0x92d   : > { %v6494_v4 = vpop.permute.xlu0 %6493  ;;  %v8023_v57 = vmul.f32 %v15473_v3, %v7915_v54  ;;  %v6538_v5 = vsel %vm6047_vm5, %v5221_v56, %v6372_v6  ;;  %v18252_v6 = vld [vmem:[#allocation135_spill] sm:$0xff] }
 0x92e   : > { %v6567_v62 = vsel %vm6080_vm6, %v6551_v0, %v6494_v4  ;;  %v5224_v15 = vadd.f32 %v18252_v6, %v18251_v46 }
 0x92f   : > { %8933 = vmatmul.mubr.msk.f32.gmra.mxu1 %vm1146_vm1, %v6567_v62  ;;  %v8146_v34 = vadd.f32 %v8024_v44, %v8023_v57 }
 0x930   : > { %8135 = vadd.xlane.f32.xlu1 %v8134_v55  ;;  %7038 = vmatprep.mubr.f32.mxu1 %v18092_v21  ;;  %v6500_v50 = vpop.permute.xlu1 %6499 }
 0x931   : > { %v6432_v63 = vpop.permute.xlu0 %6431 }
 0x932   : > { %v6552_v7 = vsel %vm2882_vm4, %v6536_v32, %v6432_v63  ;;  %v18255_v63 = vld [vmem:[#allocation190_spill] sm:$0xff] }
 0x933   : > { %v6568_v45 = vsel %vm6080_vm6, %v6552_v7, %v6496_v16 }
 0x934   : > { %8141 = vadd.xlane.f32.xlu1 %v8140_v51  ;;  %8934 = vmatmul.mubr.msk.f32.gmra.mxu1 %vm1146_vm1, %v6568_v45  ;;  %v6438_v41 = vpop.permute.xlu1 %6437 }
 0x935   : > { %v6370_v12 = vpop.permute.xlu0 %6369  ;;  %7044 = vmatprep.mubr.f32.mxu1 %v18092_v21 }
 0x936   : > { %v6537_v52 = vsel %vm6047_vm5, %v5220_v17, %v6370_v12 }
 0x937   : > { %v6553_v59 = vsel %vm2882_vm4, %v6537_v52, %v6434_v43 }
 0x938   : > { %8147 = vadd.xlane.f32.xlu1 %v8146_v34  ;;  %v6376_v10 = vpop.permute.xlu1 %6375 }
 0x939   : > { %v6498_v30 = vpop.permute.xlu0 %6497  ;;  %v6540_v23 = vsel %vm6047_vm5, %v5223_v40, %v6376_v10 }
 0x93a   : > { %v6569_v16 = vsel %vm6080_vm6, %v6553_v59, %v6498_v30 }
 0x93b   : > { %8935 = vmatmul.mubr.msk.f32.gmra.mxu1 %vm1146_vm1, %v6569_v16 }
 0x93c   : > { %7050 = vmatprep.mubr.f32.mxu1 %v18092_v21  ;;  %v6504_v19 = vpop.permute.xlu1 %6503 }
 0x93d   : > { %v6436_v13 = vpop.permute.xlu0 %6435 }
 0x93e   : > { %v6554_v18 = vsel %vm2882_vm4, %v6538_v5, %v6436_v13 }
 0x93f   : > { %v6570_v38 = vsel %vm6080_vm6, %v6554_v18, %v6500_v50  ;;  %v18256_v50 = vld [vmem:[#allocation139_spill] sm:$0xff] }
 0x940   : > { %8936 = vmatmul.mubr.msk.f32.gmra.mxu1 %vm1146_vm1, %v6570_v38  ;;  %v6442_v24 = vpop.permute.xlu1 %6441  ;;  %v5226_v7 = vadd.f32 %v18256_v50, %v18255_v63  ;;  %v18257_v38 = vld [vmem:[#allocation106_spill] sm:$0xff] }
 0x941   : > { %v6374_v43 = vpop.permute.xlu0 %6373  ;;  %7056 = vmatprep.mubr.f32.mxu1 %v18092_v21  ;;  %v5227_v42 = vadd.f32 %v18258_v58, %v18257_v38 }
 0x942   : > { %v6539_v11 = vsel %vm6047_vm5, %v5222_v47, %v6374_v43 }
 0x943   : > { %v6555_v22 = vsel %vm2882_vm4, %v6539_v11, %v6438_v41 }
 0x944   : > { %v6380_v0 = vpop.permute.xlu1 %6379 }
 0x945   : > { %v6502_v27 = vpop.permute.xlu0 %6501  ;;  %v6542_v37 = vsel %vm6047_vm5, %v5225_v14, %v6380_v0 }
 0x946   : > { %v6571_v28 = vsel %vm6080_vm6, %v6555_v22, %v6502_v27 }
 0x947   : > { %8937 = vmatmul.mubr.msk.f32.gmra.mxu1 %vm1146_vm1, %v6571_v28 }
 0x948   : > { %7062 = vmatprep.mubr.f32.mxu1 %v18092_v21  ;;  %v6508_v31 = vpop.permute.xlu1 %6507 }
 0x949   : > { %v6440_v36 = vpop.permute.xlu0 %6439 }
 0x94a   : > { %v6556_v20 = vsel %vm2882_vm4, %v6540_v23, %v6440_v36 }
 0x94b   : > { %v6572_v8 = vsel %vm6080_vm6, %v6556_v20, %v6504_v19 }
 0x94c   : > { %8938 = vmatmul.mubr.msk.f32.gmra.mxu1 %vm1146_vm1, %v6572_v8  ;;  %v6446_v45 = vpop.permute.xlu1 %6445 }
 0x94d   : > { %v6378_v53 = vpop.permute.xlu0 %6377  ;;  %7068 = vmatprep.mubr.f32.mxu1 %v18092_v21 }
 0x94e   : > { %v6541_v61 = vsel %vm6047_vm5, %v5224_v15, %v6378_v53 }
 0x94f   : > { %v6557_v4 = vsel %vm2882_vm4, %v6541_v61, %v6442_v24 }
 0x950   : > { %v6384_v18 = vpop.permute.xlu1 %6383 }
 0x951   : > { %v6506_v55 = vpop.permute.xlu0 %6505  ;;  %v6544_v43 = vsel %vm6047_vm5, %v5227_v42, %v6384_v18 }
 0x952   : > { %v6573_v62 = vsel %vm6080_vm6, %v6557_v4, %v6506_v55 }
 0x953   : > { %8939 = vmatmul.mubr.msk.f32.gmra.mxu1 %vm1146_vm1, %v6573_v62 }
 0x954   : > { %7074 = vmatprep.mubr.f32.mxu1 %v18092_v21 }
 0x955   : > { %v6444_v35 = vpop.permute.xlu0 %6443 }
 0x956   : > { %v6558_v54 = vsel %vm2882_vm4, %v6542_v37, %v6444_v35 }
 0x957   : > { %v6574_v32 = vsel %vm6080_vm6, %v6558_v54, %v6508_v31 }
 0x958   : > { %8940 = vmatmul.mubr.msk.f32.gmra.mxu1 %vm1146_vm1, %v6574_v32 }
 0x959   : > { %v6382_v51 = vpop.permute.xlu0 %6381  ;;  %7080 = vmatprep.mubr.f32.mxu1 %v18092_v21 }
 0x95a   : > { %v6543_v44 = vsel %vm6047_vm5, %v5226_v7, %v6382_v51 }
 0x95b   : > { %v6559_v48 = vsel %vm2882_vm4, %v6543_v44, %v6446_v45 }
 0x95d   : > { %v6974_v9 = vpop.f32.mrf.mxu1  ;;  %v6510_v17 = vpop.permute.xlu0 %6509 }
 0x95e   : > { %v6975_v57 = vadd.f32 %v6974_v9, %v15215_v49  ;;  %v6575_v12 = vsel %vm6080_vm6, %v6559_v48, %v6510_v17 }
 0x95f   : > { %v6976_v52 = vpop.f32.mrf.mxu1  ;;  %8941 = vmatmul.mubr.msk.f32.gmra.mxu1 %vm1146_vm1, %v6575_v12 }
 0x960   : > { %v7245_v34 = vmul.f32 0.044715, %v6975_v57  ;;  %v6977_v41 = vadd.f32 %v6976_v52, %v15218_v1  ;;  %7086 = vmatprep.mubr.f32.mxu1 %v18092_v21  ;;  %v7149_v27 = vmul.f32 0.5, %v6975_v57 }
 0x961   : > { %v6448_v47 = vpop.permute.xlu0 %6447 }
 0x962   : > { %v7341_v59 = vmul.f32 %v7245_v34, %v6975_v57  ;;  %v7246_v30 = vmul.f32 0.044715, %v6977_v41  ;;  %v6560_v21 = vsel %vm2882_vm4, %v6544_v43, %v6448_v47  ;;  %v7150_v39 = vmul.f32 0.5, %v6977_v41 }
 0x964   : > { %v7437_v16 = vmul.f32 %v7341_v59, %v6975_v57  ;;  %v7342_v25 = vmul.f32 %v7246_v30, %v6977_v41 }
 0x966   : > { %v7533_v2 = vadd.f32 %v7437_v16, %v6975_v57  ;;  %v7438_v56 = vmul.f32 %v7342_v25, %v6977_v41 }
 0x968   : > { %v7629_v5 = vmul.f32 0.7978846, %v7533_v2  ;;  %v7534_v13 = vadd.f32 %v7438_v56, %v6977_v41 }
 0x96a   : > { %v7630_v10 = vmul.f32 0.7978846, %v7534_v13  ;;  %9694 = vtanh.f32 %v7629_v5 }
 0x96c   : > { %9696 = vtanh.f32 %v7630_v10 }
 0x976   : > { %v6512_v11 = vpop.permute.xlu1 %6511 }
 0x977   : > { %v9695_v19 = vpop.eup %9694  ;;  %v6576_v22 = vsel %vm6080_vm6, %v6560_v21, %v6512_v11 }
 0x978   : > { %8942 = vmatmul.mubr.msk.f32.gmra.mxu1 %vm1146_vm1, %v6576_v22  ;;  %v7821_v28 = vadd.f32 1.0, %v9695_v19 }
 0x979   : > { %v9697_v33 = vpop.eup %9696 }
 0x97a   : > { %v7822_v40 = vadd.f32 1.0, %v9697_v33  ;;  %v7917_v23 = vmul.f32 %v7821_v28, %v7149_v27 }
 0x97c   : > { %v7918_v36 = vmul.f32 %v7822_v40, %v7150_v39  ;;  %v8025_v24 = vmul.f32 %v15473_v3, %v7917_v23 }
 0x97e   : > { %v8026_v20 = vmul.f32 %v15479_v60, %v7918_v36 }
 0x980   : > { %v8149_v8 = vadd.f32 %v8026_v20, %v8025_v24 }
 0x982   : > { %8150 = vadd.xlane.f32.xlu0 %v8149_v8 }
 0x99e   : > { %v6980_v46 = vpop.f32.mrf.mxu1 }
 0x99f   : > { %v6981_v6 = vadd.f32 %v6980_v46, %v15215_v49 }
 0x9a0   : > { %v6982_v15 = vpop.f32.mrf.mxu1 }
 0x9a1   : > { %v7247_v53 = vmul.f32 0.044715, %v6981_v6  ;;  %v6983_v61 = vadd.f32 %v6982_v15, %v15218_v1  ;;  %v7151_v54 = vmul.f32 0.5, %v6981_v6 }
 0x9a3   : > { %v7343_v0 = vmul.f32 %v7247_v53, %v6981_v6  ;;  %v7248_v4 = vmul.f32 0.044715, %v6983_v61  ;;  %v7152_v50 = vmul.f32 0.5, %v6983_v61 }
 0x9a5   : > { %v7439_v55 = vmul.f32 %v7343_v0, %v6981_v6  ;;  %v7344_v62 = vmul.f32 %v7248_v4, %v6983_v61 }
 0x9a7   : > { %v7535_v29 = vadd.f32 %v7439_v55, %v6981_v6  ;;  %v7440_v26 = vmul.f32 %v7344_v62, %v6983_v61 }
 0x9a9   : > { %v7631_v14 = vmul.f32 0.7978846, %v7535_v29  ;;  %v7536_v37 = vadd.f32 %v7440_v26, %v6983_v61 }
 0x9ab   : > { %v7632_v35 = vmul.f32 0.7978846, %v7536_v37  ;;  %9698 = vtanh.f32 %v7631_v14 }
 0x9ad   : > { %9700 = vtanh.f32 %v7632_v35 }
 0x9b8   : > { %v9699_v31 = vpop.eup %9698 }
 0x9b9   : > { %v7823_v32 = vadd.f32 1.0, %v9699_v31 }
 0x9ba   : > { %v9701_v63 = vpop.eup %9700 }
 0x9bb   : > { %v7824_v7 = vadd.f32 1.0, %v9701_v63  ;;  %v7919_v51 = vmul.f32 %v7823_v32, %v7151_v54 }
 0x9bd   : > { %v7920_v44 = vmul.f32 %v7824_v7, %v7152_v50  ;;  %v8027_v45 = vmul.f32 %v15473_v3, %v7919_v51 }
 0x9bf   : > { %v8028_v9 = vmul.f32 %v15479_v60, %v7920_v44 }
 0x9c1   : > { %v8152_v48 = vadd.f32 %v8028_v9, %v8027_v45 }
 0x9c3   : > { %8153 = vadd.xlane.f32.xlu1 %v8152_v48 }
 0x9c8   : > { %v6986_v17 = vpop.f32.mrf.mxu1 }
 0x9c9   : > { %v16527_v57 = vadd.f32 %v6986_v17, %v15215_v49 }
 0x9ca   : > { %v6988_v12 = vpop.f32.mrf.mxu1 }
 0x9cb   : > { %v7249_v52 = vmul.f32 0.044715, %v16527_v57  ;;  %v16531_v34 = vadd.f32 %v6988_v12, %v15218_v1 }
 0x9cc   : > { %v6992_v41 = vpop.f32.mrf.mxu1 }
 0x9cd   : > { %v7345_v59 = vmul.f32 %v7249_v52, %v16527_v57  ;;  %v7250_v30 = vmul.f32 0.044715, %v16531_v34  ;;  %v16536_v16 = vadd.f32 %v6992_v41, %v15215_v49  ;;  %v7153_v41 = vmul.f32 0.5, %v16527_v57 }
 0x9ce   : > { %v6994_v25 = vpop.f32.mrf.mxu1 }
 0x9cf   : > { %v7441_v2 = vmul.f32 %v7345_v59, %v16527_v57  ;;  %v7346_v56 = vmul.f32 %v7250_v30, %v16531_v34  ;;  %v7251_v5 = vmul.f32 0.044715, %v16536_v16  ;;  %v16542_v13 = vadd.f32 %v6994_v25, %v15218_v1 }
 0x9d0   : > { %v6998_v10 = vpop.f32.mrf.mxu1 }
 0x9d1   : > { %v7537_v18 = vadd.f32 %v7441_v2, %v16527_v57  ;;  %v7442_v38 = vmul.f32 %v7346_v56, %v16531_v34  ;;  %v7347_v58 = vmul.f32 %v7251_v5, %v16536_v16  ;;  %v7252_v42 = vmul.f32 0.044715, %v16542_v13 }
 0x9d2   : > { %v16549_v47 = vadd.f32 %v6998_v10, %v15215_v49  ;;  %v7000_v43 = vpop.f32.mrf.mxu1  ;;  %v7154_v10 = vmul.f32 0.5, %v16531_v34 }
 0x9d3   : > { %v7633_v21 = vmul.f32 0.7978846, %v7537_v18  ;;  %v7538_v11 = vadd.f32 %v7442_v38, %v16531_v34  ;;  %v7443_v19 = vmul.f32 %v7347_v58, %v16536_v16  ;;  %v7348_v22 = vmul.f32 %v7252_v42, %v16542_v13 }
 0x9d4   : > { %v7253_v27 = vmul.f32 0.044715, %v16549_v47  ;;  %v16556_v28 = vadd.f32 %v7000_v43, %v15218_v1  ;;  %v7004_v33 = vpop.f32.mrf.mxu1  ;;  %v7155_v43 = vmul.f32 0.5, %v16536_v16 }
 0x9d5   : > { %v7634_v39 = vmul.f32 0.7978846, %v7538_v11  ;;  %v7539_v40 = vadd.f32 %v7443_v19, %v16536_v16  ;;  %v7444_v23 = vmul.f32 %v7348_v22, %v16542_v13  ;;  %v16561_v36 = vadd.f32 %v7004_v33, %v15215_v49 }
 0x9d6   : > { %v7349_v24 = vmul.f32 %v7253_v27, %v16549_v47  ;;  %v7254_v20 = vmul.f32 0.044715, %v16556_v28  ;;  %v7006_v8 = vpop.f32.mrf.mxu1  ;;  %9702 = vtanh.f32 %v7633_v21  ;;  %v7156_v21 = vmul.f32 0.5, %v16542_v13 }
 0x9d7   : > { %v7635_v46 = vmul.f32 0.7978846, %v7539_v40  ;;  %v7540_v6 = vadd.f32 %v7444_v23, %v16542_v13  ;;  %v7255_v15 = vmul.f32 0.044715, %v16561_v36  ;;  %v16568_v53 = vadd.f32 %v7006_v8, %v15218_v1 }
 0x9d8   : > { %v7445_v61 = vmul.f32 %v7349_v24, %v16549_v47  ;;  %v7350_v0 = vmul.f32 %v7254_v20, %v16556_v28  ;;  %v7010_v4 = vpop.f32.mrf.mxu1  ;;  %9704 = vtanh.f32 %v7634_v39  ;;  %v7157_v33 = vmul.f32 0.5, %v16549_v47 }
 0x9d9   : > { %v7636_v55 = vmul.f32 0.7978846, %v7540_v6  ;;  %v7351_v62 = vmul.f32 %v7255_v15, %v16561_v36  ;;  %v7256_v29 = vmul.f32 0.044715, %v16568_v53  ;;  %v7011_v26 = vadd.f32 %v7010_v4, %v15215_v49 }
 0x9da   : > { %v7541_v14 = vadd.f32 %v7445_v61, %v16549_v47  ;;  %v7446_v37 = vmul.f32 %v7350_v0, %v16556_v28  ;;  %v7012_v35 = vpop.f32.mrf.mxu1  ;;  %9706 = vtanh.f32 %v7635_v46  ;;  %v7158_v13 = vmul.f32 0.5, %v16556_v28 }
 0x9db   : > { %v7447_v31 = vmul.f32 %v7351_v62, %v16561_v36  ;;  %v7352_v54 = vmul.f32 %v7256_v29, %v16568_v53  ;;  %v7257_v32 = vmul.f32 0.044715, %v7011_v26  ;;  %v7013_v63 = vadd.f32 %v7012_v35, %v15218_v1 }
 0x9dc   : > { %v7637_v50 = vmul.f32 0.7978846, %v7541_v14  ;;  %v7542_v7 = vadd.f32 %v7446_v37, %v16556_v28  ;;  %v7016_v51 = vpop.f32.mrf.mxu1  ;;  %9708 = vtanh.f32 %v7636_v55  ;;  %v16605_v8 = vmul.f32 0.5, %v16561_v36 }
 0x9dd   : > { %v7543_v44 = vadd.f32 %v7447_v31, %v16561_v36  ;;  %v7448_v45 = vmul.f32 %v7352_v54, %v16568_v53  ;;  %v7353_v9 = vmul.f32 %v7257_v32, %v7011_v26  ;;  %v7258_v48 = vmul.f32 0.044715, %v7013_v63 }
 0x9de   : > { %v7638_v17 = vmul.f32 0.7978846, %v7542_v7  ;;  %v16584_v12 = vadd.f32 %v7016_v51, %v15215_v49  ;;  %v7018_v52 = vpop.f32.mrf.mxu1  ;;  %9710 = vtanh.f32 %v7637_v50  ;;  %v16613_v15 = vmul.f32 0.5, %v16568_v53 }
 0x9df   : > { %v7639_v59 = vmul.f32 0.7978846, %v7543_v44  ;;  %v7544_v30 = vadd.f32 %v7448_v45, %v16568_v53  ;;  %v7449_v25 = vmul.f32 %v7353_v9, %v7011_v26  ;;  %v7354_v2 = vmul.f32 %v7258_v48, %v7013_v63 }
 0x9e0   : > { %v7259_v56 = vmul.f32 0.044715, %v16584_v12  ;;  %v16590_v5 = vadd.f32 %v7018_v52, %v15218_v1  ;;  %9712 = vtanh.f32 %v7638_v17  ;;  %v16615_v55 = vmul.f32 0.5, %v7011_v26 }
 0x9e1   : > { %v7640_v18 = vmul.f32 0.7978846, %v7544_v30  ;;  %v7545_v38 = vadd.f32 %v7449_v25, %v7011_v26  ;;  %v7450_v58 = vmul.f32 %v7354_v2, %v7013_v63  ;;  %9714 = vtanh.f32 %v7639_v59 }
 0x9e2   : > { %v7355_v57 = vmul.f32 %v7259_v56, %v16584_v12  ;;  %v7260_v42 = vmul.f32 0.044715, %v16590_v5  ;;  %v16620_v14 = vmul.f32 0.5, %v7013_v63 }
 0x9e3   : > { %v9703_v11 = vpop.eup %9702  ;;  %v7641_v19 = vmul.f32 0.7978846, %v7545_v38  ;;  %v7546_v22 = vadd.f32 %v7450_v58, %v7013_v63  ;;  %v7022_v27 = vpop.f32.mrf.mxu1  ;;  %9716 = vtanh.f32 %v7640_v18 }
 0x9e4   : > { %v7451_v34 = vmul.f32 %v7355_v57, %v16584_v12  ;;  %v7356_v39 = vmul.f32 %v7260_v42, %v16590_v5  ;;  %v16601_v40 = vadd.f32 %v7022_v27, %v15215_v49  ;;  %v7825_v23 = vadd.f32 1.0, %v9703_v11 }
 0x9e5   : > { %v9705_v24 = vpop.eup %9704  ;;  %v7642_v20 = vmul.f32 0.7978846, %v7546_v22  ;;  %v7024_v16 = vpop.f32.mrf.mxu1  ;;  %9718 = vtanh.f32 %v7641_v19 }
 0x9e6   : > { %v7547_v47 = vadd.f32 %v7451_v34, %v16584_v12  ;;  %v7261_v46 = vmul.f32 0.044715, %v16601_v40  ;;  %v16610_v6 = vadd.f32 %v7024_v16, %v15218_v1  ;;  %v7826_v0 = vadd.f32 1.0, %v9705_v24 }
 0x9e7   : > { %v9707_v61 = vpop.eup %9706  ;;  %v7921_v4 = vmul.f32 %v7825_v23, %v7153_v41  ;;  %9720 = vtanh.f32 %v7642_v20  ;;  %v7452_v28 = vmul.f32 %v7356_v39, %v16590_v5 }
 0x9e8   : > { %v7357_v36 = vmul.f32 %v7261_v46, %v16601_v40  ;;  %v7262_v62 = vmul.f32 0.044715, %v16610_v6  ;;  %v7028_v29 = vpop.f32.mrf.mxu1  ;;  %v16622_v35 = vmul.f32 0.7978846, %v7547_v47  ;;  %v7922_v31 = vmul.f32 %v7826_v0, %v7154_v10 }
 0x9e9   : > { %v9709_v37 = vpop.eup %9708  ;;  %v16625_v53 = vadd.f32 %v7028_v29, %v15215_v49  ;;  %v7827_v54 = vadd.f32 1.0, %v9707_v61  ;;  %v8029_v7 = vmul.f32 %v15473_v3, %v7921_v4  ;;  %v7548_v17 = vadd.f32 %v7452_v28, %v16590_v5 }
 0x9ea   : > { %v7453_v26 = vmul.f32 %v7357_v36, %v16601_v40  ;;  %v7358_v32 = vmul.f32 %v7262_v62, %v16610_v6  ;;  %v7030_v50 = vpop.f32.mrf.mxu1  ;;  %v7828_v51 = vadd.f32 1.0, %v9709_v37  ;;  %v8030_v9 = vmul.f32 %v15479_v60, %v7922_v31 }
 0x9eb   : > { %v9711_v44 = vpop.eup %9710  ;;  %v7263_v63 = vmul.f32 0.044715, %v16625_v53  ;;  %v16632_v45 = vadd.f32 %v7030_v50, %v15218_v1  ;;  %v7923_v48 = vmul.f32 %v7827_v54, %v7155_v43  ;;  %v7644_v34 = vmul.f32 0.7978846, %v7548_v17 }
 0x9ec   : > { %v7454_v52 = vmul.f32 %v7358_v32, %v16610_v6  ;;  %v7924_v41 = vmul.f32 %v7828_v51, %v7156_v21  ;;  %v7829_v59 = vadd.f32 1.0, %v9711_v44  ;;  %v7549_v25 = vadd.f32 %v7453_v26, %v16601_v40 }
 0x9ed   : > { %v9713_v30 = vpop.eup %9712  ;;  %v7359_v2 = vmul.f32 %v7263_v63, %v16625_v53  ;;  %v7264_v56 = vmul.f32 0.044715, %v16632_v45  ;;  %v8155_v10 = vadd.f32 %v8030_v9, %v8029_v7  ;;  %v8031_v58 = vmul.f32 %v15473_v3, %v7923_v48 }
 0x9ee   : > { %v9715_v18 = vpop.eup %9714  ;;  %v7550_v38 = vadd.f32 %v7454_v52, %v16610_v6  ;;  %v8032_v57 = vmul.f32 %v15479_v60, %v7924_v41  ;;  %v7830_v42 = vadd.f32 1.0, %v9713_v30  ;;  %v7925_v19 = vmul.f32 %v7829_v59, %v7157_v33 }
 0x9ef   : > { %v7455_v43 = vmul.f32 %v7359_v2, %v16625_v53  ;;  %v7360_v21 = vmul.f32 %v7264_v56, %v16632_v45  ;;  %8156 = vadd.xlane.f32.xlu0 %v8155_v10  ;;  %v7034_v11 = vpop.f32.mrf.mxu1  ;;  %v7831_v22 = vadd.f32 1.0, %v9715_v18  ;;  %v7645_v20 = vmul.f32 0.7978846, %v7549_v25 }
 0x9f0   : > { %v9717_v27 = vpop.eup %9716  ;;  %v16646_v39 = vadd.f32 %v7034_v11, %v15215_v49  ;;  %v8158_v23 = vadd.f32 %v8032_v57, %v8031_v58  ;;  %v7926_v24 = vmul.f32 %v7830_v42, %v7158_v13  ;;  %v8033_v46 = vmul.f32 %v15473_v3, %v7925_v19 }
 0x9f1   : > { %v7456_v16 = vmul.f32 %v7360_v21, %v16632_v45  ;;  %v7036_v47 = vpop.f32.mrf.mxu1  ;;  %v7832_v61 = vadd.f32 1.0, %v9717_v27  ;;  %v7927_v36 = vmul.f32 %v7831_v22, %v16605_v8  ;;  %v7646_v62 = vmul.f32 0.7978846, %v7550_v38 }
 0x9f2   : > { %v9719_v0 = vpop.eup %9718  ;;  %v7265_v4 = vmul.f32 0.044715, %v16646_v39  ;;  %8159 = vadd.xlane.f32.xlu1 %v8158_v23  ;;  %v16652_v33 = vadd.f32 %v7036_v47, %v15218_v1  ;;  %v8034_v28 = vmul.f32 %v15479_v60, %v7926_v24  ;;  %v7551_v13 = vadd.f32 %v7455_v43, %v16625_v53 }
 0x9f3   : > { %v7928_v29 = vmul.f32 %v7832_v61, %v16613_v15  ;;  %v7833_v37 = vadd.f32 1.0, %v9719_v0  ;;  %v7552_v54 = vadd.f32 %v7456_v16, %v16632_v45  ;;  %v8035_v8 = vmul.f32 %v15473_v3, %v7927_v36 }
 0x9f4   : > { %v9721_v31 = vpop.eup %9720  ;;  %v7361_v26 = vmul.f32 %v7265_v4, %v16646_v39  ;;  %v7266_v32 = vmul.f32 0.044715, %v16652_v33  ;;  %v7040_v50 = vpop.f32.mrf.mxu1  ;;  %v8161_v7 = vadd.f32 %v8034_v28, %v8033_v46  ;;  %9722 = vtanh.f32 %v16622_v35 }
 0x9f5   : > { %v16662_v51 = vadd.f32 %v7040_v50, %v15215_v49  ;;  %v8036_v44 = vmul.f32 %v15479_v60, %v7928_v29  ;;  %v7834_v63 = vadd.f32 1.0, %v9721_v31  ;;  %v7929_v17 = vmul.f32 %v7833_v37, %v16615_v55 }
 0x9f6   : > { %v7457_v15 = vmul.f32 %v7361_v26, %v16646_v39  ;;  %v7362_v9 = vmul.f32 %v7266_v32, %v16652_v33  ;;  %8162 = vadd.xlane.f32.xlu0 %v8161_v7  ;;  %v7042_v48 = vpop.f32.mrf.mxu1  ;;  %v7647_v25 = vmul.f32 0.7978846, %v7551_v13  ;;  %9724 = vtanh.f32 %v7644_v34 }
 0x9f7   : > { %v7267_v52 = vmul.f32 0.044715, %v16662_v51  ;;  %v16672_v41 = vadd.f32 %v7042_v48, %v15218_v1  ;;  %v8164_v59 = vadd.f32 %v8036_v44, %v8035_v8  ;;  %v7930_v30 = vmul.f32 %v7834_v63, %v16620_v14 }
 0x9f8   : > { %v7553_v2 = vadd.f32 %v7457_v15, %v16646_v39  ;;  %v7458_v56 = vmul.f32 %v7362_v9, %v16652_v33  ;;  %v8037_v35 = vmul.f32 %v15473_v3, %v7929_v17  ;;  %v7648_v38 = vmul.f32 0.7978846, %v7552_v54 }
 0x9f9   : > { %v7363_v10 = vmul.f32 %v7267_v52, %v16662_v51  ;;  %v7268_v55 = vmul.f32 0.044715, %v16672_v41  ;;  %8165 = vadd.xlane.f32.xlu1 %v8164_v59  ;;  %v8038_v18 = vmul.f32 %v15479_v60, %v7930_v30  ;;  %9726 = vtanh.f32 %v7645_v20 }
 0x9fa   : > { %v7649_v58 = vmul.f32 0.7978846, %v7553_v2  ;;  %v7554_v57 = vadd.f32 %v7458_v56, %v16652_v33  ;;  %9728 = vtanh.f32 %v7646_v62  ;;  %v7163_v28 = vmul.f32 0.5, %v16584_v12 }
 0x9fb   : > { %v7459_v14 = vmul.f32 %v7363_v10, %v16662_v51  ;;  %v7364_v42 = vmul.f32 %v7268_v55, %v16672_v41  ;;  %v7046_v43 = vpop.f32.mrf.mxu1  ;;  %v8167_v21 = vadd.f32 %v8038_v18, %v8037_v35  ;;  %9730 = vtanh.f32 %v7647_v25 }
 0x9fc   : > { %v16685_v11 = vadd.f32 %v7046_v43, %v15215_v49  ;;  %v7650_v19 = vmul.f32 0.7978846, %v7554_v57  ;;  %9732 = vtanh.f32 %v7648_v38  ;;  %v7164_v62 = vmul.f32 0.5, %v16590_v5 }
 0x9fd   : > { %v7555_v22 = vadd.f32 %v7459_v14, %v16662_v51  ;;  %v7460_v27 = vmul.f32 %v7364_v42, %v16672_v41  ;;  %8168 = vadd.xlane.f32.xlu0 %v8167_v21  ;;  %v7048_v34 = vpop.f32.mrf.mxu1  ;;  %9734 = vtanh.f32 %v7649_v58  ;;  %v7165_v29 = vmul.f32 0.5, %v16601_v40 }
 0x9fe   : > { %v7269_v23 = vmul.f32 0.044715, %v16685_v11  ;;  %v16691_v24 = vadd.f32 %v7048_v34, %v15218_v1  ;;  %9736 = vtanh.f32 %v7650_v19  ;;  %v7166_v32 = vmul.f32 0.5, %v16610_v6 }
 0x9ff   : > { %v7651_v20 = vmul.f32 0.7978846, %v7555_v22  ;;  %v7556_v16 = vadd.f32 %v7460_v27, %v16672_v41  ;;  %v7167_v7 = vmul.f32 0.5, %v16625_v53  ;;  %v7168_v44 = vmul.f32 0.5, %v16632_v45 }
 0xa00   : > { %v7365_v47 = vmul.f32 %v7269_v23, %v16685_v11  ;;  %v7270_v46 = vmul.f32 0.044715, %v16691_v24  ;;  %v7052_v61 = vpop.f32.mrf.mxu1  ;;  %v7169_v63 = vmul.f32 0.5, %v16646_v39  ;;  %v16716_v48 = vmul.f32 0.5, %v16652_v33 }
 0xa01   : > { %v7652_v0 = vmul.f32 0.7978846, %v7556_v16  ;;  %v16697_v4 = vadd.f32 %v7052_v61, %v15215_v49  ;;  %9738 = vtanh.f32 %v7651_v20  ;;  %v9723_v37 = vpop.eup %9722  ;;  %v16719_v6 = vmul.f32 0.5, %v16662_v51 }
 0xa02   : > { %v7366_v36 = vmul.f32 %v7270_v46, %v16691_v24  ;;  %v7054_v13 = vpop.f32.mrf.mxu1  ;;  %v7461_v31 = vmul.f32 %v7365_v47, %v16685_v11  ;;  %v7835_v50 = vadd.f32 1.0, %v9723_v37  ;;  %v16730_v51 = vmul.f32 0.5, %v16672_v41 }
 0xa03   : > { %v7271_v54 = vmul.f32 0.044715, %v16697_v4  ;;  %v16706_v26 = vadd.f32 %v7054_v13, %v15218_v1  ;;  %9740 = vtanh.f32 %v7652_v0  ;;  %v9725_v5 = vpop.eup %9724 }
 0xa04   : > { %v7462_v12 = vmul.f32 %v7366_v36, %v16691_v24  ;;  %v7836_v15 = vadd.f32 1.0, %v9725_v5  ;;  %v7931_v9 = vmul.f32 %v7835_v50, %v7163_v28  ;;  %v7557_v53 = vadd.f32 %v7461_v31, %v16685_v11 }
 0xa05   : > { %v7367_v40 = vmul.f32 %v7271_v54, %v16697_v4  ;;  %v7272_v8 = vmul.f32 0.044715, %v16706_v26 }
 0xa06   : > { %v9727_v17 = vpop.eup %9726  ;;  %v7558_v52 = vadd.f32 %v7462_v12, %v16691_v24  ;;  %v7932_v39 = vmul.f32 %v7836_v15, %v7164_v62  ;;  %v8039_v2 = vmul.f32 %v15473_v3, %v7931_v9  ;;  %v7653_v21 = vmul.f32 0.7978846, %v7557_v53 }
 0xa07   : > { %v7463_v59 = vmul.f32 %v7367_v40, %v16697_v4  ;;  %v7368_v30 = vmul.f32 %v7272_v8, %v16706_v26  ;;  %v7058_v45 = vpop.f32.mrf.mxu1  ;;  %v9729_v25 = vpop.eup %9728  ;;  %v7837_v35 = vadd.f32 1.0, %v9727_v17 }
 0xa08   : > { %v16727_v33 = vadd.f32 %v7058_v45, %v15215_v49  ;;  %v9731_v56 = vpop.eup %9730  ;;  %v7838_v18 = vadd.f32 1.0, %v9729_v25  ;;  %v8040_v58 = vmul.f32 %v15479_v60, %v7932_v39  ;;  %v16739_v41 = vmul.f32 0.7978846, %v7558_v52 }
 0xa09   : > { %v7559_v10 = vadd.f32 %v7463_v59, %v16697_v4  ;;  %v7464_v55 = vmul.f32 %v7368_v30, %v16706_v26  ;;  %v7060_v38 = vpop.f32.mrf.mxu1  ;;  %v7839_v42 = vadd.f32 1.0, %v9731_v56  ;;  %v9733_v43 = vpop.eup %9732  ;;  %v7933_v19 = vmul.f32 %v7837_v35, %v7165_v29 }
 0xa0a   : > { %v7273_v57 = vmul.f32 0.044715, %v16727_v33  ;;  %v16737_v14 = vadd.f32 %v7060_v38, %v15218_v1  ;;  %v7934_v22 = vmul.f32 %v7838_v18, %v7166_v32  ;;  %v9735_v27 = vpop.eup %9734  ;;  %v8170_v34 = vadd.f32 %v8040_v58, %v8039_v2 }
 0xa0b   : > { %v7560_v23 = vadd.f32 %v7464_v55, %v16706_v26  ;;  %v7655_v46 = vmul.f32 0.7978846, %v7559_v10  ;;  %v8041_v61 = vmul.f32 %v15473_v3, %v7933_v19  ;;  %v9737_v36 = vpop.eup %9736  ;;  %v7840_v29 = vadd.f32 1.0, %v9733_v43 }
 0xa0c   : > { %v7369_v20 = vmul.f32 %v7273_v57, %v16727_v33  ;;  %v7274_v16 = vmul.f32 0.044715, %v16737_v14  ;;  %v7064_v47 = vpop.f32.mrf.mxu1  ;;  %v8042_v0 = vmul.f32 %v15479_v60, %v7934_v22  ;;  %8171 = vadd.xlane.f32.xlu1 %v8170_v34  ;;  %v7935_v37 = vmul.f32 %v7839_v42, %v7167_v7 }
 0xa0d   : > { %v16747_v28 = vadd.f32 %v7064_v47, %v15215_v49  ;;  %v7841_v5 = vadd.f32 1.0, %v9735_v27  ;;  %v7656_v40 = vmul.f32 0.7978846, %v7560_v23  ;;  %v7936_v9 = vmul.f32 %v7840_v29, %v7168_v44 }
 0xa0e   : > { %v7465_v62 = vmul.f32 %v7369_v20, %v16727_v33  ;;  %v7370_v13 = vmul.f32 %v7274_v16, %v16737_v14  ;;  %v7066_v31 = vpop.f32.mrf.mxu1  ;;  %v9739_v54 = vpop.eup %9738  ;;  %v8173_v32 = vadd.f32 %v8042_v0, %v8041_v61  ;;  %v7842_v52 = vadd.f32 1.0, %v9737_v36 }
 0xa0f   : > { %v7275_v12 = vmul.f32 0.044715, %v16747_v28  ;;  %v16753_v50 = vadd.f32 %v7066_v31, %v15218_v1  ;;  %v7937_v59 = vmul.f32 %v7841_v5, %v7169_v63  ;;  %v8043_v45 = vmul.f32 %v15473_v3, %v7935_v37 }
 0xa10   : > { %v7561_v8 = vadd.f32 %v7465_v62, %v16727_v33  ;;  %v7466_v15 = vmul.f32 %v7370_v13, %v16737_v14  ;;  %v9741_v17 = vpop.eup %9740  ;;  %8174 = vadd.xlane.f32.xlu0 %v8173_v32  ;;  %v8044_v25 = vmul.f32 %v15479_v60, %v7936_v9  ;;  %v7843_v39 = vadd.f32 1.0, %v9739_v54 }
 0xa11   : > { %v7371_v53 = vmul.f32 %v7275_v12, %v16747_v28  ;;  %v7276_v7 = vmul.f32 0.044715, %v16753_v50  ;;  %v7938_v55 = vmul.f32 %v7842_v52, %v16716_v48  ;;  %v8045_v63 = vmul.f32 %v15473_v3, %v7937_v59 }
 0xa12   : > { %v7657_v30 = vmul.f32 0.7978846, %v7561_v8  ;;  %v7562_v2 = vadd.f32 %v7466_v15, %v16737_v14  ;;  %v8176_v35 = vadd.f32 %v8044_v25, %v8043_v45  ;;  %v7844_v38 = vadd.f32 1.0, %v9741_v17 }
 0xa13   : > { %v7467_v56 = vmul.f32 %v7371_v53, %v16747_v28  ;;  %v7372_v44 = vmul.f32 %v7276_v7, %v16753_v50  ;;  %v7070_v10 = vpop.f32.mrf.mxu1  ;;  %v8046_v42 = vmul.f32 %v15479_v60, %v7938_v55  ;;  %v7939_v19 = vmul.f32 %v7843_v39, %v16719_v6 }
 0xa14   : > { %v16766_v18 = vadd.f32 %v7070_v10, %v15215_v49  ;;  %8177 = vadd.xlane.f32.xlu1 %v8176_v35  ;;  %v7940_v27 = vmul.f32 %v7844_v38, %v16730_v51  ;;  %9742 = vtanh.f32 %v7653_v21  ;;  %v7658_v34 = vmul.f32 0.7978846, %v7562_v2 }
 0xa15   : > { %v7563_v58 = vadd.f32 %v7467_v56, %v16747_v28  ;;  %v7468_v57 = vmul.f32 %v7372_v44, %v16753_v50  ;;  %v7072_v43 = vpop.f32.mrf.mxu1  ;;  %v8179_v20 = vadd.f32 %v8046_v42, %v8045_v63  ;;  %v8047_v16 = vmul.f32 %v15473_v3, %v7939_v19 }
 0xa16   : > { %v7277_v22 = vmul.f32 0.044715, %v16766_v18  ;;  %v16775_v48 = vadd.f32 %v7072_v43, %v15218_v1  ;;  %v8048_v0 = vmul.f32 %v15479_v60, %v7940_v27  ;;  %9744 = vtanh.f32 %v16739_v41 }
 0xa17   : > { %v7564_v23 = vadd.f32 %v7468_v57, %v16753_v50  ;;  %v7659_v36 = vmul.f32 0.7978846, %v7563_v58  ;;  %8180 = vadd.xlane.f32.xlu0 %v8179_v20  ;;  %9746 = vtanh.f32 %v7655_v46  ;;  %v7173_v45 = vmul.f32 0.5, %v16685_v11 }
 0xa18   : > { %v7373_v47 = vmul.f32 %v7277_v22, %v16766_v18  ;;  %v7278_v61 = vmul.f32 0.044715, %v16775_v48  ;;  %v7076_v6 = vpop.f32.mrf.mxu1  ;;  %v8182_v29 = vadd.f32 %v8048_v0, %v8047_v16  ;;  %9748 = vtanh.f32 %v7656_v40 }
 0xa19   : > { %v7660_v62 = vmul.f32 0.7978846, %v7564_v23  ;;  %v16785_v51 = vadd.f32 %v7076_v6, %v15215_v49  ;;  %9750 = vtanh.f32 %v7657_v30  ;;  %v7174_v44 = vmul.f32 0.5, %v16691_v24 }
 0xa1a   : > { %v7469_v21 = vmul.f32 %v7373_v47, %v16766_v18  ;;  %v7374_v13 = vmul.f32 %v7278_v61, %v16775_v48  ;;  %v7078_v37 = vpop.f32.mrf.mxu1  ;;  %8183 = vadd.xlane.f32.xlu1 %v8182_v29  ;;  %9752 = vtanh.f32 %v7658_v34  ;;  %v7175_v10 = vmul.f32 0.5, %v16697_v4 }
 0xa1b   : > { %v7279_v31 = vmul.f32 0.044715, %v16785_v51  ;;  %v16791_v54 = vadd.f32 %v7078_v37, %v15218_v1  ;;  %9754 = vtanh.f32 %v7659_v36  ;;  %v7176_v38 = vmul.f32 0.5, %v16706_v26 }
 0xa1c   : > { %v7565_v41 = vadd.f32 %v7469_v21, %v16766_v18  ;;  %v7470_v32 = vmul.f32 %v7374_v13, %v16775_v48  ;;  %9756 = vtanh.f32 %v7660_v62  ;;  %v7177_v57 = vmul.f32 0.5, %v16727_v33 }
 0xa1d   : > { %v7375_v46 = vmul.f32 %v7279_v31, %v16785_v51  ;;  %v7280_v12 = vmul.f32 0.044715, %v16791_v54  ;;  %v7178_v42 = vmul.f32 0.5, %v16737_v14  ;;  %v7179_v23 = vmul.f32 0.5, %v16747_v28 }
 0xa1e   : > { %v7661_v5 = vmul.f32 0.7978846, %v7565_v41  ;;  %v7566_v40 = vadd.f32 %v7470_v32, %v16775_v48  ;;  %v7180_v26 = vmul.f32 0.5, %v16753_v50  ;;  %v7181_v47 = vmul.f32 0.5, %v16766_v18 }
 0xa1f   : > { %v7471_v8 = vmul.f32 %v7375_v46, %v16785_v51  ;;  %v7376_v15 = vmul.f32 %v7280_v12, %v16791_v54  ;;  %v7082_v9 = vpop.f32.mrf.mxu1 }
 0xa20   : > { %v7662_v17 = vmul.f32 0.7978846, %v7566_v40  ;;  %v16801_v53 = vadd.f32 %v7082_v9, %v15215_v49  ;;  %9758 = vtanh.f32 %v7661_v5 }
 0xa21   : > { %v7567_v7 = vadd.f32 %v7471_v8, %v16785_v51  ;;  %v7472_v52 = vmul.f32 %v7376_v15, %v16791_v54  ;;  %v7084_v59 = vpop.f32.mrf.mxu1  ;;  %v9743_v39 = vpop.eup %9742 }
 0xa22   : > { %v7281_v30 = vmul.f32 0.044715, %v16801_v53  ;;  %v16808_v25 = vadd.f32 %v7084_v59, %v15218_v1  ;;  %9760 = vtanh.f32 %v7662_v17  ;;  %v7845_v35 = vadd.f32 1.0, %v9743_v39 }
 0xa23   : > { %v7663_v2 = vmul.f32 0.7978846, %v7567_v7  ;;  %v7568_v56 = vadd.f32 %v7472_v52, %v16791_v54  ;;  %v9745_v11 = vpop.eup %9744 }
 0xa24   : > { %v7377_v55 = vmul.f32 %v7281_v30, %v16801_v53  ;;  %v7282_v63 = vmul.f32 0.044715, %v16808_v25  ;;  %v9747_v43 = vpop.eup %9746  ;;  %v7846_v24 = vadd.f32 1.0, %v9745_v11  ;;  %v7941_v22 = vmul.f32 %v7845_v35, %v7173_v45 }
 0xa25   : > { %v7664_v58 = vmul.f32 0.7978846, %v7568_v56  ;;  %9762 = vtanh.f32 %v7663_v2  ;;  %v9749_v27 = vpop.eup %9748  ;;  %v7847_v34 = vadd.f32 1.0, %v9747_v43  ;;  %v7182_v2 = vmul.f32 0.5, %v16775_v48 }
 0xa26   : > { %v7473_v19 = vmul.f32 %v7377_v55, %v16801_v53  ;;  %v7378_v4 = vmul.f32 %v7282_v63, %v16808_v25  ;;  %v9751_v20 = vpop.eup %9750  ;;  %v7942_v16 = vmul.f32 %v7846_v24, %v7174_v44  ;;  %v8049_v6 = vmul.f32 %v15473_v3, %v7941_v22 }
 0xa27   : > { %9764 = vtanh.f32 %v7664_v58  ;;  %v9753_v61 = vpop.eup %9752  ;;  %v7848_v0 = vadd.f32 1.0, %v9749_v27  ;;  %v7943_v36 = vmul.f32 %v7847_v34, %v7175_v10  ;;  %v7849_v62 = vadd.f32 1.0, %v9751_v20 }
 0xa28   : > { %v7569_v33 = vadd.f32 %v7473_v19, %v16801_v53  ;;  %v7474_v14 = vmul.f32 %v7378_v4, %v16808_v25  ;;  %v9755_v21 = vpop.eup %9754  ;;  %v8050_v28 = vmul.f32 %v15479_v60, %v7942_v16  ;;  %v7850_v29 = vadd.f32 1.0, %v9753_v61 }
 0xa29   : > { %v9757_v37 = vpop.eup %9756  ;;  %v7944_v31 = vmul.f32 %v7848_v0, %v7176_v38  ;;  %v8051_v41 = vmul.f32 %v15473_v3, %v7943_v36  ;;  %v7945_v32 = vmul.f32 %v7849_v62, %v7177_v57  ;;  %v7851_v46 = vadd.f32 1.0, %v9755_v21 }
 0xa2a   : > { %v7665_v13 = vmul.f32 0.7978846, %v7569_v33  ;;  %v7570_v50 = vadd.f32 %v7474_v14, %v16808_v25  ;;  %v8185_v18 = vadd.f32 %v8050_v28, %v8049_v6  ;;  %v7946_v5 = vmul.f32 %v7850_v29, %v7178_v42 }
 0xa2b   : > { %v7852_v40 = vadd.f32 1.0, %v9757_v37  ;;  %v8052_v15 = vmul.f32 %v15479_v60, %v7944_v31  ;;  %v8053_v9 = vmul.f32 %v15473_v3, %v7945_v32  ;;  %v7947_v17 = vmul.f32 %v7851_v46, %v7179_v23  ;;  %v18260_v46 = vld [vmem:[#allocation109_spill] sm:$0xff] }
 0xa2c   : > { %v7666_v12 = vmul.f32 0.7978846, %v7570_v50  ;;  %9766 = vtanh.f32 %v7665_v13  ;;  %8186 = vadd.xlane.f32.xlu0 %v8185_v18  ;;  %v8054_v7 = vmul.f32 %v15479_v60, %v7946_v5  ;;  %v7183_v11 = vmul.f32 0.5, %v16785_v51  ;;  %v18261_v18 = vld [vmem:[#allocation53_spill] sm:$0xff] }
 0xa2d   : > { %v9759_v8 = vpop.eup %9758  ;;  %v7948_v52 = vmul.f32 %v7852_v40, %v7180_v26  ;;  %v8188_v45 = vadd.f32 %v8052_v15, %v8051_v41  ;;  %v8055_v39 = vmul.f32 %v15473_v3, %v7947_v17  ;;  %v7184_v48 = vmul.f32 0.5, %v16791_v54  ;;  %v18262_v15 = vld [vmem:[#allocation15_spill] sm:$0xff] }
 0xa2e   : > { %v7853_v59 = vadd.f32 1.0, %v9759_v8  ;;  %9768 = vtanh.f32 %v7666_v12  ;;  %v8191_v56 = vadd.f32 %v8054_v7, %v8053_v9  ;;  %v7185_v33 = vmul.f32 0.5, %v16801_v53 }
 0xa2f   : > { %v9761_v30 = vpop.eup %9760  ;;  %v8056_v44 = vmul.f32 %v15479_v60, %v7948_v52  ;;  %8189 = vadd.xlane.f32.xlu1 %v8188_v45  ;;  %v7186_v6 = vmul.f32 0.5, %v16808_v25  ;;  %v18259_v25 = vld [vmem:[#allocation33_spill] sm:$0xff] }
 0xa30   : > { %v7854_v10 = vadd.f32 1.0, %v9761_v30  ;;  %v7949_v55 = vmul.f32 %v7853_v59, %v7181_v47  ;;  %8192 = vadd.xlane.f32.xlu0 %v8191_v56  ;;  %v18263_v59 = vld [vmem:[#allocation212_spill] sm:$0xff]  ;;  %v18265_v56 = vld [vmem:[#allocation117_spill] sm:$0xff] }
 0xa31   : > { %v8194_v63 = vadd.f32 %v8056_v44, %v8055_v39  ;;  %v8115_v44 = vpop.xlane.xlu0 %8114 }
 0xa32   : > { %v9763_v35 = vpop.eup %9762  ;;  %v7950_v38 = vmul.f32 %v7854_v10, %v7182_v2  ;;  %v8057_v42 = vmul.f32 %v15473_v3, %v7949_v55  ;;  %v18264_v2 = vld [vmem:[#allocation70_spill] sm:$0xff]  ;;  %v18266_v10 = vld [vmem:[#allocation48_spill] sm:$0xff]  ;;  %v18267_v55 = vld [vmem:[#allocation123_spill] sm:$0xff] }
 0xa33   : > { %v7855_v58 = vadd.f32 1.0, %v9763_v35  ;;  %8195 = vadd.xlane.f32.xlu1 %v8194_v63  ;;  %v18268_v35 = vld [vmem:[#allocation81_spill] sm:$0xff] }
 0xa34   : > { %v9765_v57 = vpop.eup %9764  ;;  %v8058_v43 = vmul.f32 %v15479_v60, %v7950_v38  ;;  %v18269_v38 = vld [vmem:[#allocation94_spill] sm:$0xff] }
 0xa35   : > { %v7856_v19 = vadd.f32 1.0, %v9765_v57  ;;  %v7951_v24 = vmul.f32 %v7855_v58, %v7183_v11  ;;  %v8121_v63 = vpop.xlane.xlu0 %8120  ;;  %v16862_v57 = vld [vmem:[#allocation3] ss:$0 sm:$0xff] }
 0xa36   : > { %v8197_v22 = vadd.f32 %v8058_v43, %v8057_v42  ;;  %v18272_v42 = vld [vmem:[#allocation132_spill] sm:$0xff]  ;;  %v8232_v43 = vadd.f32 %v16862_v57, %v8115_v44 }
 0xa37   : > { %v7952_v4 = vmul.f32 %v7856_v19, %v7184_v48  ;;  %v8059_v23 = vmul.f32 %v15473_v3, %v7951_v24  ;;  %v18273_v19 = vld [vmem:[#allocation113_spill] sm:$0xff] }
 0xa38   : > { %8198 = vadd.xlane.f32.xlu0 %v8197_v22  ;;  %v7088_v27 = vpop.f32.mrf.mxu1  ;;  %v18274_v22 = vld [vmem:[#allocation58_spill] sm:$0xff] }
 0xa39   : > { %v7089_v34 = vadd.f32 %v7088_v27, %v15215_v49  ;;  %v8060_v51 = vmul.f32 %v15479_v60, %v7952_v4  ;;  %v9767_v26 = vpop.eup %9766  ;;  %v8124_v11 = vpop.xlane.xlu0 %8123 }
 0xa3a   : > { %v7090_v20 = vpop.f32.mrf.mxu1  ;;  %v7857_v61 = vadd.f32 1.0, %v9767_v26  ;;  %v8118_v26 = vpop.xlane.xlu1 %8117 }
 0xa3b   : > { %v9769_v16 = vpop.eup %9768  ;;  %v7283_v14 = vmul.f32 0.044715, %v7089_v34  ;;  %v7091_v54 = vadd.f32 %v7090_v20, %v15218_v1  ;;  %v8200_v47 = vadd.f32 %v8060_v51, %v8059_v23  ;;  %v7187_v5 = vmul.f32 0.5, %v7089_v34 }
 0xa3c   : > { %v7858_v0 = vadd.f32 1.0, %v9769_v16  ;;  %v7953_v49 = vmul.f32 %v7857_v61, %v7185_v33  ;;  %v8233_v33 = vadd.f32 %v16862_v57, %v8118_v26 }
 0xa3d   : > { %v7379_v36 = vmul.f32 %v7283_v14, %v7089_v34  ;;  %v7284_v62 = vmul.f32 0.044715, %v7091_v54  ;;  %8201 = vadd.xlane.f32.xlu1 %v8200_v47  ;;  %v7188_v9 = vmul.f32 0.5, %v7091_v54  ;;  %v8127_v58 = vpop.xlane.xlu0 %8126  ;;  %v8234_v47 = vadd.f32 %v16862_v57, %v8121_v63 }
 0xa3e   : > { %v7954_v21 = vmul.f32 %v7858_v0, %v7186_v6  ;;  %v8061_v50 = vmul.f32 %v15473_v3, %v7953_v49  ;;  %v8236_v24 = vadd.f32 %v16862_v57, %v8127_v58  ;;  %v8235_v0 = vadd.f32 %v16862_v57, %v8124_v11 }
 0xa3f   : > { %v7475_v13 = vmul.f32 %v7379_v36, %v7089_v34  ;;  %v7380_v28 = vmul.f32 %v7284_v62, %v7091_v54 }
 0xa40   : > { %v8062_v53 = vmul.f32 %v15479_v60, %v7954_v21 }
 0xa41   : > { %v7571_v29 = vadd.f32 %v7475_v13, %v7089_v34  ;;  %v7476_v37 = vmul.f32 %v7380_v28, %v7091_v54  ;;  %v8133_v48 = vpop.xlane.xlu0 %8132 }
 0xa42   : > { %v8203_v31 = vadd.f32 %v8062_v53, %v8061_v50  ;;  %v8238_v27 = vadd.f32 %v16862_v57, %v8133_v48 }
 0xa43   : > { %v7667_v1 = vmul.f32 0.7978846, %v7571_v29  ;;  %v7572_v41 = vadd.f32 %v7476_v37, %v7091_v54  ;;  %v8130_v54 = vpop.xlane.xlu1 %8129 }
 0xa44   : > { %8204 = vadd.xlane.f32.xlu0 %v8203_v31  ;;  %v8237_v21 = vadd.f32 %v16862_v57, %v8130_v54 }
 0xa45   : > { %v7668_v32 = vmul.f32 0.7978846, %v7572_v41  ;;  %9770 = vtanh.f32 %v7667_v1  ;;  %v8139_v4 = vpop.xlane.xlu0 %8138 }
 0xa46   : > { %v8240_v34 = vadd.f32 %v16862_v57, %v8139_v4 }
 0xa47   : > { %9772 = vtanh.f32 %v7668_v32  ;;  %v8136_v62 = vpop.xlane.xlu1 %8135 }
 0xa48   : > { %8066 = vadd.xlane.f32.xlu0 %v18259_v25  ;;  %v8239_v53 = vadd.f32 %v16862_v57, %v8136_v62 }
 0xa49   : > { %v8145_v23 = vpop.xlane.xlu0 %8144 }
 0xa4a   : > { %v8242_v51 = vadd.f32 %v16862_v57, %v8145_v23 }
 0xa4b   : > { %v8142_v50 = vpop.xlane.xlu1 %8141 }
 0xa4c   : > { %8072 = vadd.xlane.f32.xlu0 %v18260_v46  ;;  %v8241_v37 = vadd.f32 %v16862_v57, %v8142_v50 }
 0xa4d   : > { %v8151_v20 = vpop.xlane.xlu0 %8150 }
 0xa4e   : > { %v8244_v16 = vadd.f32 %v16862_v57, %v8151_v20 }
 0xa4f   : > { %v8148_v31 = vpop.xlane.xlu1 %8147 }
 0xa50   : > { %8078 = vadd.xlane.f32.xlu0 %v18261_v18  ;;  %v8243_v32 = vadd.f32 %v16862_v57, %v8148_v31 }
 0xa52   : > { %v9771_v12 = vpop.eup %9770 }
 0xa53   : > { %v7859_v40 = vadd.f32 1.0, %v9771_v12  ;;  %v8154_v25 = vpop.xlane.xlu1 %8153 }
 0xa54   : > { %v9773_v8 = vpop.eup %9772  ;;  %8084 = vadd.xlane.f32.xlu0 %v18262_v15  ;;  %v8245_v46 = vadd.f32 %v16862_v57, %v8154_v25 }
 0xa55   : > { %v7860_v17 = vadd.f32 1.0, %v9773_v8  ;;  %v7955_v7 = vmul.f32 %v7859_v40, %v7187_v5 }
 0xa57   : > { %v7956_v52 = vmul.f32 %v7860_v17, %v7188_v9  ;;  %v8063_v30 = vmul.f32 %v15473_v3, %v7955_v7  ;;  %v18270_v3 = vld [vmem:[#allocation105_spill] sm:$0xff] }
 0xa58   : > { %8090 = vadd.xlane.f32.xlu0 %v18263_v59 }
 0xa59   : > { %v8064_v45 = vmul.f32 %v15479_v60, %v7956_v52  ;;  %v18271_v60 = vld [vmem:[#allocation225_spill] sm:$0xff] }
 0xa5b   : > { %v8206_v39 = vadd.f32 %v8064_v45, %v8063_v30 }
 0xa5c   : > { %8096 = vadd.xlane.f32.xlu0 %v18264_v2 }
 0xa5d   : > { %8207 = vadd.xlane.f32.xlu1 %v8206_v39 }
 0xa60   : > { %8102 = vadd.xlane.f32.xlu0 %v18265_v56 }
 0xa61   : > { %8069 = vadd.xlane.f32.xlu1 %v18266_v10 }
 0xa64   : > { %8108 = vadd.xlane.f32.xlu0 %v18267_v55 }
 0xa65   : > { %8075 = vadd.xlane.f32.xlu1 %v18268_v35 }
 0xa69   : > { %8081 = vadd.xlane.f32.xlu1 %v18269_v38 }
 0xa6d   : > { %8087 = vadd.xlane.f32.xlu1 %v18270_v3 }
 0xa71   : > { %8093 = vadd.xlane.f32.xlu1 %v18271_v60 }
 0xa75   : > { %8099 = vadd.xlane.f32.xlu1 %v18272_v42 }
 0xa78   : > { %v8157_v14 = vpop.xlane.xlu0 %8156 }
 0xa79   : > { %8105 = vadd.xlane.f32.xlu1 %v18273_v19  ;;  %v8246_v61 = vadd.f32 %v16862_v57, %v8157_v14 }
 0xa7a   : > { %8280 = vrot.lane.b32.xlu0 %v8232_v43, %s9901_s17 }
 0xa7b   : > { %v8160_v18 = vpop.xlane.xlu1 %8159 }
 0xa7c   : > { %v8247_v12 = vadd.f32 %v16862_v57, %v8160_v18 }
 0xa7d   : > { %8111 = vadd.xlane.f32.xlu1 %v18274_v22 }
 0xa7e   : > { %8288 = vrot.lane.b32.xlu0 %v8236_v24, %s9901_s17 }
 0xa7f   : > { %v8163_v6 = vpop.xlane.xlu0 %8162 }
 0xa80   : > { %v8248_v36 = vadd.f32 %v16862_v57, %v8163_v6 }
 0xa82   : > { %8292 = vrot.lane.b32.xlu0 %v8238_v27, %s9901_s17  ;;  %v8166_v5 = vpop.xlane.xlu1 %8165 }
 0xa83   : > { %v8249_v40 = vadd.f32 %v16862_v57, %v8166_v5 }
 0xa86   : > { %8296 = vrot.lane.b32.xlu0 %v8240_v34, %s9901_s17  ;;  %v8169_v49 = vpop.xlane.xlu0 %8168 }
 0xa87   : > { %v8250_v13 = vadd.f32 %v16862_v57, %v8169_v49 }
 0xa8a   : > { %8300 = vrot.lane.b32.xlu0 %v8242_v51, %s9901_s17 }
 0xa8e   : > { %8282 = vrot.lane.b32.xlu1 %v8233_v33, %s9901_s17  ;;  %8304 = vrot.lane.b32.xlu0 %v8244_v16, %s9901_s17 }
 0xa92   : > { %8284 = vrot.lane.b32.xlu1 %v8234_v47, %s9901_s17  ;;  %8308 = vrot.lane.b32.xlu0 %v8246_v61, %s9901_s17 }
 0xa95   : > { %v8172_v8 = vpop.xlane.xlu1 %8171 }
 0xa96   : > { %8286 = vrot.lane.b32.xlu1 %v8235_v0, %s9901_s17  ;;  %8344 = vrot.lane.b32.xlu0 %v8248_v36, %s9902_s20  ;;  %v8251_v15 = vadd.f32 %v16862_v57, %v8172_v8 }
 0xa99   : > { %v8175_v28 = vpop.xlane.xlu0 %8174 }
 0xa9a   : > { %8290 = vrot.lane.b32.xlu1 %v8237_v21, %s9901_s17  ;;  %8348 = vrot.lane.b32.xlu0 %v8250_v13, %s9902_s20  ;;  %v8252_v29 = vadd.f32 %v16862_v57, %v8175_v28 }
 0xa9d   : > { %v8178_v9 = vpop.xlane.xlu1 %8177 }
 0xa9e   : > { %8294 = vrot.lane.b32.xlu1 %v8239_v53, %s9901_s17  ;;  %8352 = vrot.lane.b32.xlu0 %v8252_v29, %s9902_s20  ;;  %v8253_v7 = vadd.f32 %v16862_v57, %v8178_v9 }
 0xaa0   : > { %v8181_v1 = vpop.xlane.xlu0 %8180 }
 0xaa1   : > { %v8254_v41 = vadd.f32 %v16862_v57, %v8181_v1 }
 0xaa2   : > { %8298 = vrot.lane.b32.xlu1 %v8241_v37, %s9901_s17 }
 0xaa3   : > { %8356 = vrot.lane.b32.xlu0 %v8254_v41, %s9902_s20  ;;  %v8184_v59 = vpop.xlane.xlu1 %8183 }
 0xaa4   : > { %v8255_v45 = vadd.f32 %v16862_v57, %v8184_v59 }
 0xaa6   : > { %8302 = vrot.lane.b32.xlu1 %v8243_v32, %s9901_s17 }
 0xaaa   : > { %8306 = vrot.lane.b32.xlu1 %v8245_v46, %s9901_s17 }
 0xaae   : > { %8310 = vrot.lane.b32.xlu1 %v8247_v12, %s9901_s17  ;;  %s16955_s17 = scalar_lea.vmem %s17068_s14, %s8534_s29 }
 0xab2   : > { %8346 = vrot.lane.b32.xlu1 %v8249_v40, %s9902_s20 }
 0xab5   : > { %v8187_v17 = vpop.xlane.xlu0 %8186 }
 0xab6   : > { %8350 = vrot.lane.b32.xlu1 %v8251_v15, %s9902_s20  ;;  %v8256_v52 = vadd.f32 %v16862_v57, %v8187_v17 }
 0xab8   : > { %8360 = vrot.lane.b32.xlu0 %v8256_v52, %s9902_s20  ;;  %v8190_v2 = vpop.xlane.xlu1 %8189 }
 0xab9   : > { %v8193_v30 = vpop.xlane.xlu0 %8192  ;;  %v8257_v56 = vadd.f32 %v16862_v57, %v8190_v2 }
 0xaba   : > { %8354 = vrot.lane.b32.xlu1 %v8253_v7, %s9902_s20  ;;  %v8258_v39 = vadd.f32 %v16862_v57, %v8193_v30 }
 0xabc   : > { %8364 = vrot.lane.b32.xlu0 %v8258_v39, %s9902_s20  ;;  %v8196_v44 = vpop.xlane.xlu1 %8195 }
 0xabd   : > { %v8259_v35 = vadd.f32 %v16862_v57, %v8196_v44 }
 0xabe   : > { %8358 = vrot.lane.b32.xlu1 %v8255_v45, %s9902_s20 }
 0xac1   : > { %v8199_v10 = vpop.xlane.xlu0 %8198 }
 0xac2   : > { %v8260_v55 = vadd.f32 %v16862_v57, %v8199_v10  ;;  %8362 = vrot.lane.b32.xlu1 %v8257_v56, %s9902_s20 }
 0xac4   : > { %8368 = vrot.lane.b32.xlu0 %v8260_v55, %s9902_s20 }
 0xac6   : > { %v8202_v63 = vpop.xlane.xlu1 %8201  ;;  %8366 = vrot.lane.b32.xlu1 %v8259_v35, %s9902_s20 }
 0xac7   : > { %v8261_v38 = vadd.f32 %v16862_v57, %v8202_v63 }
 0xaca   : > { %8370 = vrot.lane.b32.xlu1 %v8261_v38, %s9902_s20 }
 0xacd   : > { %v8205_v11 = vpop.xlane.xlu0 %8204 }
 0xace   : > { %v8262_v3 = vadd.f32 %v16862_v57, %v8205_v11 }
 0xad0   : > { %8372 = vrot.lane.b32.xlu0 %v8262_v3, %s9902_s20 }
 0xad1   : > { %v8067_v60 = vpop.xlane.xlu0 %8066 }
 0xad2   : > { %v8216_v21 = vadd.f32 %v16862_v57, %v8067_v60 }
 0xad5   : > { %v8073_v58 = vpop.xlane.xlu0 %8072 }
 0xad6   : > { %v8218_v29 = vadd.f32 %v16862_v57, %v8073_v58 }
 0xad9   : > { %v8079_v42 = vpop.xlane.xlu0 %8078 }
 0xada   : > { %v8220_v32 = vadd.f32 %v16862_v57, %v8079_v42 }
 0xadd   : > { %v8085_v43 = vpop.xlane.xlu0 %8084 }
 0xade   : > { %v8222_v5 = vadd.f32 %v16862_v57, %v8085_v43 }
 0xae1   : > { %v8091_v48 = vpop.xlane.xlu0 %8090 }
 0xae2   : > { %v8224_v59 = vadd.f32 %v16862_v57, %v8091_v48 }
 0xae5   : > { %v8097_v19 = vpop.xlane.xlu0 %8096 }
 0xae6   : > { %v8208_v24 = vpop.xlane.xlu1 %8207  ;;  %v8226_v44 = vadd.f32 %v16862_v57, %v8097_v19 }
 0xae7   : > { %v8263_v22 = vadd.f32 %v16862_v57, %v8208_v24 }
 0xae9   : > { %8374 = vrot.lane.b32.xlu1 %v8263_v22, %s9902_s20  ;;  %v16931_v4 = vpop.xlane.xlu0 %8102 }
 0xaea   : > { %v8070_v27 = vpop.xlane.xlu1 %8069  ;;  %v8228_v43 = vadd.f32 %v16862_v57, %v16931_v4 }
 0xaeb   : > { %v8217_v45 = vadd.f32 %v16862_v57, %v8070_v27 }
 0xaed   : > { %v16933_v34 = vpop.xlane.xlu0 %8108 }
 0xaee   : > { %v8076_v23 = vpop.xlane.xlu1 %8075 }
 0xaef   : > { %v8219_v63 = vadd.f32 %v16862_v57, %v8076_v23 }
 0xaf1   : > { %v8281_v51 = vpop.permute.xlu0 %8280 }
 0xaf2   : > { %v16935_v26 = vpop.xlane.xlu1 %8081  ;;  %v8392_v13 = vsel %vm6047_vm5, %v8216_v21, %v8281_v51 }
 0xaf3   : > { %v8221_v48 = vadd.f32 %v16862_v57, %v16935_v26 }
 0xaf5   : > { %v8289_v20 = vpop.permute.xlu0 %8288 }
 0xaf6   : > { %v16937_v33 = vpop.xlane.xlu1 %8087  ;;  %v8396_v25 = vsel %vm6047_vm5, %v8220_v32, %v8289_v20 }
 0xaf7   : > { %v8223_v4 = vadd.f32 %v16862_v57, %v16937_v33 }
 0xaf9   : > { %v8293_v16 = vpop.permute.xlu0 %8292 }
 0xafa   : > { %v16939_v14 = vpop.xlane.xlu1 %8093  ;;  %v8398_v40 = vsel %vm6047_vm5, %v8222_v5, %v8293_v16 }
 0xafd   : > { %v8297_v54 = vpop.permute.xlu0 %8296 }
 0xafe   : > { %v16941_v47 = vpop.xlane.xlu1 %8099  ;;  %v8400_v39 = vsel %vm6047_vm5, %v8224_v59, %v8297_v54  ;;  %v8225_v54 = vadd.f32 %v16862_v57, %v16939_v14 }
 0xaff   : > { %v8227_v21 = vadd.f32 %v16862_v57, %v16941_v47 }
 0xb01   : > { %v8301_v61 = vpop.permute.xlu0 %8300 }
 0xb02   : > { %v16945_v6 = vpop.xlane.xlu1 %8105  ;;  %v8402_v38 = vsel %vm6047_vm5, %v8226_v44, %v8301_v61 }
 0xb05   : > { %v8305_v0 = vpop.permute.xlu0 %8304 }
 0xb06   : > { %v16947_v36 = vpop.xlane.xlu1 %8111  ;;  %v8404_v19 = vsel %vm6047_vm5, %v8228_v43, %v8305_v0 }
 0xb09   : > { %v16949_v62 = vpop.permute.xlu0 %8308 }
 0xb0a   : > { %v8283_v49 = vpop.permute.xlu1 %8282 }
 0xb0b   : > { %v8393_v10 = vsel %vm6047_vm5, %v8217_v45, %v8283_v49  ;;  %v8230_v49 = vadd.f32 %v16862_v57, %v16933_v34  ;;  %v8229_v34 = vadd.f32 %v16862_v57, %v16945_v6 }
 0xb0d   : > { %v8345_v28 = vpop.permute.xlu0 %8344  ;;  %v8406_v14 = vsel %vm6047_vm5, %v8230_v49, %v16949_v62 }
 0xb0e   : > { %v8408_v50 = vsel %vm2882_vm4, %v8392_v13, %v8345_v28  ;;  %v8285_v53 = vpop.permute.xlu1 %8284 }
 0xb0f   : > { %8424 = vst.msk [vmem:[%s16955_s17] sm:$0xff] %vm6080_vm6, %v8408_v50  ;;  %v8394_v37 = vsel %vm6047_vm5, %v8218_v29, %v8285_v53 }
 0xb11   : > { %v8349_v31 = vpop.permute.xlu0 %8348 }
 0xb12   : > { %v8410_v1 = vsel %vm2882_vm4, %v8394_v37, %v8349_v31  ;;  %v8287_v41 = vpop.permute.xlu1 %8286  ;;  %v8231_v31 = vadd.f32 %v16862_v57, %v16947_v36 }
 0xb13   : > { %8426 = vst.msk [vmem:[%s16955_s17 + $0x10] sm:$0xff] %vm6080_vm6, %v8410_v1  ;;  %v8395_v60 = vsel %vm6047_vm5, %v8219_v63, %v8287_v41 }
 0xb15   : > { %v8353_v46 = vpop.permute.xlu0 %8352 }
 0xb16   : > { %v8412_v18 = vsel %vm2882_vm4, %v8396_v25, %v8353_v46  ;;  %v8291_v12 = vpop.permute.xlu1 %8290 }
 0xb17   : > { %8428 = vst.msk [vmem:[%s16955_s17 + $0x20] sm:$0xff] %vm6080_vm6, %v8412_v18  ;;  %v8397_v24 = vsel %vm6047_vm5, %v8221_v48, %v8291_v12 }
 0xb19   : > { %v8357_v8 = vpop.permute.xlu0 %8356 }
 0xb1a   : > { %v8414_v15 = vsel %vm2882_vm4, %v8398_v40, %v8357_v8  ;;  %v8295_v9 = vpop.permute.xlu1 %8294 }
 0xb1b   : > { %8430 = vst.msk [vmem:[%s16955_s17 + $0x30] sm:$0xff] %vm6080_vm6, %v8414_v15  ;;  %v8399_v26 = vsel %vm6047_vm5, %v8223_v4, %v8295_v9 }
 0xb1e   : > { %v8299_v17 = vpop.permute.xlu1 %8298 }
 0xb1f   : > { %v8401_v61 = vsel %vm6047_vm5, %v8225_v54, %v8299_v17 }
 0xb22   : > { %v8303_v7 = vpop.permute.xlu1 %8302 }
 0xb23   : > { %v8403_v13 = vsel %vm6047_vm5, %v8227_v21, %v8303_v7 }
 0xb26   : > { %v8307_v52 = vpop.permute.xlu1 %8306 }
 0xb27   : > { %v8405_v47 = vsel %vm6047_vm5, %v8229_v34, %v8307_v52 }
 0xb2a   : > { %v8311_v30 = vpop.permute.xlu1 %8310  ;;  %v8361_v2 = vpop.permute.xlu0 %8360 }
 0xb2b   : > { %v8416_v56 = vsel %vm2882_vm4, %v8400_v39, %v8361_v2  ;;  %v8407_v1 = vsel %vm6047_vm5, %v8231_v31, %v8311_v30 }
 0xb2c   : > { %8432 = vst.msk [vmem:[%s16955_s17 + $0x40] sm:$0xff] %vm6080_vm6, %v8416_v56 }
 0xb2e   : > { %v8347_v55 = vpop.permute.xlu1 %8346  ;;  %v8365_v11 = vpop.permute.xlu0 %8364 }
 0xb2f   : > { %v8409_v35 = vsel %vm2882_vm4, %v8393_v10, %v8347_v55  ;;  %v8418_v3 = vsel %vm2882_vm4, %v8402_v38, %v8365_v11 }
 0xb30   : > { %8425 = vst.msk [vmem:[%s16955_s17 + $0x8] sm:$0xff] %vm6080_vm6, %v8409_v35  ;;  %8434 = vst.msk [vmem:[%s16955_s17 + $0x50] sm:$0xff] %vm6080_vm6, %v8418_v3 }
 0xb32   : > { %v8351_v58 = vpop.permute.xlu1 %8350 }
 0xb33   : > { %v8411_v42 = vsel %vm2882_vm4, %v8395_v60, %v8351_v58 }
 0xb34   : > { %8427 = vst.msk [vmem:[%s16955_s17 + $0x18] sm:$0xff] %vm6080_vm6, %v8411_v42 }
 0xb36   : > { %v8355_v22 = vpop.permute.xlu1 %8354  ;;  %v8369_v27 = vpop.permute.xlu0 %8368 }
 0xb37   : > { %v8413_v23 = vsel %vm2882_vm4, %v8397_v24, %v8355_v22  ;;  %v8420_v51 = vsel %vm2882_vm4, %v8404_v19, %v8369_v27 }
 0xb38   : > { %8429 = vst.msk [vmem:[%s16955_s17 + $0x28] sm:$0xff] %vm6080_vm6, %v8413_v23  ;;  %8436 = vst.msk [vmem:[%s16955_s17 + $0x60] sm:$0xff] %vm6080_vm6, %v8420_v51 }
 0xb3a   : > { %v8359_v20 = vpop.permute.xlu1 %8358 }
 0xb3b   : > { %v8415_v16 = vsel %vm2882_vm4, %v8399_v26, %v8359_v20 }
 0xb3c   : > { %8431 = vst.msk [vmem:[%s16955_s17 + $0x38] sm:$0xff] %vm6080_vm6, %v8415_v16 }
 0xb3e   : > { %v8363_v0 = vpop.permute.xlu1 %8362 }
 0xb3f   : > { %v8417_v33 = vsel %vm2882_vm4, %v8401_v61, %v8363_v0 }
 0xb40   : > { %8433 = vst.msk [vmem:[%s16955_s17 + $0x48] sm:$0xff] %vm6080_vm6, %v8417_v33 }
 0xb42   : > { %v8367_v28 = vpop.permute.xlu1 %8366  ;;  %v8373_v50 = vpop.permute.xlu0 %8372 }
 0xb43   : > { %v8419_v53 = vsel %vm2882_vm4, %v8403_v13, %v8367_v28  ;;  %v8422_v29 = vsel %vm2882_vm4, %v8406_v14, %v8373_v50 }
 0xb44   : > { %8435 = vst.msk [vmem:[%s16955_s17 + $0x58] sm:$0xff] %vm6080_vm6, %v8419_v53  ;;  %8438 = vst.msk [vmem:[%s16955_s17 + $0x70] sm:$0xff] %vm6080_vm6, %v8422_v29 }
 0xb46   : > { %v8371_v37 = vpop.permute.xlu1 %8370 }
 0xb47   : > { %v8421_v62 = vsel %vm2882_vm4, %v8405_v47, %v8371_v37 }
 0xb48   : > { %8437 = vst.msk [vmem:[%s16955_s17 + $0x68] sm:$0xff] %vm6080_vm6, %v8421_v62 }
 0xb5b   : > { %v8375_v41 = vpop.permute.xlu1 %8374 }
 0xb5c   : > { %v8423_v32 = vsel %vm2882_vm4, %v8407_v1, %v8375_v41 }
 0xb5d   : > { %8439 = vst.msk [vmem:[%s16955_s17 + $0x78] sm:$0xff] %vm6080_vm6, %v8423_v32 }
 0xb5e PF: > { %p25_p9 = scmp.ge.s32.totalorder %s10002_s13, 6   ;;  %s18275_s17 = smov %s9894_s18 }
 0xb5f   : > { %s18276_s18 = smov %s10011_s22  ;;  %s18277_s19 = smov %s10002_s13 }
 0xb60   :  { %27 = sbr.rel (!%p25_p9) target bundleno = 5 (0x5), region = 201 }

</bundles_post_ra>
